<compile_context>
chip_gen: v6e
topology: v6e:2x2x1
jax: 0.10.0
libtpu: 0.0.40
codegen_flags: <defaults>
</compile_context>

<pallas_src>
import functools

import jax
import jax.numpy as jnp
import numpy as np
from jax import lax
from jax.experimental import pallas as pl
from jax.experimental.pallas import tpu as pltpu


# --------------------------------------------------------------------------------------
# small helpers
# --------------------------------------------------------------------------------------

def _pick_tile(n, target):
    """Largest multiple of 8 that divides n and is <= target (falls back to n)."""
    t = min(target, n)
    for cand in range(t - t % 8, 7, -8):
        if n % cand == 0:
            return cand
    return n


def _vmem_limit(block_bytes):
    """Scoped-VMEM limit: keep the 32 MiB default unless the tile footprint needs more,
    never request more than ~48 MiB (headroom under v7x's 64 MiB physical VMEM)."""
    need = 3 * block_bytes + (4 << 20)
    return int(min(max(need, 32 << 20), 48 << 20))


# --------------------------------------------------------------------------------------
# K1: fused linear (bf16 MXU) + per-channel BatchNorm batch statistics
# --------------------------------------------------------------------------------------

def _matmul_stats_kernel(x_ref, wt_ref, y_ref, psum_ref, psumsq_ref):
    # Operands are already bf16 (pre-cast in the wrapper); f32 MXU accumulation.
    y = jnp.dot(x_ref[...], wt_ref[...], preferred_element_type=jnp.float32)
    y_ref[...] = y
    psum_ref[...] = jnp.sum(y, axis=0, keepdims=True)[None]
    psumsq_ref[...] = jnp.sum(y * y, axis=0, keepdims=True)[None]


def _linear_with_stats(x2, wt, *, row_tile_target=256):
    """y = x2 @ wt (f32 out) plus per-column sum and sum-of-squares (BN batch stats)."""
    R, K = x2.shape
    Nout = wt.shape[1]
    tr = _pick_tile(R, row_tile_target)
    G = R // tr
    block_bytes = (x2.dtype.itemsize * tr * K + wt.dtype.itemsize * K * Nout
                   + 4 * tr * Nout + 8 * Nout)
    y, psum, psumsq = pl.pallas_call(
        _matmul_stats_kernel,
        out_shape=(jax.ShapeDtypeStruct((R, Nout), jnp.float32),
                   jax.ShapeDtypeStruct((G, 1, Nout), jnp.float32),
                   jax.ShapeDtypeStruct((G, 1, Nout), jnp.float32)),
        grid_spec=pltpu.PrefetchScalarGridSpec(
            num_scalar_prefetch=0,
            grid=(G,),
            in_specs=[pl.BlockSpec((tr, K), lambda i: (i, 0)),
                      pl.BlockSpec((K, Nout), lambda i: (0, 0))],
            out_specs=(pl.BlockSpec((tr, Nout), lambda i: (i, 0)),
                       pl.BlockSpec((1, 1, Nout), lambda i: (i, 0, 0)),
                       pl.BlockSpec((1, 1, Nout), lambda i: (i, 0, 0)))),
        compiler_params=pltpu.CompilerParams(
            dimension_semantics=("parallel",),
            vmem_limit_bytes=_vmem_limit(block_bytes)),
        cost_estimate=pl.CostEstimate(
            flops=2 * R * K * Nout,
            transcendentals=0,
            bytes_accessed=(x2.dtype.itemsize * R * K + wt.dtype.itemsize * K * Nout
                            + 4 * R * Nout)),
    )(x2, wt)
    return y, jnp.sum(psum[:, 0, :], axis=0), jnp.sum(psumsq[:, 0, :], axis=0)


# --------------------------------------------------------------------------------------
# K2: pre-folded BN affine + LIF membrane scan over the time axis (bf16 spike output)
# --------------------------------------------------------------------------------------

def _bn_lif_kernel(y_ref, scale_ref, shift_ref, out_ref, *, tau, v_th):
    T = y_ref.shape[0]
    scale = scale_ref[...]                    # (1, C), hoisted out of the time loop
    shift = shift_ref[...]                    # (1, C)
    inv_tau = 1.0 / tau
    v = jnp.zeros(y_ref.shape[1:], jnp.float32)
    for t in range(T):                         # T is small & static
        yn = y_ref[t] * scale + shift
        v = v + (yn - v) * inv_tau             # neuronal charge (decay_input)
        spike = v >= v_th
        out_ref[t] = jnp.where(spike, 1.0, 0.0).astype(out_ref.dtype)
        v = jnp.where(spike, 0.0, v)           # hard reset via select


def _bn_lif(y3, scale, shift, *, tau, v_th, out_dtype=jnp.bfloat16, m_tile_target=128):
    T, M, C = y3.shape
    tm = _pick_tile(M, m_tile_target)
    G = M // tm
    out_sz = jnp.dtype(out_dtype).itemsize
    block_bytes = 4 * T * tm * C + out_sz * T * tm * C + 8 * C
    return pl.pallas_call(
        functools.partial(_bn_lif_kernel, tau=tau, v_th=v_th),
        out_shape=jax.ShapeDtypeStruct((T, M, C), out_dtype),
        grid_spec=pltpu.PrefetchScalarGridSpec(
            num_scalar_prefetch=0,
            grid=(G,),
            in_specs=[pl.BlockSpec((T, tm, C), lambda i: (0, i, 0)),
                      pl.BlockSpec((1, C), lambda i: (0, 0)),
                      pl.BlockSpec((1, C), lambda i: (0, 0))],
            out_specs=pl.BlockSpec((T, tm, C), lambda i: (0, i, 0))),
        compiler_params=pltpu.CompilerParams(
            dimension_semantics=("parallel",),
            vmem_limit_bytes=_vmem_limit(block_bytes)),
        cost_estimate=pl.CostEstimate(
            flops=8 * T * M * C, transcendentals=0,
            bytes_accessed=(4 + out_sz) * T * M * C),
    )(y3, scale, shift)


# --------------------------------------------------------------------------------------
# K2b: v-branch BN + LIF that emits token-transposed spikes (feeds the TokenMixer)
# --------------------------------------------------------------------------------------

def _bn_lif_transpose_kernel(y_ref, scale_ref, shift_ref, out_ref, *, tau, v_th):
    T = y_ref.shape[0]
    scale = scale_ref[...]
    shift = shift_ref[...]
    inv_tau = 1.0 / tau
    v = jnp.zeros(y_ref.shape[2:], jnp.float32)          # (N, C)
    for t in range(T):
        yn = y_ref[t, 0] * scale + shift
        v = v + (yn - v) * inv_tau
        spike = v >= v_th
        s = jnp.where(spike, 1.0, 0.0)
        out_ref[t, 0] = s.T.astype(out_ref.dtype)        # (C, N): XLU transpose in VMEM
        v = jnp.where(spike, 0.0, v)


def _bn_lif_transpose(y4, scale, shift, *, col_block, tau, v_th):
    """y4: (T, B, N, W) f32; BN+LIF on the C-wide column block `col_block`, output spikes
    already transposed to (T, B, C, N) bf16 (TokenMixer input layout)."""
    T, B, N, _ = y4.shape
    C = scale.shape[-1]
    block_bytes = 4 * T * N * C + 2 * T * C * N + 8 * C
    return pl.pallas_call(
        functools.partial(_bn_lif_transpose_kernel, tau=tau, v_th=v_th),
        out_shape=jax.ShapeDtypeStruct((T, B, C, N), jnp.bfloat16),
        grid_spec=pltpu.PrefetchScalarGridSpec(
            num_scalar_prefetch=0,
            grid=(B,),
            in_specs=[pl.BlockSpec((T, 1, N, C), lambda b: (0, b, 0, col_block)),
                      pl.BlockSpec((1, C), lambda b: (0, 0)),
                      pl.BlockSpec((1, C), lambda b: (0, 0))],
            out_specs=pl.BlockSpec((T, 1, C, N), lambda b: (0, b, 0, 0))),
        compiler_params=pltpu.CompilerParams(
            dimension_semantics=("parallel",),
            vmem_limit_bytes=_vmem_limit(block_bytes)),
        cost_estimate=pl.CostEstimate(
            flops=8 * T * B * N * C, transcendentals=0,
            bytes_accessed=4 * T * B * N * C + 2 * T * B * C * N),
    )(y4, scale, shift)


# --------------------------------------------------------------------------------------
# K3: attention — all heads per grid step, fused q/k BN affine, lane-dense (N, C) output
# --------------------------------------------------------------------------------------

def _attention_kernel(yq_ref, yk_ref, v_ref, bias_ref,
                      sq_ref, hq_ref, sk_ref, hk_ref, out_ref, *, num_heads, sm_scale):
    N, C = out_ref.shape[1], out_ref.shape[2]
    d = C // num_heads
    # q/k BatchNorm affine fused here: one full-width (128-lane) VPU pass each.
    q = (yq_ref[0] * sq_ref[...] + hq_ref[...]).astype(jnp.bfloat16)    # (N, C)
    k = (yk_ref[0] * sk_ref[...] + hk_ref[...]).astype(jnp.bfloat16)    # (N, C)
    v = v_ref[0]                                                        # (N, C) bf16 spikes
    for h in range(num_heads):                  # all heads batched in one grid step
        sl = slice(h * d, (h + 1) * d)
        s = lax.dot_general(q[:, sl], k[:, sl], (((1,), (1,)), ((), ())),
                            preferred_element_type=jnp.float32)         # (N, N) = q_h @ k_h^T
        s = s + bias_ref[h]
        o = jnp.dot(s.astype(jnp.bfloat16), v[:, sl],
                    preferred_element_type=jnp.float32) * sm_scale      # (N, d)
        out_ref[0, :, sl] = o.astype(out_ref.dtype)   # heads side-by-side -> lane-dense DMA


def _attention(y_qkv3, v_mixed, rel_bias, sq, hq, sk, hk, *, num_heads, sm_scale):
    TB, N, _ = y_qkv3.shape
    C = v_mixed.shape[-1]
    H = num_heads
    block_bytes = (4 * 2 * N * C + 2 * N * C + 4 * H * N * N + 4 * N * C
                   + 16 * C + 4 * N * N)
    return pl.pallas_call(
        functools.partial(_attention_kernel, num_heads=H, sm_scale=sm_scale),
        out_shape=jax.ShapeDtypeStruct((TB, N, C), jnp.float32),
        grid_spec=pltpu.PrefetchScalarGridSpec(
            num_scalar_prefetch=0,
            grid=(TB,),
            in_specs=[
                pl.BlockSpec((1, N, C), lambda tb: (tb, 0, 0)),   # q columns of y_qkv
                pl.BlockSpec((1, N, C), lambda tb: (tb, 0, 1)),   # k columns of y_qkv
                pl.BlockSpec((1, N, C), lambda tb: (tb, 0, 0)),   # mixed v spikes (bf16)
                pl.BlockSpec((H, N, N), lambda tb: (0, 0, 0)),    # rel bias, DMA'd once
                pl.BlockSpec((1, C), lambda tb: (0, 0)),          # scale_q
                pl.BlockSpec((1, C), lambda tb: (0, 0)),          # shift_q
                pl.BlockSpec((1, C), lambda tb: (0, 0)),          # scale_k
                pl.BlockSpec((1, C), lambda tb: (0, 0)),          # shift_k
            ],
            out_specs=pl.BlockSpec((1, N, C), lambda tb: (tb, 0, 0))),
        compiler_params=pltpu.CompilerParams(
            dimension_semantics=("parallel",),
            vmem_limit_bytes=_vmem_limit(block_bytes)),
        cost_estimate=pl.CostEstimate(
            flops=4 * TB * H * N * N * (C // H),
            transcendentals=0,
            bytes_accessed=4 * 3 * TB * N * C + 2 * TB * N * C + 4 * H * N * N),
    )(y_qkv3, y_qkv3, v_mixed, rel_bias, sq, hq, sk, hk)


# --------------------------------------------------------------------------------------
# K4: attn_lif fused into the projection matmul prologue (+ BN batch statistics)
# --------------------------------------------------------------------------------------

def _lif_matmul_stats_kernel(a_ref, wt_ref, y_ref, psum_ref, psumsq_ref, *, tau, v_th):
    T = a_ref.shape[0]
    inv_tau = 1.0 / tau
    wt = wt_ref[...]                                            # (C, C) bf16
    v = jnp.zeros(a_ref.shape[1:], jnp.float32)                 # (tm, C)
    psum = jnp.zeros((1, wt.shape[1]), jnp.float32)
    psq = jnp.zeros((1, wt.shape[1]), jnp.float32)
    for t in range(T):
        v = v + (a_ref[t] - v) * inv_tau                        # identity-affine LIF (attn_lif)
        spike = v >= v_th
        s = jnp.where(spike, 1.0, 0.0).astype(jnp.bfloat16)
        v = jnp.where(spike, 0.0, v)
        y = jnp.dot(s, wt, preferred_element_type=jnp.float32)  # spikes @ Wp^T on the MXU
        y_ref[t] = y
        psum = psum + jnp.sum(y, axis=0, keepdims=True)
        psq = psq + jnp.sum(y * y, axis=0, keepdims=True)
    psum_ref[...] = psum[None]
    psumsq_ref[...] = psq[None]


def _lif_linear_with_stats(a3, wt, *, tau, v_th, row_tile_target=128):
    T, M, K = a3.shape
    Nout = wt.shape[1]
    tm = _pick_tile(M, row_tile_target)
    G = M // tm
    block_bytes = (4 * T * tm * K + wt.dtype.itemsize * K * Nout
                   + 4 * T * tm * Nout + 8 * Nout)
    y, psum, psumsq = pl.pallas_call(
        functools.partial(_lif_matmul_stats_kernel, tau=tau, v_th=v_th),
        out_shape=(jax.ShapeDtypeStruct((T, M, Nout), jnp.float32),
                   jax.ShapeDtypeStruct((G, 1, Nout), jnp.float32),
                   jax.ShapeDtypeStruct((G, 1, Nout), jnp.float32)),
        grid_spec=pltpu.PrefetchScalarGridSpec(
            num_scalar_prefetch=0,
            grid=(G,),
            in_specs=[pl.BlockSpec((T, tm, K), lambda i: (0, i, 0)),
                      pl.BlockSpec((K, Nout), lambda i: (0, 0))],
            out_specs=(pl.BlockSpec((T, tm, Nout), lambda i: (0, i, 0)),
                       pl.BlockSpec((1, 1, Nout), lambda i: (i, 0, 0)),
                       pl.BlockSpec((1, 1, Nout), lambda i: (i, 0, 0)))),
        compiler_params=pltpu.CompilerParams(
            dimension_semantics=("parallel",),
            vmem_limit_bytes=_vmem_limit(block_bytes)),
        cost_estimate=pl.CostEstimate(
            flops=2 * T * M * K * Nout + 6 * T * M * K,
            transcendentals=0,
            bytes_accessed=(4 * T * M * K + 4 * T * M * Nout
                            + wt.dtype.itemsize * K * Nout)),
    )(a3, wt)
    return y, jnp.sum(psum[:, 0, :], axis=0), jnp.sum(psumsq[:, 0, :], axis=0)


# --------------------------------------------------------------------------------------
# full forward
# --------------------------------------------------------------------------------------

def _bn_fold(ch_sum, ch_sumsq, count, gamma, beta, eps):
    """Fold training-mode BatchNorm (batch stats, biased variance) into y*scale + shift."""
    mean = ch_sum / count
    var = jnp.maximum(ch_sumsq / count - mean * mean, 0.0)
    scale = gamma * lax.rsqrt(var + eps)
    shift = beta - mean * scale
    return scale.reshape(1, -1), shift.reshape(1, -1)


def ssa_rel_scl_forward(x, params, *, num_heads=8, tau=2.0, v_th=0.5, eps=1e-5):
    T, B, N, C = x.shape
    H = num_heads
    TB = T * B
    R = TB * N
    sm_scale = C ** (-0.5)

    Wq, gq, bq = params["q"]
    Wk, gk, bk = params["k"]
    Wv, gv, bv = params["v"]
    Wm, gm, bm = params["mixer"]
    Wp, gp, bp = params["proj"]
    bias_table = params["bias_table"]

    # --- fused q/k/v projection: one bf16 matmul over a (C, 3C) weight, x read once (K1) ---
    x2 = x.reshape(R, C).astype(jnp.bfloat16)
    Wqkv = jnp.concatenate([Wq.T, Wk.T, Wv.T], axis=1).astype(jnp.bfloat16)   # (C, 3C)
    y_qkv, qkv_sum, qkv_sq = _linear_with_stats(x2, Wqkv)                     # (R, 3C) f32
    scale_q, shift_q = _bn_fold(qkv_sum[:C], qkv_sq[:C], R, gq, bq, eps)
    scale_k, shift_k = _bn_fold(qkv_sum[C:2 * C], qkv_sq[C:2 * C], R, gk, bk, eps)
    scale_v, shift_v = _bn_fold(qkv_sum[2 * C:], qkv_sq[2 * C:], R, gv, bv, eps)

    # --- v: BN affine + LIF over T, emitted token-transposed for the mixer (K2b) ---
    xm = _bn_lif_transpose(y_qkv.reshape(T, B, N, 3 * C), scale_v, shift_v,
                           col_block=2, tau=tau, v_th=v_th)          # (T, B, C, N) bf16

    # --- TokenMixer: Linear(N, N) over tokens + BN(N) + LIF ---
    ym, m_sum, m_sq = _linear_with_stats(xm.reshape(T * B * C, N),
                                         Wm.T.astype(jnp.bfloat16))  # rows ordered (t,b,c)
    scale_m, shift_m = _bn_fold(m_sum, m_sq, T * B * C, gm, bm, eps)
    m_spk = _bn_lif(ym.reshape(T, B * C, N), scale_m, shift_m, tau=tau, v_th=v_th,
                    out_dtype=jnp.bfloat16)                          # (T, B*C, N)
    # torch: [T*B, C, N] --(raw reshape, exactly as the PyTorch code does)--> [T, B, N, C]
    v_mixed = m_spk.reshape(TB, N, C)                                # free raw reshape

    # --- relative position bias: tiny gather in plain JAX (relative_idx = i - j + N - 1) ---
    idx = (jnp.arange(N)[:, None] - jnp.arange(N)[None, :]) + (N - 1)
    rel_bias = bias_table[idx.reshape(-1)].reshape(N, N, H).transpose(2, 0, 1)  # [H, N, N]

    # --- attention: all heads per grid step, lane-dense (N, C) output (K3) ---
    attn = _attention(y_qkv.reshape(TB, N, 3 * C), v_mixed, rel_bias,
                      scale_q, shift_q, scale_k, shift_k,
                      num_heads=H, sm_scale=sm_scale)                # (TB, N, C) f32

    # --- attn_lif fused into the projection matmul prologue (K4) ---
    yp, p_sum, p_sq = _lif_linear_with_stats(attn.reshape(T, B * N, C),
                                             Wp.T.astype(jnp.bfloat16),
                                             tau=tau, v_th=v_th)     # (T, B*N, C) f32
    scale_p, shift_p = _bn_fold(p_sum, p_sq, R, gp, bp, eps)

    # --- final BN + LIF (K2), f32 output to match the PyTorch module ---
    out = _bn_lif(yp, scale_p, shift_p, tau=tau, v_th=v_th, out_dtype=jnp.float32)
    return out.reshape(T, B, N, C)


# --------------------------------------------------------------------------------------
# pure-JAX reference mirroring the PyTorch forward (MSSA, pe=True)
# --------------------------------------------------------------------------------------

def ssa_rel_scl_reference(x, params, *, num_heads=8, tau=2.0, v_th=0.5, eps=1e-5):
    T, B, N, C = x.shape
    H = num_heads
    d = C // H
    sm_scale = C ** (-0.5)
    Wq, gq, bq = params["q"]
    Wk, gk, bk = params["k"]
    Wv, gv, bv = params["v"]
    Wm, gm, bm = params["mixer"]
    Wp, gp, bp = params["proj"]
    table = params["bias_table"]

    def linear(z2, w):   # same bf16-operand / f32-accumulate convention as the kernels
        return jnp.dot(z2.astype(jnp.bfloat16), w.T.astype(jnp.bfloat16),
                       preferred_element_type=jnp.float32)

    def bn(y2, gamma, beta):   # training-mode batch stats over rows, biased variance
        mean = jnp.mean(y2, axis=0)
        var = jnp.mean(y2 * y2, axis=0) - mean * mean
        return (y2 - mean) * lax.rsqrt(var + eps) * gamma + beta

    def lif(seq):
        v = jnp.zeros(seq.shape[1:], jnp.float32)
        outs = []
        for t in range(seq.shape[0]):
            v = v + (seq[t] - v) / tau
            s = (v >= v_th).astype(jnp.float32)
            outs.append(s)
            v = v * (1.0 - s)
        return jnp.stack(outs, axis=0)

    x2 = x.reshape(T * B * N, C)
    q = bn(linear(x2, Wq), gq, bq)
    k = bn(linear(x2, Wk), gk, bk)
    v = lif(bn(linear(x2, Wv), gv, bv).reshape(T, B, N, C))

    # TokenMixer (including the raw [C, N] -> [N, C] reshape done by the torch code)
    u = linear(jnp.transpose(v, (0, 1, 3, 2)).reshape(T * B * C, N), Wm)
    u = bn(u, gm, bm)
    v = lif(u.reshape(T, B, C, N).reshape(T, B, N, C))

    def heads(z):
        return z.reshape(T, B, N, H, d).transpose(0, 1, 3, 2, 4)

    qh = heads(q.reshape(T, B, N, C))
    kh = heads(k.reshape(T, B, N, C))
    vh = heads(v)

    idx = (jnp.arange(N)[:, None] - jnp.arange(N)[None, :]) + (N - 1)
    rel_bias = table[idx.reshape(-1)].reshape(N, N, H).transpose(2, 0, 1)

    scores = jnp.einsum("tbhnd,tbhmd->tbhnm",
                        qh.astype(jnp.bfloat16), kh.astype(jnp.bfloat16),
                        preferred_element_type=jnp.float32) + rel_bias[None, None]
    attn = jnp.einsum("tbhnm,tbhmd->tbhnd",
                      scores.astype(jnp.bfloat16), vh.astype(jnp.bfloat16),
                      preferred_element_type=jnp.float32) * sm_scale
    attn = attn.transpose(0, 1, 3, 2, 4).reshape(T, B, N, C)
    attn = lif(attn)

    yp = bn(linear(attn.reshape(T * B * N, C), Wp), gp, bp)
    return lif(yp.reshape(T, B, N, C))


# --------------------------------------------------------------------------------------
# main
# --------------------------------------------------------------------------------------

if __name__ == "__main__":
    T, B, N, C, H = 2, 2, 128, 128, 8     # x: [T, B, seq_len, dim]; lane-dense C and N

    key = jax.random.PRNGKey(0)
    ks = jax.random.split(key, 10)

    def lin_init(k, n_out, n_in):
        return jax.random.normal(k, (n_out, n_in), jnp.float32) * (n_in ** -0.5)

    def bn_init(kg, kb, n):
        return (1.0 + 0.1 * jax.random.normal(kg, (n,), jnp.float32),
                0.1 * jax.random.normal(kb, (n,), jnp.float32))

    x = jax.random.normal(ks[0], (T, B, N, C), jnp.float32)
    kg = jax.random.split(ks[1], 5)
    kb = jax.random.split(ks[2], 5)
    params = {
        "q": (lin_init(ks[3], C, C), *bn_init(kg[0], kb[0], C)),
        "k": (lin_init(ks[4], C, C), *bn_init(kg[1], kb[1], C)),
        "v": (lin_init(ks[5], C, C), *bn_init(kg[2], kb[2], C)),
        "mixer": (lin_init(ks[6], N, N), *bn_init(kg[3], kb[3], N)),
        "proj": (lin_init(ks[7], C, C), *bn_init(kg[4], kb[4], C)),
        "bias_table": 0.1 * jax.random.normal(ks[8], (2 * N - 1, H), jnp.float32),
    }

    fwd = jax.jit(functools.partial(ssa_rel_scl_forward, num_heads=H))
    out = jax.block_until_ready(fwd(x, params))

    ref = jax.block_until_ready(ssa_rel_scl_reference(x, params, num_heads=H))

    out_np = np.asarray(out)
    ref_np = np.asarray(ref)
    assert out_np.shape == (T, B, N, C)
    assert np.isfinite(out_np).all()
    # Output is a binary spike train behind hard thresholds; bit-level reduction-order
    # differences between the Pallas kernels and the XLA reference can flip the occasional
    # borderline spike, so compare with a small mismatch budget instead of exact allclose.
    mismatch = float(np.mean(np.abs(out_np - ref_np) > 1e-3))
    assert mismatch < 0.02, f"spike mismatch fraction too high: {mismatch:.4f}"
    print("KERNEL_OK")
</pallas_src>

<mosaic_0001>
module attributes {stable_mosaic.version = 11 : i64} {
  func.func @_matmul_stats_kernel(%arg0: i32, %arg1: memref<256x128xbf16, #tpu.memory_space<vmem>>, %arg2: memref<128x384xbf16, #tpu.memory_space<vmem>>, %arg3: memref<256x384xf32, #tpu.memory_space<vmem>>, %arg4: memref<1x1x384xf32, #tpu.memory_space<vmem>>, %arg5: memref<1x1x384xf32, #tpu.memory_space<vmem>>) attributes {dimension_semantics = [#tpu.dimension_semantics<parallel>], iteration_bounds = array<i64: 2>, scalar_prefetch = 0 : i64, scratch_operands = 0 : i64, tpu.core_type = #tpu.core_type<tc>, window_params = [{transform_indices = @transform_0, window_bounds = array<i64: 256, 128>}, {pipeline_mode = #tpu.pipeline_mode<synchronous>, transform_indices = @transform_1, window_bounds = array<i64: 128, 384>}, {transform_indices = @transform_2, window_bounds = array<i64: 256, 384>}, {transform_indices = @transform_3, window_bounds = array<i64: 1, 1, 384>}, {transform_indices = @transform_4, window_bounds = array<i64: 1, 1, 384>}]} {
    %c0 = arith.constant 0 : index
    %c0_0 = arith.constant 0 : index
    %0 = vector.load %arg1[%c0, %c0_0] : memref<256x128xbf16, #tpu.memory_space<vmem>>, vector<256x128xbf16>
    %c0_1 = arith.constant 0 : index
    %c0_2 = arith.constant 0 : index
    %1 = vector.load %arg2[%c0_1, %c0_2] : memref<128x384xbf16, #tpu.memory_space<vmem>>, vector<128x384xbf16>
    %cst = arith.constant dense<0.000000e+00> : vector<256x384xf32>
    %2 = tpu.matmul %0, %1, %cst {dimension_numbers = #tpu.dot_dimension_numbers<[1], [0], [0], [1], [0, 0, 1, 1], [], []>} : vector<256x128xbf16>, vector<128x384xbf16>, vector<256x384xf32> -> vector<256x384xf32>
    %c0_3 = arith.constant 0 : index
    %c0_4 = arith.constant 0 : index
    %3 = vector.load %arg3[%c0_3, %c0_4] : memref<256x384xf32, #tpu.memory_space<vmem>>, vector<256x384xf32>
    tpu.vector_store %arg3[%c0_3, %c0_4], %2 {strides = array<i32>} : memref<256x384xf32, #tpu.memory_space<vmem>>, vector<256x384xf32>,
    %cst_5 = arith.constant dense<0.000000e+00> : vector<384xf32>
    %4 = vector.multi_reduction <add>, %2, %cst_5 [0] : vector<256x384xf32> to vector<384xf32>
    %5 = vector.shape_cast %4 : vector<384xf32> to vector<1x384xf32>
    %6 = vector.shape_cast %5 : vector<1x384xf32> to vector<1x1x384xf32>
    %c0_6 = arith.constant 0 : index
    %c0_7 = arith.constant 0 : index
    %c0_8 = arith.constant 0 : index
    %7 = vector.load %arg4[%c0_6, %c0_7, %c0_8] : memref<1x1x384xf32, #tpu.memory_space<vmem>>, vector<1x1x384xf32>
    tpu.vector_store %arg4[%c0_6, %c0_7, %c0_8], %6 {strides = array<i32>} : memref<1x1x384xf32, #tpu.memory_space<vmem>>, vector<1x1x384xf32>,
    %8 = arith.mulf %2, %2 : vector<256x384xf32>
    %cst_9 = arith.constant dense<0.000000e+00> : vector<384xf32>
    %9 = vector.multi_reduction <add>, %8, %cst_9 [0] : vector<256x384xf32> to vector<384xf32>
    %10 = vector.shape_cast %9 : vector<384xf32> to vector<1x384xf32>
    %11 = vector.shape_cast %10 : vector<1x384xf32> to vector<1x1x384xf32>
    %c0_10 = arith.constant 0 : index
    %c0_11 = arith.constant 0 : index
    %c0_12 = arith.constant 0 : index
    %12 = vector.load %arg5[%c0_10, %c0_11, %c0_12] : memref<1x1x384xf32, #tpu.memory_space<vmem>>, vector<1x1x384xf32>
    tpu.vector_store %arg5[%c0_10, %c0_11, %c0_12], %11 {strides = array<i32>} : memref<1x1x384xf32, #tpu.memory_space<vmem>>, vector<1x1x384xf32>,
    return
  }
  func.func @transform_0(%arg0: i32) -> (i32, i32) {
    %c0_i32 = arith.constant 0 : i32
    %c0_i32_0 = arith.constant 0 : i32
    return %arg0, %c0_i32 : i32, i32
  }
  func.func @transform_1(%arg0: i32) -> (i32, i32) {
    %c0_i32 = arith.constant 0 : i32
    %c0_i32_0 = arith.constant 0 : i32
    %c0_i32_1 = arith.constant 0 : i32
    return %c0_i32, %c0_i32_0 : i32, i32
  }
  func.func @transform_2(%arg0: i32) -> (i32, i32) {
    %c0_i32 = arith.constant 0 : i32
    %c0_i32_0 = arith.constant 0 : i32
    return %arg0, %c0_i32 : i32, i32
  }
  func.func @transform_3(%arg0: i32) -> (i32, i32, i32) {
    %c0_i32 = arith.constant 0 : i32
    %c0_i32_0 = arith.constant 0 : i32
    %c0_i32_1 = arith.constant 0 : i32
    return %arg0, %c0_i32, %c0_i32_0 : i32, i32, i32
  }
  func.func @transform_4(%arg0: i32) -> (i32, i32, i32) {
    %c0_i32 = arith.constant 0 : i32
    %c0_i32_0 = arith.constant 0 : i32
    %c0_i32_1 = arith.constant 0 : i32
    return %arg0, %c0_i32, %c0_i32_0 : i32, i32, i32
  }
}

module attributes {stable_mosaic.version = 11 : i64} {
  func.func @_bn_lif_transpose_kernel(%arg0: i32, %arg1: memref<2x1x128x128xf32, #tpu.memory_space<vmem>>, %arg2: memref<1x128xf32, #tpu.memory_space<vmem>>, %arg3: memref<1x128xf32, #tpu.memory_space<vmem>>, %arg4: memref<2x1x128x128xbf16, #tpu.memory_space<vmem>>) attributes {dimension_semantics = [#tpu.dimension_semantics<parallel>], iteration_bounds = array<i64: 2>, scalar_prefetch = 0 : i64, scratch_operands = 0 : i64, tpu.core_type = #tpu.core_type<tc>, window_params = [{transform_indices = @transform_0, window_bounds = array<i64: 2, 1, 128, 128>}, {pipeline_mode = #tpu.pipeline_mode<synchronous>, transform_indices = @transform_1, window_bounds = array<i64: 1, 128>}, {pipeline_mode = #tpu.pipeline_mode<synchronous>, transform_indices = @transform_2, window_bounds = array<i64: 1, 128>}, {transform_indices = @transform_3, window_bounds = array<i64: 2, 1, 128, 128>}]} {
    %c0 = arith.constant 0 : index
    %c0_0 = arith.constant 0 : index
    %0 = vector.load %arg2[%c0, %c0_0] : memref<1x128xf32, #tpu.memory_space<vmem>>, vector<1x128xf32>
    %c0_1 = arith.constant 0 : index
    %c0_2 = arith.constant 0 : index
    %1 = vector.load %arg3[%c0_1, %c0_2] : memref<1x128xf32, #tpu.memory_space<vmem>>, vector<1x128xf32>
    %cst = arith.constant 0.000000e+00 : f32
    %2 = vector.broadcast %cst : f32 to vector<128x128xf32>
    %c0_3 = arith.constant 0 : index
    %c0_4 = arith.constant 0 : index
    %c0_5 = arith.constant 0 : index
    %c0_6 = arith.constant 0 : index
    %3 = vector.load %arg1[%c0_3, %c0_4, %c0_5, %c0_6] : memref<2x1x128x128xf32, #tpu.memory_space<vmem>>, vector<1x1x128x128xf32>
    %4 = vector.shape_cast %3 : vector<1x1x128x128xf32> to vector<128x128xf32>
    %5 = vector.broadcast %0 : vector<1x128xf32> to vector<128x128xf32>
    %6 = arith.mulf %4, %5 : vector<128x128xf32>
    %7 = vector.broadcast %1 : vector<1x128xf32> to vector<128x128xf32>
    %8 = arith.addf %6, %7 : vector<128x128xf32>
    %9 = arith.subf %8, %2 : vector<128x128xf32>
    %cst_7 = arith.constant 5.000000e-01 : f32
    %10 = vector.broadcast %cst_7 : f32 to vector<128x128xf32>
    %11 = arith.mulf %9, %10 : vector<128x128xf32>
    %12 = arith.addf %2, %11 : vector<128x128xf32>
    %cst_8 = arith.constant 5.000000e-01 : f32
    %13 = vector.broadcast %cst_8 : f32 to vector<128x128xf32>
    %14 = arith.cmpf oge, %12, %13 : vector<128x128xf32>
    %cst_9 = arith.constant 1.000000e+00 : f32
    %cst_10 = arith.constant 0.000000e+00 : f32
    %15 = vector.broadcast %cst_9 : f32 to vector<128x128xf32>
    %16 = vector.broadcast %cst_10 : f32 to vector<128x128xf32>
    %17 = arith.select %14, %15, %16 : vector<128x128xi1>, vector<128x128xf32>
    %18 = tpu.transpose %17, [1, 0] : vector<128x128xf32> -> vector<128x128xf32>
    %19 = arith.truncf %18 : vector<128x128xf32> to vector<128x128xbf16>
    %c0_11 = arith.constant 0 : index
    %c0_12 = arith.constant 0 : index
    %c0_13 = arith.constant 0 : index
    %c0_14 = arith.constant 0 : index
    %20 = vector.load %arg4[%c0_11, %c0_12, %c0_13, %c0_14] : memref<2x1x128x128xbf16, #tpu.memory_space<vmem>>, vector<1x1x128x128xbf16>
    %21 = vector.shape_cast %20 : vector<1x1x128x128xbf16> to vector<128x128xbf16>
    %22 = vector.shape_cast %19 : vector<128x128xbf16> to vector<1x1x128x128xbf16>
    tpu.vector_store %arg4[%c0_11, %c0_12, %c0_13, %c0_14], %22 {strides = array<i32>} : memref<2x1x128x128xbf16, #tpu.memory_space<vmem>>, vector<1x1x128x128xbf16>,
    %cst_15 = arith.constant 0.000000e+00 : f32
    %23 = vector.broadcast %cst_15 : f32 to vector<128x128xf32>
    %24 = arith.select %14, %23, %12 : vector<128x128xi1>, vector<128x128xf32>
    %c1 = arith.constant 1 : index
    %c0_16 = arith.constant 0 : index
    %c0_17 = arith.constant 0 : index
    %c0_18 = arith.constant 0 : index
    %25 = vector.load %arg1[%c1, %c0_16, %c0_17, %c0_18] : memref<2x1x128x128xf32, #tpu.memory_space<vmem>>, vector<1x1x128x128xf32>
    %26 = vector.shape_cast %25 : vector<1x1x128x128xf32> to vector<128x128xf32>
    %27 = vector.broadcast %0 : vector<1x128xf32> to vector<128x128xf32>
    %28 = arith.mulf %26, %27 : vector<128x128xf32>
    %29 = vector.broadcast %1 : vector<1x128xf32> to vector<128x128xf32>
    %30 = arith.addf %28, %29 : vector<128x128xf32>
    %31 = arith.subf %30, %24 : vector<128x128xf32>
    %cst_19 = arith.constant 5.000000e-01 : f32
    %32 = vector.broadcast %cst_19 : f32 to vector<128x128xf32>
    %33 = arith.mulf %31, %32 : vector<128x128xf32>
    %34 = arith.addf %24, %33 : vector<128x128xf32>
    %cst_20 = arith.constant 5.000000e-01 : f32
    %35 = vector.broadcast %cst_20 : f32 to vector<128x128xf32>
    %36 = arith.cmpf oge, %34, %35 : vector<128x128xf32>
    %cst_21 = arith.constant 1.000000e+00 : f32
    %cst_22 = arith.constant 0.000000e+00 : f32
    %37 = vector.broadcast %cst_21 : f32 to vector<128x128xf32>
    %38 = vector.broadcast %cst_22 : f32 to vector<128x128xf32>
    %39 = arith.select %36, %37, %38 : vector<128x128xi1>, vector<128x128xf32>
    %40 = tpu.transpose %39, [1, 0] : vector<128x128xf32> -> vector<128x128xf32>
    %41 = arith.truncf %40 : vector<128x128xf32> to vector<128x128xbf16>
    %c1_23 = arith.constant 1 : index
    %c0_24 = arith.constant 0 : index
    %c0_25 = arith.constant 0 : index
    %c0_26 = arith.constant 0 : index
    %42 = vector.load %arg4[%c1_23, %c0_24, %c0_25, %c0_26] : memref<2x1x128x128xbf16, #tpu.memory_space<vmem>>, vector<1x1x128x128xbf16>
    %43 = vector.shape_cast %42 : vector<1x1x128x128xbf16> to vector<128x128xbf16>
    %44 = vector.shape_cast %41 : vector<128x128xbf16> to vector<1x1x128x128xbf16>
    tpu.vector_store %arg4[%c1_23, %c0_24, %c0_25, %c0_26], %44 {strides = array<i32>} : memref<2x1x128x128xbf16, #tpu.memory_space<vmem>>, vector<1x1x128x128xbf16>,
    return
  }
  func.func @transform_0(%arg0: i32) -> (i32, i32, i32, i32) {
    %c0_i32 = arith.constant 0 : i32
    %c0_i32_0 = arith.constant 0 : i32
    %c2_i32 = arith.constant 2 : i32
    %c0_i32_1 = arith.constant 0 : i32
    return %c0_i32, %arg0, %c0_i32_0, %c2_i32 : i32, i32, i32, i32
  }
  func.func @transform_1(%arg0: i32) -> (i32, i32) {
    %c0_i32 = arith.constant 0 : i32
    %c0_i32_0 = arith.constant 0 : i32
    %c0_i32_1 = arith.constant 0 : i32
    return %c0_i32, %c0_i32_0 : i32, i32
  }
  func.func @transform_2(%arg0: i32) -> (i32, i32) {
    %c0_i32 = arith.constant 0 : i32
    %c0_i32_0 = arith.constant 0 : i32
    %c0_i32_1 = arith.constant 0 : i32
    return %c0_i32, %c0_i32_0 : i32, i32
  }
  func.func @transform_3(%arg0: i32) -> (i32, i32, i32, i32) {
    %c0_i32 = arith.constant 0 : i32
    %c0_i32_0 = arith.constant 0 : i32
    %c0_i32_1 = arith.constant 0 : i32
    %c0_i32_2 = arith.constant 0 : i32
    return %c0_i32, %arg0, %c0_i32_0, %c0_i32_1 : i32, i32, i32, i32
  }
}

module attributes {stable_mosaic.version = 11 : i64} {
  func.func @_matmul_stats_kernel(%arg0: i32, %arg1: memref<256x128xbf16, #tpu.memory_space<vmem>>, %arg2: memref<128x128xbf16, #tpu.memory_space<vmem>>, %arg3: memref<256x128xf32, #tpu.memory_space<vmem>>, %arg4: memref<1x1x128xf32, #tpu.memory_space<vmem>>, %arg5: memref<1x1x128xf32, #tpu.memory_space<vmem>>) attributes {dimension_semantics = [#tpu.dimension_semantics<parallel>], iteration_bounds = array<i64: 2>, scalar_prefetch = 0 : i64, scratch_operands = 0 : i64, tpu.core_type = #tpu.core_type<tc>, window_params = [{transform_indices = @transform_0, window_bounds = array<i64: 256, 128>}, {pipeline_mode = #tpu.pipeline_mode<synchronous>, transform_indices = @transform_1, window_bounds = array<i64: 128, 128>}, {transform_indices = @transform_2, window_bounds = array<i64: 256, 128>}, {transform_indices = @transform_3, window_bounds = array<i64: 1, 1, 128>}, {transform_indices = @transform_4, window_bounds = array<i64: 1, 1, 128>}]} {
    %c0 = arith.constant 0 : index
    %c0_0 = arith.constant 0 : index
    %0 = vector.load %arg1[%c0, %c0_0] : memref<256x128xbf16, #tpu.memory_space<vmem>>, vector<256x128xbf16>
    %c0_1 = arith.constant 0 : index
    %c0_2 = arith.constant 0 : index
    %1 = vector.load %arg2[%c0_1, %c0_2] : memref<128x128xbf16, #tpu.memory_space<vmem>>, vector<128x128xbf16>
    %cst = arith.constant dense<0.000000e+00> : vector<256x128xf32>
    %2 = tpu.matmul %0, %1, %cst {dimension_numbers = #tpu.dot_dimension_numbers<[1], [0], [0], [1], [0, 0, 1, 1], [], []>} : vector<256x128xbf16>, vector<128x128xbf16>, vector<256x128xf32> -> vector<256x128xf32>
    %c0_3 = arith.constant 0 : index
    %c0_4 = arith.constant 0 : index
    %3 = vector.load %arg3[%c0_3, %c0_4] : memref<256x128xf32, #tpu.memory_space<vmem>>, vector<256x128xf32>
    tpu.vector_store %arg3[%c0_3, %c0_4], %2 {strides = array<i32>} : memref<256x128xf32, #tpu.memory_space<vmem>>, vector<256x128xf32>,
    %cst_5 = arith.constant dense<0.000000e+00> : vector<128xf32>
    %4 = vector.multi_reduction <add>, %2, %cst_5 [0] : vector<256x128xf32> to vector<128xf32>
    %5 = vector.shape_cast %4 : vector<128xf32> to vector<1x128xf32>
    %6 = vector.shape_cast %5 : vector<1x128xf32> to vector<1x1x128xf32>
    %c0_6 = arith.constant 0 : index
    %c0_7 = arith.constant 0 : index
    %c0_8 = arith.constant 0 : index
    %7 = vector.load %arg4[%c0_6, %c0_7, %c0_8] : memref<1x1x128xf32, #tpu.memory_space<vmem>>, vector<1x1x128xf32>
    tpu.vector_store %arg4[%c0_6, %c0_7, %c0_8], %6 {strides = array<i32>} : memref<1x1x128xf32, #tpu.memory_space<vmem>>, vector<1x1x128xf32>,
    %8 = arith.mulf %2, %2 : vector<256x128xf32>
    %cst_9 = arith.constant dense<0.000000e+00> : vector<128xf32>
    %9 = vector.multi_reduction <add>, %8, %cst_9 [0] : vector<256x128xf32> to vector<128xf32>
    %10 = vector.shape_cast %9 : vector<128xf32> to vector<1x128xf32>
    %11 = vector.shape_cast %10 : vector<1x128xf32> to vector<1x1x128xf32>
    %c0_10 = arith.constant 0 : index
    %c0_11 = arith.constant 0 : index
    %c0_12 = arith.constant 0 : index
    %12 = vector.load %arg5[%c0_10, %c0_11, %c0_12] : memref<1x1x128xf32, #tpu.memory_space<vmem>>, vector<1x1x128xf32>
    tpu.vector_store %arg5[%c0_10, %c0_11, %c0_12], %11 {strides = array<i32>} : memref<1x1x128xf32, #tpu.memory_space<vmem>>, vector<1x1x128xf32>,
    return
  }
  func.func @transform_0(%arg0: i32) -> (i32, i32) {
    %c0_i32 = arith.constant 0 : i32
    %c0_i32_0 = arith.constant 0 : i32
    return %arg0, %c0_i32 : i32, i32
  }
  func.func @transform_1(%arg0: i32) -> (i32, i32) {
    %c0_i32 = arith.constant 0 : i32
    %c0_i32_0 = arith.constant 0 : i32
    %c0_i32_1 = arith.constant 0 : i32
    return %c0_i32, %c0_i32_0 : i32, i32
  }
  func.func @transform_2(%arg0: i32) -> (i32, i32) {
    %c0_i32 = arith.constant 0 : i32
    %c0_i32_0 = arith.constant 0 : i32
    return %arg0, %c0_i32 : i32, i32
  }
  func.func @transform_3(%arg0: i32) -> (i32, i32, i32) {
    %c0_i32 = arith.constant 0 : i32
    %c0_i32_0 = arith.constant 0 : i32
    %c0_i32_1 = arith.constant 0 : i32
    return %arg0, %c0_i32, %c0_i32_0 : i32, i32, i32
  }
  func.func @transform_4(%arg0: i32) -> (i32, i32, i32) {
    %c0_i32 = arith.constant 0 : i32
    %c0_i32_0 = arith.constant 0 : i32
    %c0_i32_1 = arith.constant 0 : i32
    return %arg0, %c0_i32, %c0_i32_0 : i32, i32, i32
  }
}

module attributes {stable_mosaic.version = 11 : i64} {
  func.func @_bn_lif_kernel(%arg0: i32, %arg1: memref<2x128x128xf32, #tpu.memory_space<vmem>>, %arg2: memref<1x128xf32, #tpu.memory_space<vmem>>, %arg3: memref<1x128xf32, #tpu.memory_space<vmem>>, %arg4: memref<2x128x128xbf16, #tpu.memory_space<vmem>>) attributes {dimension_semantics = [#tpu.dimension_semantics<parallel>], iteration_bounds = array<i64: 2>, scalar_prefetch = 0 : i64, scratch_operands = 0 : i64, tpu.core_type = #tpu.core_type<tc>, window_params = [{transform_indices = @transform_0, window_bounds = array<i64: 2, 128, 128>}, {pipeline_mode = #tpu.pipeline_mode<synchronous>, transform_indices = @transform_1, window_bounds = array<i64: 1, 128>}, {pipeline_mode = #tpu.pipeline_mode<synchronous>, transform_indices = @transform_2, window_bounds = array<i64: 1, 128>}, {transform_indices = @transform_3, window_bounds = array<i64: 2, 128, 128>}]} {
    %c0 = arith.constant 0 : index
    %c0_0 = arith.constant 0 : index
    %0 = vector.load %arg2[%c0, %c0_0] : memref<1x128xf32, #tpu.memory_space<vmem>>, vector<1x128xf32>
    %c0_1 = arith.constant 0 : index
    %c0_2 = arith.constant 0 : index
    %1 = vector.load %arg3[%c0_1, %c0_2] : memref<1x128xf32, #tpu.memory_space<vmem>>, vector<1x128xf32>
    %cst = arith.constant 0.000000e+00 : f32
    %2 = vector.broadcast %cst : f32 to vector<128x128xf32>
    %c0_3 = arith.constant 0 : index
    %c0_4 = arith.constant 0 : index
    %c0_5 = arith.constant 0 : index
    %3 = vector.load %arg1[%c0_3, %c0_4, %c0_5] : memref<2x128x128xf32, #tpu.memory_space<vmem>>, vector<1x128x128xf32>
    %4 = vector.shape_cast %3 : vector<1x128x128xf32> to vector<128x128xf32>
    %5 = vector.broadcast %0 : vector<1x128xf32> to vector<128x128xf32>
    %6 = arith.mulf %4, %5 : vector<128x128xf32>
    %7 = vector.broadcast %1 : vector<1x128xf32> to vector<128x128xf32>
    %8 = arith.addf %6, %7 : vector<128x128xf32>
    %9 = arith.subf %8, %2 : vector<128x128xf32>
    %cst_6 = arith.constant 5.000000e-01 : f32
    %10 = vector.broadcast %cst_6 : f32 to vector<128x128xf32>
    %11 = arith.mulf %9, %10 : vector<128x128xf32>
    %12 = arith.addf %2, %11 : vector<128x128xf32>
    %cst_7 = arith.constant 5.000000e-01 : f32
    %13 = vector.broadcast %cst_7 : f32 to vector<128x128xf32>
    %14 = arith.cmpf oge, %12, %13 : vector<128x128xf32>
    %cst_8 = arith.constant 1.000000e+00 : f32
    %cst_9 = arith.constant 0.000000e+00 : f32
    %15 = vector.broadcast %cst_8 : f32 to vector<128x128xf32>
    %16 = vector.broadcast %cst_9 : f32 to vector<128x128xf32>
    %17 = arith.select %14, %15, %16 : vector<128x128xi1>, vector<128x128xf32>
    %18 = arith.truncf %17 : vector<128x128xf32> to vector<128x128xbf16>
    %c0_10 = arith.constant 0 : index
    %c0_11 = arith.constant 0 : index
    %c0_12 = arith.constant 0 : index
    %19 = vector.load %arg4[%c0_10, %c0_11, %c0_12] : memref<2x128x128xbf16, #tpu.memory_space<vmem>>, vector<1x128x128xbf16>
    %20 = vector.shape_cast %19 : vector<1x128x128xbf16> to vector<128x128xbf16>
    %21 = vector.shape_cast %18 : vector<128x128xbf16> to vector<1x128x128xbf16>
    tpu.vector_store %arg4[%c0_10, %c0_11, %c0_12], %21 {strides = array<i32>} : memref<2x128x128xbf16, #tpu.memory_space<vmem>>, vector<1x128x128xbf16>,
    %cst_13 = arith.constant 0.000000e+00 : f32
    %22 = vector.broadcast %cst_13 : f32 to vector<128x128xf32>
    %23 = arith.select %14, %22, %12 : vector<128x128xi1>, vector<128x128xf32>
    %c1 = arith.constant 1 : index
    %c0_14 = arith.constant 0 : index
    %c0_15 = arith.constant 0 : index
    %24 = vector.load %arg1[%c1, %c0_14, %c0_15] : memref<2x128x128xf32, #tpu.memory_space<vmem>>, vector<1x128x128xf32>
    %25 = vector.shape_cast %24 : vector<1x128x128xf32> to vector<128x128xf32>
    %26 = vector.broadcast %0 : vector<1x128xf32> to vector<128x128xf32>
    %27 = arith.mulf %25, %26 : vector<128x128xf32>
    %28 = vector.broadcast %1 : vector<1x128xf32> to vector<128x128xf32>
    %29 = arith.addf %27, %28 : vector<128x128xf32>
    %30 = arith.subf %29, %23 : vector<128x128xf32>
    %cst_16 = arith.constant 5.000000e-01 : f32
    %31 = vector.broadcast %cst_16 : f32 to vector<128x128xf32>
    %32 = arith.mulf %30, %31 : vector<128x128xf32>
    %33 = arith.addf %23, %32 : vector<128x128xf32>
    %cst_17 = arith.constant 5.000000e-01 : f32
    %34 = vector.broadcast %cst_17 : f32 to vector<128x128xf32>
    %35 = arith.cmpf oge, %33, %34 : vector<128x128xf32>
    %cst_18 = arith.constant 1.000000e+00 : f32
    %cst_19 = arith.constant 0.000000e+00 : f32
    %36 = vector.broadcast %cst_18 : f32 to vector<128x128xf32>
    %37 = vector.broadcast %cst_19 : f32 to vector<128x128xf32>
    %38 = arith.select %35, %36, %37 : vector<128x128xi1>, vector<128x128xf32>
    %39 = arith.truncf %38 : vector<128x128xf32> to vector<128x128xbf16>
    %c1_20 = arith.constant 1 : index
    %c0_21 = arith.constant 0 : index
    %c0_22 = arith.constant 0 : index
    %40 = vector.load %arg4[%c1_20, %c0_21, %c0_22] : memref<2x128x128xbf16, #tpu.memory_space<vmem>>, vector<1x128x128xbf16>
    %41 = vector.shape_cast %40 : vector<1x128x128xbf16> to vector<128x128xbf16>
    %42 = vector.shape_cast %39 : vector<128x128xbf16> to vector<1x128x128xbf16>
    tpu.vector_store %arg4[%c1_20, %c0_21, %c0_22], %42 {strides = array<i32>} : memref<2x128x128xbf16, #tpu.memory_space<vmem>>, vector<1x128x128xbf16>,
    return
  }
  func.func @transform_0(%arg0: i32) -> (i32, i32, i32) {
    %c0_i32 = arith.constant 0 : i32
    %c0_i32_0 = arith.constant 0 : i32
    %c0_i32_1 = arith.constant 0 : i32
    return %c0_i32, %arg0, %c0_i32_0 : i32, i32, i32
  }
  func.func @transform_1(%arg0: i32) -> (i32, i32) {
    %c0_i32 = arith.constant 0 : i32
    %c0_i32_0 = arith.constant 0 : i32
    %c0_i32_1 = arith.constant 0 : i32
    return %c0_i32, %c0_i32_0 : i32, i32
  }
  func.func @transform_2(%arg0: i32) -> (i32, i32) {
    %c0_i32 = arith.constant 0 : i32
    %c0_i32_0 = arith.constant 0 : i32
    %c0_i32_1 = arith.constant 0 : i32
    return %c0_i32, %c0_i32_0 : i32, i32
  }
  func.func @transform_3(%arg0: i32) -> (i32, i32, i32) {
    %c0_i32 = arith.constant 0 : i32
    %c0_i32_0 = arith.constant 0 : i32
    %c0_i32_1 = arith.constant 0 : i32
    return %c0_i32, %arg0, %c0_i32_0 : i32, i32, i32
  }
}

module attributes {stable_mosaic.version = 11 : i64} {
  func.func @_attention_kernel(%arg0: i32, %arg1: memref<1x128x128xf32, #tpu.memory_space<vmem>>, %arg2: memref<1x128x128xf32, #tpu.memory_space<vmem>>, %arg3: memref<1x128x128xbf16, #tpu.memory_space<vmem>>, %arg4: memref<8x128x128xf32, #tpu.memory_space<vmem>>, %arg5: memref<1x128xf32, #tpu.memory_space<vmem>>, %arg6: memref<1x128xf32, #tpu.memory_space<vmem>>, %arg7: memref<1x128xf32, #tpu.memory_space<vmem>>, %arg8: memref<1x128xf32, #tpu.memory_space<vmem>>, %arg9: memref<1x128x128xf32, #tpu.memory_space<vmem>>) attributes {dimension_semantics = [#tpu.dimension_semantics<parallel>], iteration_bounds = array<i64: 4>, scalar_prefetch = 0 : i64, scratch_operands = 0 : i64, tpu.core_type = #tpu.core_type<tc>, window_params = [{transform_indices = @transform_0, window_bounds = array<i64: 1, 128, 128>}, {transform_indices = @transform_1, window_bounds = array<i64: 1, 128, 128>}, {transform_indices = @transform_2, window_bounds = array<i64: 1, 128, 128>}, {pipeline_mode = #tpu.pipeline_mode<synchronous>, transform_indices = @transform_3, window_bounds = array<i64: 8, 128, 128>}, {pipeline_mode = #tpu.pipeline_mode<synchronous>, transform_indices = @transform_4, window_bounds = array<i64: 1, 128>}, {pipeline_mode = #tpu.pipeline_mode<synchronous>, transform_indices = @transform_5, window_bounds = array<i64: 1, 128>}, {pipeline_mode = #tpu.pipeline_mode<synchronous>, transform_indices = @transform_6, window_bounds = array<i64: 1, 128>}, {pipeline_mode = #tpu.pipeline_mode<synchronous>, transform_indices = @transform_7, window_bounds = array<i64: 1, 128>}, {transform_indices = @transform_8, window_bounds = array<i64: 1, 128, 128>}]} {
    %c0 = arith.constant 0 : index
    %c0_0 = arith.constant 0 : index
    %c0_1 = arith.constant 0 : index
    %0 = vector.load %arg1[%c0, %c0_0, %c0_1] : memref<1x128x128xf32, #tpu.memory_space<vmem>>, vector<1x128x128xf32>
    %1 = vector.shape_cast %0 : vector<1x128x128xf32> to vector<128x128xf32>
    %c0_2 = arith.constant 0 : index
    %c0_3 = arith.constant 0 : index
    %2 = vector.load %arg5[%c0_2, %c0_3] : memref<1x128xf32, #tpu.memory_space<vmem>>, vector<1x128xf32>
    %3 = vector.broadcast %2 : vector<1x128xf32> to vector<128x128xf32>
    %4 = arith.mulf %1, %3 : vector<128x128xf32>
    %c0_4 = arith.constant 0 : index
    %c0_5 = arith.constant 0 : index
    %5 = vector.load %arg6[%c0_4, %c0_5] : memref<1x128xf32, #tpu.memory_space<vmem>>, vector<1x128xf32>
    %6 = vector.broadcast %5 : vector<1x128xf32> to vector<128x128xf32>
    %7 = arith.addf %4, %6 : vector<128x128xf32>
    %8 = arith.truncf %7 : vector<128x128xf32> to vector<128x128xbf16>
    %c0_6 = arith.constant 0 : index
    %c0_7 = arith.constant 0 : index
    %c0_8 = arith.constant 0 : index
    %9 = vector.load %arg2[%c0_6, %c0_7, %c0_8] : memref<1x128x128xf32, #tpu.memory_space<vmem>>, vector<1x128x128xf32>
    %10 = vector.shape_cast %9 : vector<1x128x128xf32> to vector<128x128xf32>
    %c0_9 = arith.constant 0 : index
    %c0_10 = arith.constant 0 : index
    %11 = vector.load %arg7[%c0_9, %c0_10] : memref<1x128xf32, #tpu.memory_space<vmem>>, vector<1x128xf32>
    %12 = vector.broadcast %11 : vector<1x128xf32> to vector<128x128xf32>
    %13 = arith.mulf %10, %12 : vector<128x128xf32>
    %c0_11 = arith.constant 0 : index
    %c0_12 = arith.constant 0 : index
    %14 = vector.load %arg8[%c0_11, %c0_12] : memref<1x128xf32, #tpu.memory_space<vmem>>, vector<1x128xf32>
    %15 = vector.broadcast %14 : vector<1x128xf32> to vector<128x128xf32>
    %16 = arith.addf %13, %15 : vector<128x128xf32>
    %17 = arith.truncf %16 : vector<128x128xf32> to vector<128x128xbf16>
    %c0_13 = arith.constant 0 : index
    %c0_14 = arith.constant 0 : index
    %c0_15 = arith.constant 0 : index
    %18 = vector.load %arg3[%c0_13, %c0_14, %c0_15] : memref<1x128x128xbf16, #tpu.memory_space<vmem>>, vector<1x128x128xbf16>
    %19 = vector.shape_cast %18 : vector<1x128x128xbf16> to vector<128x128xbf16>
    %20 = vector.extract_strided_slice %8 {offsets = [0, 0], sizes = [128, 16], strides = [1, 1]} : vector<128x128xbf16> to vector<128x16xbf16>
    %21 = vector.extract_strided_slice %17 {offsets = [0, 0], sizes = [128, 16], strides = [1, 1]} : vector<128x128xbf16> to vector<128x16xbf16>
    %cst = arith.constant dense<0.000000e+00> : vector<128x128xf32>
    %22 = tpu.matmul %20, %21, %cst {dimension_numbers = #tpu.dot_dimension_numbers<[1], [1], [0], [0], [0, 0, 1, 0], [], []>} : vector<128x16xbf16>, vector<128x16xbf16>, vector<128x128xf32> -> vector<128x128xf32>
    %c0_16 = arith.constant 0 : index
    %c0_17 = arith.constant 0 : index
    %c0_18 = arith.constant 0 : index
    %23 = vector.load %arg4[%c0_16, %c0_17, %c0_18] : memref<8x128x128xf32, #tpu.memory_space<vmem>>, vector<1x128x128xf32>
    %24 = vector.shape_cast %23 : vector<1x128x128xf32> to vector<128x128xf32>
    %25 = arith.addf %22, %24 : vector<128x128xf32>
    %26 = arith.truncf %25 : vector<128x128xf32> to vector<128x128xbf16>
    %27 = vector.extract_strided_slice %19 {offsets = [0, 0], sizes = [128, 16], strides = [1, 1]} : vector<128x128xbf16> to vector<128x16xbf16>
    %cst_19 = arith.constant dense<0.000000e+00> : vector<128x16xf32>
    %28 = tpu.matmul %26, %27, %cst_19 {dimension_numbers = #tpu.dot_dimension_numbers<[1], [0], [0], [1], [0, 0, 1, 1], [], []>} : vector<128x128xbf16>, vector<128x16xbf16>, vector<128x16xf32> -> vector<128x16xf32>
    %cst_20 = arith.constant 0.0883883461 : f32
    %29 = vector.broadcast %cst_20 : f32 to vector<128x16xf32>
    %30 = arith.mulf %28, %29 : vector<128x16xf32>
    %c0_21 = arith.constant 0 : index
    %c0_22 = arith.constant 0 : index
    %c0_23 = arith.constant 0 : index
    %31 = vector.load %arg9[%c0_21, %c0_22, %c0_23] : memref<1x128x128xf32, #tpu.memory_space<vmem>>, vector<1x128x16xf32>
    %32 = vector.shape_cast %31 : vector<1x128x16xf32> to vector<128x16xf32>
    %33 = vector.shape_cast %30 : vector<128x16xf32> to vector<1x128x16xf32>
    tpu.vector_store %arg9[%c0_21, %c0_22, %c0_23], %33 {strides = array<i32>} : memref<1x128x128xf32, #tpu.memory_space<vmem>>, vector<1x128x16xf32>,
    %34 = vector.extract_strided_slice %8 {offsets = [0, 16], sizes = [128, 16], strides = [1, 1]} : vector<128x128xbf16> to vector<128x16xbf16>
    %35 = vector.extract_strided_slice %17 {offsets = [0, 16], sizes = [128, 16], strides = [1, 1]} : vector<128x128xbf16> to vector<128x16xbf16>
    %cst_24 = arith.constant dense<0.000000e+00> : vector<128x128xf32>
    %36 = tpu.matmul %34, %35, %cst_24 {dimension_numbers = #tpu.dot_dimension_numbers<[1], [1], [0], [0], [0, 0, 1, 0], [], []>} : vector<128x16xbf16>, vector<128x16xbf16>, vector<128x128xf32> -> vector<128x128xf32>
    %c1 = arith.constant 1 : index
    %c0_25 = arith.constant 0 : index
    %c0_26 = arith.constant 0 : index
    %37 = vector.load %arg4[%c1, %c0_25, %c0_26] : memref<8x128x128xf32, #tpu.memory_space<vmem>>, vector<1x128x128xf32>
    %38 = vector.shape_cast %37 : vector<1x128x128xf32> to vector<128x128xf32>
    %39 = arith.addf %36, %38 : vector<128x128xf32>
    %40 = arith.truncf %39 : vector<128x128xf32> to vector<128x128xbf16>
    %41 = vector.extract_strided_slice %19 {offsets = [0, 16], sizes = [128, 16], strides = [1, 1]} : vector<128x128xbf16> to vector<128x16xbf16>
    %cst_27 = arith.constant dense<0.000000e+00> : vector<128x16xf32>
    %42 = tpu.matmul %40, %41, %cst_27 {dimension_numbers = #tpu.dot_dimension_numbers<[1], [0], [0], [1], [0, 0, 1, 1], [], []>} : vector<128x128xbf16>, vector<128x16xbf16>, vector<128x16xf32> -> vector<128x16xf32>
    %cst_28 = arith.constant 0.0883883461 : f32
    %43 = vector.broadcast %cst_28 : f32 to vector<128x16xf32>
    %44 = arith.mulf %42, %43 : vector<128x16xf32>
    %c0_29 = arith.constant 0 : index
    %c0_30 = arith.constant 0 : index
    %c16 = arith.constant 16 : index
    %45 = vector.load %arg9[%c0_29, %c0_30, %c16] : memref<1x128x128xf32, #tpu.memory_space<vmem>>, vector<1x128x16xf32>
    %46 = vector.shape_cast %45 : vector<1x128x16xf32> to vector<128x16xf32>
    %47 = vector.shape_cast %44 : vector<128x16xf32> to vector<1x128x16xf32>
    tpu.vector_store %arg9[%c0_29, %c0_30, %c16], %47 {strides = array<i32>} : memref<1x128x128xf32, #tpu.memory_space<vmem>>, vector<1x128x16xf32>,
    %48 = vector.extract_strided_slice %8 {offsets = [0, 32], sizes = [128, 16], strides = [1, 1]} : vector<128x128xbf16> to vector<128x16xbf16>
    %49 = vector.extract_strided_slice %17 {offsets = [0, 32], sizes = [128, 16], strides = [1, 1]} : vector<128x128xbf16> to vector<128x16xbf16>
    %cst_31 = arith.constant dense<0.000000e+00> : vector<128x128xf32>
    %50 = tpu.matmul %48, %49, %cst_31 {dimension_numbers = #tpu.dot_dimension_numbers<[1], [1], [0], [0], [0, 0, 1, 0], [], []>} : vector<128x16xbf16>, vector<128x16xbf16>, vector<128x128xf32> -> vector<128x128xf32>
    %c2 = arith.constant 2 : index
    %c0_32 = arith.constant 0 : index
    %c0_33 = arith.constant 0 : index
    %51 = vector.load %arg4[%c2, %c0_32, %c0_33] : memref<8x128x128xf32, #tpu.memory_space<vmem>>, vector<1x128x128xf32>
    %52 = vector.shape_cast %51 : vector<1x128x128xf32> to vector<128x128xf32>
    %53 = arith.addf %50, %52 : vector<128x128xf32>
    %54 = arith.truncf %53 : vector<128x128xf32> to vector<128x128xbf16>
    %55 = vector.extract_strided_slice %19 {offsets = [0, 32], sizes = [128, 16], strides = [1, 1]} : vector<128x128xbf16> to vector<128x16xbf16>
    %cst_34 = arith.constant dense<0.000000e+00> : vector<128x16xf32>
    %56 = tpu.matmul %54, %55, %cst_34 {dimension_numbers = #tpu.dot_dimension_numbers<[1], [0], [0], [1], [0, 0, 1, 1], [], []>} : vector<128x128xbf16>, vector<128x16xbf16>, vector<128x16xf32> -> vector<128x16xf32>
    %cst_35 = arith.constant 0.0883883461 : f32
    %57 = vector.broadcast %cst_35 : f32 to vector<128x16xf32>
    %58 = arith.mulf %56, %57 : vector<128x16xf32>
    %c0_36 = arith.constant 0 : index
    %c0_37 = arith.constant 0 : index
    %c32 = arith.constant 32 : index
    %59 = vector.load %arg9[%c0_36, %c0_37, %c32] : memref<1x128x128xf32, #tpu.memory_space<vmem>>, vector<1x128x16xf32>
    %60 = vector.shape_cast %59 : vector<1x128x16xf32> to vector<128x16xf32>
    %61 = vector.shape_cast %58 : vector<128x16xf32> to vector<1x128x16xf32>
    tpu.vector_store %arg9[%c0_36, %c0_37, %c32], %61 {strides = array<i32>} : memref<1x128x128xf32, #tpu.memory_space<vmem>>, vector<1x128x16xf32>,
    %62 = vector.extract_strided_slice %8 {offsets = [0, 48], sizes = [128, 16], strides = [1, 1]} : vector<128x128xbf16> to vector<128x16xbf16>
    %63 = vector.extract_strided_slice %17 {offsets = [0, 48], sizes = [128, 16], strides = [1, 1]} : vector<128x128xbf16> to vector<128x16xbf16>
    %cst_38 = arith.constant dense<0.000000e+00> : vector<128x128xf32>
    %64 = tpu.matmul %62, %63, %cst_38 {dimension_numbers = #tpu.dot_dimension_numbers<[1], [1], [0], [0], [0, 0, 1, 0], [], []>} : vector<128x16xbf16>, vector<128x16xbf16>, vector<128x128xf32> -> vector<128x128xf32>
    %c3 = arith.constant 3 : index
    %c0_39 = arith.constant 0 : index
    %c0_40 = arith.constant 0 : index
    %65 = vector.load %arg4[%c3, %c0_39, %c0_40] : memref<8x128x128xf32, #tpu.memory_space<vmem>>, vector<1x128x128xf32>
    %66 = vector.shape_cast %65 : vector<1x128x128xf32> to vector<128x128xf32>
    %67 = arith.addf %64, %66 : vector<128x128xf32>
    %68 = arith.truncf %67 : vector<128x128xf32> to vector<128x128xbf16>
    %69 = vector.extract_strided_slice %19 {offsets = [0, 48], sizes = [128, 16], strides = [1, 1]} : vector<128x128xbf16> to vector<128x16xbf16>
    %cst_41 = arith.constant dense<0.000000e+00> : vector<128x16xf32>
    %70 = tpu.matmul %68, %69, %cst_41 {dimension_numbers = #tpu.dot_dimension_numbers<[1], [0], [0], [1], [0, 0, 1, 1], [], []>} : vector<128x128xbf16>, vector<128x16xbf16>, vector<128x16xf32> -> vector<128x16xf32>
    %cst_42 = arith.constant 0.0883883461 : f32
    %71 = vector.broadcast %cst_42 : f32 to vector<128x16xf32>
    %72 = arith.mulf %70, %71 : vector<128x16xf32>
    %c0_43 = arith.constant 0 : index
    %c0_44 = arith.constant 0 : index
    %c48 = arith.constant 48 : index
    %73 = vector.load %arg9[%c0_43, %c0_44, %c48] : memref<1x128x128xf32, #tpu.memory_space<vmem>>, vector<1x128x16xf32>
    %74 = vector.shape_cast %73 : vector<1x128x16xf32> to vector<128x16xf32>
    %75 = vector.shape_cast %72 : vector<128x16xf32> to vector<1x128x16xf32>
    tpu.vector_store %arg9[%c0_43, %c0_44, %c48], %75 {strides = array<i32>} : memref<1x128x128xf32, #tpu.memory_space<vmem>>, vector<1x128x16xf32>,
    %76 = vector.extract_strided_slice %8 {offsets = [0, 64], sizes = [128, 16], strides = [1, 1]} : vector<128x128xbf16> to vector<128x16xbf16>
    %77 = vector.extract_strided_slice %17 {offsets = [0, 64], sizes = [128, 16], strides = [1, 1]} : vector<128x128xbf16> to vector<128x16xbf16>
    %cst_45 = arith.constant dense<0.000000e+00> : vector<128x128xf32>
    %78 = tpu.matmul %76, %77, %cst_45 {dimension_numbers = #tpu.dot_dimension_numbers<[1], [1], [0], [0], [0, 0, 1, 0], [], []>} : vector<128x16xbf16>, vector<128x16xbf16>, vector<128x128xf32> -> vector<128x128xf32>
    %c4 = arith.constant 4 : index
    %c0_46 = arith.constant 0 : index
    %c0_47 = arith.constant 0 : index
    %79 = vector.load %arg4[%c4, %c0_46, %c0_47] : memref<8x128x128xf32, #tpu.memory_space<vmem>>, vector<1x128x128xf32>
    %80 = vector.shape_cast %79 : vector<1x128x128xf32> to vector<128x128xf32>
    %81 = arith.addf %78, %80 : vector<128x128xf32>
    %82 = arith.truncf %81 : vector<128x128xf32> to vector<128x128xbf16>
    %83 = vector.extract_strided_slice %19 {offsets = [0, 64], sizes = [128, 16], strides = [1, 1]} : vector<128x128xbf16> to vector<128x16xbf16>
    %cst_48 = arith.constant dense<0.000000e+00> : vector<128x16xf32>
    %84 = tpu.matmul %82, %83, %cst_48 {dimension_numbers = #tpu.dot_dimension_numbers<[1], [0], [0], [1], [0, 0, 1, 1], [], []>} : vector<128x128xbf16>, vector<128x16xbf16>, vector<128x16xf32> -> vector<128x16xf32>
    %cst_49 = arith.constant 0.0883883461 : f32
    %85 = vector.broadcast %cst_49 : f32 to vector<128x16xf32>
    %86 = arith.mulf %84, %85 : vector<128x16xf32>
    %c0_50 = arith.constant 0 : index
    %c0_51 = arith.constant 0 : index
    %c64 = arith.constant 64 : index
    %87 = vector.load %arg9[%c0_50, %c0_51, %c64] : memref<1x128x128xf32, #tpu.memory_space<vmem>>, vector<1x128x16xf32>
    %88 = vector.shape_cast %87 : vector<1x128x16xf32> to vector<128x16xf32>
    %89 = vector.shape_cast %86 : vector<128x16xf32> to vector<1x128x16xf32>
    tpu.vector_store %arg9[%c0_50, %c0_51, %c64], %89 {strides = array<i32>} : memref<1x128x128xf32, #tpu.memory_space<vmem>>, vector<1x128x16xf32>,
    %90 = vector.extract_strided_slice %8 {offsets = [0, 80], sizes = [128, 16], strides = [1, 1]} : vector<128x128xbf16> to vector<128x16xbf16>
    %91 = vector.extract_strided_slice %17 {offsets = [0, 80], sizes = [128, 16], strides = [1, 1]} : vector<128x128xbf16> to vector<128x16xbf16>
    %cst_52 = arith.constant dense<0.000000e+00> : vector<128x128xf32>
    %92 = tpu.matmul %90, %91, %cst_52 {dimension_numbers = #tpu.dot_dimension_numbers<[1], [1], [0], [0], [0, 0, 1, 0], [], []>} : vector<128x16xbf16>, vector<128x16xbf16>, vector<128x128xf32> -> vector<128x128xf32>
    %c5 = arith.constant 5 : index
    %c0_53 = arith.constant 0 : index
    %c0_54 = arith.constant 0 : index
    %93 = vector.load %arg4[%c5, %c0_53, %c0_54] : memref<8x128x128xf32, #tpu.memory_space<vmem>>, vector<1x128x128xf32>
    %94 = vector.shape_cast %93 : vector<1x128x128xf32> to vector<128x128xf32>
    %95 = arith.addf %92, %94 : vector<128x128xf32>
    %96 = arith.truncf %95 : vector<128x128xf32> to vector<128x128xbf16>
    %97 = vector.extract_strided_slice %19 {offsets = [0, 80], sizes = [128, 16], strides = [1, 1]} : vector<128x128xbf16> to vector<128x16xbf16>
    %cst_55 = arith.constant dense<0.000000e+00> : vector<128x16xf32>
    %98 = tpu.matmul %96, %97, %cst_55 {dimension_numbers = #tpu.dot_dimension_numbers<[1], [0], [0], [1], [0, 0, 1, 1], [], []>} : vector<128x128xbf16>, vector<128x16xbf16>, vector<128x16xf32> -> vector<128x16xf32>
    %cst_56 = arith.constant 0.0883883461 : f32
    %99 = vector.broadcast %cst_56 : f32 to vector<128x16xf32>
    %100 = arith.mulf %98, %99 : vector<128x16xf32>
    %c0_57 = arith.constant 0 : index
    %c0_58 = arith.constant 0 : index
    %c80 = arith.constant 80 : index
    %101 = vector.load %arg9[%c0_57, %c0_58, %c80] : memref<1x128x128xf32, #tpu.memory_space<vmem>>, vector<1x128x16xf32>
    %102 = vector.shape_cast %101 : vector<1x128x16xf32> to vector<128x16xf32>
    %103 = vector.shape_cast %100 : vector<128x16xf32> to vector<1x128x16xf32>
    tpu.vector_store %arg9[%c0_57, %c0_58, %c80], %103 {strides = array<i32>} : memref<1x128x128xf32, #tpu.memory_space<vmem>>, vector<1x128x16xf32>,
    %104 = vector.extract_strided_slice %8 {offsets = [0, 96], sizes = [128, 16], strides = [1, 1]} : vector<128x128xbf16> to vector<128x16xbf16>
    %105 = vector.extract_strided_slice %17 {offsets = [0, 96], sizes = [128, 16], strides = [1, 1]} : vector<128x128xbf16> to vector<128x16xbf16>
    %cst_59 = arith.constant dense<0.000000e+00> : vector<128x128xf32>
    %106 = tpu.matmul %104, %105, %cst_59 {dimension_numbers = #tpu.dot_dimension_numbers<[1], [1], [0], [0], [0, 0, 1, 0], [], []>} : vector<128x16xbf16>, vector<128x16xbf16>, vector<128x128xf32> -> vector<128x128xf32>
    %c6 = arith.constant 6 : index
    %c0_60 = arith.constant 0 : index
    %c0_61 = arith.constant 0 : index
    %107 = vector.load %arg4[%c6, %c0_60, %c0_61] : memref<8x128x128xf32, #tpu.memory_space<vmem>>, vector<1x128x128xf32>
    %108 = vector.shape_cast %107 : vector<1x128x128xf32> to vector<128x128xf32>
    %109 = arith.addf %106, %108 : vector<128x128xf32>
    %110 = arith.truncf %109 : vector<128x128xf32> to vector<128x128xbf16>
    %111 = vector.extract_strided_slice %19 {offsets = [0, 96], sizes = [128, 16], strides = [1, 1]} : vector<128x128xbf16> to vector<128x16xbf16>
    %cst_62 = arith.constant dense<0.000000e+00> : vector<128x16xf32>
    %112 = tpu.matmul %110, %111, %cst_62 {dimension_numbers = #tpu.dot_dimension_numbers<[1], [0], [0], [1], [0, 0, 1, 1], [], []>} : vector<128x128xbf16>, vector<128x16xbf16>, vector<128x16xf32> -> vector<128x16xf32>
    %cst_63 = arith.constant 0.0883883461 : f32
    %113 = vector.broadcast %cst_63 : f32 to vector<128x16xf32>
    %114 = arith.mulf %112, %113 : vector<128x16xf32>
    %c0_64 = arith.constant 0 : index
    %c0_65 = arith.constant 0 : index
    %c96 = arith.constant 96 : index
    %115 = vector.load %arg9[%c0_64, %c0_65, %c96] : memref<1x128x128xf32, #tpu.memory_space<vmem>>, vector<1x128x16xf32>
    %116 = vector.shape_cast %115 : vector<1x128x16xf32> to vector<128x16xf32>
    %117 = vector.shape_cast %114 : vector<128x16xf32> to vector<1x128x16xf32>
    tpu.vector_store %arg9[%c0_64, %c0_65, %c96], %117 {strides = array<i32>} : memref<1x128x128xf32, #tpu.memory_space<vmem>>, vector<1x128x16xf32>,
    %118 = vector.extract_strided_slice %8 {offsets = [0, 112], sizes = [128, 16], strides = [1, 1]} : vector<128x128xbf16> to vector<128x16xbf16>
    %119 = vector.extract_strided_slice %17 {offsets = [0, 112], sizes = [128, 16], strides = [1, 1]} : vector<128x128xbf16> to vector<128x16xbf16>
    %cst_66 = arith.constant dense<0.000000e+00> : vector<128x128xf32>
    %120 = tpu.matmul %118, %119, %cst_66 {dimension_numbers = #tpu.dot_dimension_numbers<[1], [1], [0], [0], [0, 0, 1, 0], [], []>} : vector<128x16xbf16>, vector<128x16xbf16>, vector<128x128xf32> -> vector<128x128xf32>
    %c7 = arith.constant 7 : index
    %c0_67 = arith.constant 0 : index
    %c0_68 = arith.constant 0 : index
    %121 = vector.load %arg4[%c7, %c0_67, %c0_68] : memref<8x128x128xf32, #tpu.memory_space<vmem>>, vector<1x128x128xf32>
    %122 = vector.shape_cast %121 : vector<1x128x128xf32> to vector<128x128xf32>
    %123 = arith.addf %120, %122 : vector<128x128xf32>
    %124 = arith.truncf %123 : vector<128x128xf32> to vector<128x128xbf16>
    %125 = vector.extract_strided_slice %19 {offsets = [0, 112], sizes = [128, 16], strides = [1, 1]} : vector<128x128xbf16> to vector<128x16xbf16>
    %cst_69 = arith.constant dense<0.000000e+00> : vector<128x16xf32>
    %126 = tpu.matmul %124, %125, %cst_69 {dimension_numbers = #tpu.dot_dimension_numbers<[1], [0], [0], [1], [0, 0, 1, 1], [], []>} : vector<128x128xbf16>, vector<128x16xbf16>, vector<128x16xf32> -> vector<128x16xf32>
    %cst_70 = arith.constant 0.0883883461 : f32
    %127 = vector.broadcast %cst_70 : f32 to vector<128x16xf32>
    %128 = arith.mulf %126, %127 : vector<128x16xf32>
    %c0_71 = arith.constant 0 : index
    %c0_72 = arith.constant 0 : index
    %c112 = arith.constant 112 : index
    %129 = vector.load %arg9[%c0_71, %c0_72, %c112] : memref<1x128x128xf32, #tpu.memory_space<vmem>>, vector<1x128x16xf32>
    %130 = vector.shape_cast %129 : vector<1x128x16xf32> to vector<128x16xf32>
    %131 = vector.shape_cast %128 : vector<128x16xf32> to vector<1x128x16xf32>
    tpu.vector_store %arg9[%c0_71, %c0_72, %c112], %131 {strides = array<i32>} : memref<1x128x128xf32, #tpu.memory_space<vmem>>, vector<1x128x16xf32>,
    return
  }
  func.func @transform_0(%arg0: i32) -> (i32, i32, i32) {
    %c0_i32 = arith.constant 0 : i32
    %c0_i32_0 = arith.constant 0 : i32
    %c0_i32_1 = arith.constant 0 : i32
    return %arg0, %c0_i32, %c0_i32_0 : i32, i32, i32
  }
  func.func @transform_1(%arg0: i32) -> (i32, i32, i32) {
    %c0_i32 = arith.constant 0 : i32
    %c1_i32 = arith.constant 1 : i32
    %c0_i32_0 = arith.constant 0 : i32
    return %arg0, %c0_i32, %c1_i32 : i32, i32, i32
  }
  func.func @transform_2(%arg0: i32) -> (i32, i32, i32) {
    %c0_i32 = arith.constant 0 : i32
    %c0_i32_0 = arith.constant 0 : i32
    %c0_i32_1 = arith.constant 0 : i32
    return %arg0, %c0_i32, %c0_i32_0 : i32, i32, i32
  }
  func.func @transform_3(%arg0: i32) -> (i32, i32, i32) {
    %c0_i32 = arith.constant 0 : i32
    %c0_i32_0 = arith.constant 0 : i32
    %c0_i32_1 = arith.constant 0 : i32
    %c0_i32_2 = arith.constant 0 : i32
    return %c0_i32, %c0_i32_0, %c0_i32_1 : i32, i32, i32
  }
  func.func @transform_4(%arg0: i32) -> (i32, i32) {
    %c0_i32 = arith.constant 0 : i32
    %c0_i32_0 = arith.constant 0 : i32
    %c0_i32_1 = arith.constant 0 : i32
    return %c0_i32, %c0_i32_0 : i32, i32
  }
  func.func @transform_5(%arg0: i32) -> (i32, i32) {
    %c0_i32 = arith.constant 0 : i32
    %c0_i32_0 = arith.constant 0 : i32
    %c0_i32_1 = arith.constant 0 : i32
    return %c0_i32, %c0_i32_0 : i32, i32
  }
  func.func @transform_6(%arg0: i32) -> (i32, i32) {
    %c0_i32 = arith.constant 0 : i32
    %c0_i32_0 = arith.constant 0 : i32
    %c0_i32_1 = arith.constant 0 : i32
    return %c0_i32, %c0_i32_0 : i32, i32
  }
  func.func @transform_7(%arg0: i32) -> (i32, i32) {
    %c0_i32 = arith.constant 0 : i32
    %c0_i32_0 = arith.constant 0 : i32
    %c0_i32_1 = arith.constant 0 : i32
    return %c0_i32, %c0_i32_0 : i32, i32
  }
  func.func @transform_8(%arg0: i32) -> (i32, i32, i32) {
    %c0_i32 = arith.constant 0 : i32
    %c0_i32_0 = arith.constant 0 : i32
    %c0_i32_1 = arith.constant 0 : i32
    return %arg0, %c0_i32, %c0_i32_0 : i32, i32, i32
  }
}

module attributes {stable_mosaic.version = 11 : i64} {
  func.func @_lif_matmul_stats_kernel(%arg0: i32, %arg1: memref<2x128x128xf32, #tpu.memory_space<vmem>>, %arg2: memref<128x128xbf16, #tpu.memory_space<vmem>>, %arg3: memref<2x128x128xf32, #tpu.memory_space<vmem>>, %arg4: memref<1x1x128xf32, #tpu.memory_space<vmem>>, %arg5: memref<1x1x128xf32, #tpu.memory_space<vmem>>) attributes {dimension_semantics = [#tpu.dimension_semantics<parallel>], iteration_bounds = array<i64: 2>, scalar_prefetch = 0 : i64, scratch_operands = 0 : i64, tpu.core_type = #tpu.core_type<tc>, window_params = [{transform_indices = @transform_0, window_bounds = array<i64: 2, 128, 128>}, {pipeline_mode = #tpu.pipeline_mode<synchronous>, transform_indices = @transform_1, window_bounds = array<i64: 128, 128>}, {transform_indices = @transform_2, window_bounds = array<i64: 2, 128, 128>}, {transform_indices = @transform_3, window_bounds = array<i64: 1, 1, 128>}, {transform_indices = @transform_4, window_bounds = array<i64: 1, 1, 128>}]} {
    %c0 = arith.constant 0 : index
    %c0_0 = arith.constant 0 : index
    %0 = vector.load %arg2[%c0, %c0_0] : memref<128x128xbf16, #tpu.memory_space<vmem>>, vector<128x128xbf16>
    %cst = arith.constant 0.000000e+00 : f32
    %1 = vector.broadcast %cst : f32 to vector<128x128xf32>
    %cst_1 = arith.constant 0.000000e+00 : f32
    %2 = vector.broadcast %cst_1 : f32 to vector<1x128xf32>
    %cst_2 = arith.constant 0.000000e+00 : f32
    %3 = vector.broadcast %cst_2 : f32 to vector<1x128xf32>
    %c0_3 = arith.constant 0 : index
    %c0_4 = arith.constant 0 : index
    %c0_5 = arith.constant 0 : index
    %4 = vector.load %arg1[%c0_3, %c0_4, %c0_5] : memref<2x128x128xf32, #tpu.memory_space<vmem>>, vector<1x128x128xf32>
    %5 = vector.shape_cast %4 : vector<1x128x128xf32> to vector<128x128xf32>
    %6 = arith.subf %5, %1 : vector<128x128xf32>
    %cst_6 = arith.constant 5.000000e-01 : f32
    %7 = vector.broadcast %cst_6 : f32 to vector<128x128xf32>
    %8 = arith.mulf %6, %7 : vector<128x128xf32>
    %9 = arith.addf %1, %8 : vector<128x128xf32>
    %cst_7 = arith.constant 5.000000e-01 : f32
    %10 = vector.broadcast %cst_7 : f32 to vector<128x128xf32>
    %11 = arith.cmpf oge, %9, %10 : vector<128x128xf32>
    %cst_8 = arith.constant 1.000000e+00 : f32
    %cst_9 = arith.constant 0.000000e+00 : f32
    %12 = vector.broadcast %cst_8 : f32 to vector<128x128xf32>
    %13 = vector.broadcast %cst_9 : f32 to vector<128x128xf32>
    %14 = arith.select %11, %12, %13 : vector<128x128xi1>, vector<128x128xf32>
    %15 = arith.truncf %14 : vector<128x128xf32> to vector<128x128xbf16>
    %cst_10 = arith.constant 0.000000e+00 : f32
    %16 = vector.broadcast %cst_10 : f32 to vector<128x128xf32>
    %17 = arith.select %11, %16, %9 : vector<128x128xi1>, vector<128x128xf32>
    %cst_11 = arith.constant dense<0.000000e+00> : vector<128x128xf32>
    %18 = tpu.matmul %15, %0, %cst_11 {dimension_numbers = #tpu.dot_dimension_numbers<[1], [0], [0], [1], [0, 0, 1, 1], [], []>} : vector<128x128xbf16>, vector<128x128xbf16>, vector<128x128xf32> -> vector<128x128xf32>
    %c0_12 = arith.constant 0 : index
    %c0_13 = arith.constant 0 : index
    %c0_14 = arith.constant 0 : index
    %19 = vector.load %arg3[%c0_12, %c0_13, %c0_14] : memref<2x128x128xf32, #tpu.memory_space<vmem>>, vector<1x128x128xf32>
    %20 = vector.shape_cast %19 : vector<1x128x128xf32> to vector<128x128xf32>
    %21 = vector.shape_cast %18 : vector<128x128xf32> to vector<1x128x128xf32>
    tpu.vector_store %arg3[%c0_12, %c0_13, %c0_14], %21 {strides = array<i32>} : memref<2x128x128xf32, #tpu.memory_space<vmem>>, vector<1x128x128xf32>,
    %cst_15 = arith.constant dense<0.000000e+00> : vector<128xf32>
    %22 = vector.multi_reduction <add>, %18, %cst_15 [0] : vector<128x128xf32> to vector<128xf32>
    %23 = vector.shape_cast %22 : vector<128xf32> to vector<1x128xf32>
    %24 = arith.addf %2, %23 : vector<1x128xf32>
    %25 = arith.mulf %18, %18 : vector<128x128xf32>
    %cst_16 = arith.constant dense<0.000000e+00> : vector<128xf32>
    %26 = vector.multi_reduction <add>, %25, %cst_16 [0] : vector<128x128xf32> to vector<128xf32>
    %27 = vector.shape_cast %26 : vector<128xf32> to vector<1x128xf32>
    %28 = arith.addf %3, %27 : vector<1x128xf32>
    %c1 = arith.constant 1 : index
    %c0_17 = arith.constant 0 : index
    %c0_18 = arith.constant 0 : index
    %29 = vector.load %arg1[%c1, %c0_17, %c0_18] : memref<2x128x128xf32, #tpu.memory_space<vmem>>, vector<1x128x128xf32>
    %30 = vector.shape_cast %29 : vector<1x128x128xf32> to vector<128x128xf32>
    %31 = arith.subf %30, %17 : vector<128x128xf32>
    %cst_19 = arith.constant 5.000000e-01 : f32
    %32 = vector.broadcast %cst_19 : f32 to vector<128x128xf32>
    %33 = arith.mulf %31, %32 : vector<128x128xf32>
    %34 = arith.addf %17, %33 : vector<128x128xf32>
    %cst_20 = arith.constant 5.000000e-01 : f32
    %35 = vector.broadcast %cst_20 : f32 to vector<128x128xf32>
    %36 = arith.cmpf oge, %34, %35 : vector<128x128xf32>
    %cst_21 = arith.constant 1.000000e+00 : f32
    %cst_22 = arith.constant 0.000000e+00 : f32
    %37 = vector.broadcast %cst_21 : f32 to vector<128x128xf32>
    %38 = vector.broadcast %cst_22 : f32 to vector<128x128xf32>
    %39 = arith.select %36, %37, %38 : vector<128x128xi1>, vector<128x128xf32>
    %40 = arith.truncf %39 : vector<128x128xf32> to vector<128x128xbf16>
    %cst_23 = arith.constant dense<0.000000e+00> : vector<128x128xf32>
    %41 = tpu.matmul %40, %0, %cst_23 {dimension_numbers = #tpu.dot_dimension_numbers<[1], [0], [0], [1], [0, 0, 1, 1], [], []>} : vector<128x128xbf16>, vector<128x128xbf16>, vector<128x128xf32> -> vector<128x128xf32>
    %c1_24 = arith.constant 1 : index
    %c0_25 = arith.constant 0 : index
    %c0_26 = arith.constant 0 : index
    %42 = vector.load %arg3[%c1_24, %c0_25, %c0_26] : memref<2x128x128xf32, #tpu.memory_space<vmem>>, vector<1x128x128xf32>
    %43 = vector.shape_cast %42 : vector<1x128x128xf32> to vector<128x128xf32>
    %44 = vector.shape_cast %41 : vector<128x128xf32> to vector<1x128x128xf32>
    tpu.vector_store %arg3[%c1_24, %c0_25, %c0_26], %44 {strides = array<i32>} : memref<2x128x128xf32, #tpu.memory_space<vmem>>, vector<1x128x128xf32>,
    %cst_27 = arith.constant dense<0.000000e+00> : vector<128xf32>
    %45 = vector.multi_reduction <add>, %41, %cst_27 [0] : vector<128x128xf32> to vector<128xf32>
    %46 = vector.shape_cast %45 : vector<128xf32> to vector<1x128xf32>
    %47 = arith.addf %24, %46 : vector<1x128xf32>
    %48 = arith.mulf %41, %41 : vector<128x128xf32>
    %cst_28 = arith.constant dense<0.000000e+00> : vector<128xf32>
    %49 = vector.multi_reduction <add>, %48, %cst_28 [0] : vector<128x128xf32> to vector<128xf32>
    %50 = vector.shape_cast %49 : vector<128xf32> to vector<1x128xf32>
    %51 = arith.addf %28, %50 : vector<1x128xf32>
    %52 = vector.shape_cast %47 : vector<1x128xf32> to vector<1x1x128xf32>
    %c0_29 = arith.constant 0 : index
    %c0_30 = arith.constant 0 : index
    %c0_31 = arith.constant 0 : index
    %53 = vector.load %arg4[%c0_29, %c0_30, %c0_31] : memref<1x1x128xf32, #tpu.memory_space<vmem>>, vector<1x1x128xf32>
    tpu.vector_store %arg4[%c0_29, %c0_30, %c0_31], %52 {strides = array<i32>} : memref<1x1x128xf32, #tpu.memory_space<vmem>>, vector<1x1x128xf32>,
    %54 = vector.shape_cast %51 : vector<1x128xf32> to vector<1x1x128xf32>
    %c0_32 = arith.constant 0 : index
    %c0_33 = arith.constant 0 : index
    %c0_34 = arith.constant 0 : index
    %55 = vector.load %arg5[%c0_32, %c0_33, %c0_34] : memref<1x1x128xf32, #tpu.memory_space<vmem>>, vector<1x1x128xf32>
    tpu.vector_store %arg5[%c0_32, %c0_33, %c0_34], %54 {strides = array<i32>} : memref<1x1x128xf32, #tpu.memory_space<vmem>>, vector<1x1x128xf32>,
    return
  }
  func.func @transform_0(%arg0: i32) -> (i32, i32, i32) {
    %c0_i32 = arith.constant 0 : i32
    %c0_i32_0 = arith.constant 0 : i32
    %c0_i32_1 = arith.constant 0 : i32
    return %c0_i32, %arg0, %c0_i32_0 : i32, i32, i32
  }
  func.func @transform_1(%arg0: i32) -> (i32, i32) {
    %c0_i32 = arith.constant 0 : i32
    %c0_i32_0 = arith.constant 0 : i32
    %c0_i32_1 = arith.constant 0 : i32
    return %c0_i32, %c0_i32_0 : i32, i32
  }
  func.func @transform_2(%arg0: i32) -> (i32, i32, i32) {
    %c0_i32 = arith.constant 0 : i32
    %c0_i32_0 = arith.constant 0 : i32
    %c0_i32_1 = arith.constant 0 : i32
    return %c0_i32, %arg0, %c0_i32_0 : i32, i32, i32
  }
  func.func @transform_3(%arg0: i32) -> (i32, i32, i32) {
    %c0_i32 = arith.constant 0 : i32
    %c0_i32_0 = arith.constant 0 : i32
    %c0_i32_1 = arith.constant 0 : i32
    return %arg0, %c0_i32, %c0_i32_0 : i32, i32, i32
  }
  func.func @transform_4(%arg0: i32) -> (i32, i32, i32) {
    %c0_i32 = arith.constant 0 : i32
    %c0_i32_0 = arith.constant 0 : i32
    %c0_i32_1 = arith.constant 0 : i32
    return %arg0, %c0_i32, %c0_i32_0 : i32, i32, i32
  }
}

module attributes {stable_mosaic.version = 11 : i64} {
  func.func @_bn_lif_kernel(%arg0: i32, %arg1: memref<2x128x128xf32, #tpu.memory_space<vmem>>, %arg2: memref<1x128xf32, #tpu.memory_space<vmem>>, %arg3: memref<1x128xf32, #tpu.memory_space<vmem>>, %arg4: memref<2x128x128xf32, #tpu.memory_space<vmem>>) attributes {dimension_semantics = [#tpu.dimension_semantics<parallel>], iteration_bounds = array<i64: 2>, scalar_prefetch = 0 : i64, scratch_operands = 0 : i64, tpu.core_type = #tpu.core_type<tc>, window_params = [{transform_indices = @transform_0, window_bounds = array<i64: 2, 128, 128>}, {pipeline_mode = #tpu.pipeline_mode<synchronous>, transform_indices = @transform_1, window_bounds = array<i64: 1, 128>}, {pipeline_mode = #tpu.pipeline_mode<synchronous>, transform_indices = @transform_2, window_bounds = array<i64: 1, 128>}, {transform_indices = @transform_3, window_bounds = array<i64: 2, 128, 128>}]} {
    %c0 = arith.constant 0 : index
    %c0_0 = arith.constant 0 : index
    %0 = vector.load %arg2[%c0, %c0_0] : memref<1x128xf32, #tpu.memory_space<vmem>>, vector<1x128xf32>
    %c0_1 = arith.constant 0 : index
    %c0_2 = arith.constant 0 : index
    %1 = vector.load %arg3[%c0_1, %c0_2] : memref<1x128xf32, #tpu.memory_space<vmem>>, vector<1x128xf32>
    %cst = arith.constant 0.000000e+00 : f32
    %2 = vector.broadcast %cst : f32 to vector<128x128xf32>
    %c0_3 = arith.constant 0 : index
    %c0_4 = arith.constant 0 : index
    %c0_5 = arith.constant 0 : index
    %3 = vector.load %arg1[%c0_3, %c0_4, %c0_5] : memref<2x128x128xf32, #tpu.memory_space<vmem>>, vector<1x128x128xf32>
    %4 = vector.shape_cast %3 : vector<1x128x128xf32> to vector<128x128xf32>
    %5 = vector.broadcast %0 : vector<1x128xf32> to vector<128x128xf32>
    %6 = arith.mulf %4, %5 : vector<128x128xf32>
    %7 = vector.broadcast %1 : vector<1x128xf32> to vector<128x128xf32>
    %8 = arith.addf %6, %7 : vector<128x128xf32>
    %9 = arith.subf %8, %2 : vector<128x128xf32>
    %cst_6 = arith.constant 5.000000e-01 : f32
    %10 = vector.broadcast %cst_6 : f32 to vector<128x128xf32>
    %11 = arith.mulf %9, %10 : vector<128x128xf32>
    %12 = arith.addf %2, %11 : vector<128x128xf32>
    %cst_7 = arith.constant 5.000000e-01 : f32
    %13 = vector.broadcast %cst_7 : f32 to vector<128x128xf32>
    %14 = arith.cmpf oge, %12, %13 : vector<128x128xf32>
    %cst_8 = arith.constant 1.000000e+00 : f32
    %cst_9 = arith.constant 0.000000e+00 : f32
    %15 = vector.broadcast %cst_8 : f32 to vector<128x128xf32>
    %16 = vector.broadcast %cst_9 : f32 to vector<128x128xf32>
    %17 = arith.select %14, %15, %16 : vector<128x128xi1>, vector<128x128xf32>
    %c0_10 = arith.constant 0 : index
    %c0_11 = arith.constant 0 : index
    %c0_12 = arith.constant 0 : index
    %18 = vector.load %arg4[%c0_10, %c0_11, %c0_12] : memref<2x128x128xf32, #tpu.memory_space<vmem>>, vector<1x128x128xf32>
    %19 = vector.shape_cast %18 : vector<1x128x128xf32> to vector<128x128xf32>
    %20 = vector.shape_cast %17 : vector<128x128xf32> to vector<1x128x128xf32>
    tpu.vector_store %arg4[%c0_10, %c0_11, %c0_12], %20 {strides = array<i32>} : memref<2x128x128xf32, #tpu.memory_space<vmem>>, vector<1x128x128xf32>,
    %cst_13 = arith.constant 0.000000e+00 : f32
    %21 = vector.broadcast %cst_13 : f32 to vector<128x128xf32>
    %22 = arith.select %14, %21, %12 : vector<128x128xi1>, vector<128x128xf32>
    %c1 = arith.constant 1 : index
    %c0_14 = arith.constant 0 : index
    %c0_15 = arith.constant 0 : index
    %23 = vector.load %arg1[%c1, %c0_14, %c0_15] : memref<2x128x128xf32, #tpu.memory_space<vmem>>, vector<1x128x128xf32>
    %24 = vector.shape_cast %23 : vector<1x128x128xf32> to vector<128x128xf32>
    %25 = vector.broadcast %0 : vector<1x128xf32> to vector<128x128xf32>
    %26 = arith.mulf %24, %25 : vector<128x128xf32>
    %27 = vector.broadcast %1 : vector<1x128xf32> to vector<128x128xf32>
    %28 = arith.addf %26, %27 : vector<128x128xf32>
    %29 = arith.subf %28, %22 : vector<128x128xf32>
    %cst_16 = arith.constant 5.000000e-01 : f32
    %30 = vector.broadcast %cst_16 : f32 to vector<128x128xf32>
    %31 = arith.mulf %29, %30 : vector<128x128xf32>
    %32 = arith.addf %22, %31 : vector<128x128xf32>
    %cst_17 = arith.constant 5.000000e-01 : f32
    %33 = vector.broadcast %cst_17 : f32 to vector<128x128xf32>
    %34 = arith.cmpf oge, %32, %33 : vector<128x128xf32>
    %cst_18 = arith.constant 1.000000e+00 : f32
    %cst_19 = arith.constant 0.000000e+00 : f32
    %35 = vector.broadcast %cst_18 : f32 to vector<128x128xf32>
    %36 = vector.broadcast %cst_19 : f32 to vector<128x128xf32>
    %37 = arith.select %34, %35, %36 : vector<128x128xi1>, vector<128x128xf32>
    %c1_20 = arith.constant 1 : index
    %c0_21 = arith.constant 0 : index
    %c0_22 = arith.constant 0 : index
    %38 = vector.load %arg4[%c1_20, %c0_21, %c0_22] : memref<2x128x128xf32, #tpu.memory_space<vmem>>, vector<1x128x128xf32>
    %39 = vector.shape_cast %38 : vector<1x128x128xf32> to vector<128x128xf32>
    %40 = vector.shape_cast %37 : vector<128x128xf32> to vector<1x128x128xf32>
    tpu.vector_store %arg4[%c1_20, %c0_21, %c0_22], %40 {strides = array<i32>} : memref<2x128x128xf32, #tpu.memory_space<vmem>>, vector<1x128x128xf32>,
    return
  }
  func.func @transform_0(%arg0: i32) -> (i32, i32, i32) {
    %c0_i32 = arith.constant 0 : i32
    %c0_i32_0 = arith.constant 0 : i32
    %c0_i32_1 = arith.constant 0 : i32
    return %c0_i32, %arg0, %c0_i32_0 : i32, i32, i32
  }
  func.func @transform_1(%arg0: i32) -> (i32, i32) {
    %c0_i32 = arith.constant 0 : i32
    %c0_i32_0 = arith.constant 0 : i32
    %c0_i32_1 = arith.constant 0 : i32
    return %c0_i32, %c0_i32_0 : i32, i32
  }
  func.func @transform_2(%arg0: i32) -> (i32, i32) {
    %c0_i32 = arith.constant 0 : i32
    %c0_i32_0 = arith.constant 0 : i32
    %c0_i32_1 = arith.constant 0 : i32
    return %c0_i32, %c0_i32_0 : i32, i32
  }
  func.func @transform_3(%arg0: i32) -> (i32, i32, i32) {
    %c0_i32 = arith.constant 0 : i32
    %c0_i32_0 = arith.constant 0 : i32
    %c0_i32_1 = arith.constant 0 : i32
    return %c0_i32, %arg0, %c0_i32_0 : i32, i32, i32
  }
}

</mosaic_0001>

<bundles_post_ra>
// kernel: ssa_rel_scl_forward.9
= control target key start
LH: loop header
LB: loop body
LE: loop exit
PB: predicated region body
PF: predicated region fallthrough
CT: control target
= control target key end

     0   :  { %s1006_s15 = smov 0   ;;  %s1198_s0 = inlined_call_operand.vmem [shape: bf16[512,128], index: 0, kind: input, shape index: {}]   ;;  %s1199_s1 = inlined_call_operand.vmem [shape: bf16[128,128], index: 1, kind: input, shape index: {}]   ;;  %s1200_s2 = inlined_call_operand.vmem [shape: f32[512,128], index: 2, kind: output, shape index: {0}]   ;;  %s1201_s3 = inlined_call_operand.vmem [shape: f32[2,1,128], index: 3, kind: output, shape index: {1}]   ;;  %s1202_s4 = inlined_call_operand.vmem [shape: f32[2,1,128], index: 4, kind: output, shape index: {2}]  }
   0x1 LB: > { %s1012_s16 = sadd.s32 4294967295, %s979_s15   ;;  %p822_p0 = scmp.ge.s32.totalorder %s979_s15, 1  ;;  %s979_s15 = sphi %s1006_s15, %s15_s15  }
   0x2   : > { %p168_p1 = scmp.lt.s32.totalorder %s979_s15, 3 }
   0x4   : > { %p169_p2 = pnand %p822_p0, %p168_p1 }
   0x5   : > { %s823_s19 = sshll.u32 (!%p169_p2), %s1012_s16, 5  ;;  %p212_p4 = scmp.lt.s32.totalorder (!%p169_p2), %s1012_s16, 1 }
   0x6   : > { %172 = sbr.rel (%p169_p2) target bundleno = 320 (0x140), region = 28  ;;  %p201_p3 = scmp.lt.s32.totalorder (!%p169_p2), %s823_s19, 63 }
   0xb   : > { %v949_v0 = vld [vmem:[%s1199_s1 + $0x38] sm:$0xff]   ;;  %v950_v1 = vld [vmem:[%s1199_s1 + $0x30] sm:$0xff]   ;;  %s1204_s19 = smov (!%p201_p3, %s823_s19), 63  ;;  %v951_v2 = vld [vmem:[%s1199_s1 + $0x28] sm:$0xff]   ;;  %s1206_s16 = smov (!%p212_p4, %s1012_s16), 1 }
   0xc   : > { %877 = vmatprep.subr.bf16.mxu0 %v949_v0  ;;  %925 = vmatprep.subr.bf16.mxu1 %v949_v0  ;;  %s824_s24 = sshll.u32 %s1204_s19, 2  ;;  %v952_v3 = vld [vmem:[%s1199_s1 + $0x20] sm:$0xff]   ;;  %v953_v5 = vld [vmem:[%s1199_s1 + $0x18] sm:$0xff]   ;;  %v954_v6 = vld [vmem:[%s1199_s1 + $0x10] sm:$0xff]   ;;  %s826_s12 = sshll.u32 %s1204_s19, 3 }
   0xd   : > { %878 = vmatpush3.bf16.msra.mxu0 %v949_v0  ;;  %933 = vmatpush3.bf16.msra.mxu1 %v949_v0  ;;  %s1032_s27 = scalar_lea.vmem %s1198_s0, %s824_s24  ;;  %v955_v8 = vld [vmem:[%s1199_s1 + $0x8] sm:$0xff]   ;;  %v956_v9 = vld [vmem:[%s1199_s1] sm:$0xff]   ;;  %s1069_s17 = scalar_lea.vmem %s1200_s2, %s826_s12 }
   0xe   : > { %879 = vmatprep.subr.bf16.mxu0 %v950_v1  ;;  %926 = vmatprep.subr.bf16.mxu1 %v950_v1  ;;  %v957_v4 = vld [vmem:[%s1032_s27] sm:$0xff]   ;;  %v958_v10 = vld [vmem:[%s1032_s27 + $0x8] sm:$0xff]   ;;  %v959_v12 = vld [vmem:[%s1032_s27 + $0x10] sm:$0xff]   ;;  %s214_s20 = scalar_lea.vmem %s1201_s3, %s1206_s16  ;;  %s217_s23 = scalar_lea.vmem %s1202_s4, %s1206_s16 }
   0xf   : > { %893 = vmatprep.mubr.bf16.mxu0 %v957_v4  ;;  %v965_v7 = vld [vmem:[%s1032_s27 + $0x40] sm:$0xff]   ;;  %v966_v11 = vld [vmem:[%s1032_s27 + $0x48] sm:$0xff]   ;;  %v967_v13 = vld [vmem:[%s1032_s27 + $0x50] sm:$0xff]  }
  0x10   : > { %909 = vmatprep.mubr.bf16.mxu1 %v965_v7  ;;  %v960_v14 = vld [vmem:[%s1032_s27 + $0x18] sm:$0xff]   ;;  %v961_v16 = vld [vmem:[%s1032_s27 + $0x20] sm:$0xff]   ;;  %v962_v18 = vld [vmem:[%s1032_s27 + $0x28] sm:$0xff]  }
  0x11   : > { %880 = vmatpush3.bf16.msra.mxu0 %v950_v1  ;;  %934 = vmatpush3.bf16.msra.mxu1 %v950_v1  ;;  %v968_v15 = vld [vmem:[%s1032_s27 + $0x58] sm:$0xff]   ;;  %v969_v17 = vld [vmem:[%s1032_s27 + $0x60] sm:$0xff]   ;;  %v970_v19 = vld [vmem:[%s1032_s27 + $0x68] sm:$0xff]  }
  0x12   : > { %881 = vmatprep.subr.bf16.mxu0 %v951_v2  ;;  %927 = vmatprep.subr.bf16.mxu1 %v951_v2  ;;  %v963_v20 = vld [vmem:[%s1032_s27 + $0x30] sm:$0xff]   ;;  %v964_v22 = vld [vmem:[%s1032_s27 + $0x38] sm:$0xff]  }
  0x13   : > { %v971_v21 = vld [vmem:[%s1032_s27 + $0x70] sm:$0xff]   ;;  %v972_v23 = vld [vmem:[%s1032_s27 + $0x78] sm:$0xff]  }
  0x15   : > { %882 = vmatpush3.bf16.msra.mxu0 %v951_v2  ;;  %935 = vmatpush3.bf16.msra.mxu1 %v951_v2 }
  0x16   : > { %883 = vmatprep.subr.bf16.mxu0 %v952_v3  ;;  %928 = vmatprep.subr.bf16.mxu1 %v952_v3 }
  0x19   : > { %884 = vmatpush3.bf16.msra.mxu0 %v952_v3  ;;  %936 = vmatpush3.bf16.msra.mxu1 %v952_v3 }
  0x1a   : > { %885 = vmatprep.subr.bf16.mxu0 %v953_v5  ;;  %929 = vmatprep.subr.bf16.mxu1 %v953_v5 }
  0x1d   : > { %886 = vmatpush3.bf16.msra.mxu0 %v953_v5  ;;  %937 = vmatpush3.bf16.msra.mxu1 %v953_v5 }
  0x1e   : > { %887 = vmatprep.subr.bf16.mxu0 %v954_v6  ;;  %930 = vmatprep.subr.bf16.mxu1 %v954_v6 }
  0x21   : > { %888 = vmatpush3.bf16.msra.mxu0 %v954_v6  ;;  %938 = vmatpush3.bf16.msra.mxu1 %v954_v6 }
  0x22   : > { %889 = vmatprep.subr.bf16.mxu0 %v955_v8  ;;  %931 = vmatprep.subr.bf16.mxu1 %v955_v8 }
  0x25   : > { %890 = vmatpush3.bf16.msra.mxu0 %v955_v8  ;;  %939 = vmatpush3.bf16.msra.mxu1 %v955_v8 }
  0x26   : > { %891 = vmatprep.subr.bf16.mxu0 %v956_v9  ;;  %932 = vmatprep.subr.bf16.mxu1 %v956_v9 }
  0x29   : > { %892 = vmatpush3.bf16.msra.mxu0 %v956_v9  ;;  %940 = vmatpush3.bf16.msra.mxu1 %v956_v9 }
  0x2c   : > { %894 = vmatmul.mubr.bf16.vlgmr.msra.gmra.mxu0 %v958_v10  ;;  %910 = vmatmul.mubr.bf16.vlgmr.msra.gmra.mxu1 %v966_v11 }
  0x2d   : > { %897 = vmatprep.mubr.bf16.mxu0 %v959_v12  ;;  %913 = vmatprep.mubr.bf16.mxu1 %v967_v13 }
  0x34   : > { %898 = vmatmul.mubr.bf16.gmra.mxu0 %v960_v14  ;;  %914 = vmatmul.mubr.bf16.gmra.mxu1 %v968_v15 }
  0x35   : > { %901 = vmatprep.mubr.bf16.mxu0 %v961_v16  ;;  %917 = vmatprep.mubr.bf16.mxu1 %v969_v17 }
  0x3c   : > { %902 = vmatmul.mubr.bf16.gmra.mxu0 %v962_v18  ;;  %918 = vmatmul.mubr.bf16.gmra.mxu1 %v970_v19 }
  0x3d   : > { %905 = vmatprep.mubr.bf16.mxu0 %v963_v20  ;;  %921 = vmatprep.mubr.bf16.mxu1 %v971_v21 }
  0x44   : > { %906 = vmatmul.mubr.bf16.gmra.mxu0 %v964_v22  ;;  %922 = vmatmul.mubr.bf16.gmra.mxu1 %v972_v23 }
  0xec   : > { %v895_v24 = vpop.f32.mrf.mxu0  ;;  %v1071_v25 = vpop.f32.mrf.mxu1 }
  0xed   : > { %574 = vst [vmem:[%s1069_s17 + $0x10] sm:$0xff] %v895_v24  ;;  %590 = vst [vmem:[%s1069_s17 + $0x90] sm:$0xff] %v1071_v25  ;;  %v644_v37 = vmul.f32 %v895_v24, %v895_v24 }
  0xee   : > { %v445_v26 = vpop.f32.mrf.mxu0  ;;  %v1076_v27 = vpop.f32.mrf.mxu1 }
  0xef   : > { %572 = vst [vmem:[%s1069_s17] sm:$0xff] %v445_v26  ;;  %588 = vst [vmem:[%s1069_s17 + $0x80] sm:$0xff] %v1076_v27  ;;  %v642_v32 = vmul.f32 %v445_v26, %v445_v26 }
  0xf0   : > { %v896_v28 = vpop.f32.mrf.mxu0  ;;  %v1081_v29 = vpop.f32.mrf.mxu1 }
  0xf1   : > { %575 = vst [vmem:[%s1069_s17 + $0x18] sm:$0xff] %v896_v28  ;;  %591 = vst [vmem:[%s1069_s17 + $0x98] sm:$0xff] %v1081_v29  ;;  %v645_v42 = vmul.f32 %v896_v28, %v896_v28 }
  0xf2   : > { %v448_v30 = vpop.f32.mrf.mxu0  ;;  %v1086_v31 = vpop.f32.mrf.mxu1 }
  0xf3   : > { %573 = vst [vmem:[%s1069_s17 + $0x8] sm:$0xff] %v448_v30  ;;  %v604_v33 = vadd.f32 %v448_v30, %v445_v26  ;;  %v643_v34 = vmul.f32 %v448_v30, %v448_v30  ;;  %589 = vst [vmem:[%s1069_s17 + $0x88] sm:$0xff] %v1086_v31 }
  0xf4   : > { %v899_v35 = vpop.f32.mrf.mxu0  ;;  %v1091_v36 = vpop.f32.mrf.mxu1 }
  0xf5   : > { %v605_v38 = vadd.f32 %v895_v24, %v604_v33  ;;  %v674_v39 = vadd.f32 %v643_v34, %v642_v32  ;;  %578 = vst [vmem:[%s1069_s17 + $0x30] sm:$0xff] %v899_v35  ;;  %594 = vst [vmem:[%s1069_s17 + $0xb0] sm:$0xff] %v1091_v36  ;;  %v648_v57 = vmul.f32 %v899_v35, %v899_v35 }
  0xf6   : > { %v461_v40 = vpop.f32.mrf.mxu0  ;;  %v1096_v41 = vpop.f32.mrf.mxu1 }
  0xf7   : > { %v675_v43 = vadd.f32 %v674_v39, %v644_v37  ;;  %576 = vst [vmem:[%s1069_s17 + $0x20] sm:$0xff] %v461_v40  ;;  %v606_v44 = vadd.f32 %v896_v28, %v605_v38  ;;  %592 = vst [vmem:[%s1069_s17 + $0xa0] sm:$0xff] %v1096_v41  ;;  %v646_v48 = vmul.f32 %v461_v40, %v461_v40 }
  0xf8   : > { %v900_v45 = vpop.f32.mrf.mxu0  ;;  %v1101_v46 = vpop.f32.mrf.mxu1 }
  0xf9   : > { %v607_v47 = vadd.f32 %v606_v44, %v461_v40  ;;  %v676_v49 = vadd.f32 %v675_v43, %v645_v42  ;;  %579 = vst [vmem:[%s1069_s17 + $0x38] sm:$0xff] %v900_v45  ;;  %595 = vst [vmem:[%s1069_s17 + $0xb8] sm:$0xff] %v1101_v46  ;;  %v649_v62 = vmul.f32 %v900_v45, %v900_v45 }
  0xfa   : > { %v464_v50 = vpop.f32.mrf.mxu0  ;;  %v1106_v51 = vpop.f32.mrf.mxu1  ;;  %v658_v43 = vmul.f32 %v1076_v27, %v1076_v27 }
  0xfb   : > { %v677_v52 = vadd.f32 %v676_v49, %v646_v48  ;;  %577 = vst [vmem:[%s1069_s17 + $0x28] sm:$0xff] %v464_v50  ;;  %v608_v53 = vadd.f32 %v607_v47, %v464_v50  ;;  %v647_v54 = vmul.f32 %v464_v50, %v464_v50  ;;  %593 = vst [vmem:[%s1069_s17 + $0xa8] sm:$0xff] %v1106_v51 }
  0xfc   : > { %v903_v55 = vpop.f32.mrf.mxu0  ;;  %v1111_v56 = vpop.f32.mrf.mxu1  ;;  %v659_v48 = vmul.f32 %v1086_v31, %v1086_v31  ;;  %v660_v50 = vmul.f32 %v1071_v25, %v1071_v25 }
  0xfd   : > { %v609_v58 = vadd.f32 %v899_v35, %v608_v53  ;;  %v678_v59 = vadd.f32 %v677_v52, %v647_v54  ;;  %582 = vst [vmem:[%s1069_s17 + $0x50] sm:$0xff] %v903_v55  ;;  %598 = vst [vmem:[%s1069_s17 + $0xd0] sm:$0xff] %v1111_v56  ;;  %v652_v13 = vmul.f32 %v903_v55, %v903_v55 }
  0xfe   : > { %v477_v60 = vpop.f32.mrf.mxu0  ;;  %v1116_v61 = vpop.f32.mrf.mxu1  ;;  %v661_v54 = vmul.f32 %v1081_v29, %v1081_v29 }
  0xff   : > { %v679_v63 = vadd.f32 %v678_v59, %v648_v57  ;;  %580 = vst [vmem:[%s1069_s17 + $0x40] sm:$0xff] %v477_v60  ;;  %v610_v0 = vadd.f32 %v900_v45, %v609_v58  ;;  %596 = vst [vmem:[%s1069_s17 + $0xc0] sm:$0xff] %v1116_v61  ;;  %v650_v4 = vmul.f32 %v477_v60, %v477_v60 }
 0x100   : > { %v904_v1 = vpop.f32.mrf.mxu0  ;;  %v1121_v2 = vpop.f32.mrf.mxu1  ;;  %v662_v58 = vmul.f32 %v1096_v41, %v1096_v41 }
 0x101   : > { %v611_v3 = vadd.f32 %v610_v0, %v477_v60  ;;  %v680_v5 = vadd.f32 %v679_v63, %v649_v62  ;;  %583 = vst [vmem:[%s1069_s17 + $0x58] sm:$0xff] %v904_v1  ;;  %599 = vst [vmem:[%s1069_s17 + $0xd8] sm:$0xff] %v1121_v2  ;;  %v653_v18 = vmul.f32 %v904_v1, %v904_v1 }
 0x102   : > { %v480_v6 = vpop.f32.mrf.mxu0  ;;  %v1126_v7 = vpop.f32.mrf.mxu1  ;;  %v663_v62 = vmul.f32 %v1106_v51, %v1106_v51 }
 0x103   : > { %v681_v8 = vadd.f32 %v680_v5, %v650_v4  ;;  %581 = vst [vmem:[%s1069_s17 + $0x48] sm:$0xff] %v480_v6  ;;  %v612_v9 = vadd.f32 %v611_v3, %v480_v6  ;;  %v651_v10 = vmul.f32 %v480_v6, %v480_v6  ;;  %597 = vst [vmem:[%s1069_s17 + $0xc8] sm:$0xff] %v1126_v7 }
 0x104   : > { %v907_v11 = vpop.f32.mrf.mxu0  ;;  %v1131_v12 = vpop.f32.mrf.mxu1  ;;  %v666_v4 = vmul.f32 %v1116_v61, %v1116_v61 }
 0x105   : > { %v613_v14 = vadd.f32 %v903_v55, %v612_v9  ;;  %v682_v15 = vadd.f32 %v681_v8, %v651_v10  ;;  %586 = vst [vmem:[%s1069_s17 + $0x70] sm:$0xff] %v907_v11  ;;  %602 = vst [vmem:[%s1069_s17 + $0xf0] sm:$0xff] %v1131_v12  ;;  %v656_v35 = vmul.f32 %v907_v11, %v907_v11 }
 0x106   : > { %v493_v16 = vpop.f32.mrf.mxu0  ;;  %v557_v17 = vpop.f32.mrf.mxu1  ;;  %v667_v8 = vmul.f32 %v1126_v7, %v1126_v7 }
 0x107   : > { %v683_v19 = vadd.f32 %v682_v15, %v652_v13  ;;  %584 = vst [vmem:[%s1069_s17 + $0x60] sm:$0xff] %v493_v16  ;;  %v614_v20 = vadd.f32 %v904_v1, %v613_v14  ;;  %600 = vst [vmem:[%s1069_s17 + $0xe0] sm:$0xff] %v557_v17  ;;  %v654_v24 = vmul.f32 %v493_v16, %v493_v16 }
 0x108   : > { %v908_v21 = vpop.f32.mrf.mxu0  ;;  %v1138_v22 = vpop.f32.mrf.mxu1  ;;  %v670_v14 = vmul.f32 %v557_v17, %v557_v17 }
 0x109   : > { %v615_v23 = vadd.f32 %v614_v20, %v493_v16  ;;  %v684_v26 = vadd.f32 %v683_v19, %v653_v18  ;;  %587 = vst [vmem:[%s1069_s17 + $0x78] sm:$0xff] %v908_v21  ;;  %603 = vst [vmem:[%s1069_s17 + $0xf8] sm:$0xff] %v1138_v22  ;;  %v657_v39 = vmul.f32 %v908_v21, %v908_v21 }
 0x10a   : > { %v496_v28 = vpop.f32.mrf.mxu0  ;;  %v560_v30 = vpop.f32.mrf.mxu1  ;;  %v672_v19 = vmul.f32 %v1131_v12, %v1131_v12 }
 0x10b   : > { %v685_v32 = vadd.f32 %v684_v26, %v654_v24  ;;  %585 = vst [vmem:[%s1069_s17 + $0x68] sm:$0xff] %v496_v28  ;;  %v616_v33 = vadd.f32 %v615_v23, %v496_v28  ;;  %v655_v34 = vmul.f32 %v496_v28, %v496_v28  ;;  %601 = vst [vmem:[%s1069_s17 + $0xe8] sm:$0xff] %v560_v30 }
 0x10d   : > { %v617_v37 = vadd.f32 %v907_v11, %v616_v33  ;;  %v686_v38 = vadd.f32 %v685_v32, %v655_v34 }
 0x10f   : > { %v618_v40 = vadd.f32 %v908_v21, %v617_v37  ;;  %v687_v42 = vadd.f32 %v686_v38, %v656_v35  ;;  %v673_v21 = vmul.f32 %v1138_v22, %v1138_v22 }
 0x111   : > { %v688_v44 = vadd.f32 %v687_v42, %v657_v39  ;;  %v619_v45 = vadd.f32 %v618_v40, %v1076_v27 }
 0x113   : > { %v620_v47 = vadd.f32 %v619_v45, %v1086_v31  ;;  %v689_v49 = vadd.f32 %v688_v44, %v658_v43 }
 0x115   : > { %v621_v52 = vadd.f32 %v1071_v25, %v620_v47  ;;  %v690_v53 = vadd.f32 %v689_v49, %v659_v48  ;;  %v664_v25 = vmul.f32 %v1091_v36, %v1091_v36 }
 0x117   : > { %v691_v55 = vadd.f32 %v690_v53, %v660_v50  ;;  %v622_v57 = vadd.f32 %v1081_v29, %v621_v52  ;;  %v665_v29 = vmul.f32 %v1101_v46, %v1101_v46 }
 0x119   : > { %v623_v27 = vadd.f32 %v622_v57, %v1096_v41  ;;  %v692_v59 = vadd.f32 %v691_v55, %v661_v54 }
 0x11b   : > { %v693_v31 = vadd.f32 %v692_v59, %v662_v58  ;;  %v624_v60 = vadd.f32 %v623_v27, %v1106_v51 }
 0x11d   : > { %v625_v63 = vadd.f32 %v1091_v36, %v624_v60  ;;  %v694_v0 = vadd.f32 %v693_v31, %v663_v62  ;;  %v668_v36 = vmul.f32 %v1111_v56, %v1111_v56 }
 0x11f   : > { %v695_v1 = vadd.f32 %v694_v0, %v664_v25  ;;  %v626_v3 = vadd.f32 %v1101_v46, %v625_v63  ;;  %v669_v46 = vmul.f32 %v1121_v2, %v1121_v2 }
 0x121   : > { %v627_v41 = vadd.f32 %v626_v3, %v1116_v61  ;;  %v696_v5 = vadd.f32 %v695_v1, %v665_v29 }
 0x123   : > { %v697_v6 = vadd.f32 %v696_v5, %v666_v4  ;;  %v628_v51 = vadd.f32 %v627_v41, %v1126_v7  ;;  %v671_v7 = vmul.f32 %v560_v30, %v560_v30 }
 0x125   : > { %v629_v9 = vadd.f32 %v1111_v56, %v628_v51  ;;  %v698_v10 = vadd.f32 %v697_v6, %v667_v8 }
 0x127   : > { %v699_v11 = vadd.f32 %v698_v10, %v668_v36  ;;  %v630_v61 = vadd.f32 %v1121_v2, %v629_v9 }
 0x129   : > { %v631_v13 = vadd.f32 %v630_v61, %v557_v17  ;;  %v700_v15 = vadd.f32 %v699_v11, %v669_v46 }
 0x12b   : > { %v701_v16 = vadd.f32 %v700_v15, %v670_v14  ;;  %v632_v18 = vadd.f32 %v631_v13, %v560_v30 }
 0x12d   : > { %v633_v56 = vadd.f32 %v1131_v12, %v632_v18  ;;  %v702_v20 = vadd.f32 %v701_v16, %v671_v7 }
 0x12f   : > { %v634_v23 = vadd.f32 %v1138_v22, %v633_v56  ;;  %v703_v24 = vadd.f32 %v702_v20, %v672_v19 }
 0x131   : > { %v635_v2 = vrot.slane %v634_v23, 4  ;;  %v704_v26 = vadd.f32 %v703_v24, %v673_v21 }
 0x133   : > { %v636_v17 = vadd.f32 %v635_v2, %v634_v23  ;;  %v705_v28 = vrot.slane %v704_v26, 4 }
 0x135   : > { %v637_v32 = vrot.slane %v636_v17, 2  ;;  %v706_v33 = vadd.f32 %v705_v28, %v704_v26 }
 0x137   : > { %v638_v30 = vadd.f32 %v637_v32, %v636_v17  ;;  %v707_v34 = vrot.slane %v706_v33, 2 }
 0x139   : > { %v639_v35 = vrot.slane %v638_v30, 1  ;;  %v708_v37 = vadd.f32 %v707_v34, %v706_v33 }
 0x13b   : > { %v640_v12 = vadd.f32 %v639_v35, %v638_v30  ;;  %v709_v38 = vrot.slane %v708_v37, 1 }
 0x13d   : > { %641 = vst [vmem:[%s214_s20] sm:$0x1] %v640_v12  ;;  %v710_v22 = vadd.f32 %v709_v38, %v708_v37 }
 0x13f   : > { %711 = vst [vmem:[%s217_s23] sm:$0x1] %v710_v22 }
 0x140 PF: > { %s15_s15 = sadd.s32 1, %s979_s15  }
 0x141   : > { %p12_p5 = scmp.ge.s32.totalorder %s15_s15, 4  }
 0x143   :  { %14 = sbr.rel (!%p12_p5) target bundleno = 1 (0x1), region = 82 }

// kernel: ssa_rel_scl_forward.8
= control target key start
LH: loop header
LB: loop body
LE: loop exit
PB: predicated region body
PF: predicated region fallthrough
CT: control target
= control target key end

     0   :  { %s1477_s12 = smov 0   ;;  %s1479_s13 = smov 0   ;;  %s1849_s0 = inlined_call_operand.vmem [shape: f32[2,2,128,384], index: 0, kind: input, shape index: {}]   ;;  %s1850_s1 = inlined_call_operand.vmem [shape: f32[1,128], index: 1, kind: input, shape index: {}]   ;;  %s1851_s2 = inlined_call_operand.vmem [shape: f32[1,128], index: 2, kind: input, shape index: {}]   ;;  %s1852_s3 = inlined_call_operand.vmem [shape: bf16[2,2,128,128], index: 3, kind: output, shape index: {}]  }
   0x1   :  { %s1481_s14 = smov 0  }
   0x2 LB: > { %s1055_s15 = sadd.s32 4294967295, %s1454_s14   ;;  %s1494_s16 = sadd.s32 1, %s1454_s14   ;;  %s1454_s14 = sphi %s1481_s14, %s1856_s14   ;;  %s1450_s13 = sphi %s1479_s13, %s1855_s13   ;;  %s1446_s12 = sphi %s1477_s12, %s1854_s12  }
   0x3   : > { %s17_s17 = ssub.s32 %s1454_s14, %s1494_s16  ;;  %s20_s18 = sadd.s32 1, %s1450_s13 }
   0x4   : > { %p18_p0 = scmp.eq.s32.totalorder %s17_s17, 0  ;;  %p27_p1 = scmp.ne.s32.totalorder %s1450_s13, %s1446_s12 }
   0x5   : > { %p28_p2 = scmp.eq.s32.totalorder %s1454_s14, 0  ;;  %p99_p3 = scmp.eq.s32.totalorder %s1055_s15, 1 }
   0x6   : > { %s1505_s19 = scalar_select %p18_p0, %s1450_s13, %s20_s18  }
   0x7   : > { %p29_p4 = por %p28_p2, %p27_p1  ;;  %p1507_p5 = por %p99_p3, %p27_p1 }
   0x8   : > { %p1058_p6 = scmp.ge.s32.totalorder %s1454_s14, 2 }
   0xa   : > { %127 = sbr.rel (%p1058_p6) target bundleno = 36 (0x24), region = 24 }
   0xf   : > { %130 = sbr.rel (!%p29_p4) target bundleno = 36 (0x24), region = 28  ;;  %s132_s21 = sand.u32 (%p29_p4), 1, %s1450_s13  }
  0x10   : > { %s1060_s22 = smul.u32 (%p29_p4), 384, %s1454_s14  ;;  %s1059_s23 = sshll.u32 (%p29_p4), %s132_s21, 8 }
  0x11   : > { %s1522_s27 = scalar_lea.vmem (%p29_p4), [#allocation2], %s1059_s23 }
  0x12   : > { %s1517_s26 = scalar_lea.vmem (%p29_p4), %s1849_s0, %s1060_s22 }
  0x13   : > { %v1061_v0 = vld [vmem:[%s1517_s26 + $0x10] sm:$0xff] (%p29_p4)  ;;  %v1062_v1 = vld [vmem:[%s1517_s26 + $0x28] sm:$0xff] (%p29_p4)  ;;  %v1063_v2 = vld [vmem:[%s1517_s26 + $0x40] sm:$0xff] (%p29_p4) }
  0x14   : > { %230 = vst [vmem:[%s1522_s27] sm:$0xff] %v1061_v0  ;;  %232 = vst [vmem:[%s1522_s27 + $0x8] sm:$0xff] %v1062_v1  ;;  %v1064_v3 = vld [vmem:[%s1517_s26 + $0x58] sm:$0xff]  ;;  %v1065_v4 = vld [vmem:[%s1517_s26 + $0x70] sm:$0xff] }
  0x15   : > { %234 = vst [vmem:[%s1522_s27 + $0x10] sm:$0xff] %v1063_v2  ;;  %v1066_v5 = vld [vmem:[%s1517_s26 + $0x88] sm:$0xff]  ;;  %236 = vst [vmem:[%s1522_s27 + $0x18] sm:$0xff] %v1064_v3  ;;  %v1067_v6 = vld [vmem:[%s1517_s26 + $0xa0] sm:$0xff] }
  0x16   : > { %238 = vst [vmem:[%s1522_s27 + $0x20] sm:$0xff] %v1065_v4  ;;  %240 = vst [vmem:[%s1522_s27 + $0x28] sm:$0xff] %v1066_v5  ;;  %v1068_v7 = vld [vmem:[%s1517_s26 + $0xb8] sm:$0xff]  ;;  %v1069_v8 = vld [vmem:[%s1517_s26 + $0xd0] sm:$0xff] }
  0x17   : > { %242 = vst [vmem:[%s1522_s27 + $0x30] sm:$0xff] %v1067_v6  ;;  %244 = vst [vmem:[%s1522_s27 + $0x38] sm:$0xff] %v1068_v7  ;;  %v1070_v9 = vld [vmem:[%s1517_s26 + $0xe8] sm:$0xff]  ;;  %v1071_v10 = vld [vmem:[%s1517_s26 + $0x100] sm:$0xff] }
  0x18   : > { %246 = vst [vmem:[%s1522_s27 + $0x40] sm:$0xff] %v1069_v8  ;;  %v1072_v11 = vld [vmem:[%s1517_s26 + $0x118] sm:$0xff]  ;;  %248 = vst [vmem:[%s1522_s27 + $0x48] sm:$0xff] %v1070_v9  ;;  %v1073_v12 = vld [vmem:[%s1517_s26 + $0x130] sm:$0xff] }
  0x19   : > { %250 = vst [vmem:[%s1522_s27 + $0x50] sm:$0xff] %v1071_v10  ;;  %252 = vst [vmem:[%s1522_s27 + $0x58] sm:$0xff] %v1072_v11  ;;  %v1074_v13 = vld [vmem:[%s1517_s26 + $0x148] sm:$0xff]  ;;  %v1075_v14 = vld [vmem:[%s1517_s26 + $0x160] sm:$0xff] }
  0x1a   : > { %254 = vst [vmem:[%s1522_s27 + $0x60] sm:$0xff] %v1073_v12  ;;  %256 = vst [vmem:[%s1522_s27 + $0x68] sm:$0xff] %v1074_v13  ;;  %v1076_v15 = vld [vmem:[%s1517_s26 + $0x178] sm:$0xff]  ;;  %v1077_v16 = vld [vmem:[%s1517_s26 + $0x310] sm:$0xff] }
  0x1b   : > { %258 = vst [vmem:[%s1522_s27 + $0x70] sm:$0xff] %v1075_v14  ;;  %v1078_v17 = vld [vmem:[%s1517_s26 + $0x328] sm:$0xff]  ;;  %260 = vst [vmem:[%s1522_s27 + $0x78] sm:$0xff] %v1076_v15  ;;  %v1079_v18 = vld [vmem:[%s1517_s26 + $0x340] sm:$0xff] }
  0x1c   : > { %262 = vst [vmem:[%s1522_s27 + $0x80] sm:$0xff] %v1077_v16  ;;  %264 = vst [vmem:[%s1522_s27 + $0x88] sm:$0xff] %v1078_v17  ;;  %v1080_v19 = vld [vmem:[%s1517_s26 + $0x358] sm:$0xff]  ;;  %v1081_v20 = vld [vmem:[%s1517_s26 + $0x370] sm:$0xff] }
  0x1d   : > { %266 = vst [vmem:[%s1522_s27 + $0x90] sm:$0xff] %v1079_v18  ;;  %268 = vst [vmem:[%s1522_s27 + $0x98] sm:$0xff] %v1080_v19  ;;  %v1082_v21 = vld [vmem:[%s1517_s26 + $0x388] sm:$0xff]  ;;  %v1083_v22 = vld [vmem:[%s1517_s26 + $0x3a0] sm:$0xff] }
  0x1e   : > { %270 = vst [vmem:[%s1522_s27 + $0xa0] sm:$0xff] %v1081_v20  ;;  %v1084_v23 = vld [vmem:[%s1517_s26 + $0x3b8] sm:$0xff]  ;;  %272 = vst [vmem:[%s1522_s27 + $0xa8] sm:$0xff] %v1082_v21  ;;  %v1085_v24 = vld [vmem:[%s1517_s26 + $0x3d0] sm:$0xff] }
  0x1f   : > { %274 = vst [vmem:[%s1522_s27 + $0xb0] sm:$0xff] %v1083_v22  ;;  %276 = vst [vmem:[%s1522_s27 + $0xb8] sm:$0xff] %v1084_v23  ;;  %v1086_v25 = vld [vmem:[%s1517_s26 + $0x3e8] sm:$0xff]  ;;  %v1087_v26 = vld [vmem:[%s1517_s26 + $0x400] sm:$0xff] }
  0x20   : > { %278 = vst [vmem:[%s1522_s27 + $0xc0] sm:$0xff] %v1085_v24  ;;  %280 = vst [vmem:[%s1522_s27 + $0xc8] sm:$0xff] %v1086_v25  ;;  %v1088_v27 = vld [vmem:[%s1517_s26 + $0x418] sm:$0xff]  ;;  %v1089_v28 = vld [vmem:[%s1517_s26 + $0x430] sm:$0xff] }
  0x21   : > { %282 = vst [vmem:[%s1522_s27 + $0xd0] sm:$0xff] %v1087_v26  ;;  %v1090_v29 = vld [vmem:[%s1517_s26 + $0x448] sm:$0xff]  ;;  %284 = vst [vmem:[%s1522_s27 + $0xd8] sm:$0xff] %v1088_v27  ;;  %v1091_v30 = vld [vmem:[%s1517_s26 + $0x460] sm:$0xff] }
  0x22   : > { %286 = vst [vmem:[%s1522_s27 + $0xe0] sm:$0xff] %v1089_v28  ;;  %288 = vst [vmem:[%s1522_s27 + $0xe8] sm:$0xff] %v1090_v29  ;;  %v1092_v31 = vld [vmem:[%s1517_s26 + $0x478] sm:$0xff] }
  0x23   : > { %290 = vst [vmem:[%s1522_s27 + $0xf0] sm:$0xff] %v1091_v30  ;;  %292 = vst [vmem:[%s1522_s27 + $0xf8] sm:$0xff] %v1092_v31 }
  0x24 PF: > { %p1093_p7 = scmp.ge.s32.totalorder %s1454_s14, 1  ;;  %p297_p8 = scmp.lt.s32.totalorder %s1454_s14, 3 }
  0x26   : > { %p298_p9 = pnand %p1093_p7, %p297_p8 }
  0x27   : > { %s304_s28 = sand.u32 (!%p298_p9), 1, %s1446_s12  }
  0x28   : > { %301 = sbr.rel (%p298_p9) target bundleno = 265 (0x109), region = 66  ;;  %s1094_s29 = sshll.u32 (!%p298_p9), %s304_s28, 8 }
  0x29   : > { %s1600_s7 = scalar_lea.vmem (!%p298_p9), [#allocation2], %s1094_s29  ;;  %s1095_s8 = sshll.u32 (!%p298_p9), %s304_s28, 7 }
  0x2a   : > { %s1798_s9 = scalar_lea.vmem (!%p298_p9), [#allocation3], %s1095_s8 }
  0x2d   : > { %v1593_v32 = vld [vmem:[%s1850_s1] ss:$0 sm:$0xff]  ;;  %v329_v36 = vld [vmem:[%s1600_s7 + $0x8] sm:$0xff]  ;;  %v330_v41 = vld [vmem:[%s1600_s7 + $0x10] sm:$0xff]  ;;  %v1456_v9 = vmov 0.0   ;;  %s1199_s10 = sshll.u32 (%p1507_p5), %s1055_s15, 6 }
  0x2e   : > { %v1598_v33 = vld [vmem:[%s1851_s2] ss:$0 sm:$0xff]  ;;  %v351_v39 = vmul.f32 %v1593_v32, %v329_v36  ;;  %v1115_v40 = vld [vmem:[%s1600_s7 + $0x88] sm:$0xff]  ;;  %v1116_v42 = vld [vmem:[%s1600_s7 + $0x90] sm:$0xff]  ;;  %v352_v44 = vmul.f32 %v1593_v32, %v330_v41  ;;  %s831_s17 = scalar_lea.vmem (%p1507_p5), %s1852_s3, %s1199_s10 }
  0x2f   : > { %v328_v34 = vld [vmem:[%s1600_s7] sm:$0xff]  ;;  %v598_v43 = vmul.f32 %v1115_v40, %v1593_v32  ;;  %v599_v45 = vmul.f32 %v1116_v42, %v1593_v32  ;;  %v331_v46 = vld [vmem:[%s1600_s7 + $0x18] sm:$0xff]  ;;  %v333_v60 = vld [vmem:[%s1600_s7 + $0x28] sm:$0xff] }
  0x30   : > { %v1114_v35 = vld [vmem:[%s1600_s7 + $0x80] sm:$0xff]  ;;  %v350_v37 = vmul.f32 %v1593_v32, %v328_v34  ;;  %v1117_v47 = vld [vmem:[%s1600_s7 + $0x98] sm:$0xff]  ;;  %v373_v50 = vadd.f32 %v1598_v33, %v351_v39  ;;  %v353_v51 = vmul.f32 %v1593_v32, %v331_v46  ;;  %v374_v54 = vadd.f32 %v1598_v33, %v352_v44  ;;  %v1119_v8 = vld [vmem:[%s1600_s7 + $0xa8] sm:$0xff] }
  0x31   : > { %v597_v38 = vmul.f32 %v1114_v35, %v1593_v32  ;;  %v332_v48 = vld [vmem:[%s1600_s7 + $0x20] sm:$0xff]  ;;  %v614_v53 = vadd.f32 %v1598_v33, %v598_v43  ;;  %v600_v55 = vmul.f32 %v1117_v47, %v1593_v32  ;;  %v615_v62 = vadd.f32 %v1598_v33, %v599_v45  ;;  %v334_v26 = vld [vmem:[%s1600_s7 + $0x30] sm:$0xff]  ;;  %v335_v41 = vld [vmem:[%s1600_s7 + $0x38] sm:$0xff] }
  0x32   : > { %v372_v49 = vadd.f32 %v1598_v33, %v350_v37  ;;  %v389_v57 = vmul.f32 0.5, %v373_v50  ;;  %v375_v58 = vadd.f32 %v1598_v33, %v353_v51  ;;  %v354_v59 = vmul.f32 %v1593_v32, %v332_v48  ;;  %v1118_v1 = vld [vmem:[%s1600_s7 + $0xa0] sm:$0xff]  ;;  %v1120_v40 = vld [vmem:[%s1600_s7 + $0xb0] sm:$0xff]  ;;  %v1121_v45 = vld [vmem:[%s1600_s7 + $0xb8] sm:$0xff] }
  0x33   : > { %v613_v52 = vadd.f32 %v1598_v33, %v597_v38  ;;  %v390_v61 = vmul.f32 0.5, %v374_v54  ;;  %v616_v0 = vadd.f32 %v1598_v33, %v600_v55  ;;  %v355_v5 = vmul.f32 %v1593_v32, %v333_v60  ;;  %v336_v46 = vld [vmem:[%s1600_s7 + $0x40] sm:$0xff] }
  0x34   : > { %v388_v56 = vmul.f32 0.5, %v372_v49  ;;  %vm421_vm1 = vcmp.ge.f32.partialorder %v389_v57, 0.5  ;;  %v391_v63 = vmul.f32 0.5, %v375_v58  ;;  %v376_v4 = vadd.f32 %v1598_v33, %v354_v59  ;;  %v1122_v47 = vld [vmem:[%s1600_s7 + $0xc0] sm:$0xff]  ;;  %v337_v59 = vld [vmem:[%s1600_s7 + $0x48] sm:$0xff] }
  0x35   : > { %v565_v3 = vsel %vm421_vm1, 0.0, %v389_v57  ;;  %vm422_vm2 = vcmp.ge.f32.partialorder %v390_v61, 0.5  ;;  %v601_v13 = vmul.f32 %v1118_v1, %v1593_v32  ;;  %v437_v18 = vsel %vm421_vm1, 1.0, %v1456_v9 }
  0x36   : > { %vm420_vm0 = vcmp.ge.f32.partialorder %v388_v56, 0.5  ;;  %v630_v7 = vsub.f32 %v614_v53, %v565_v3  ;;  %vm423_vm3 = vcmp.ge.f32.partialorder %v391_v63, 0.5  ;;  %v566_v11 = vsel %vm422_vm2, 0.0, %v390_v61 }
  0x37   : > { %v564_v2 = vsel %vm420_vm0, 0.0, %v388_v56  ;;  %v436_v10 = vsel %vm420_vm0, 1.0, %v1456_v9  ;;  %v567_v12 = vsel %vm423_vm3, 0.0, %v391_v63  ;;  %v631_v16 = vsub.f32 %v615_v62, %v566_v11 }
  0x38   : > { %v629_v6 = vsub.f32 %v613_v52, %v564_v2  ;;  %v646_v15 = vmul.f32 0.5, %v630_v7  ;;  %v632_v17 = vsub.f32 %v616_v0, %v567_v12  ;;  %v392_v19 = vmul.f32 0.5, %v376_v4 }
  0x39   : > { %v377_v20 = vadd.f32 %v1598_v33, %v355_v5  ;;  %v602_v21 = vmul.f32 %v1119_v8, %v1593_v32  ;;  %v647_v24 = vmul.f32 0.5, %v631_v16  ;;  %v617_v27 = vadd.f32 %v1598_v33, %v601_v13 }
  0x3a   : > { %v645_v14 = vmul.f32 0.5, %v629_v6  ;;  %v662_v23 = vadd.f32 %v646_v15, %v565_v3  ;;  %v648_v25 = vmul.f32 0.5, %v632_v17  ;;  %vm424_vm4 = vcmp.ge.f32.partialorder %v392_v19, 0.5  ;;  %v1123_v6 = vld [vmem:[%s1600_s7 + $0xc8] sm:$0xff] }
  0x3b   : > { %v1644_v28 = vmul.f32 0.5, %v377_v20  ;;  %v618_v29 = vadd.f32 %v1598_v33, %v602_v21  ;;  %v663_v30 = vadd.f32 %v647_v24, %v566_v11  ;;  %v568_v36 = vsel %vm424_vm4, 0.0, %v392_v19 }
  0x3c   : > { %v661_v22 = vadd.f32 %v645_v14, %v564_v2  ;;  %vm678_vm6 = vcmp.ge.f32.partialorder %v662_v23, 0.5  ;;  %v664_v31 = vadd.f32 %v648_v25, %v567_v12  ;;  %v356_v37 = vmul.f32 %v1593_v32, %v334_v26  ;;  %v1124_v23 = vld [vmem:[%s1600_s7 + $0xd0] sm:$0xff] }
  0x3d   : > { %v694_v35 = vsel %vm678_vm6, 1.0, %v1456_v9  ;;  %v438_v39 = vsel %vm422_vm2, 1.0, %v1456_v9  ;;  %vm679_vm7 = vcmp.ge.f32.partialorder %v663_v30, 0.5  ;;  %v439_v42 = vsel %vm423_vm3, 1.0, %v1456_v9 }
  0x3e   : > { %vm677_vm5 = vcmp.ge.f32.partialorder %v661_v22, 0.5  ;;  %v1659_v43 = vsel %vm424_vm4, 1.0, %v1456_v9  ;;  %v633_v44 = vsub.f32 %v617_v27, %v568_v36  ;;  %vm425_vm8 = vcmp.ge.f32.partialorder %v1644_v28, 0.5 }
  0x3f   : > { %v693_v34 = vsel %vm677_vm5, 1.0, %v1456_v9  ;;  %v1322_v48 = vpack.i.bf16 %v694_v35, %v437_v18  ;;  %v695_v49 = vsel %vm679_vm7, 1.0, %v1456_v9  ;;  %vm680_vm9 = vcmp.ge.f32.partialorder %v664_v31, 0.5  ;;  %v338_v18 = vld [vmem:[%s1600_s7 + $0x50] sm:$0xff] }
  0x40   : > { %v1320_v38 = vpack.i.bf16 %v693_v34, %v436_v10  ;;  %v569_v50 = vsel %vm425_vm8, 0.0, %v1644_v28  ;;  %v649_v51 = vmul.f32 0.5, %v633_v44  ;;  %v378_v53 = vadd.f32 %v1598_v33, %v356_v37  ;;  %v340_v44 = vld [vmem:[%s1600_s7 + $0x60] sm:$0xff] }
  0x41   : > { %v634_v52 = vsub.f32 %v618_v29, %v569_v50  ;;  %v603_v54 = vmul.f32 %v1120_v40, %v1593_v32  ;;  %v357_v55 = vmul.f32 %v1593_v32, %v335_v41  ;;  %v604_v56 = vmul.f32 %v1121_v45, %v1593_v32 }
  0x42   : > { %1321 = vxpose.xlu0.b32.start [1/16] %v1320_v38, 128  ;;  %v358_v57 = vmul.f32 %v1593_v32, %v336_v46  ;;  %v605_v58 = vmul.f32 %v1122_v47, %v1593_v32  ;;  %v665_v60 = vadd.f32 %v649_v51, %v568_v36  ;;  %v394_v62 = vmul.f32 0.5, %v378_v53  ;;  %v339_v36 = vld [vmem:[%s1600_s7 + $0x58] sm:$0xff] }
  0x43   : > { %v650_v61 = vmul.f32 0.5, %v634_v52  ;;  %v619_v63 = vadd.f32 %v1598_v33, %v603_v54  ;;  %v1324_v0 = vpack.i.bf16 %v695_v49, %v438_v39  ;;  %v696_v1 = vsel %vm680_vm9, 1.0, %v1456_v9  ;;  %v1125_v39 = vld [vmem:[%s1600_s7 + $0xd8] sm:$0xff] }
  0x44   : > { %v379_v2 = vadd.f32 %v1598_v33, %v357_v55  ;;  %v380_v3 = vadd.f32 %v1598_v33, %v358_v57  ;;  %vm681_vm10 = vcmp.ge.f32.partialorder %v665_v60, 0.5  ;;  %vm426_vm11 = vcmp.ge.f32.partialorder %v394_v62, 0.5  ;;  %v341_v57 = vld [vmem:[%s1600_s7 + $0x68] sm:$0xff] }
  0x45   : > { %v666_v4 = vadd.f32 %v650_v61, %v569_v50  ;;  %v359_v5 = vmul.f32 %v1593_v32, %v337_v59  ;;  %v697_v7 = vsel %vm681_vm10, 1.0, %v1456_v9  ;;  %v570_v8 = vsel %vm426_vm11, 0.0, %v394_v62 }
  0x46   : > { %1323 = vxpose.xlu0.b32.cont [2/16] %v1322_v48, 128  ;;  %v395_v10 = vmul.f32 0.5, %v379_v2  ;;  %v620_v11 = vadd.f32 %v1598_v33, %v604_v56  ;;  %v1326_v12 = vpack.i.bf16 %v696_v1, %v439_v42  ;;  %v635_v13 = vsub.f32 %v619_v63, %v570_v8  ;;  %v1126_v56 = vld [vmem:[%s1600_s7 + $0xe0] sm:$0xff] }
  0x47   : > { %v1686_v14 = vmul.f32 0.5, %v380_v3  ;;  %v621_v15 = vadd.f32 %v1598_v33, %v605_v58  ;;  %vm682_vm12 = vcmp.ge.f32.partialorder %v666_v4, 0.5  ;;  %v381_v16 = vadd.f32 %v1598_v33, %v359_v5  ;;  %v1127_v4 = vld [vmem:[%s1600_s7 + $0xe8] sm:$0xff]  ;;  %v342_v5 = vld [vmem:[%s1600_s7 + $0x70] sm:$0xff] }
  0x48   : > { %vm427_vm13 = vcmp.ge.f32.partialorder %v395_v10, 0.5  ;;  %v606_v17 = vmul.f32 %v1123_v6, %v1593_v32  ;;  %v1328_v19 = vpack.i.bf16 %v697_v7, %v1659_v43  ;;  %v441_v20 = vsel %vm425_vm8, 1.0, %v1456_v9 }
  0x49   : > { %v651_v21 = vmul.f32 0.5, %v635_v13  ;;  %v571_v22 = vsel %vm427_vm13, 0.0, %v395_v10  ;;  %vm428_vm14 = vcmp.ge.f32.partialorder %v1686_v14, 0.5  ;;  %v1699_v25 = vmul.f32 0.5, %v381_v16  ;;  %v1128_v16 = vld [vmem:[%s1600_s7 + $0xf0] sm:$0xff] }
  0x4a   : > { %1325 = vxpose.xlu0.b32.cont [3/16] %v1324_v0, 128  ;;  %v636_v24 = vsub.f32 %v620_v11, %v571_v22  ;;  %v622_v26 = vadd.f32 %v1598_v33, %v606_v17  ;;  %v698_v27 = vsel %vm682_vm12, 1.0, %v1456_v9  ;;  %v572_v28 = vsel %vm428_vm14, 0.0, %v1686_v14  ;;  %v343_v17 = vld [vmem:[%s1600_s7 + $0x78] sm:$0xff] }
  0x4b   : > { %v667_v29 = vadd.f32 %v651_v21, %v570_v8  ;;  %v360_v30 = vmul.f32 %v1593_v32, %v338_v18  ;;  %v637_v34 = vsub.f32 %v621_v15, %v572_v28  ;;  %vm429_vm15 = vcmp.ge.f32.partialorder %v1699_v25, 0.5 }
  0x4c   : > { %v652_v31 = vmul.f32 0.5, %v636_v24  ;;  %v607_v35 = vmul.f32 %v1124_v23, %v1593_v32  ;;  %v573_v37 = vsel %vm429_vm15, 0.0, %v1699_v25  ;;  %v442_v40 = vsel %vm426_vm11, 1.0, %v1456_v9 }
  0x4d   : > { %vm683_vm0 = vcmp.ge.f32.partialorder %v667_v29, 0.5  ;;  %v382_v38 = vadd.f32 %v1598_v33, %v360_v30  ;;  %v653_v42 = vmul.f32 0.5, %v637_v34  ;;  %v638_v43 = vsub.f32 %v622_v26, %v573_v37  ;;  %v1129_v30 = vld [vmem:[%s1600_s7 + $0xf8] sm:$0xff] }
  0x4e   : > { %1327 = vxpose.xlu0.b32.cont [4/16] %v1326_v12, 128  ;;  %v668_v41 = vadd.f32 %v652_v31, %v571_v22  ;;  %v1330_v45 = vpack.i.bf16 %v698_v27, %v441_v20  ;;  %v699_v46 = vsel %vm683_vm0, 1.0, %v1456_v9  ;;  %v361_v48 = vmul.f32 %v1593_v32, %v339_v36 }
  0x4f   : > { %v1719_v47 = vmul.f32 0.5, %v382_v38  ;;  %v654_v49 = vmul.f32 0.5, %v638_v43  ;;  %v623_v50 = vadd.f32 %v1598_v33, %v607_v35  ;;  %v608_v51 = vmul.f32 %v1125_v39, %v1593_v32 }
  0x50   : > { %vm684_vm1 = vcmp.ge.f32.partialorder %v668_v41, 0.5  ;;  %v669_v52 = vadd.f32 %v653_v42, %v572_v28  ;;  %v383_v53 = vadd.f32 %v1598_v33, %v361_v48  ;;  %v362_v54 = vmul.f32 %v1593_v32, %v340_v44 }
  0x51   : > { %vm430_vm2 = vcmp.ge.f32.partialorder %v1719_v47, 0.5  ;;  %v443_v55 = vsel %vm427_vm13, 1.0, %v1456_v9  ;;  %v700_v58 = vsel %vm684_vm1, 1.0, %v1456_v9  ;;  %v624_v61 = vadd.f32 %v1598_v33, %v608_v51 }
  0x52   : > { %1329 = vxpose.xlu0.b32.cont [5/16] %v1328_v19, 128  ;;  %v574_v59 = vsel %vm430_vm2, 0.0, %v1719_v47  ;;  %v1735_v60 = vmul.f32 0.5, %v383_v53  ;;  %v1332_v62 = vpack.i.bf16 %v699_v46, %v442_v40  ;;  %v670_v63 = vadd.f32 %v654_v49, %v573_v37 }
  0x53   : > { %v639_v0 = vsub.f32 %v623_v50, %v574_v59  ;;  %v384_v1 = vadd.f32 %v1598_v33, %v362_v54  ;;  %vm685_vm3 = vcmp.ge.f32.partialorder %v669_v52, 0.5  ;;  %v609_v2 = vmul.f32 %v1126_v56, %v1593_v32 }
  0x54   : > { %vm431_vm4 = vcmp.ge.f32.partialorder %v1735_v60, 0.5  ;;  %v363_v3 = vmul.f32 %v1593_v32, %v341_v57  ;;  %v1334_v6 = vpack.i.bf16 %v700_v58, %v443_v55  ;;  %v444_v7 = vsel %vm428_vm14, 1.0, %v1456_v9 }
  0x55   : > { %v655_v8 = vmul.f32 0.5, %v639_v0  ;;  %v575_v10 = vsel %vm431_vm4, 0.0, %v1735_v60  ;;  %v400_v12 = vmul.f32 0.5, %v384_v1  ;;  %v625_v13 = vadd.f32 %v1598_v33, %v609_v2 }
  0x56   : > { %1331 = vxpose.xlu0.b32.cont [6/16] %v1330_v45, 128  ;;  %v640_v11 = vsub.f32 %v624_v61, %v575_v10  ;;  %v385_v15 = vadd.f32 %v1598_v33, %v363_v3  ;;  %v701_v18 = vsel %vm685_vm3, 1.0, %v1456_v9  ;;  %vm686_vm5 = vcmp.ge.f32.partialorder %v670_v63, 0.5 }
  0x57   : > { %v610_v14 = vmul.f32 %v1127_v4, %v1593_v32  ;;  %v364_v19 = vmul.f32 %v1593_v32, %v342_v5  ;;  %v671_v20 = vadd.f32 %v655_v8, %v574_v59  ;;  %vm432_vm6 = vcmp.ge.f32.partialorder %v400_v12, 0.5 }
  0x58   : > { %v656_v21 = vmul.f32 0.5, %v640_v11  ;;  %v401_v22 = vmul.f32 0.5, %v385_v15  ;;  %v576_v23 = vsel %vm432_vm6, 0.0, %v400_v12  ;;  %v611_v26 = vmul.f32 %v1128_v16, %v1593_v32 }
  0x59   : > { %v626_v24 = vadd.f32 %v1598_v33, %v610_v14  ;;  %v365_v27 = vmul.f32 %v1593_v32, %v343_v17  ;;  %v445_v29 = vsel %vm429_vm15, 1.0, %v1456_v9  ;;  %v641_v28 = vsub.f32 %v625_v13, %v576_v23 }
  0x5a   : > { %1333 = vxpose.xlu0.b32.cont [7/16] %v1332_v62, 128  ;;  %vm433_vm7 = vcmp.ge.f32.partialorder %v401_v22, 0.5  ;;  %v1336_v31 = vpack.i.bf16 %v701_v18, %v444_v7  ;;  %v702_v34 = vsel %vm686_vm5, 1.0, %v1456_v9  ;;  %v386_v36 = vadd.f32 %v1598_v33, %v364_v19 }
  0x5b   : > { %v577_v35 = vsel %vm433_vm7, 0.0, %v401_v22  ;;  %vm687_vm8 = vcmp.ge.f32.partialorder %v671_v20, 0.5  ;;  %v672_v37 = vadd.f32 %v656_v21, %v575_v10  ;;  %v657_v38 = vmul.f32 0.5, %v641_v28 }
  0x5c   : > { %v642_v39 = vsub.f32 %v626_v24, %v577_v35  ;;  %v402_v40 = vmul.f32 0.5, %v386_v36  ;;  %v627_v25 = vadd.f32 %v1598_v33, %v611_v26  ;;  %v387_v41 = vadd.f32 %v1598_v33, %v365_v27 }
  0x5d   : > { %v612_v42 = vmul.f32 %v1129_v30, %v1593_v32  ;;  %v1338_v43 = vpack.i.bf16 %v702_v34, %v445_v29  ;;  %v446_v46 = vsel %vm430_vm2, 1.0, %v1456_v9  ;;  %v703_v48 = vsel %vm687_vm8, 1.0, %v1456_v9 }
  0x5e   : > { %1335 = vxpose.xlu0.b32.cont [8/16] %v1334_v6, 128  ;;  %vm434_vm9 = vcmp.ge.f32.partialorder %v402_v40, 0.5  ;;  %v403_v44 = vmul.f32 0.5, %v387_v41  ;;  %vm688_vm10 = vcmp.ge.f32.partialorder %v672_v37, 0.5  ;;  %v673_v50 = vadd.f32 %v657_v38, %v576_v23 }
  0x5f   : > { %v628_v45 = vadd.f32 %v1598_v33, %v612_v42  ;;  %v578_v49 = vsel %vm434_vm9, 0.0, %v402_v40  ;;  %v658_v51 = vmul.f32 0.5, %v642_v39  ;;  %v1340_v53 = vpack.i.bf16 %v703_v48, %v446_v46 }
  0x60   : > { %v643_v52 = vsub.f32 %v627_v25, %v578_v49  ;;  %vm435_vm11 = vcmp.ge.f32.partialorder %v403_v44, 0.5  ;;  %v447_v33 = vsel %vm431_vm4, 1.0, %v1456_v9  ;;  %v704_v47 = vsel %vm688_vm10, 1.0, %v1456_v9 }
  0x61   : > { %v579_v32 = vsel %vm435_vm11, 0.0, %v403_v44  ;;  %vm689_vm12 = vcmp.ge.f32.partialorder %v673_v50, 0.5  ;;  %v674_v54 = vadd.f32 %v658_v51, %v577_v35  ;;  %v1342_v57 = vpack.i.bf16 %v704_v47, %v447_v33 }
  0x62   : > { %1337 = vxpose.xlu0.b32.cont [9/16] %v1336_v31, 128  ;;  %v659_v55 = vmul.f32 0.5, %v643_v52  ;;  %v644_v56 = vsub.f32 %v628_v45, %v579_v32  ;;  %v448_v58 = vsel %vm432_vm6, 1.0, %v1456_v9  ;;  %v705_v59 = vsel %vm689_vm12, 1.0, %v1456_v9 }
  0x63   : > { %vm690_vm13 = vcmp.ge.f32.partialorder %v674_v54, 0.5  ;;  %v1344_v63 = vpack.i.bf16 %v705_v59, %v448_v58  ;;  %v449_v60 = vsel %vm433_vm7, 1.0, %v1456_v9  ;;  %v450_v3 = vsel %vm434_vm9, 1.0, %v1456_v9 }
  0x64   : > { %v675_v61 = vadd.f32 %v659_v55, %v578_v49  ;;  %v660_v62 = vmul.f32 0.5, %v644_v56  ;;  %v706_v0 = vsel %vm690_vm13, 1.0, %v1456_v9  ;;  %v451_v6 = vsel %vm435_vm11, 1.0, %v1456_v9 }
  0x65   : > { %v1346_v2 = vpack.i.bf16 %v706_v0, %v449_v60 }
  0x66   : > { %1339 = vxpose.xlu0.b32.cont [10/16] %v1338_v43, 128  ;;  %vm691_vm14 = vcmp.ge.f32.partialorder %v675_v61, 0.5  ;;  %v676_v1 = vadd.f32 %v660_v62, %v579_v32 }
  0x67   : > { %v707_v4 = vsel %vm691_vm14, 1.0, %v1456_v9 }
  0x68   : > { %vm692_vm15 = vcmp.ge.f32.partialorder %v676_v1, 0.5  ;;  %v1348_v5 = vpack.i.bf16 %v707_v4, %v450_v3 }
  0x69   : > { %v708_v7 = vsel %vm692_vm15, 1.0, %v1456_v9 }
  0x6a   : > { %1341 = vxpose.xlu0.b32.cont [11/16] %v1340_v53, 128  ;;  %v1350_v8 = vpack.i.bf16 %v708_v7, %v451_v6 }
  0x6e   : > { %1343 = vxpose.xlu0.b32.cont [12/16] %v1342_v57, 128 }
  0x72   : > { %1345 = vxpose.xlu0.b32.cont [13/16] %v1344_v63, 128 }
  0x76   : > { %1347 = vxpose.xlu0.b32.cont [14/16] %v1346_v2, 128 }
  0x7a   : > { %1349 = vxpose.xlu0.b32.cont [15/16] %v1348_v5, 128 }
  0x7e   : > { %1351 = vxpose.xlu0.b32.end [16/16] %v1350_v8, 128 }
  0xbe   : > { %v1352_v10 = vpop.trf.xlu0 }
  0xbf   : > { %v1356_v11 = vunpack.i.h.bf16 %v1352_v10  ;;  %v1353_v12 = vunpack.i.l.bf16 %v1352_v10 }
  0xc2   : > { %v1357_v13 = vpop.trf.xlu0 }
  0xc3   : > { %v1361_v15 = vunpack.i.h.bf16 %v1357_v13  ;;  %v1358_v16 = vunpack.i.l.bf16 %v1357_v13 }
  0xc5   : > { %v1203_v17 = vpack.c.bf16 %v1358_v16, %v1353_v12  ;;  %v1243_v18 = vpack.c.bf16 %v1361_v15, %v1356_v11 }
  0xc6   : > { %v1362_v14 = vpop.trf.xlu0 }
  0xc7   : > { %1204 = vst [vmem:[%s1798_s9] sm:$0xff] %v1203_v17   ;;  %1287 = vst [vmem:[%s1798_s9 + $0x40] sm:$0xff] %v1243_v18   ;;  %v1366_v9 = vunpack.i.h.bf16 %v1362_v14  ;;  %v1363_v19 = vunpack.i.l.bf16 %v1362_v14 }
  0xca   : > { %v1367_v20 = vpop.trf.xlu0 }
  0xcb   : > { %v1371_v21 = vunpack.i.h.bf16 %v1367_v20  ;;  %v1368_v22 = vunpack.i.l.bf16 %v1367_v20 }
  0xcd   : > { %v1208_v23 = vpack.c.bf16 %v1368_v22, %v1363_v19  ;;  %v1248_v24 = vpack.c.bf16 %v1371_v21, %v1366_v9 }
  0xce   : > { %v1372_v26 = vpop.trf.xlu0  ;;  %v848_v10 = vld [vmem:[%s1798_s9] sm:$0xff] (%p1507_p5)  }
  0xcf   : > { %1280 = vst [vmem:[%s1798_s9 + $0x8] sm:$0xff] %v1208_v23   ;;  %1288 = vst [vmem:[%s1798_s9 + $0x48] sm:$0xff] %v1248_v24   ;;  %v1376_v27 = vunpack.i.h.bf16 %v1372_v26  ;;  %v1373_v29 = vunpack.i.l.bf16 %v1372_v26  ;;  %v880_v14 = vld [vmem:[%s1798_s9 + $0x40] sm:$0xff] (%p1507_p5)  }
  0xd0   : > { %849 = vst [vmem:[%s831_s17] sm:$0xff] (%p1507_p5), %v848_v10   ;;  %881 = vst [vmem:[%s831_s17 + $0x80] sm:$0xff] (%p1507_p5), %v880_v14  }
  0xd2   : > { %v1377_v28 = vpop.trf.xlu0 }
  0xd3   : > { %v1381_v30 = vunpack.i.h.bf16 %v1377_v28  ;;  %v1378_v31 = vunpack.i.l.bf16 %v1377_v28 }
  0xd5   : > { %v1213_v34 = vpack.c.bf16 %v1378_v31, %v1373_v29  ;;  %v1253_v35 = vpack.c.bf16 %v1381_v30, %v1376_v27 }
  0xd6   : > { %v1382_v36 = vpop.trf.xlu0  ;;  %v852_v11 = vld [vmem:[%s1798_s9 + $0x8] sm:$0xff] (%p1507_p5)  }
  0xd7   : > { %1281 = vst [vmem:[%s1798_s9 + $0x10] sm:$0xff] %v1213_v34   ;;  %1289 = vst [vmem:[%s1798_s9 + $0x50] sm:$0xff] %v1253_v35   ;;  %v1386_v37 = vunpack.i.h.bf16 %v1382_v36  ;;  %v1383_v38 = vunpack.i.l.bf16 %v1382_v36  ;;  %v884_v9 = vld [vmem:[%s1798_s9 + $0x48] sm:$0xff] (%p1507_p5)  }
  0xd8   : > { %853 = vst [vmem:[%s831_s17 + $0x8] sm:$0xff] (%p1507_p5), %v852_v11   ;;  %885 = vst [vmem:[%s831_s17 + $0x88] sm:$0xff] (%p1507_p5), %v884_v9  }
  0xda   : > { %v1387_v39 = vpop.trf.xlu0 }
  0xdb   : > { %v1391_v40 = vunpack.i.h.bf16 %v1387_v39  ;;  %v1388_v25 = vunpack.i.l.bf16 %v1387_v39 }
  0xdd   : > { %v1218_v41 = vpack.c.bf16 %v1388_v25, %v1383_v38  ;;  %v1258_v42 = vpack.c.bf16 %v1391_v40, %v1386_v37 }
  0xde   : > { %v1392_v43 = vpop.trf.xlu0  ;;  %v856_v12 = vld [vmem:[%s1798_s9 + $0x10] sm:$0xff] (%p1507_p5)  }
  0xdf   : > { %1282 = vst [vmem:[%s1798_s9 + $0x18] sm:$0xff] %v1218_v41   ;;  %1290 = vst [vmem:[%s1798_s9 + $0x58] sm:$0xff] %v1258_v42   ;;  %v1396_v44 = vunpack.i.h.bf16 %v1392_v43  ;;  %v1393_v45 = vunpack.i.l.bf16 %v1392_v43  ;;  %v888_v19 = vld [vmem:[%s1798_s9 + $0x50] sm:$0xff] (%p1507_p5)  }
  0xe0   : > { %857 = vst [vmem:[%s831_s17 + $0x10] sm:$0xff] (%p1507_p5), %v856_v12   ;;  %889 = vst [vmem:[%s831_s17 + $0x90] sm:$0xff] (%p1507_p5), %v888_v19  }
  0xe2   : > { %v1397_v46 = vpop.trf.xlu0 }
  0xe3   : > { %v1401_v48 = vunpack.i.h.bf16 %v1397_v46  ;;  %v1398_v49 = vunpack.i.l.bf16 %v1397_v46 }
  0xe5   : > { %v1223_v50 = vpack.c.bf16 %v1398_v49, %v1393_v45  ;;  %v1263_v51 = vpack.c.bf16 %v1401_v48, %v1396_v44 }
  0xe6   : > { %v1402_v52 = vpop.trf.xlu0  ;;  %v860_v13 = vld [vmem:[%s1798_s9 + $0x18] sm:$0xff] (%p1507_p5)  }
  0xe7   : > { %1283 = vst [vmem:[%s1798_s9 + $0x20] sm:$0xff] %v1223_v50   ;;  %1291 = vst [vmem:[%s1798_s9 + $0x60] sm:$0xff] %v1263_v51   ;;  %v1406_v32 = vunpack.i.h.bf16 %v1402_v52  ;;  %v1403_v53 = vunpack.i.l.bf16 %v1402_v52  ;;  %v892_v20 = vld [vmem:[%s1798_s9 + $0x58] sm:$0xff] (%p1507_p5)  }
  0xe8   : > { %861 = vst [vmem:[%s831_s17 + $0x18] sm:$0xff] (%p1507_p5), %v860_v13   ;;  %893 = vst [vmem:[%s831_s17 + $0x98] sm:$0xff] (%p1507_p5), %v892_v20  }
  0xea   : > { %v1407_v33 = vpop.trf.xlu0 }
  0xeb   : > { %v1411_v47 = vunpack.i.h.bf16 %v1407_v33  ;;  %v1408_v54 = vunpack.i.l.bf16 %v1407_v33 }
  0xed   : > { %v1228_v55 = vpack.c.bf16 %v1408_v54, %v1403_v53  ;;  %v1268_v56 = vpack.c.bf16 %v1411_v47, %v1406_v32 }
  0xee   : > { %v1412_v57 = vpop.trf.xlu0  ;;  %v864_v15 = vld [vmem:[%s1798_s9 + $0x20] sm:$0xff] (%p1507_p5)  }
  0xef   : > { %1284 = vst [vmem:[%s1798_s9 + $0x28] sm:$0xff] %v1228_v55   ;;  %1292 = vst [vmem:[%s1798_s9 + $0x68] sm:$0xff] %v1268_v56   ;;  %v1416_v58 = vunpack.i.h.bf16 %v1412_v57  ;;  %v1413_v59 = vunpack.i.l.bf16 %v1412_v57  ;;  %v896_v21 = vld [vmem:[%s1798_s9 + $0x60] sm:$0xff] (%p1507_p5)  }
  0xf0   : > { %865 = vst [vmem:[%s831_s17 + $0x20] sm:$0xff] (%p1507_p5), %v864_v15   ;;  %897 = vst [vmem:[%s831_s17 + $0xa0] sm:$0xff] (%p1507_p5), %v896_v21  }
  0xf2   : > { %v1417_v61 = vpop.trf.xlu0 }
  0xf3   : > { %v1421_v62 = vunpack.i.h.bf16 %v1417_v61  ;;  %v1418_v63 = vunpack.i.l.bf16 %v1417_v61 }
  0xf5   : > { %v1233_v60 = vpack.c.bf16 %v1418_v63, %v1413_v59  ;;  %v1273_v0 = vpack.c.bf16 %v1421_v62, %v1416_v58 }
  0xf6   : > { %v1422_v1 = vpop.trf.xlu0  ;;  %v868_v16 = vld [vmem:[%s1798_s9 + $0x28] sm:$0xff] (%p1507_p5)  }
  0xf7   : > { %1285 = vst [vmem:[%s1798_s9 + $0x30] sm:$0xff] %v1233_v60   ;;  %1293 = vst [vmem:[%s1798_s9 + $0x70] sm:$0xff] %v1273_v0   ;;  %v1426_v2 = vunpack.i.h.bf16 %v1422_v1  ;;  %v1423_v3 = vunpack.i.l.bf16 %v1422_v1  ;;  %v900_v22 = vld [vmem:[%s1798_s9 + $0x68] sm:$0xff] (%p1507_p5)  }
  0xf8   : > { %869 = vst [vmem:[%s831_s17 + $0x28] sm:$0xff] (%p1507_p5), %v868_v16   ;;  %901 = vst [vmem:[%s831_s17 + $0xa8] sm:$0xff] (%p1507_p5), %v900_v22  }
  0xfa   : > { %v1427_v4 = vpop.trf.xlu0 }
  0xfb   : > { %v1431_v5 = vunpack.i.h.bf16 %v1427_v4  ;;  %v1428_v6 = vunpack.i.l.bf16 %v1427_v4  ;;  %828 = sbr.rel (!%p1507_p5) target bundleno = 265 (0x109), region = 74 }
  0xfd   : > { %v1238_v7 = vpack.c.bf16 %v1428_v6, %v1423_v3  ;;  %v1278_v8 = vpack.c.bf16 %v1431_v5, %v1426_v2 }
  0xfe   : > { %v872_v17 = vld [vmem:[%s1798_s9 + $0x30] sm:$0xff] (%p1507_p5)  }
  0xff   : > { %1286 = vst [vmem:[%s1798_s9 + $0x38] sm:$0xff] %v1238_v7   ;;  %1294 = vst [vmem:[%s1798_s9 + $0x78] sm:$0xff] %v1278_v8   ;;  %v904_v23 = vld [vmem:[%s1798_s9 + $0x70] sm:$0xff] (%p1507_p5)  }
 0x100   : > { %873 = vst [vmem:[%s831_s17 + $0x30] sm:$0xff] %v872_v17   ;;  %905 = vst [vmem:[%s831_s17 + $0xb0] sm:$0xff] %v904_v23  }
 0x106   : > { %v876_v18 = vld [vmem:[%s1798_s9 + $0x38] sm:$0xff]  }
 0x107   : > { %877 = vst [vmem:[%s831_s17 + $0x38] sm:$0xff] %v876_v18   ;;  %v908_v24 = vld [vmem:[%s1798_s9 + $0x78] sm:$0xff]  }
 0x108   : > { %909 = vst [vmem:[%s831_s17 + $0xb8] sm:$0xff] %v908_v24  }
 0x109 PF: > { %p10_p10 = scmp.ge.s32.totalorder %s1494_s16, 4   ;;  %s1854_s12 = smov %s1450_s13 }
 0x10a   : > { %s1855_s13 = smov %s1505_s19  ;;  %s1856_s14 = smov %s1494_s16 }
 0x10b   :  { %12 = sbr.rel (!%p10_p10) target bundleno = 2 (0x2), region = 148 }

// kernel: ssa_rel_scl_forward.10
= control target key start
LH: loop header
LB: loop body
LE: loop exit
PB: predicated region body
PF: predicated region fallthrough
CT: control target
= control target key end

     0   :  { %s1238_s12 = smov 0   ;;  %s1240_s13 = smov 0   ;;  %s1695_s0 = inlined_call_operand.vmem [shape: f32[2,256,128], index: 0, kind: input, shape index: {}]   ;;  %s1696_s1 = inlined_call_operand.vmem [shape: f32[1,128], index: 1, kind: input, shape index: {}]   ;;  %s1697_s2 = inlined_call_operand.vmem [shape: f32[1,128], index: 2, kind: input, shape index: {}]   ;;  %s1698_s3 = inlined_call_operand.vmem [shape: bf16[2,256,128], index: 3, kind: output, shape index: {}]  }
   0x1   :  { %s1242_s14 = smov 0  }
   0x2 LB: > { %s990_s15 = sadd.s32 4294967295, %s1215_s14   ;;  %s1255_s16 = sadd.s32 1, %s1215_s14   ;;  %s1215_s14 = sphi %s1242_s14, %s1702_s14   ;;  %s1211_s13 = sphi %s1240_s13, %s1701_s13   ;;  %s1207_s12 = sphi %s1238_s12, %s1700_s12  }
   0x3   : > { %s17_s17 = ssub.s32 %s1215_s14, %s1255_s16  ;;  %s20_s18 = sadd.s32 1, %s1211_s13 }
   0x4   : > { %p18_p0 = scmp.eq.s32.totalorder %s17_s17, 0  ;;  %p27_p1 = scmp.ne.s32.totalorder %s1211_s13, %s1207_s12 }
   0x5   : > { %p28_p2 = scmp.eq.s32.totalorder %s1215_s14, 0  ;;  %p99_p3 = scmp.eq.s32.totalorder %s990_s15, 1 }
   0x6   : > { %s1266_s19 = scalar_select %p18_p0, %s1211_s13, %s20_s18  }
   0x7   : > { %p29_p4 = por %p28_p2, %p27_p1  ;;  %p1268_p5 = por %p99_p3, %p27_p1 }
   0x8   : > { %p993_p6 = scmp.ge.s32.totalorder %s1215_s14, 2 }
   0xa   : > { %127 = sbr.rel (%p993_p6) target bundleno = 35 (0x23), region = 24 }
   0xf   : > { %130 = sbr.rel (!%p29_p4) target bundleno = 35 (0x23), region = 28  ;;  %s132_s21 = sand.u32 (%p29_p4), 1, %s1211_s13  }
  0x10   : > { %s1071_s22 = sshll.u32 (%p29_p4), %s1215_s14, 7  ;;  %s994_s23 = sshll.u32 (%p29_p4), %s132_s21, 8 }
  0x11   : > { %s1278_s26 = scalar_lea.vmem (%p29_p4), %s1695_s0, %s1071_s22  ;;  %s1283_s27 = scalar_lea.vmem (%p29_p4), [#allocation2], %s994_s23 }
  0x12   : > { %v228_v0 = vld [vmem:[%s1278_s26] sm:$0xff] (%p29_p4)  ;;  %v230_v1 = vld [vmem:[%s1278_s26 + $0x8] sm:$0xff] (%p29_p4)  ;;  %v232_v2 = vld [vmem:[%s1278_s26 + $0x10] sm:$0xff] (%p29_p4) }
  0x13   : > { %229 = vst [vmem:[%s1283_s27] sm:$0xff] (%p29_p4), %v228_v0  ;;  %231 = vst [vmem:[%s1283_s27 + $0x8] sm:$0xff] (%p29_p4), %v230_v1  ;;  %v234_v3 = vld [vmem:[%s1278_s26 + $0x18] sm:$0xff] (%p29_p4)  ;;  %v236_v4 = vld [vmem:[%s1278_s26 + $0x20] sm:$0xff] (%p29_p4) }
  0x14   : > { %233 = vst [vmem:[%s1283_s27 + $0x10] sm:$0xff] %v232_v2  ;;  %v238_v5 = vld [vmem:[%s1278_s26 + $0x28] sm:$0xff]  ;;  %235 = vst [vmem:[%s1283_s27 + $0x18] sm:$0xff] %v234_v3  ;;  %v240_v6 = vld [vmem:[%s1278_s26 + $0x30] sm:$0xff] }
  0x15   : > { %237 = vst [vmem:[%s1283_s27 + $0x20] sm:$0xff] %v236_v4  ;;  %239 = vst [vmem:[%s1283_s27 + $0x28] sm:$0xff] %v238_v5  ;;  %v242_v7 = vld [vmem:[%s1278_s26 + $0x38] sm:$0xff]  ;;  %v244_v8 = vld [vmem:[%s1278_s26 + $0x40] sm:$0xff] }
  0x16   : > { %241 = vst [vmem:[%s1283_s27 + $0x30] sm:$0xff] %v240_v6  ;;  %243 = vst [vmem:[%s1283_s27 + $0x38] sm:$0xff] %v242_v7  ;;  %v246_v9 = vld [vmem:[%s1278_s26 + $0x48] sm:$0xff]  ;;  %v248_v10 = vld [vmem:[%s1278_s26 + $0x50] sm:$0xff] }
  0x17   : > { %245 = vst [vmem:[%s1283_s27 + $0x40] sm:$0xff] %v244_v8  ;;  %v250_v11 = vld [vmem:[%s1278_s26 + $0x58] sm:$0xff]  ;;  %247 = vst [vmem:[%s1283_s27 + $0x48] sm:$0xff] %v246_v9  ;;  %v252_v12 = vld [vmem:[%s1278_s26 + $0x60] sm:$0xff] }
  0x18   : > { %249 = vst [vmem:[%s1283_s27 + $0x50] sm:$0xff] %v248_v10  ;;  %251 = vst [vmem:[%s1283_s27 + $0x58] sm:$0xff] %v250_v11  ;;  %v254_v13 = vld [vmem:[%s1278_s26 + $0x68] sm:$0xff]  ;;  %v256_v14 = vld [vmem:[%s1278_s26 + $0x70] sm:$0xff] }
  0x19   : > { %253 = vst [vmem:[%s1283_s27 + $0x60] sm:$0xff] %v252_v12  ;;  %255 = vst [vmem:[%s1283_s27 + $0x68] sm:$0xff] %v254_v13  ;;  %v258_v15 = vld [vmem:[%s1278_s26 + $0x78] sm:$0xff]  ;;  %v260_v16 = vld [vmem:[%s1278_s26 + $0x100] sm:$0xff] }
  0x1a   : > { %257 = vst [vmem:[%s1283_s27 + $0x70] sm:$0xff] %v256_v14  ;;  %v262_v17 = vld [vmem:[%s1278_s26 + $0x108] sm:$0xff]  ;;  %259 = vst [vmem:[%s1283_s27 + $0x78] sm:$0xff] %v258_v15  ;;  %v264_v18 = vld [vmem:[%s1278_s26 + $0x110] sm:$0xff] }
  0x1b   : > { %261 = vst [vmem:[%s1283_s27 + $0x80] sm:$0xff] %v260_v16  ;;  %263 = vst [vmem:[%s1283_s27 + $0x88] sm:$0xff] %v262_v17  ;;  %v266_v19 = vld [vmem:[%s1278_s26 + $0x118] sm:$0xff]  ;;  %v268_v20 = vld [vmem:[%s1278_s26 + $0x120] sm:$0xff] }
  0x1c   : > { %265 = vst [vmem:[%s1283_s27 + $0x90] sm:$0xff] %v264_v18  ;;  %267 = vst [vmem:[%s1283_s27 + $0x98] sm:$0xff] %v266_v19  ;;  %v270_v21 = vld [vmem:[%s1278_s26 + $0x128] sm:$0xff]  ;;  %v272_v22 = vld [vmem:[%s1278_s26 + $0x130] sm:$0xff] }
  0x1d   : > { %269 = vst [vmem:[%s1283_s27 + $0xa0] sm:$0xff] %v268_v20  ;;  %v274_v23 = vld [vmem:[%s1278_s26 + $0x138] sm:$0xff]  ;;  %271 = vst [vmem:[%s1283_s27 + $0xa8] sm:$0xff] %v270_v21  ;;  %v276_v24 = vld [vmem:[%s1278_s26 + $0x140] sm:$0xff] }
  0x1e   : > { %273 = vst [vmem:[%s1283_s27 + $0xb0] sm:$0xff] %v272_v22  ;;  %275 = vst [vmem:[%s1283_s27 + $0xb8] sm:$0xff] %v274_v23  ;;  %v278_v25 = vld [vmem:[%s1278_s26 + $0x148] sm:$0xff]  ;;  %v280_v26 = vld [vmem:[%s1278_s26 + $0x150] sm:$0xff] }
  0x1f   : > { %277 = vst [vmem:[%s1283_s27 + $0xc0] sm:$0xff] %v276_v24  ;;  %279 = vst [vmem:[%s1283_s27 + $0xc8] sm:$0xff] %v278_v25  ;;  %v282_v27 = vld [vmem:[%s1278_s26 + $0x158] sm:$0xff]  ;;  %v284_v28 = vld [vmem:[%s1278_s26 + $0x160] sm:$0xff] }
  0x20   : > { %281 = vst [vmem:[%s1283_s27 + $0xd0] sm:$0xff] %v280_v26  ;;  %v286_v29 = vld [vmem:[%s1278_s26 + $0x168] sm:$0xff]  ;;  %283 = vst [vmem:[%s1283_s27 + $0xd8] sm:$0xff] %v282_v27  ;;  %v288_v30 = vld [vmem:[%s1278_s26 + $0x170] sm:$0xff] }
  0x21   : > { %285 = vst [vmem:[%s1283_s27 + $0xe0] sm:$0xff] %v284_v28  ;;  %287 = vst [vmem:[%s1283_s27 + $0xe8] sm:$0xff] %v286_v29  ;;  %v290_v31 = vld [vmem:[%s1278_s26 + $0x178] sm:$0xff] }
  0x22   : > { %289 = vst [vmem:[%s1283_s27 + $0xf0] sm:$0xff] %v288_v30  ;;  %291 = vst [vmem:[%s1283_s27 + $0xf8] sm:$0xff] %v290_v31 }
  0x23 PF: > { %p997_p7 = scmp.ge.s32.totalorder %s1215_s14, 1  ;;  %p296_p8 = scmp.lt.s32.totalorder %s1215_s14, 3 }
  0x25   : > { %p297_p9 = pnand %p997_p7, %p296_p8 }
  0x26   : > { %s303_s28 = sand.u32 (!%p297_p9), 1, %s1207_s12  }
  0x27   : > { %300 = sbr.rel (%p297_p9) target bundleno = 115 (0x73), region = 66  ;;  %s998_s29 = sshll.u32 (!%p297_p9), %s303_s28, 8 }
  0x28   : > { %s1361_s7 = scalar_lea.vmem (!%p297_p9), [#allocation2], %s998_s29  ;;  %s999_s8 = sshll.u32 (!%p297_p9), %s303_s28, 7 }
  0x29   : > { %s1421_s9 = scalar_lea.vmem (!%p297_p9), [#allocation3], %s999_s8 }
  0x2c   : > { %v1354_v32 = vld [vmem:[%s1696_s1] ss:$0 sm:$0xff]  ;;  %v330_v35 = vld [vmem:[%s1361_s7 + $0x8] sm:$0xff]  ;;  %v331_v41 = vld [vmem:[%s1361_s7 + $0x10] sm:$0xff]  ;;  %v1217_v5 = vmov 0.0   ;;  %s1104_s10 = sshll.u32 (%p1268_p5), %s990_s15, 6 }
  0x2d   : > { %v1359_v33 = vld [vmem:[%s1697_s2] ss:$0 sm:$0xff]  ;;  %v352_v38 = vmul.f32 %v1354_v32, %v330_v35  ;;  %v1019_v39 = vld [vmem:[%s1361_s7 + $0x88] sm:$0xff]  ;;  %v332_v42 = vld [vmem:[%s1361_s7 + $0x18] sm:$0xff]  ;;  %v353_v44 = vmul.f32 %v1354_v32, %v331_v41  ;;  %s768_s17 = scalar_lea.vmem (%p1268_p5), %s1698_s3, %s1104_s10 }
  0x2e   : > { %v329_v34 = vld [vmem:[%s1361_s7] sm:$0xff]  ;;  %v567_v43 = vmul.f32 %v1019_v39, %v1354_v32  ;;  %v354_v45 = vmul.f32 %v1354_v32, %v332_v42  ;;  %v1020_v46 = vld [vmem:[%s1361_s7 + $0x90] sm:$0xff]  ;;  %v1021_v47 = vld [vmem:[%s1361_s7 + $0x98] sm:$0xff] }
  0x2f   : > { %v1018_v36 = vld [vmem:[%s1361_s7 + $0x80] sm:$0xff]  ;;  %v351_v37 = vmul.f32 %v1354_v32, %v329_v34  ;;  %v374_v50 = vadd.f32 %v1359_v33, %v352_v38  ;;  %v568_v52 = vmul.f32 %v1020_v46, %v1354_v32  ;;  %v334_v53 = vld [vmem:[%s1361_s7 + $0x28] sm:$0xff]  ;;  %v375_v55 = vadd.f32 %v1359_v33, %v353_v44  ;;  %v335_v17 = vld [vmem:[%s1361_s7 + $0x30] sm:$0xff] }
  0x30   : > { %v566_v40 = vmul.f32 %v1018_v36, %v1354_v32  ;;  %v333_v48 = vld [vmem:[%s1361_s7 + $0x20] sm:$0xff]  ;;  %v1386_v54 = vadd.f32 %v1359_v33, %v567_v43  ;;  %v376_v56 = vadd.f32 %v1359_v33, %v354_v45  ;;  %v569_v57 = vmul.f32 %v1021_v47, %v1354_v32  ;;  %v1023_v13 = vld [vmem:[%s1361_s7 + $0xa8] sm:$0xff]  ;;  %v336_v18 = vld [vmem:[%s1361_s7 + $0x38] sm:$0xff] }
  0x31   : > { %v373_v49 = vadd.f32 %v1359_v33, %v351_v37  ;;  %v1022_v58 = vld [vmem:[%s1361_s7 + $0xa0] sm:$0xff]  ;;  %v390_v60 = vmul.f32 0.5, %v374_v50  ;;  %v1395_v61 = vadd.f32 %v1359_v33, %v568_v52  ;;  %v355_v62 = vmul.f32 %v1354_v32, %v333_v48  ;;  %v1024_v30 = vld [vmem:[%s1361_s7 + $0xb0] sm:$0xff]  ;;  %v1025_v36 = vld [vmem:[%s1361_s7 + $0xb8] sm:$0xff] }
  0x32   : > { %v1381_v51 = vadd.f32 %v1359_v33, %v566_v40  ;;  %v391_v63 = vmul.f32 0.5, %v375_v55  ;;  %v392_v0 = vmul.f32 0.5, %v376_v56  ;;  %v1399_v1 = vadd.f32 %v1359_v33, %v569_v57  ;;  %v337_v37 = vld [vmem:[%s1361_s7 + $0x40] sm:$0xff]  ;;  %v338_v38 = vld [vmem:[%s1361_s7 + $0x48] sm:$0xff] }
  0x33   : > { %v389_v59 = vmul.f32 0.5, %v373_v49  ;;  %v356_v2 = vmul.f32 %v1354_v32, %v334_v53  ;;  %vm422_vm1 = vcmp.ge.f32.partialorder %v390_v60, 0.5  ;;  %v377_v3 = vadd.f32 %v1359_v33, %v355_v62  ;;  %v1026_v43 = vld [vmem:[%s1361_s7 + $0xc0] sm:$0xff]  ;;  %v1027_v44 = vld [vmem:[%s1361_s7 + $0xc8] sm:$0xff] }
  0x34   : > { %v570_v4 = vmul.f32 %v1022_v58, %v1354_v32  ;;  %v438_v7 = vsel %vm422_vm1, 1.0, %v1217_v5  ;;  %v1408_v9 = vsel %vm422_vm1, 0.0, %v390_v60  ;;  %vm423_vm2 = vcmp.ge.f32.partialorder %v391_v63, 0.5 }
  0x35   : > { %vm421_vm0 = vcmp.ge.f32.partialorder %v389_v59, 0.5  ;;  %v599_v12 = vsub.f32 %v1386_v54, %v1408_v9  ;;  %vm424_vm3 = vcmp.ge.f32.partialorder %v392_v0, 0.5  ;;  %v439_v14 = vsel %vm423_vm2, 1.0, %v1217_v5 }
  0x36   : > { %v437_v6 = vsel %vm421_vm0, 1.0, %v1217_v5  ;;  %v1406_v8 = vsel %vm421_vm0, 0.0, %v389_v59  ;;  %v1416_v15 = vsel %vm423_vm2, 0.0, %v391_v63  ;;  %v378_v16 = vadd.f32 %v1359_v33, %v356_v2 }
  0x37   : > { %v1106_v10 = vpack.c.bf16 %v438_v7, %v437_v6  ;;  %v598_v11 = vsub.f32 %v1381_v51, %v1406_v8  ;;  %v440_v19 = vsel %vm424_vm3, 1.0, %v1217_v5  ;;  %v1425_v20 = vsel %vm424_vm3, 0.0, %v392_v0  ;;  %v1028_v6 = vld [vmem:[%s1361_s7 + $0xd0] sm:$0xff] }
  0x38   : > { %v600_v21 = vsub.f32 %v1395_v61, %v1416_v15  ;;  %v393_v22 = vmul.f32 0.5, %v377_v3  ;;  %v1109_v23 = vpack.c.bf16 %v440_v19, %v439_v14  ;;  %v601_v24 = vsub.f32 %v1399_v1, %v1425_v20  ;;  %v339_v3 = vld [vmem:[%s1361_s7 + $0x50] sm:$0xff] }
  0x39   : > { %1107 = vst [vmem:[%s1421_s9] sm:$0xff] %v1106_v10   ;;  %v394_v25 = vmul.f32 0.5, %v378_v16  ;;  %v571_v26 = vmul.f32 %v1023_v13, %v1354_v32  ;;  %v1433_v27 = vadd.f32 %v1359_v33, %v570_v4  ;;  %v357_v28 = vmul.f32 %v1354_v32, %v335_v17  ;;  %v340_v4 = vld [vmem:[%s1361_s7 + $0x58] sm:$0xff] }
  0x3a   : > { %vm425_vm4 = vcmp.ge.f32.partialorder %v393_v22, 0.5  ;;  %v358_v29 = vmul.f32 %v1354_v32, %v336_v18  ;;  %1153 = vst [vmem:[%s1421_s9 + $0x8] sm:$0xff] %v1109_v23   ;;  %v572_v48 = vmul.f32 %v1024_v30, %v1354_v32  ;;  %v573_v50 = vmul.f32 %v1025_v36, %v1354_v32  ;;  %v1029_v16 = vld [vmem:[%s1361_s7 + $0xd8] sm:$0xff]  ;;  %v342_v36 = vld [vmem:[%s1361_s7 + $0x68] sm:$0xff] }
  0x3b   : > { %vm426_vm5 = vcmp.ge.f32.partialorder %v394_v25, 0.5  ;;  %v441_v31 = vsel %vm425_vm4, 1.0, %v1217_v5  ;;  %v1440_v34 = vsel %vm425_vm4, 0.0, %v393_v22  ;;  %v1443_v35 = vadd.f32 %v1359_v33, %v571_v26 }
  0x3c   : > { %v442_v39 = vsel %vm426_vm5, 1.0, %v1217_v5  ;;  %v1449_v40 = vsel %vm426_vm5, 0.0, %v394_v25  ;;  %v602_v41 = vsub.f32 %v1433_v27, %v1440_v34  ;;  %v379_v42 = vadd.f32 %v1359_v33, %v357_v28 }
  0x3d   : > { %v1112_v45 = vpack.c.bf16 %v442_v39, %v441_v31  ;;  %v603_v46 = vsub.f32 %v1443_v35, %v1449_v40  ;;  %v380_v47 = vadd.f32 %v1359_v33, %v358_v29  ;;  %v359_v52 = vmul.f32 %v1354_v32, %v337_v37  ;;  %v341_v31 = vld [vmem:[%s1361_s7 + $0x60] sm:$0xff] }
  0x3e   : > { %v395_v49 = vmul.f32 0.5, %v379_v42  ;;  %v360_v53 = vmul.f32 %v1354_v32, %v338_v38  ;;  %v1465_v56 = vadd.f32 %v1359_v33, %v572_v48  ;;  %v574_v57 = vmul.f32 %v1026_v43, %v1354_v32  ;;  %v1030_v43 = vld [vmem:[%s1361_s7 + $0xe0] sm:$0xff] }
  0x3f   : > { %1154 = vst [vmem:[%s1421_s9 + $0x10] sm:$0xff] %v1112_v45   ;;  %v396_v55 = vmul.f32 0.5, %v380_v47  ;;  %v575_v58 = vmul.f32 %v1027_v44, %v1354_v32  ;;  %v1470_v59 = vadd.f32 %v1359_v33, %v573_v50  ;;  %v381_v60 = vadd.f32 %v1359_v33, %v359_v52  ;;  %v1031_v44 = vld [vmem:[%s1361_s7 + $0xe8] sm:$0xff]  ;;  %v343_v45 = vld [vmem:[%s1361_s7 + $0x70] sm:$0xff]  ;;  %v344_v52 = vld [vmem:[%s1361_s7 + $0x78] sm:$0xff] }
  0x40   : > { %vm427_vm6 = vcmp.ge.f32.partialorder %v395_v49, 0.5  ;;  %v382_v62 = vadd.f32 %v1359_v33, %v360_v53  ;;  %v1478_v2 = vadd.f32 %v1359_v33, %v574_v57  ;;  %v361_v23 = vmul.f32 %v1354_v32, %v339_v3 }
  0x41   : > { %vm428_vm7 = vcmp.ge.f32.partialorder %v396_v55, 0.5  ;;  %v443_v63 = vsel %vm427_vm6, 1.0, %v1217_v5  ;;  %v1475_v0 = vsel %vm427_vm6, 0.0, %v395_v49  ;;  %v397_v14 = vmul.f32 0.5, %v381_v60 }
  0x42   : > { %v444_v7 = vsel %vm428_vm7, 1.0, %v1217_v5  ;;  %v1484_v10 = vsel %vm428_vm7, 0.0, %v396_v55  ;;  %v604_v13 = vsub.f32 %v1465_v56, %v1475_v0  ;;  %v398_v19 = vmul.f32 0.5, %v382_v62 }
  0x43   : > { %v1115_v17 = vpack.c.bf16 %v444_v7, %v443_v63  ;;  %v605_v18 = vsub.f32 %v1470_v59, %v1484_v10  ;;  %v1492_v22 = vadd.f32 %v1359_v33, %v575_v58  ;;  %vm429_vm8 = vcmp.ge.f32.partialorder %v397_v14, 0.5 }
  0x44   : > { %v362_v25 = vmul.f32 %v1354_v32, %v340_v4  ;;  %v576_v26 = vmul.f32 %v1028_v6, %v1354_v32  ;;  %vm430_vm9 = vcmp.ge.f32.partialorder %v398_v19, 0.5  ;;  %v445_v28 = vsel %vm429_vm8, 1.0, %v1217_v5 }
  0x45   : > { %1155 = vst [vmem:[%s1421_s9 + $0x18] sm:$0xff] %v1115_v17   ;;  %v1499_v29 = vsel %vm429_vm8, 0.0, %v397_v14  ;;  %v577_v30 = vmul.f32 %v1029_v16, %v1354_v32  ;;  %v446_v37 = vsel %vm430_vm9, 1.0, %v1217_v5  ;;  %v1505_v38 = vsel %vm430_vm9, 0.0, %v398_v19  ;;  %v1032_v19 = vld [vmem:[%s1361_s7 + $0xf0] sm:$0xff] }
  0x46   : > { %v606_v39 = vsub.f32 %v1478_v2, %v1499_v29  ;;  %v383_v42 = vadd.f32 %v1359_v33, %v361_v23  ;;  %v1118_v47 = vpack.c.bf16 %v446_v37, %v445_v28  ;;  %v607_v48 = vsub.f32 %v1492_v22, %v1505_v38 }
  0x47   : > { %v384_v49 = vadd.f32 %v1359_v33, %v362_v25  ;;  %v1517_v50 = vadd.f32 %v1359_v33, %v576_v26  ;;  %v1521_v55 = vadd.f32 %v1359_v33, %v577_v30  ;;  %v363_v57 = vmul.f32 %v1354_v32, %v341_v31  ;;  %v1033_v30 = vld [vmem:[%s1361_s7 + $0xf8] sm:$0xff] }
  0x48   : > { %v399_v53 = vmul.f32 0.5, %v383_v42  ;;  %v364_v58 = vmul.f32 %v1354_v32, %v342_v36  ;;  %1156 = vst [vmem:[%s1421_s9 + $0x20] sm:$0xff] %v1118_v47   ;;  %v578_v62 = vmul.f32 %v1030_v43, %v1354_v32  ;;  %v579_v63 = vmul.f32 %v1031_v44, %v1354_v32 }
  0x49   : > { %v400_v60 = vmul.f32 0.5, %v384_v49  ;;  %v365_v3 = vmul.f32 %v1354_v32, %v343_v45  ;;  %v385_v4 = vadd.f32 %v1359_v33, %v363_v57  ;;  %v366_v7 = vmul.f32 %v1354_v32, %v344_v52 }
  0x4a   : > { %vm431_vm10 = vcmp.ge.f32.partialorder %v399_v53, 0.5  ;;  %v386_v6 = vadd.f32 %v1359_v33, %v364_v58  ;;  %v1536_v17 = vadd.f32 %v1359_v33, %v578_v62  ;;  %v1548_v42 = vadd.f32 %v1359_v33, %v579_v63 }
  0x4b   : > { %vm432_vm11 = vcmp.ge.f32.partialorder %v400_v60, 0.5  ;;  %v447_v14 = vsel %vm431_vm10, 1.0, %v1217_v5  ;;  %v1533_v16 = vsel %vm431_vm10, 0.0, %v399_v53  ;;  %v401_v28 = vmul.f32 0.5, %v385_v4 }
  0x4c   : > { %v448_v23 = vsel %vm432_vm11, 1.0, %v1217_v5  ;;  %v1540_v25 = vsel %vm432_vm11, 0.0, %v400_v60  ;;  %v608_v26 = vsub.f32 %v1517_v50, %v1533_v16  ;;  %v402_v37 = vmul.f32 0.5, %v386_v6 }
  0x4d   : > { %v1121_v31 = vpack.c.bf16 %v448_v23, %v447_v14  ;;  %v609_v36 = vsub.f32 %v1521_v55, %v1540_v25  ;;  %vm433_vm12 = vcmp.ge.f32.partialorder %v401_v28, 0.5  ;;  %v387_v43 = vadd.f32 %v1359_v33, %v365_v3 }
  0x4e   : > { %v388_v44 = vadd.f32 %v1359_v33, %v366_v7  ;;  %v580_v45 = vmul.f32 %v1032_v19, %v1354_v32  ;;  %vm434_vm13 = vcmp.ge.f32.partialorder %v402_v37, 0.5  ;;  %v449_v47 = vsel %vm433_vm12, 1.0, %v1217_v5 }
  0x4f   : > { %1157 = vst [vmem:[%s1421_s9 + $0x28] sm:$0xff] %v1121_v31   ;;  %v1555_v49 = vsel %vm433_vm12, 0.0, %v401_v28  ;;  %v581_v52 = vmul.f32 %v1033_v30, %v1354_v32  ;;  %v450_v53 = vsel %vm434_vm13, 1.0, %v1217_v5  ;;  %v1559_v57 = vsel %vm434_vm13, 0.0, %v402_v37 }
  0x50   : > { %v610_v58 = vsub.f32 %v1536_v17, %v1555_v49  ;;  %v403_v60 = vmul.f32 0.5, %v387_v43  ;;  %v1124_v62 = vpack.c.bf16 %v450_v53, %v449_v47  ;;  %v611_v63 = vsub.f32 %v1548_v42, %v1559_v57 }
  0x51   : > { %v404_v3 = vmul.f32 0.5, %v388_v44  ;;  %v1566_v4 = vadd.f32 %v1359_v33, %v580_v45  ;;  %v1569_v6 = vadd.f32 %v1359_v33, %v581_v52  ;;  %v614_v32 = vmul.f32 0.5, %v598_v11 }
  0x52   : > { %vm435_vm14 = vcmp.ge.f32.partialorder %v403_v60, 0.5  ;;  %v615_v7 = vmul.f32 0.5, %v599_v12  ;;  %1158 = vst [vmem:[%s1421_s9 + $0x30] sm:$0xff] %v1124_v62   ;;  %v616_v33 = vmul.f32 0.5, %v600_v21  ;;  %v617_v61 = vmul.f32 0.5, %v601_v24 }
  0x53   : > { %vm436_vm15 = vcmp.ge.f32.partialorder %v404_v3, 0.5  ;;  %v451_v14 = vsel %vm435_vm14, 1.0, %v1217_v5  ;;  %v1579_v17 = vsel %vm435_vm14, 0.0, %v403_v60  ;;  %v630_v54 = vadd.f32 %v614_v32, %v1406_v8  ;;  %v785_v32 = vld [vmem:[%s1421_s9] sm:$0xff] (%p1268_p5)  }
  0x54   : > { %v452_v19 = vsel %vm436_vm15, 1.0, %v1217_v5  ;;  %v1585_v23 = vsel %vm436_vm15, 0.0, %v404_v3  ;;  %v612_v51 = vsub.f32 %v1566_v4, %v1579_v17  ;;  %v631_v28 = vadd.f32 %v615_v7, %v1408_v9  ;;  %v789_v7 = vld [vmem:[%s1421_s9 + $0x8] sm:$0xff] (%p1268_p5)   ;;  %786 = vst [vmem:[%s768_s17] sm:$0xff] (%p1268_p5), %v785_v32  }
  0x55   : > { %v1127_v11 = vpack.c.bf16 %v452_v19, %v451_v14  ;;  %v613_v12 = vsub.f32 %v1569_v6, %v1585_v23  ;;  %vm646_vm0 = vcmp.ge.f32.partialorder %v630_v54, 0.5  ;;  %v632_v21 = vadd.f32 %v616_v33, %v1416_v15  ;;  %v797_v14 = vld [vmem:[%s1421_s9 + $0x18] sm:$0xff] (%p1268_p5)   ;;  %790 = vst [vmem:[%s768_s17 + $0x8] sm:$0xff] (%p1268_p5), %v789_v7  }
  0x56   : > { %v618_v30 = vmul.f32 0.5, %v602_v41  ;;  %v619_v8 = vmul.f32 0.5, %v603_v46  ;;  %vm647_vm1 = vcmp.ge.f32.partialorder %v631_v28, 0.5  ;;  %v662_v9 = vsel %vm646_vm0, 1.0, %v1217_v5  ;;  %v805_v33 = vld [vmem:[%s1421_s9 + $0x28] sm:$0xff] (%p1268_p5)   ;;  %798 = vst [vmem:[%s768_s17 + $0x18] sm:$0xff] (%p1268_p5), %v797_v14  }
  0x57   : > { %1159 = vst [vmem:[%s1421_s9 + $0x38] sm:$0xff] %v1127_v11   ;;  %v633_v31 = vadd.f32 %v617_v61, %v1425_v20  ;;  %v620_v1 = vmul.f32 0.5, %v604_v13  ;;  %v663_v15 = vsel %vm647_vm1, 1.0, %v1217_v5  ;;  %vm648_vm2 = vcmp.ge.f32.partialorder %v632_v21, 0.5  ;;  %806 = vst [vmem:[%s768_s17 + $0x28] sm:$0xff] (%p1268_p5), %v805_v33  }
  0x58   : > { %v634_v24 = vadd.f32 %v618_v30, %v1440_v34  ;;  %v635_v27 = vadd.f32 %v619_v8, %v1449_v40  ;;  %v1130_v35 = vpack.c.bf16 %v663_v15, %v662_v9  ;;  %v664_v41 = vsel %vm648_vm2, 1.0, %v1217_v5 }
  0x59   : > { %vm649_vm3 = vcmp.ge.f32.partialorder %v633_v31, 0.5  ;;  %v621_v20 = vmul.f32 0.5, %v605_v18  ;;  %v636_v56 = vadd.f32 %v620_v1, %v1475_v0  ;;  %v622_v59 = vmul.f32 0.5, %v606_v39  ;;  %v809_v19 = vld [vmem:[%s1421_s9 + $0x30] sm:$0xff] (%p1268_p5)  }
  0x5a   : > { %v665_v46 = vsel %vm649_vm3, 1.0, %v1217_v5  ;;  %vm650_vm4 = vcmp.ge.f32.partialorder %v634_v24, 0.5  ;;  %vm651_vm5 = vcmp.ge.f32.partialorder %v635_v27, 0.5  ;;  %1160 = vst [vmem:[%s1421_s9 + $0x40] sm:$0xff] %v1130_v35   ;;  %v623_v18 = vmul.f32 0.5, %v607_v48  ;;  %810 = vst [vmem:[%s768_s17 + $0x30] sm:$0xff] (%p1268_p5), %v809_v19  }
  0x5b   : > { %v1133_v34 = vpack.c.bf16 %v665_v46, %v664_v41  ;;  %v666_v40 = vsel %vm650_vm4, 1.0, %v1217_v5  ;;  %v667_v13 = vsel %vm651_vm5, 1.0, %v1217_v5  ;;  %v637_v37 = vadd.f32 %v621_v20, %v1484_v10 }
  0x5c   : > { %v1136_v43 = vpack.c.bf16 %v667_v13, %v666_v40  ;;  %vm652_vm6 = vcmp.ge.f32.partialorder %v636_v56, 0.5  ;;  %v624_v44 = vmul.f32 0.5, %v608_v26  ;;  %v625_v10 = vmul.f32 0.5, %v609_v36 }
  0x5d   : > { %1161 = vst [vmem:[%s1421_s9 + $0x48] sm:$0xff] %v1133_v34   ;;  %vm653_vm7 = vcmp.ge.f32.partialorder %v637_v37, 0.5  ;;  %v668_v0 = vsel %vm652_vm6, 1.0, %v1217_v5  ;;  %v638_v39 = vadd.f32 %v622_v59, %v1499_v29  ;;  %v639_v22 = vadd.f32 %v623_v18, %v1505_v38 }
  0x5e   : > { %1162 = vst [vmem:[%s1421_s9 + $0x50] sm:$0xff] %v1136_v43   ;;  %v669_v2 = vsel %vm653_vm7, 1.0, %v1217_v5  ;;  %v626_v48 = vmul.f32 0.5, %v610_v58  ;;  %v640_v47 = vadd.f32 %v624_v44, %v1533_v16  ;;  %v641_v52 = vadd.f32 %v625_v10, %v1540_v25 }
  0x5f   : > { %v1139_v45 = vpack.c.bf16 %v669_v2, %v668_v0  ;;  %v627_v50 = vmul.f32 0.5, %v611_v63  ;;  %vm654_vm8 = vcmp.ge.f32.partialorder %v638_v39, 0.5  ;;  %vm655_vm9 = vcmp.ge.f32.partialorder %v639_v22, 0.5 }
  0x60   : > { %v642_v55 = vadd.f32 %v626_v48, %v1555_v49  ;;  %v628_v26 = vmul.f32 0.5, %v612_v51  ;;  %v670_v29 = vsel %vm654_vm8, 1.0, %v1217_v5  ;;  %v671_v38 = vsel %vm655_vm9, 1.0, %v1217_v5 }
  0x61   : > { %1163 = vst [vmem:[%s1421_s9 + $0x58] sm:$0xff] %v1139_v45   ;;  %vm656_vm10 = vcmp.ge.f32.partialorder %v640_v47, 0.5  ;;  %vm657_vm11 = vcmp.ge.f32.partialorder %v641_v52, 0.5  ;;  %v1142_v16 = vpack.c.bf16 %v671_v38, %v670_v29  ;;  %v643_v42 = vadd.f32 %v627_v50, %v1559_v57  ;;  %v817_v51 = vld [vmem:[%s1421_s9 + $0x40] sm:$0xff] (%p1268_p5)  }
  0x62   : > { %v672_v25 = vsel %vm656_vm10, 1.0, %v1217_v5  ;;  %v673_v36 = vsel %vm657_vm11, 1.0, %v1217_v5  ;;  %vm658_vm12 = vcmp.ge.f32.partialorder %v642_v55, 0.5  ;;  %v629_v49 = vmul.f32 0.5, %v613_v12  ;;  %818 = vst [vmem:[%s768_s17 + $0x80] sm:$0xff] (%p1268_p5), %v817_v51  }
  0x63   : > { %v1145_v53 = vpack.c.bf16 %v673_v36, %v672_v25  ;;  %v644_v58 = vadd.f32 %v628_v26, %v1579_v17  ;;  %1164 = vst [vmem:[%s1421_s9 + $0x60] sm:$0xff] %v1142_v16   ;;  %vm659_vm13 = vcmp.ge.f32.partialorder %v643_v42, 0.5  ;;  %v674_v60 = vsel %vm658_vm12, 1.0, %v1217_v5  ;;  %v801_v17 = vld [vmem:[%s1421_s9 + $0x20] sm:$0xff] (%p1268_p5)  }
  0x64   : > { %v675_v62 = vsel %vm659_vm13, 1.0, %v1217_v5  ;;  %v645_v63 = vadd.f32 %v629_v49, %v1585_v23  ;;  %802 = vst [vmem:[%s768_s17 + $0x20] sm:$0xff] (%p1268_p5), %v801_v17   ;;  %v813_v23 = vld [vmem:[%s1421_s9 + $0x38] sm:$0xff] (%p1268_p5)   ;;  %v821_v54 = vld [vmem:[%s1421_s9 + $0x48] sm:$0xff] (%p1268_p5)  }
  0x65   : > { %1165 = vst [vmem:[%s1421_s9 + $0x68] sm:$0xff] %v1145_v53   ;;  %vm660_vm14 = vcmp.ge.f32.partialorder %v644_v58, 0.5  ;;  %v1148_v3 = vpack.c.bf16 %v675_v62, %v674_v60  ;;  %814 = vst [vmem:[%s768_s17 + $0x38] sm:$0xff] (%p1268_p5), %v813_v23   ;;  %v825_v11 = vld [vmem:[%s1421_s9 + $0x50] sm:$0xff] (%p1268_p5)  }
  0x66   : > { %v676_v4 = vsel %vm660_vm14, 1.0, %v1217_v5  ;;  %vm661_vm15 = vcmp.ge.f32.partialorder %v645_v63, 0.5  ;;  %765 = sbr.rel (!%p1268_p5) target bundleno = 115 (0x73), region = 74  ;;  %822 = vst [vmem:[%s768_s17 + $0x88] sm:$0xff] (%p1268_p5), %v821_v54   ;;  %826 = vst [vmem:[%s768_s17 + $0x90] sm:$0xff] (%p1268_p5), %v825_v11  }
  0x67   : > { %1166 = vst [vmem:[%s1421_s9 + $0x70] sm:$0xff] %v1148_v3   ;;  %v677_v57 = vsel %vm661_vm15, 1.0, %v1217_v5  ;;  %v793_v5 = vld [vmem:[%s1421_s9 + $0x10] sm:$0xff] (%p1268_p5)  }
  0x68   : > { %v1151_v6 = vpack.c.bf16 %v677_v57, %v676_v4  ;;  %794 = vst [vmem:[%s768_s17 + $0x10] sm:$0xff] (%p1268_p5), %v793_v5   ;;  %v829_v12 = vld [vmem:[%s1421_s9 + $0x58] sm:$0xff] (%p1268_p5)  }
  0x69   : > { %830 = vst [vmem:[%s768_s17 + $0x98] sm:$0xff] (%p1268_p5), %v829_v12  }
  0x6a   : > { %1167 = vst [vmem:[%s1421_s9 + $0x78] sm:$0xff] %v1151_v6   ;;  %v833_v28 = vld [vmem:[%s1421_s9 + $0x60] sm:$0xff] (%p1268_p5)  }
  0x6b   : > { %834 = vst [vmem:[%s768_s17 + $0xa0] sm:$0xff] %v833_v28  }
  0x6c   : > { %v837_v61 = vld [vmem:[%s1421_s9 + $0x68] sm:$0xff]  }
  0x6d   : > { %838 = vst [vmem:[%s768_s17 + $0xa8] sm:$0xff] %v837_v61  }
  0x6e   : > { %v841_v21 = vld [vmem:[%s1421_s9 + $0x70] sm:$0xff]  }
  0x6f   : > { %842 = vst [vmem:[%s768_s17 + $0xb0] sm:$0xff] %v841_v21  }
  0x71   : > { %v845_v30 = vld [vmem:[%s1421_s9 + $0x78] sm:$0xff]  }
  0x72   : > { %846 = vst [vmem:[%s768_s17 + $0xb8] sm:$0xff] %v845_v30  }
  0x73 PF: > { %p10_p10 = scmp.ge.s32.totalorder %s1255_s16, 4   ;;  %s1700_s12 = smov %s1211_s13 }
  0x74   : > { %s1701_s13 = smov %s1266_s19  ;;  %s1702_s14 = smov %s1255_s16 }
  0x75   :  { %12 = sbr.rel (!%p10_p10) target bundleno = 2 (0x2), region = 148 }

// kernel: ssa_rel_scl_forward.7
= control target key start
LH: loop header
LB: loop body
LE: loop exit
PB: predicated region body
PF: predicated region fallthrough
CT: control target
= control target key end

     0   :  { %s1695_s15 = smov 0   ;;  %s2257_s0 = inlined_call_operand.vmem [shape: bf16[512,128], index: 0, kind: input, shape index: {}]   ;;  %s2258_s1 = inlined_call_operand.vmem [shape: bf16[128,384], index: 1, kind: input, shape index: {}]   ;;  %s2259_s2 = inlined_call_operand.vmem [shape: f32[512,384], index: 2, kind: output, shape index: {0}]   ;;  %s2260_s3 = inlined_call_operand.vmem [shape: f32[2,1,384], index: 3, kind: output, shape index: {1}]   ;;  %s2261_s4 = inlined_call_operand.vmem [shape: f32[2,1,384], index: 4, kind: output, shape index: {2}]  }
   0x1 LB: > { %s1701_s16 = sadd.s32 4294967295, %s1666_s15   ;;  %p1465_p0 = scmp.ge.s32.totalorder %s1666_s15, 1  ;;  %s1666_s15 = sphi %s1695_s15, %s15_s15  }
   0x2   : > { %p168_p1 = scmp.lt.s32.totalorder %s1666_s15, 3 }
   0x4   : > { %p169_p2 = pnand %p1465_p0, %p168_p1 }
   0x5   : > { %s1466_s19 = sshll.u32 (!%p169_p2), %s1701_s16, 5  ;;  %p216_p4 = scmp.lt.s32.totalorder (!%p169_p2), %s1701_s16, 1 }
   0x6   : > { %172 = sbr.rel (%p169_p2) target bundleno = 374 (0x176), region = 28  ;;  %p204_p3 = scmp.lt.s32.totalorder (!%p169_p2), %s1466_s19, 63 }
   0xb   : > { %v1612_v0 = vld [vmem:[%s2258_s1 + $0xac] ss:$12 sps:$4 sm:$0xff]   ;;  %v1614_v1 = vld [vmem:[%s2258_s1 + $0xa8] ss:$12 sps:$4 sm:$0xff]   ;;  %v1668_v2 = vmov 0   ;;  %s2263_s19 = smov (!%p204_p3, %s1466_s19), 63 }
   0xc   : > { %545 = vmatprep.mubr.bf16.mxu0 %v1668_v2  ;;  %665 = vmatprep.mubr.bf16.mxu1 %v1668_v2  ;;  %v1615_v3 = vld [vmem:[%s2258_s1 + $0x94] ss:$12 sps:$4 sm:$0xff]   ;;  %v1617_v4 = vld [vmem:[%s2258_s1 + $0x90] ss:$12 sps:$4 sm:$0xff]   ;;  %s1467_s28 = sshll.u32 %s2263_s19, 2  ;;  %s1600_s25 = smul.u32 24, %s2263_s19 }
   0xd   : > { %513 = vmatprep.subr.bf16.mxu0 %v1612_v0  ;;  %1584 = vmatprep.subr.bf16.mxu1 %v1612_v0  ;;  %v1618_v5 = vld [vmem:[%s2258_s1 + $0x7c] ss:$12 sps:$4 sm:$0xff]   ;;  %v1620_v6 = vld [vmem:[%s2258_s1 + $0x78] ss:$12 sps:$4 sm:$0xff]   ;;  %s1735_s9 = scalar_lea.vmem %s2257_s0, %s1467_s28  ;;  %v1623_v8 = vld [vmem:[%s2258_s1 + $0x60] ss:$12 sps:$4 sm:$0xff]  }
   0xe   : > { %514 = vmatpush1.bf16.msra.mxu0 %v1614_v1  ;;  %1592 = vmatpush1.bf16.msra.mxu1 %v1614_v1  ;;  %v1621_v7 = vld [vmem:[%s2258_s1 + $0x64] ss:$12 sps:$4 sm:$0xff]   ;;  %v1624_v9 = vld [vmem:[%s2258_s1 + $0x4c] ss:$12 sps:$4 sm:$0xff]   ;;  %v1626_v10 = vld [vmem:[%s2258_s1 + $0x48] ss:$12 sps:$4 sm:$0xff]   ;;  %s1830_s28 = scalar_lea.vmem %s2259_s2, %s1600_s25 }
   0xf   : > { %515 = vmatprep.subr.bf16.mxu0 %v1615_v3  ;;  %1585 = vmatprep.subr.bf16.mxu1 %v1615_v3  ;;  %v1627_v11 = vld [vmem:[%s2258_s1 + $0x34] ss:$12 sps:$4 sm:$0xff]   ;;  %v1629_v12 = vld [vmem:[%s2258_s1 + $0x30] ss:$12 sps:$4 sm:$0xff]   ;;  %v1632_v14 = vld [vmem:[%s2258_s1 + $0x18] ss:$12 sps:$4 sm:$0xff]  }
  0x10   : > { %v1630_v13 = vld [vmem:[%s2258_s1 + $0x1c] ss:$12 sps:$4 sm:$0xff]   ;;  %v1633_v15 = vld [vmem:[%s2258_s1 + $0x4] ss:$12 sps:$4 sm:$0xff]   ;;  %v1635_v16 = vld [vmem:[%s2258_s1] ss:$12 sps:$4 sm:$0xff]  }
  0x11   : > { %v1638_v17 = vld [vmem:[%s2258_s1 + $0xb0] ss:$12 sps:$4 sm:$0xff]   ;;  %v1636_v18 = vld [vmem:[%s1735_s9] sm:$0xff]   ;;  %v1640_v22 = vld [vmem:[%s1735_s9 + $0x8] sm:$0xff]   ;;  %s2265_s16 = smov (!%p216_p4, %s1701_s16), 1 }
  0x12   : > { %516 = vmatpush1.bf16.msra.mxu0 %v1617_v4  ;;  %1593 = vmatpush1.bf16.msra.mxu1 %v1617_v4  ;;  %v1769_v19 = vld [vmem:[%s1735_s9 + $0x60] sm:$0xff]   ;;  %v1782_v23 = vld [vmem:[%s1735_s9 + $0x68] sm:$0xff]   ;;  %v1646_v25 = vld [vmem:[%s2258_s1 + $0x50] ss:$12 sps:$4 sm:$0xff]   ;;  %s1601_s19 = smul.u32 3, %s2265_s16 }
  0x13   : > { %517 = vmatprep.subr.bf16.mxu0 %v1618_v5  ;;  %1586 = vmatprep.subr.bf16.mxu1 %v1618_v5  ;;  %v1639_v20 = vld [vmem:[%s2258_s1 + $0x98] ss:$12 sps:$4 sm:$0xff]   ;;  %v1642_v21 = vld [vmem:[%s2258_s1 + $0x80] ss:$12 sps:$4 sm:$0xff]   ;;  %v1643_v24 = vld [vmem:[%s2258_s1 + $0x68] ss:$12 sps:$4 sm:$0xff]  }
  0x14   : > { %v1644_v26 = vld [vmem:[%s1735_s9 + $0x10] sm:$0xff]   ;;  %v1647_v28 = vld [vmem:[%s2258_s1 + $0x38] ss:$12 sps:$4 sm:$0xff]   ;;  %v1650_v29 = vld [vmem:[%s2258_s1 + $0x20] ss:$12 sps:$4 sm:$0xff]   ;;  %s219_s30 = scalar_lea.vmem %s2260_s3, %s1601_s19  ;;  %s223_s7 = scalar_lea.vmem %s2261_s4, %s1601_s19 }
  0x15   : > { %v1645_v27 = vld [vmem:[%s1735_s9 + $0x70] sm:$0xff]   ;;  %v1648_v30 = vld [vmem:[%s1735_s9 + $0x18] sm:$0xff]   ;;  %v1652_v33 = vld [vmem:[%s1735_s9 + $0x20] sm:$0xff]  }
  0x16   : > { %518 = vmatpush1.bf16.msra.mxu0 %v1620_v6  ;;  %1594 = vmatpush1.bf16.msra.mxu1 %v1620_v6  ;;  %v1649_v31 = vld [vmem:[%s1735_s9 + $0x78] sm:$0xff]   ;;  %v1651_v32 = vld [vmem:[%s2258_s1 + $0x8] ss:$12 sps:$4 sm:$0xff]   ;;  %v1656_v37 = vld [vmem:[%s1735_s9 + $0x40] sm:$0xff]  }
  0x17   : > { %519 = vmatprep.subr.bf16.mxu0 %v1621_v7  ;;  %1587 = vmatprep.subr.bf16.mxu1 %v1621_v7  ;;  %v1653_v34 = vld [vmem:[%s1735_s9 + $0x28] sm:$0xff]   ;;  %v1654_v35 = vld [vmem:[%s1735_s9 + $0x30] sm:$0xff]   ;;  %v1655_v36 = vld [vmem:[%s1735_s9 + $0x38] sm:$0xff]  }
  0x18   : > { %v1657_v38 = vld [vmem:[%s1735_s9 + $0x48] sm:$0xff]   ;;  %v1658_v39 = vld [vmem:[%s1735_s9 + $0x50] sm:$0xff]   ;;  %v1659_v40 = vld [vmem:[%s1735_s9 + $0x58] sm:$0xff]  }
  0x1a   : > { %520 = vmatpush1.bf16.msra.mxu0 %v1623_v8  ;;  %1595 = vmatpush1.bf16.msra.mxu1 %v1623_v8 }
  0x1b   : > { %521 = vmatprep.subr.bf16.mxu0 %v1624_v9  ;;  %1588 = vmatprep.subr.bf16.mxu1 %v1624_v9 }
  0x1e   : > { %522 = vmatpush1.bf16.msra.mxu0 %v1626_v10  ;;  %1596 = vmatpush1.bf16.msra.mxu1 %v1626_v10 }
  0x1f   : > { %523 = vmatprep.subr.bf16.mxu0 %v1627_v11  ;;  %1589 = vmatprep.subr.bf16.mxu1 %v1627_v11 }
  0x22   : > { %524 = vmatpush1.bf16.msra.mxu0 %v1629_v12  ;;  %1597 = vmatpush1.bf16.msra.mxu1 %v1629_v12 }
  0x23   : > { %525 = vmatprep.subr.bf16.mxu0 %v1630_v13  ;;  %1590 = vmatprep.subr.bf16.mxu1 %v1630_v13 }
  0x26   : > { %526 = vmatpush1.bf16.msra.mxu0 %v1632_v14  ;;  %1598 = vmatpush1.bf16.msra.mxu1 %v1632_v14 }
  0x27   : > { %527 = vmatprep.subr.bf16.mxu0 %v1633_v15  ;;  %1591 = vmatprep.subr.bf16.mxu1 %v1633_v15 }
  0x2a   : > { %528 = vmatpush1.bf16.msra.mxu0 %v1635_v16  ;;  %1599 = vmatpush1.bf16.msra.mxu1 %v1635_v16 }
  0x2b   : > { %1536 = vmatprep.subr.bf16.mxu1 %v1638_v17 }
  0x2d   : > { %546 = vmatmul.mubr.bf16.vlgmr.msra.gmra.mxu0 %v1636_v18  ;;  %666 = vmatmul.mubr.bf16.vlgmr.msra.gmra.mxu1 %v1769_v19 }
  0x2e   : > { %1537 = vmatpush3.bf16.msra.mxu1 %v1638_v17  ;;  %555 = vmatprep.mubr.bf16.mxu0 %v1668_v2 }
  0x2f   : > { %1538 = vmatprep.subr.bf16.mxu1 %v1639_v20  ;;  %675 = vmatprep.mubr.bf16.mxu1 %v1668_v2 }
  0x32   : > { %1539 = vmatpush3.bf16.msra.mxu1 %v1639_v20 }
  0x33   : > { %1540 = vmatprep.subr.bf16.mxu1 %v1642_v21 }
  0x35   : > { %556 = vmatmul.mubr.bf16.gmra.mxu0 %v1640_v22  ;;  %676 = vmatmul.mubr.bf16.gmra.mxu1 %v1782_v23 }
  0x36   : > { %1541 = vmatpush3.bf16.msra.mxu1 %v1642_v21  ;;  %565 = vmatprep.mubr.bf16.mxu0 %v1668_v2 }
  0x37   : > { %1542 = vmatprep.subr.bf16.mxu1 %v1643_v24  ;;  %685 = vmatprep.mubr.bf16.mxu1 %v1668_v2 }
  0x3a   : > { %1543 = vmatpush3.bf16.msra.mxu1 %v1643_v24 }
  0x3b   : > { %1544 = vmatprep.subr.bf16.mxu1 %v1646_v25 }
  0x3d   : > { %566 = vmatmul.mubr.bf16.gmra.mxu0 %v1644_v26  ;;  %686 = vmatmul.mubr.bf16.gmra.mxu1 %v1645_v27 }
  0x3e   : > { %1545 = vmatpush3.bf16.msra.mxu1 %v1646_v25  ;;  %575 = vmatprep.mubr.bf16.mxu0 %v1668_v2 }
  0x3f   : > { %1546 = vmatprep.subr.bf16.mxu1 %v1647_v28  ;;  %695 = vmatprep.mubr.bf16.mxu1 %v1668_v2 }
  0x42   : > { %1547 = vmatpush3.bf16.msra.mxu1 %v1647_v28 }
  0x43   : > { %1548 = vmatprep.subr.bf16.mxu1 %v1650_v29 }
  0x45   : > { %576 = vmatmul.mubr.bf16.gmra.mxu0 %v1648_v30  ;;  %696 = vmatmul.mubr.bf16.gmra.mxu1 %v1649_v31 }
  0x46   : > { %1549 = vmatpush3.bf16.msra.mxu1 %v1650_v29  ;;  %585 = vmatprep.mubr.bf16.mxu0 %v1668_v2 }
  0x47   : > { %1550 = vmatprep.subr.bf16.mxu1 %v1651_v32  ;;  %1552 = vmatprep.mubr.bf16.mxu1 %v1636_v18 }
  0x4a   : > { %1551 = vmatpush3.bf16.msra.mxu1 %v1651_v32 }
  0x4d   : > { %586 = vmatmul.mubr.bf16.gmra.mxu0 %v1652_v33  ;;  %1553 = vmatmul.mubr.bf16.vlgmr.msra.gmra.mxu1 %v1640_v22 }
  0x4e   : > { %595 = vmatprep.mubr.bf16.mxu0 %v1668_v2  ;;  %1556 = vmatprep.mubr.bf16.mxu1 %v1644_v26 }
  0x55   : > { %596 = vmatmul.mubr.bf16.gmra.mxu0 %v1653_v34  ;;  %1557 = vmatmul.mubr.bf16.gmra.mxu1 %v1648_v30 }
  0x56   : > { %605 = vmatprep.mubr.bf16.mxu0 %v1668_v2  ;;  %1560 = vmatprep.mubr.bf16.mxu1 %v1652_v33 }
  0x5d   : > { %606 = vmatmul.mubr.bf16.gmra.mxu0 %v1654_v35  ;;  %1561 = vmatmul.mubr.bf16.gmra.mxu1 %v1653_v34 }
  0x5e   : > { %615 = vmatprep.mubr.bf16.mxu0 %v1668_v2  ;;  %1564 = vmatprep.mubr.bf16.mxu1 %v1654_v35 }
  0x65   : > { %616 = vmatmul.mubr.bf16.gmra.mxu0 %v1655_v36  ;;  %1565 = vmatmul.mubr.bf16.gmra.mxu1 %v1655_v36 }
  0x66   : > { %625 = vmatprep.mubr.bf16.mxu0 %v1668_v2  ;;  %1568 = vmatprep.mubr.bf16.mxu1 %v1656_v37 }
  0x6d   : > { %626 = vmatmul.mubr.bf16.gmra.mxu0 %v1656_v37  ;;  %1569 = vmatmul.mubr.bf16.gmra.mxu1 %v1657_v38 }
  0x6e   : > { %635 = vmatprep.mubr.bf16.mxu0 %v1668_v2  ;;  %1572 = vmatprep.mubr.bf16.mxu1 %v1658_v39 }
  0x75   : > { %636 = vmatmul.mubr.bf16.gmra.mxu0 %v1657_v38  ;;  %1573 = vmatmul.mubr.bf16.gmra.mxu1 %v1659_v40 }
  0x76   : > { %645 = vmatprep.mubr.bf16.mxu0 %v1668_v2  ;;  %1576 = vmatprep.mubr.bf16.mxu1 %v1769_v19 }
  0x7d   : > { %646 = vmatmul.mubr.bf16.gmra.mxu0 %v1658_v39  ;;  %1577 = vmatmul.mubr.bf16.gmra.mxu1 %v1782_v23 }
  0x7e   : > { %655 = vmatprep.mubr.bf16.mxu0 %v1668_v2  ;;  %1580 = vmatprep.mubr.bf16.mxu1 %v1645_v27 }
  0x85   : > { %656 = vmatmul.mubr.bf16.gmra.mxu0 %v1659_v40  ;;  %1581 = vmatmul.mubr.bf16.gmra.mxu1 %v1649_v31 }
  0xed   : > { %v1832_v41 = vpop.f32.mrf.mxu0  ;;  %v1834_v42 = vpop.f32.mrf.mxu1 }
  0xee   : > { %867 = vst [vmem:[%s1830_s28] sm:$0xff] %v1832_v41  ;;  %939 = vst [vmem:[%s1830_s28 + $0x240] sm:$0xff] %v1834_v42  ;;  %v1106_v21 = vmul.f32 %v1832_v41, %v1832_v41 }
  0xef   : > { %v1840_v43 = vpop.f32.mrf.mxu0  ;;  %v1842_v44 = vpop.f32.mrf.mxu1 }
  0xf0   : > { %868 = vst [vmem:[%s1830_s28 + $0x8] sm:$0xff] %v1840_v43  ;;  %940 = vst [vmem:[%s1830_s28 + $0x248] sm:$0xff] %v1842_v44  ;;  %v1107_v27 = vmul.f32 %v1840_v43, %v1840_v43 }
  0xf1   : > { %v1848_v45 = vpop.f32.mrf.mxu0  ;;  %v1850_v46 = vpop.f32.mrf.mxu1 }
  0xf2   : > { %870 = vst [vmem:[%s1830_s28 + $0x18] sm:$0xff] %v1848_v45  ;;  %942 = vst [vmem:[%s1830_s28 + $0x258] sm:$0xff] %v1850_v46  ;;  %v1109_v15 = vmul.f32 %v1848_v45, %v1848_v45  ;;  %v963_v28 = vadd.f32 %v1848_v45, %v1832_v41 }
  0xf3   : > { %v1856_v47 = vpop.f32.mrf.mxu0  ;;  %v1858_v48 = vpop.f32.mrf.mxu1 }
  0xf4   : > { %871 = vst [vmem:[%s1830_s28 + $0x20] sm:$0xff] %v1856_v47  ;;  %943 = vst [vmem:[%s1830_s28 + $0x260] sm:$0xff] %v1858_v48  ;;  %v1110_v19 = vmul.f32 %v1856_v47, %v1856_v47  ;;  %v1202_v31 = vadd.f32 %v1109_v15, %v1106_v21  ;;  %v1000_v37 = vadd.f32 %v1856_v47, %v1840_v43 }
  0xf5   : > { %v1864_v49 = vpop.f32.mrf.mxu0  ;;  %v1866_v50 = vpop.f32.mrf.mxu1 }
  0xf6   : > { %873 = vst [vmem:[%s1830_s28 + $0x30] sm:$0xff] %v1864_v49  ;;  %945 = vst [vmem:[%s1830_s28 + $0x270] sm:$0xff] %v1866_v50  ;;  %v1112_v22 = vmul.f32 %v1864_v49, %v1864_v49  ;;  %v1239_v38 = vadd.f32 %v1110_v19, %v1107_v27  ;;  %v964_v41 = vadd.f32 %v963_v28, %v1864_v49 }
  0xf7   : > { %v1872_v51 = vpop.f32.mrf.mxu0  ;;  %v1874_v52 = vpop.f32.mrf.mxu1  ;;  %v2021_v49 = vmul.f32 %v1834_v42, %v1834_v42 }
  0xf8   : > { %874 = vst [vmem:[%s1830_s28 + $0x38] sm:$0xff] %v1872_v51  ;;  %946 = vst [vmem:[%s1830_s28 + $0x278] sm:$0xff] %v1874_v52  ;;  %v1113_v29 = vmul.f32 %v1872_v51, %v1872_v51  ;;  %v1203_v45 = vadd.f32 %v1202_v31, %v1112_v22  ;;  %v1001_v43 = vadd.f32 %v1000_v37, %v1872_v51 }
  0xf9   : > { %v1880_v53 = vpop.f32.mrf.mxu0  ;;  %v1882_v54 = vpop.f32.mrf.mxu1 }
  0xfa   : > { %876 = vst [vmem:[%s1830_s28 + $0x48] sm:$0xff] %v1880_v53  ;;  %948 = vst [vmem:[%s1830_s28 + $0x288] sm:$0xff] %v1882_v54  ;;  %v1115_v32 = vmul.f32 %v1880_v53, %v1880_v53  ;;  %v1240_v47 = vadd.f32 %v1239_v38, %v1113_v29 }
  0xfb   : > { %v1888_v55 = vpop.f32.mrf.mxu0  ;;  %v1890_v56 = vpop.f32.mrf.mxu1 }
  0xfc   : > { %877 = vst [vmem:[%s1830_s28 + $0x50] sm:$0xff] %v1888_v55  ;;  %949 = vst [vmem:[%s1830_s28 + $0x290] sm:$0xff] %v1890_v56  ;;  %v1116_v39 = vmul.f32 %v1888_v55, %v1888_v55 }
  0xfd   : > { %v1896_v57 = vpop.f32.mrf.mxu0  ;;  %v1898_v58 = vpop.f32.mrf.mxu1 }
  0xfe   : > { %879 = vst [vmem:[%s1830_s28 + $0x60] sm:$0xff] %v1896_v57  ;;  %951 = vst [vmem:[%s1830_s28 + $0x2a0] sm:$0xff] %v1898_v58 }
  0xff   : > { %v1904_v59 = vpop.f32.mrf.mxu0  ;;  %v1906_v60 = vpop.f32.mrf.mxu1 }
 0x100   : > { %880 = vst [vmem:[%s1830_s28 + $0x68] sm:$0xff] %v1904_v59  ;;  %952 = vst [vmem:[%s1830_s28 + $0x2a8] sm:$0xff] %v1906_v60  ;;  %v1119_v27 = vmul.f32 %v1904_v59, %v1904_v59 }
 0x101   : > { %v1912_v61 = vpop.f32.mrf.mxu0  ;;  %v1914_v62 = vpop.f32.mrf.mxu1 }
 0x102   : > { %882 = vst [vmem:[%s1830_s28 + $0x78] sm:$0xff] %v1912_v61  ;;  %954 = vst [vmem:[%s1830_s28 + $0x2b8] sm:$0xff] %v1914_v62 }
 0x103   : > { %v1920_v63 = vpop.f32.mrf.mxu0  ;;  %v1922_v0 = vpop.f32.mrf.mxu1 }
 0x104   : > { %883 = vst [vmem:[%s1830_s28 + $0x80] sm:$0xff] %v1920_v63  ;;  %955 = vst [vmem:[%s1830_s28 + $0x2c0] sm:$0xff] %v1922_v0 }
 0x105   : > { %v1928_v1 = vpop.f32.mrf.mxu0  ;;  %v1930_v2 = vpop.f32.mrf.mxu1 }
 0x106   : > { %885 = vst [vmem:[%s1830_s28 + $0x90] sm:$0xff] %v1928_v1  ;;  %957 = vst [vmem:[%s1830_s28 + $0x2d0] sm:$0xff] %v1930_v2 }
 0x107   : > { %v1936_v3 = vpop.f32.mrf.mxu0  ;;  %v1938_v4 = vpop.f32.mrf.mxu1 }
 0x108   : > { %886 = vst [vmem:[%s1830_s28 + $0x98] sm:$0xff] %v1936_v3  ;;  %958 = vst [vmem:[%s1830_s28 + $0x2d8] sm:$0xff] %v1938_v4 }
 0x109   : > { %v1944_v5 = vpop.f32.mrf.mxu0  ;;  %v1946_v6 = vpop.f32.mrf.mxu1 }
 0x10a   : > { %888 = vst [vmem:[%s1830_s28 + $0xa8] sm:$0xff] %v1944_v5  ;;  %960 = vst [vmem:[%s1830_s28 + $0x2e8] sm:$0xff] %v1946_v6 }
 0x10b   : > { %v1952_v7 = vpop.f32.mrf.mxu0  ;;  %v1954_v8 = vpop.f32.mrf.mxu1 }
 0x10c   : > { %889 = vst [vmem:[%s1830_s28 + $0xb0] sm:$0xff] %v1952_v7  ;;  %961 = vst [vmem:[%s1830_s28 + $0x2f0] sm:$0xff] %v1954_v8 }
 0x10d   : > { %v1960_v9 = vpop.f32.mrf.mxu0  ;;  %v1554_v10 = vpop.f32.mrf.mxu1 }
 0x10e   : > { %891 = vst [vmem:[%s1830_s28 + $0xc0] sm:$0xff] %v1960_v9  ;;  %875 = vst [vmem:[%s1830_s28 + $0x40] sm:$0xff] %v1554_v10  ;;  %v1114_v23 = vmul.f32 %v1554_v10, %v1554_v10 }
 0x10f   : > { %v1965_v11 = vpop.f32.mrf.mxu0  ;;  %v740_v12 = vpop.f32.mrf.mxu1 }
 0x110   : > { %892 = vst [vmem:[%s1830_s28 + $0xc8] sm:$0xff] %v1965_v11  ;;  %869 = vst [vmem:[%s1830_s28 + $0x10] sm:$0xff] %v740_v12  ;;  %v1108_v16 = vmul.f32 %v740_v12, %v740_v12 }
 0x111   : > { %v1970_v13 = vpop.f32.mrf.mxu0  ;;  %v1555_v14 = vpop.f32.mrf.mxu1 }
 0x112   : > { %894 = vst [vmem:[%s1830_s28 + $0xd8] sm:$0xff] %v1970_v13  ;;  %878 = vst [vmem:[%s1830_s28 + $0x58] sm:$0xff] %v1555_v14  ;;  %v1117_v33 = vmul.f32 %v1555_v14, %v1555_v14 }
 0x113   : > { %v1977_v17 = vpop.f32.mrf.mxu0  ;;  %v743_v18 = vpop.f32.mrf.mxu1 }
 0x114   : > { %895 = vst [vmem:[%s1830_s28 + $0xe0] sm:$0xff] %v1977_v17  ;;  %872 = vst [vmem:[%s1830_s28 + $0x28] sm:$0xff] %v743_v18  ;;  %v1037_v20 = vadd.f32 %v743_v18, %v740_v12  ;;  %v1111_v24 = vmul.f32 %v743_v18, %v743_v18  ;;  %v1118_v18 = vmul.f32 %v1896_v57, %v1896_v57 }
 0x115   : > { %v1988_v25 = vpop.f32.mrf.mxu0  ;;  %v1558_v26 = vpop.f32.mrf.mxu1 }
 0x116   : > { %v1038_v30 = vadd.f32 %v1554_v10, %v1037_v20  ;;  %897 = vst [vmem:[%s1830_s28 + $0xf0] sm:$0xff] %v1988_v25  ;;  %887 = vst [vmem:[%s1830_s28 + $0xa0] sm:$0xff] %v1558_v26  ;;  %v1276_v34 = vadd.f32 %v1111_v24, %v1108_v16  ;;  %v1204_v20 = vadd.f32 %v1203_v45, %v1115_v32 }
 0x117   : > { %v2001_v35 = vpop.f32.mrf.mxu0  ;;  %v756_v36 = vpop.f32.mrf.mxu1  ;;  %v1241_v24 = vadd.f32 %v1240_v47, %v1116_v39  ;;  %v1126_v29 = vmul.f32 %v1558_v26, %v1558_v26  ;;  %v1124_v39 = vmul.f32 %v1928_v1, %v1928_v1 }
 0x118   : > { %898 = vst [vmem:[%s1830_s28 + $0xf8] sm:$0xff] %v2001_v35  ;;  %881 = vst [vmem:[%s1830_s28 + $0x70] sm:$0xff] %v756_v36  ;;  %v1039_v40 = vadd.f32 %v1555_v14, %v1038_v30  ;;  %v1277_v10 = vadd.f32 %v1276_v34, %v1114_v23  ;;  %v1120_v12 = vmul.f32 %v756_v36, %v756_v36 }
 0x119   : > { %v2011_v15 = vpop.f32.mrf.mxu0  ;;  %v1559_v16 = vpop.f32.mrf.mxu1  ;;  %v965_v14 = vadd.f32 %v964_v41, %v1880_v53  ;;  %v1002_v23 = vadd.f32 %v1001_v43, %v1888_v55  ;;  %v1121_v53 = vmul.f32 %v1912_v61, %v1912_v61  ;;  %v1205_v34 = vadd.f32 %v1204_v20, %v1118_v18 }
 0x11a   : > { %v1040_v19 = vadd.f32 %v1039_v40, %v756_v36  ;;  %900 = vst [vmem:[%s1830_s28 + $0x108] sm:$0xff] %v2011_v15  ;;  %890 = vst [vmem:[%s1830_s28 + $0xb8] sm:$0xff] %v1559_v16  ;;  %v1278_v21 = vadd.f32 %v1277_v10, %v1117_v33  ;;  %v1122_v36 = vmul.f32 %v1920_v63, %v1920_v63 }
 0x11b   : > { %v2024_v22 = vpop.f32.mrf.mxu0  ;;  %v759_v51 = vpop.f32.mrf.mxu1  ;;  %v966_v55 = vadd.f32 %v965_v14, %v1896_v57  ;;  %v1003_v38 = vadd.f32 %v1002_v23, %v1904_v59  ;;  %v1129_v40 = vmul.f32 %v1559_v16, %v1559_v16  ;;  %v1242_v57 = vadd.f32 %v1241_v24, %v1119_v27 }
 0x11c   : > { %901 = vst [vmem:[%s1830_s28 + $0x110] sm:$0xff] %v2024_v22  ;;  %884 = vst [vmem:[%s1830_s28 + $0x88] sm:$0xff] %v759_v51  ;;  %v1041_v28 = vadd.f32 %v1040_v19, %v759_v51  ;;  %v1279_v30 = vadd.f32 %v1278_v21, %v1120_v12  ;;  %v1123_v31 = vmul.f32 %v759_v51, %v759_v51 }
 0x11d   : > { %v2034_v32 = vpop.f32.mrf.mxu0  ;;  %v1562_v33 = vpop.f32.mrf.mxu1  ;;  %v967_v12 = vadd.f32 %v966_v55, %v1912_v61  ;;  %v1206_v43 = vadd.f32 %v1205_v34, %v1121_v53  ;;  %v1004_v47 = vadd.f32 %v1003_v38, %v1920_v63  ;;  %v1243_v21 = vadd.f32 %v1242_v57, %v1122_v36 }
 0x11e   : > { %v1042_v37 = vadd.f32 %v1558_v26, %v1041_v28  ;;  %903 = vst [vmem:[%s1830_s28 + $0x120] sm:$0xff] %v2034_v32  ;;  %899 = vst [vmem:[%s1830_s28 + $0x100] sm:$0xff] %v1562_v33  ;;  %v1280_v41 = vadd.f32 %v1279_v30, %v1123_v31  ;;  %v1125_v26 = vmul.f32 %v1936_v3, %v1936_v3 }
 0x11f   : > { %v2045_v45 = vpop.f32.mrf.mxu0  ;;  %v772_v10 = vpop.f32.mrf.mxu1  ;;  %v968_v61 = vadd.f32 %v967_v12, %v1928_v1  ;;  %v1127_v51 = vmul.f32 %v1944_v5, %v1944_v5  ;;  %v1005_v63 = vadd.f32 %v1004_v47, %v1936_v3  ;;  %v1128_v24 = vmul.f32 %v1952_v7, %v1952_v7 }
 0x120   : > { %904 = vst [vmem:[%s1830_s28 + $0x128] sm:$0xff] %v2045_v45  ;;  %893 = vst [vmem:[%s1830_s28 + $0xd0] sm:$0xff] %v772_v10  ;;  %v1043_v59 = vadd.f32 %v1559_v16, %v1042_v37  ;;  %v1281_v18 = vadd.f32 %v1280_v41, %v1126_v29  ;;  %v1132_v19 = vmul.f32 %v772_v10, %v772_v10 }
 0x121   : > { %v2054_v14 = vpop.f32.mrf.mxu0  ;;  %v1563_v20 = vpop.f32.mrf.mxu1  ;;  %v1207_v16 = vadd.f32 %v1206_v43, %v1124_v39  ;;  %v1244_v29 = vadd.f32 %v1243_v21, %v1125_v26  ;;  %v969_v1 = vadd.f32 %v968_v61, %v1944_v5  ;;  %v1130_v30 = vmul.f32 %v1960_v9, %v1960_v9 }
 0x122   : > { %v1044_v23 = vadd.f32 %v1043_v59, %v772_v10  ;;  %906 = vst [vmem:[%s1830_s28 + $0x138] sm:$0xff] %v2054_v14  ;;  %902 = vst [vmem:[%s1830_s28 + $0x118] sm:$0xff] %v1563_v20  ;;  %v1282_v27 = vadd.f32 %v1281_v18, %v1129_v40  ;;  %v1131_v3 = vmul.f32 %v1965_v11, %v1965_v11 }
 0x123   : > { %v2065_v28 = vpop.f32.mrf.mxu0  ;;  %v775_v53 = vpop.f32.mrf.mxu1  ;;  %v1138_v55 = vmul.f32 %v1562_v33, %v1562_v33  ;;  %v1208_v39 = vadd.f32 %v1207_v16, %v1127_v51  ;;  %v1006_v5 = vadd.f32 %v1005_v63, %v1952_v7  ;;  %v1133_v40 = vmul.f32 %v1970_v13, %v1970_v13 }
 0x124   : > { %907 = vst [vmem:[%s1830_s28 + $0x140] sm:$0xff] %v2065_v28  ;;  %896 = vst [vmem:[%s1830_s28 + $0xe8] sm:$0xff] %v775_v53  ;;  %v1045_v31 = vadd.f32 %v1044_v23, %v775_v53  ;;  %v1283_v34 = vadd.f32 %v1282_v27, %v1132_v19  ;;  %v1135_v36 = vmul.f32 %v775_v53, %v775_v53 }
 0x125   : > { %v2075_v37 = vpop.f32.mrf.mxu0  ;;  %v1566_v38 = vpop.f32.mrf.mxu1  ;;  %v1245_v10 = vadd.f32 %v1244_v29, %v1128_v24  ;;  %v1134_v57 = vmul.f32 %v1977_v17, %v1977_v17  ;;  %v1141_v12 = vmul.f32 %v1563_v20, %v1563_v20  ;;  %v970_v47 = vadd.f32 %v969_v1, %v1960_v9 }
 0x126   : > { %v1046_v41 = vadd.f32 %v1562_v33, %v1045_v31  ;;  %909 = vst [vmem:[%s1830_s28 + $0x150] sm:$0xff] %v2075_v37  ;;  %911 = vst [vmem:[%s1830_s28 + $0x160] sm:$0xff] %v1566_v38  ;;  %v1284_v26 = vadd.f32 %v1283_v34, %v1135_v36  ;;  %v1209_v7 = vadd.f32 %v1208_v39, %v1130_v30 }
 0x127   : > { %v2085_v59 = vpop.f32.mrf.mxu0  ;;  %v788_v43 = vpop.f32.mrf.mxu1  ;;  %v1136_v33 = vmul.f32 %v1988_v25, %v1988_v25  ;;  %v1007_v19 = vadd.f32 %v1006_v5, %v1965_v11  ;;  %v1246_v21 = vadd.f32 %v1245_v10, %v1131_v3  ;;  %v971_v9 = vadd.f32 %v970_v47, %v1970_v13 }
 0x128   : > { %910 = vst [vmem:[%s1830_s28 + $0x158] sm:$0xff] %v2085_v59  ;;  %905 = vst [vmem:[%s1830_s28 + $0x130] sm:$0xff] %v788_v43  ;;  %v1047_v18 = vadd.f32 %v1563_v20, %v1046_v41  ;;  %v1285_v61 = vadd.f32 %v1284_v26, %v1138_v55  ;;  %v1144_v51 = vmul.f32 %v788_v43, %v788_v43 }
 0x129   : > { %v2094_v23 = vpop.f32.mrf.mxu0  ;;  %v1567_v16 = vpop.f32.mrf.mxu1  ;;  %v1210_v63 = vadd.f32 %v1209_v7, %v1133_v40  ;;  %v1137_v24 = vmul.f32 %v2001_v35, %v2001_v35  ;;  %v2104_v11 = vmul.f32 %v1842_v44, %v1842_v44  ;;  %v1008_v20 = vadd.f32 %v1007_v19, %v1977_v17 }
 0x12a   : > { %v1048_v27 = vadd.f32 %v1047_v18, %v788_v43  ;;  %912 = vst [vmem:[%s1830_s28 + $0x168] sm:$0xff] %v2094_v23  ;;  %914 = vst [vmem:[%s1830_s28 + $0x178] sm:$0xff] %v1567_v16  ;;  %v1247_v53 = vadd.f32 %v1246_v21, %v1134_v57  ;;  %v1286_v29 = vadd.f32 %v1285_v61, %v1141_v12 }
 0x12b   : > { %v2107_v1 = vpop.f32.mrf.mxu0  ;;  %v791_v13 = vpop.f32.mrf.mxu1  ;;  %v972_v30 = vadd.f32 %v971_v9, %v1988_v25  ;;  %v1211_v31 = vadd.f32 %v1210_v63, %v1136_v33  ;;  %v1139_v3 = vmul.f32 %v2011_v15, %v2011_v15  ;;  %v1140_v17 = vmul.f32 %v2024_v22, %v2024_v22 }
 0x12c   : > { %913 = vst [vmem:[%s1830_s28 + $0x170] sm:$0xff] %v2107_v1  ;;  %908 = vst [vmem:[%s1830_s28 + $0x148] sm:$0xff] %v791_v13  ;;  %v1049_v55 = vadd.f32 %v1048_v27, %v791_v13  ;;  %v1150_v34 = vmul.f32 %v1566_v38, %v1566_v38  ;;  %v1287_v36 = vadd.f32 %v1286_v29, %v1144_v51 }
 0x12d   : > { %v1147_v39 = vmul.f32 %v791_v13, %v791_v13  ;;  %v2117_v5 = vpop.f32.mrf.mxu0  ;;  %v1570_v40 = vpop.f32.mrf.mxu1  ;;  %v1009_v25 = vadd.f32 %v1008_v20, %v2001_v35  ;;  %v1248_v41 = vadd.f32 %v1247_v53, %v1137_v24  ;;  %v1142_v10 = vmul.f32 %v2034_v32, %v2034_v32 }
 0x12e   : > { %v1050_v57 = vadd.f32 %v1566_v38, %v1049_v55  ;;  %915 = vst [vmem:[%s1830_s28 + $0x180] sm:$0xff] %v2117_v5  ;;  %923 = vst [vmem:[%s1830_s28 + $0x1c0] sm:$0xff] %v1570_v40  ;;  %v973_v12 = vadd.f32 %v972_v30, %v2011_v15  ;;  %v1143_v26 = vmul.f32 %v2045_v45, %v2045_v45 }
 0x12f   : > { %v1153_v43 = vmul.f32 %v1567_v16, %v1567_v16  ;;  %v1288_v47 = vadd.f32 %v1287_v36, %v1147_v39  ;;  %v2128_v7 = vpop.f32.mrf.mxu0  ;;  %v804_v33 = vpop.f32.mrf.mxu1  ;;  %v1212_v35 = vadd.f32 %v1211_v31, %v1139_v3  ;;  %v1010_v18 = vadd.f32 %v1009_v25, %v2024_v22 }
 0x130   : > { %v1145_v38 = vmul.f32 %v2054_v14, %v2054_v14  ;;  %916 = vst [vmem:[%s1830_s28 + $0x188] sm:$0xff] %v2128_v7  ;;  %917 = vst [vmem:[%s1830_s28 + $0x190] sm:$0xff] %v804_v33  ;;  %v1051_v15 = vadd.f32 %v1567_v16, %v1050_v57  ;;  %v1249_v19 = vadd.f32 %v1248_v41, %v1140_v17 }
 0x131   : > { %v974_v21 = vadd.f32 %v973_v12, %v2034_v32  ;;  %v1289_v61 = vadd.f32 %v1288_v47, %v1150_v34  ;;  %v1156_v51 = vmul.f32 %v804_v33, %v804_v33  ;;  %v2137_v9 = vpop.f32.mrf.mxu0  ;;  %v1571_v63 = vpop.f32.mrf.mxu1  ;;  %v1213_v24 = vadd.f32 %v1212_v35, %v1142_v10 }
 0x132   : > { %v1011_v22 = vadd.f32 %v1010_v18, %v2045_v45  ;;  %v1146_v27 = vmul.f32 %v2065_v28, %v2065_v28  ;;  %v1052_v20 = vadd.f32 %v1051_v15, %v804_v33  ;;  %918 = vst [vmem:[%s1830_s28 + $0x198] sm:$0xff] %v2137_v9  ;;  %926 = vst [vmem:[%s1830_s28 + $0x1d8] sm:$0xff] %v1571_v63 }
 0x133   : > { %v1250_v16 = vadd.f32 %v1249_v19, %v1143_v26  ;;  %v975_v32 = vadd.f32 %v974_v21, %v2054_v14  ;;  %v1148_v53 = vmul.f32 %v2075_v37, %v2075_v37  ;;  %v1290_v29 = vadd.f32 %v1289_v61, %v1153_v43  ;;  %v2148_v13 = vpop.f32.mrf.mxu0  ;;  %v807_v30 = vpop.f32.mrf.mxu1 }
 0x134   : > { %v1214_v31 = vadd.f32 %v1213_v24, %v1145_v38  ;;  %v1012_v45 = vadd.f32 %v1011_v22, %v2065_v28  ;;  %v1149_v3 = vmul.f32 %v2085_v59, %v2085_v59  ;;  %919 = vst [vmem:[%s1830_s28 + $0x1a0] sm:$0xff] %v2148_v13  ;;  %920 = vst [vmem:[%s1830_s28 + $0x1a8] sm:$0xff] %v807_v30 }
 0x135   : > { %v1053_v55 = vadd.f32 %v1052_v20, %v807_v30  ;;  %v1151_v14 = vmul.f32 %v2094_v23, %v2094_v23  ;;  %v1162_v17 = vmul.f32 %v1570_v40, %v1570_v40  ;;  %v1291_v34 = vadd.f32 %v1290_v29, %v1156_v51  ;;  %v637_v39 = vpop.f32.mrf.mxu0  ;;  %v1574_v25 = vpop.f32.mrf.mxu1 }
 0x136   : > { %v1159_v36 = vmul.f32 %v807_v30, %v807_v30  ;;  %v1251_v41 = vadd.f32 %v1250_v16, %v1146_v27  ;;  %v976_v28 = vadd.f32 %v975_v32, %v2075_v37  ;;  %v1152_v10 = vmul.f32 %v2107_v1, %v2107_v1  ;;  %921 = vst [vmem:[%s1830_s28 + $0x1b0] sm:$0xff] %v637_v39 }
 0x137   : > { %v1054_v57 = vadd.f32 %v1570_v40, %v1053_v55  ;;  %935 = vst [vmem:[%s1830_s28 + $0x220] sm:$0xff] %v1574_v25  ;;  %v1215_v12 = vadd.f32 %v1214_v31, %v1148_v53  ;;  %v1154_v26 = vmul.f32 %v2117_v5, %v2117_v5  ;;  %v1165_v43 = vmul.f32 %v1571_v63, %v1571_v63  ;;  %v639_v33 = vpop.f32.mrf.mxu0  ;;  %v820_v35 = vpop.f32.mrf.mxu1 }
 0x138   : > { %v1292_v47 = vadd.f32 %v1291_v34, %v1159_v36  ;;  %v1013_v18 = vadd.f32 %v1012_v45, %v2085_v59  ;;  %v1252_v38 = vadd.f32 %v1251_v41, %v1149_v3  ;;  %v1155_v37 = vmul.f32 %v2128_v7, %v2128_v7  ;;  %922 = vst [vmem:[%s1830_s28 + $0x1b8] sm:$0xff] %v639_v33 }
 0x139   : > { %929 = vst [vmem:[%s1830_s28 + $0x1f0] sm:$0xff] %v820_v35  ;;  %v1055_v40 = vadd.f32 %v1571_v63, %v1054_v57  ;;  %v977_v15 = vadd.f32 %v976_v28, %v2094_v23  ;;  %v1216_v19 = vadd.f32 %v1215_v12, %v1151_v14  ;;  %v1168_v61 = vmul.f32 %v820_v35, %v820_v35  ;;  %v641_v51 = vpop.f32.mrf.mxu0  ;;  %v1575_v24 = vpop.f32.mrf.mxu1 }
 0x13a   : > { %v1293_v21 = vadd.f32 %v1292_v47, %v1162_v17  ;;  %v1014_v22 = vadd.f32 %v1013_v18, %v2107_v1  ;;  %v1253_v59 = vadd.f32 %v1252_v38, %v1152_v10  ;;  %v1157_v27 = vmul.f32 %v2137_v9, %v2137_v9  ;;  %924 = vst [vmem:[%s1830_s28 + $0x1c8] sm:$0xff] %v641_v51 }
 0x13b   : > { %v1056_v20 = vadd.f32 %v1055_v40, %v820_v35  ;;  %938 = vst [vmem:[%s1830_s28 + $0x238] sm:$0xff] %v1575_v24  ;;  %v978_v63 = vadd.f32 %v977_v15, %v2117_v5  ;;  %v1217_v16 = vadd.f32 %v1216_v19, %v1154_v26  ;;  %v1158_v23 = vmul.f32 %v2148_v13, %v2148_v13  ;;  %v643_v53 = vpop.f32.mrf.mxu0  ;;  %v823_v29 = vpop.f32.mrf.mxu1 }
 0x13c   : > { %v1294_v32 = vadd.f32 %v1293_v21, %v1165_v43  ;;  %v1015_v30 = vadd.f32 %v1014_v22, %v2128_v7  ;;  %v1254_v1 = vadd.f32 %v1253_v59, %v1155_v37  ;;  %v1160_v31 = vmul.f32 %v637_v39, %v637_v39  ;;  %925 = vst [vmem:[%s1830_s28 + $0x1d0] sm:$0xff] %v643_v53 }
 0x13d   : > { %932 = vst [vmem:[%s1830_s28 + $0x208] sm:$0xff] %v823_v29  ;;  %v1057_v45 = vadd.f32 %v1056_v20, %v823_v29  ;;  %v979_v3 = vadd.f32 %v978_v63, %v2137_v9  ;;  %v1174_v55 = vmul.f32 %v1574_v25, %v1574_v25  ;;  %v1171_v14 = vmul.f32 %v823_v29, %v823_v29  ;;  %v647_v17 = vpop.f32.mrf.mxu0  ;;  %v1578_v34 = vpop.f32.mrf.mxu1 }
 0x13e   : > { %v1295_v5 = vadd.f32 %v1294_v32, %v1168_v61  ;;  %v1218_v36 = vadd.f32 %v1217_v16, %v1157_v27  ;;  %v1161_v41 = vmul.f32 %v639_v33, %v639_v33  ;;  %v1163_v28 = vmul.f32 %v641_v51, %v641_v51  ;;  %927 = vst [vmem:[%s1830_s28 + $0x1e0] sm:$0xff] %v647_v17 }
 0x13f   : > { %v1058_v7 = vadd.f32 %v1574_v25, %v1057_v45  ;;  %947 = vst [vmem:[%s1830_s28 + $0x280] sm:$0xff] %v1578_v34  ;;  %v1016_v10 = vadd.f32 %v1015_v30, %v2148_v13  ;;  %v1255_v57 = vadd.f32 %v1254_v1, %v1158_v23  ;;  %v1177_v12 = vmul.f32 %v1575_v24, %v1575_v24  ;;  %v649_v43 = vpop.f32.mrf.mxu0  ;;  %v836_v9 = vpop.f32.mrf.mxu1 }
 0x140   : > { %v1296_v26 = vadd.f32 %v1295_v5, %v1171_v14  ;;  %v980_v47 = vadd.f32 %v979_v3, %v637_v39  ;;  %v1219_v35 = vadd.f32 %v1218_v36, %v1160_v31  ;;  %v1164_v18 = vmul.f32 %v643_v53, %v643_v53  ;;  %928 = vst [vmem:[%s1830_s28 + $0x1e8] sm:$0xff] %v649_v43 }
 0x141   : > { %941 = vst [vmem:[%s1830_s28 + $0x250] sm:$0xff] %v836_v9  ;;  %v1059_v38 = vadd.f32 %v1575_v24, %v1058_v7  ;;  %v1017_v37 = vadd.f32 %v1016_v10, %v639_v33  ;;  %v1166_v25 = vmul.f32 %v647_v17, %v647_v17  ;;  %v1180_v15 = vmul.f32 %v836_v9, %v836_v9  ;;  %v651_v19 = vpop.f32.mrf.mxu0  ;;  %v1579_v21 = vpop.f32.mrf.mxu1 }
 0x142   : > { %v1297_v40 = vadd.f32 %v1296_v26, %v1174_v55  ;;  %v1256_v13 = vadd.f32 %v1255_v57, %v1161_v41  ;;  %v981_v61 = vadd.f32 %v980_v47, %v641_v51  ;;  %v1220_v22 = vadd.f32 %v1219_v35, %v1163_v28  ;;  %930 = vst [vmem:[%s1830_s28 + $0x1f8] sm:$0xff] %v651_v19 }
 0x143   : > { %v1060_v59 = vadd.f32 %v1059_v38, %v836_v9  ;;  %950 = vst [vmem:[%s1830_s28 + $0x298] sm:$0xff] %v1579_v21  ;;  %v1018_v39 = vadd.f32 %v1017_v37, %v643_v53  ;;  %v1167_v27 = vmul.f32 %v649_v43, %v649_v43  ;;  %v1169_v63 = vmul.f32 %v651_v19, %v651_v19  ;;  %v653_v16 = vpop.f32.mrf.mxu0  ;;  %v839_v24 = vpop.f32.mrf.mxu1 }
 0x144   : > { %v1298_v20 = vadd.f32 %v1297_v40, %v1177_v12  ;;  %v1257_v33 = vadd.f32 %v1256_v13, %v1164_v18  ;;  %v982_v23 = vadd.f32 %v981_v61, %v647_v17  ;;  %v1186_v32 = vmul.f32 %v1578_v34, %v1578_v34  ;;  %931 = vst [vmem:[%s1830_s28 + $0x200] sm:$0xff] %v653_v16 }
 0x145   : > { %944 = vst [vmem:[%s1830_s28 + $0x268] sm:$0xff] %v839_v24  ;;  %v1061_v29 = vadd.f32 %v1060_v59, %v839_v24  ;;  %v1221_v30 = vadd.f32 %v1220_v22, %v1166_v25  ;;  %v1170_v1 = vmul.f32 %v653_v16, %v653_v16  ;;  %v1183_v31 = vmul.f32 %v839_v24, %v839_v24  ;;  %v657_v45 = vpop.f32.mrf.mxu0  ;;  %v1582_v53 = vpop.f32.mrf.mxu1 }
 0x146   : > { %v1299_v51 = vadd.f32 %v1298_v20, %v1180_v15  ;;  %v1019_v3 = vadd.f32 %v1018_v39, %v649_v43  ;;  %v983_v55 = vadd.f32 %v982_v23, %v651_v19  ;;  %933 = vst [vmem:[%s1830_s28 + $0x210] sm:$0xff] %v657_v45  ;;  %v1172_v14 = vmul.f32 %v657_v45, %v657_v45 }
 0x147   : > { %v1062_v5 = vadd.f32 %v1578_v34, %v1061_v29  ;;  %959 = vst [vmem:[%s1830_s28 + $0x2e0] sm:$0xff] %v1582_v53  ;;  %v1258_v17 = vadd.f32 %v1257_v33, %v1167_v27  ;;  %v1222_v36 = vadd.f32 %v1221_v30, %v1169_v63  ;;  %v1189_v41 = vmul.f32 %v1579_v21, %v1579_v21  ;;  %v659_v7 = vpop.f32.mrf.mxu0  ;;  %v852_v10 = vpop.f32.mrf.mxu1 }
 0x148   : > { %v1300_v28 = vadd.f32 %v1299_v51, %v1183_v31  ;;  %v1020_v57 = vadd.f32 %v1019_v3, %v653_v16  ;;  %v984_v12 = vadd.f32 %v983_v55, %v657_v45  ;;  %934 = vst [vmem:[%s1830_s28 + $0x218] sm:$0xff] %v659_v7  ;;  %v1173_v26 = vmul.f32 %v659_v7, %v659_v7 }
 0x149   : > { %953 = vst [vmem:[%s1830_s28 + $0x2b0] sm:$0xff] %v852_v10  ;;  %v1063_v43 = vadd.f32 %v1579_v21, %v1062_v5  ;;  %v1259_v9 = vadd.f32 %v1258_v17, %v1170_v1  ;;  %v1223_v34 = vadd.f32 %v1222_v36, %v1172_v14  ;;  %v1192_v35 = vmul.f32 %v852_v10, %v852_v10  ;;  %v661_v18 = vpop.f32.mrf.mxu0  ;;  %v1583_v38 = vpop.f32.mrf.mxu1 }
 0x14a   : > { %v1301_v47 = vadd.f32 %v1300_v28, %v1186_v32  ;;  %v1021_v37 = vadd.f32 %v1020_v57, %v659_v7  ;;  %936 = vst [vmem:[%s1830_s28 + $0x228] sm:$0xff] %v661_v18  ;;  %v985_v25 = vadd.f32 %v984_v12, %v661_v18  ;;  %v1175_v15 = vmul.f32 %v661_v18, %v661_v18 }
 0x14b   : > { %v1064_v40 = vadd.f32 %v1063_v43, %v852_v10  ;;  %962 = vst [vmem:[%s1830_s28 + $0x2f8] sm:$0xff] %v1583_v38  ;;  %v1181_v19 = vmul.f32 %v1850_v46, %v1850_v46  ;;  %v1182_v21 = vmul.f32 %v1858_v48, %v1858_v48  ;;  %v1260_v13 = vadd.f32 %v1259_v9, %v1173_v26  ;;  %v663_v22 = vpop.f32.mrf.mxu0  ;;  %v855_v59 = vpop.f32.mrf.mxu1 }
 0x14c   : > { %v1302_v61 = vadd.f32 %v1301_v47, %v1189_v41  ;;  %v986_v39 = vadd.f32 %v985_v25, %v1834_v42  ;;  %v1224_v27 = vadd.f32 %v1223_v34, %v1175_v15  ;;  %937 = vst [vmem:[%s1830_s28 + $0x230] sm:$0xff] %v663_v22  ;;  %v1022_v20 = vadd.f32 %v1021_v37, %v663_v22 }
 0x14d   : > { %v1176_v63 = vmul.f32 %v663_v22, %v663_v22  ;;  %956 = vst [vmem:[%s1830_s28 + $0x2c8] sm:$0xff] %v855_v59  ;;  %v1198_v16 = vmul.f32 %v1582_v53, %v1582_v53  ;;  %v1065_v33 = vadd.f32 %v1064_v40, %v855_v59  ;;  %v1195_v23 = vmul.f32 %v855_v59, %v855_v59 }
 0x14e   : > { %v1303_v24 = vadd.f32 %v1302_v61, %v1192_v35  ;;  %v987_v32 = vadd.f32 %v986_v39, %v1850_v46  ;;  %v1225_v29 = vadd.f32 %v1224_v27, %v2021_v49  ;;  %v1023_v30 = vadd.f32 %v1022_v20, %v1842_v44 }
 0x14f   : > { %v1261_v51 = vadd.f32 %v1260_v13, %v1176_v63  ;;  %v1184_v1 = vmul.f32 %v1866_v50, %v1866_v50  ;;  %v1201_v42 = vmul.f32 %v1583_v38, %v1583_v38  ;;  %v1066_v31 = vadd.f32 %v1582_v53, %v1065_v33 }
 0x150   : > { %v1304_v45 = vadd.f32 %v1303_v24, %v1195_v23  ;;  %v988_v3 = vadd.f32 %v987_v32, %v1866_v50  ;;  %v1226_v55 = vadd.f32 %v1225_v29, %v1181_v19  ;;  %v1024_v5 = vadd.f32 %v1023_v30, %v1858_v48 }
 0x151   : > { %v1262_v14 = vadd.f32 %v1261_v51, %v2104_v11  ;;  %v1185_v46 = vmul.f32 %v1874_v52, %v1874_v52  ;;  %v1187_v44 = vmul.f32 %v1882_v54, %v1882_v54  ;;  %v1067_v49 = vadd.f32 %v1583_v38, %v1066_v31 }
 0x152   : > { %v1305_v17 = vadd.f32 %v1304_v45, %v1198_v16  ;;  %v989_v36 = vadd.f32 %v988_v3, %v1882_v54  ;;  %v1227_v41 = vadd.f32 %v1226_v55, %v1184_v1  ;;  %v1025_v53 = vadd.f32 %v1024_v5, %v1874_v52 }
 0x153   : > { %v1263_v28 = vadd.f32 %v1262_v14, %v1182_v21  ;;  %v1188_v50 = vmul.f32 %v1890_v56, %v1890_v56  ;;  %v1190_v48 = vmul.f32 %v1898_v58, %v1898_v58  ;;  %v1068_v11 = vrot.slane %v1067_v49, 4 }
 0x154   : > { %v1306_v7 = vadd.f32 %v1305_v17, %v1201_v42  ;;  %v990_v10 = vadd.f32 %v989_v36, %v1898_v58  ;;  %v1228_v57 = vadd.f32 %v1227_v41, %v1187_v44  ;;  %v1026_v12 = vadd.f32 %v1025_v53, %v1890_v56 }
 0x155   : > { %v1264_v26 = vadd.f32 %v1263_v28, %v1185_v46  ;;  %v1191_v54 = vmul.f32 %v1906_v60, %v1906_v60  ;;  %v1193_v52 = vmul.f32 %v1914_v62, %v1914_v62  ;;  %v1194_v58 = vmul.f32 %v1922_v0, %v1922_v0 }
 0x156   : > { %v1307_v43 = vrot.slane %v1306_v7, 4  ;;  %v991_v9 = vadd.f32 %v990_v10, %v1914_v62  ;;  %v1229_v47 = vadd.f32 %v1228_v57, %v1190_v48  ;;  %v1027_v34 = vadd.f32 %v1026_v12, %v1906_v60 }
 0x157   : > { %v1265_v35 = vadd.f32 %v1264_v26, %v1188_v50  ;;  %v1196_v56 = vmul.f32 %v1930_v2, %v1930_v2  ;;  %v1069_v18 = vadd.f32 %v1068_v11, %v1067_v49  ;;  %v1197_v62 = vmul.f32 %v1938_v4, %v1938_v4 }
 0x158   : > { %v992_v38 = vadd.f32 %v991_v9, %v1930_v2  ;;  %v1230_v37 = vadd.f32 %v1229_v47, %v1193_v52  ;;  %v1028_v40 = vadd.f32 %v1027_v34, %v1922_v0  ;;  %v1199_v60 = vmul.f32 %v1946_v6, %v1946_v6 }
 0x159   : > { %v1266_v25 = vadd.f32 %v1265_v35, %v1191_v54  ;;  %v1308_v15 = vadd.f32 %v1307_v43, %v1306_v7  ;;  %v1200_v2 = vmul.f32 %v1954_v8, %v1954_v8  ;;  %v1070_v22 = vrot.slane %v1069_v18, 2 }
 0x15a   : > { %v993_v19 = vadd.f32 %v992_v38, %v1946_v6  ;;  %v1231_v21 = vadd.f32 %v1230_v37, %v1196_v56  ;;  %v1029_v13 = vadd.f32 %v1028_v40, %v1938_v4  ;;  %v1669_v23 = vmov 1966171168  }
 0x15b   : > { %v1267_v61 = vadd.f32 %v1266_v25, %v1194_v58  ;;  %v1309_v20 = vrot.slane %v1308_v15, 2  ;;  %v1071_v6 = vadd.f32 %v1070_v22, %v1069_v18  ;;  %v1079_v32 = vunpack.c.l.s4 %v1669_v23 }
 0x15c   : > { %v994_v59 = vrot.slane %v993_v19, 4  ;;  %v1232_v0 = vadd.f32 %v1231_v21, %v1199_v60  ;;  %v1030_v39 = vadd.f32 %v1029_v13, %v1954_v8  ;;  %v1081_v4 = vlaneseq }
 0x15d   : > { %v1268_v27 = vadd.f32 %v1267_v61, %v1197_v62  ;;  %v1310_v42 = vadd.f32 %v1309_v20, %v1308_v15  ;;  %v1072_v55 = vrot.slane %v1071_v6, 1  ;;  %v1080_v5 = vunpack.c.0.s8 %v1079_v32 }
 0x15e   : > { %v995_v63 = vadd.f32 %v994_v59, %v993_v19  ;;  %v1233_v16 = vrot.slane %v1232_v0, 4  ;;  %v1031_v24 = vrot.slane %v1030_v39, 4  ;;  %v1082_v14 = vshrl.u32 %v1081_v4, 7 }
 0x15f   : > { %v1269_v33 = vadd.f32 %v1268_v27, %v1200_v2  ;;  %v1311_v28 = vrot.slane %v1310_v42, 1  ;;  %v1073_v7 = vadd.f32 %v1072_v55, %v1071_v6  ;;  %vm1103_vm0 = vcmp.lt.s32.totalorder %v1081_v4, 384 }
 0x160   : > { %v996_v29 = vrot.slane %v995_v63, 2  ;;  %v1234_v30 = vadd.f32 %v1233_v16, %v1232_v0  ;;  %v1032_v51 = vadd.f32 %v1031_v24, %v1030_v39  ;;  %v1083_v50 = vsub.s32 %v1080_v5, %v1082_v14 }
 0x161   : > { %v1270_v1 = vrot.slane %v1269_v33, 4  ;;  %v1312_v54 = vadd.f32 %v1311_v28, %v1310_v42 }
 0x162   : > { %v997_v31 = vadd.f32 %v996_v29, %v995_v63  ;;  %v1235_v45 = vrot.slane %v1234_v30, 2  ;;  %v1033_v8 = vrot.slane %v1032_v51, 2  ;;  %v1091_v43 = vrot.slane %v1073_v7, %v1083_v50 }
 0x163   : > { %v1271_v3 = vadd.f32 %v1270_v1, %v1269_v33  ;;  %v1330_v35 = vrot.slane %v1312_v54, %v1083_v50 }
 0x164   : > { %v1236_v46 = vadd.f32 %v1235_v45, %v1234_v30  ;;  %v1034_v44 = vadd.f32 %v1033_v8, %v1032_v51  ;;  %v998_v17 = vrot.slane %v997_v31, 1 }
 0x165   : > { %v1272_v49 = vrot.slane %v1271_v3, 2 }
 0x166   : > { %v1035_v41 = vrot.slane %v1034_v44, 1  ;;  %v1237_v53 = vrot.slane %v1236_v46, 1  ;;  %v999_v48 = vadd.f32 %v998_v17, %v997_v31 }
 0x167   : > { %v1273_v36 = vadd.f32 %v1272_v49, %v1271_v3 }
 0x168   : > { %v1036_v11 = vadd.f32 %v1035_v41, %v1034_v44  ;;  %v1238_v12 = vadd.f32 %v1237_v53, %v1236_v46 }
 0x169   : > { %v1274_v10 = vrot.slane %v1273_v36, 1 }
 0x16a   : > { %v1077_v57 = vcombine.low %v999_v48, %v1036_v11 }
 0x16b   : > { %v1275_v26 = vadd.f32 %v1274_v10, %v1273_v36 }
 0x16c   : > { %v1084_v52 = vrot.slane %v1077_v57, %v1083_v50 }
 0x16d   : > { %v1316_v9 = vcombine.low %v1238_v12, %v1275_v26 }
 0x16e   : > { %v1092_v47 = vcombine.low %v1084_v52, %v1091_v43 }
 0x16f   : > { %v1323_v34 = vrot.slane %v1316_v9, %v1083_v50 }
 0x170   : > { %v1099_v58 = vrot.slane %v1092_v47, %v1083_v50 }
 0x171   : > { %v1331_v56 = vcombine.low %v1323_v34, %v1330_v35 }
 0x172   : > { %1105 = vst.msk [vmem:[%s219_s30] sm:$0x7] %vm1103_vm0, %v1099_v58 }
 0x173   : > { %v1338_v18 = vrot.slane %v1331_v56, %v1083_v50 }
 0x175   : > { %1340 = vst.msk [vmem:[%s223_s7] sm:$0x7] %vm1103_vm0, %v1338_v18 }
 0x176 PF: > { %s15_s15 = sadd.s32 1, %s1666_s15  }
 0x177   : > { %p12_p5 = scmp.ge.s32.totalorder %s15_s15, 4  }
 0x179   :  { %14 = sbr.rel (!%p12_p5) target bundleno = 1 (0x1), region = 82 }

// kernel: ssa_rel_scl_forward.13
= control target key start
LH: loop header
LB: loop body
LE: loop exit
PB: predicated region body
PF: predicated region fallthrough
CT: control target
= control target key end

     0   :  { %8 = vsyncpa [#allocation4], 0  ;;  %s1402_s0 = inlined_call_operand.vmem [shape: f32[2,256,128], index: 0, kind: input, shape index: {}]   ;;  %s1403_s1 = inlined_call_operand.vmem [shape: f32[1,128], index: 1, kind: input, shape index: {}]   ;;  %s1404_s2 = inlined_call_operand.vmem [shape: f32[1,128], index: 2, kind: input, shape index: {}]   ;;  %s1405_s3 = inlined_call_operand.hbm [shape: f32[2,256,128], index: 3, kind: output, shape index: {}]  }
   0x1   :  { %10 = vsyncpa [#allocation4 + $0x1], 0  ;;  %s907_s12 = smov 0   ;;  %s909_s13 = smov 0  }
   0x2   :  { %s911_s14 = smov 0   ;;  %s913_s15 = smov 0  }
   0x3 LB: > { %s739_s16 = sadd.s32 4294967295, %s877_s15   ;;  %s740_s17 = sadd.s32 4294967294, %s877_s15   ;;  %s877_s15 = sphi %s913_s15, %s1411_s15   ;;  %s873_s14 = sphi %s911_s14, %s1410_s14   ;;  %s869_s13 = sphi %s909_s13, %s1409_s13   ;;  %s865_s12 = sphi %s907_s12, %s1408_s12  }
   0x4   : > { %s930_s18 = sadd.s32 1, %s877_s15   ;;  %s23_s19 = sadd.s32 1, %s873_s14 }
   0x5   : > { %s20_s20 = ssub.s32 %s877_s15, %s930_s18  ;;  %p30_p0 = scmp.ne.s32.totalorder %s873_s14, %s869_s13 }
   0x6   : > { %p21_p1 = scmp.eq.s32.totalorder %s20_s20, 0  ;;  %p31_p2 = scmp.eq.s32.totalorder %s877_s15, 0 }
   0x7   : > { %p102_p3 = scmp.eq.s32.totalorder %s739_s16, 1  ;;  %p107_p4 = scmp.ne.s32.totalorder %s869_s13, %s865_s12 }
   0x8   : > { %s943_s21 = scalar_select %p21_p1, %s873_s14, %s23_s19  }
   0x9   : > { %p32_p5 = por %p31_p2, %p30_p0  ;;  %p945_p6 = por %p102_p3, %p30_p0 }
   0xa   : > { %p108_p7 = scmp.eq.s32.totalorder %s740_s17, 1  ;;  %p742_p9 = scmp.ge.s32.totalorder %s877_s15, 2 }
   0xc   : > { %p949_p8 = por %p108_p7, %p107_p4  ;;  %130 = sbr.rel (%p742_p9) target bundleno = 37 (0x25), region = 24 }
  0x11   : > { %133 = sbr.rel (!%p32_p5) target bundleno = 37 (0x25), region = 28  ;;  %s135_s24 = sand.u32 (%p32_p5), 1, %s873_s14  }
  0x12   : > { %s788_s25 = sshll.u32 (%p32_p5), %s877_s15, 7  ;;  %s743_s26 = sshll.u32 (%p32_p5), %s135_s24, 8 }
  0x13   : > { %s961_s29 = scalar_lea.vmem (%p32_p5), %s1402_s0, %s788_s25  ;;  %s966_s30 = scalar_lea.vmem (%p32_p5), [#allocation2], %s743_s26 }
  0x14   : > { %v231_v0 = vld [vmem:[%s961_s29] sm:$0xff] (%p32_p5)  ;;  %v233_v1 = vld [vmem:[%s961_s29 + $0x8] sm:$0xff] (%p32_p5)  ;;  %v235_v2 = vld [vmem:[%s961_s29 + $0x10] sm:$0xff] (%p32_p5) }
  0x15   : > { %232 = vst [vmem:[%s966_s30] sm:$0xff] (%p32_p5), %v231_v0  ;;  %234 = vst [vmem:[%s966_s30 + $0x8] sm:$0xff] (%p32_p5), %v233_v1  ;;  %v237_v3 = vld [vmem:[%s961_s29 + $0x18] sm:$0xff] (%p32_p5)  ;;  %v239_v4 = vld [vmem:[%s961_s29 + $0x20] sm:$0xff] (%p32_p5) }
  0x16   : > { %236 = vst [vmem:[%s966_s30 + $0x10] sm:$0xff] %v235_v2  ;;  %v241_v5 = vld [vmem:[%s961_s29 + $0x28] sm:$0xff]  ;;  %238 = vst [vmem:[%s966_s30 + $0x18] sm:$0xff] %v237_v3  ;;  %v243_v6 = vld [vmem:[%s961_s29 + $0x30] sm:$0xff] }
  0x17   : > { %240 = vst [vmem:[%s966_s30 + $0x20] sm:$0xff] %v239_v4  ;;  %242 = vst [vmem:[%s966_s30 + $0x28] sm:$0xff] %v241_v5  ;;  %v245_v7 = vld [vmem:[%s961_s29 + $0x38] sm:$0xff]  ;;  %v247_v8 = vld [vmem:[%s961_s29 + $0x40] sm:$0xff] }
  0x18   : > { %244 = vst [vmem:[%s966_s30 + $0x30] sm:$0xff] %v243_v6  ;;  %246 = vst [vmem:[%s966_s30 + $0x38] sm:$0xff] %v245_v7  ;;  %v249_v9 = vld [vmem:[%s961_s29 + $0x48] sm:$0xff]  ;;  %v251_v10 = vld [vmem:[%s961_s29 + $0x50] sm:$0xff] }
  0x19   : > { %248 = vst [vmem:[%s966_s30 + $0x40] sm:$0xff] %v247_v8  ;;  %v253_v11 = vld [vmem:[%s961_s29 + $0x58] sm:$0xff]  ;;  %250 = vst [vmem:[%s966_s30 + $0x48] sm:$0xff] %v249_v9  ;;  %v255_v12 = vld [vmem:[%s961_s29 + $0x60] sm:$0xff] }
  0x1a   : > { %252 = vst [vmem:[%s966_s30 + $0x50] sm:$0xff] %v251_v10  ;;  %254 = vst [vmem:[%s966_s30 + $0x58] sm:$0xff] %v253_v11  ;;  %v257_v13 = vld [vmem:[%s961_s29 + $0x68] sm:$0xff]  ;;  %v259_v14 = vld [vmem:[%s961_s29 + $0x70] sm:$0xff] }
  0x1b   : > { %256 = vst [vmem:[%s966_s30 + $0x60] sm:$0xff] %v255_v12  ;;  %258 = vst [vmem:[%s966_s30 + $0x68] sm:$0xff] %v257_v13  ;;  %v261_v15 = vld [vmem:[%s961_s29 + $0x78] sm:$0xff]  ;;  %v263_v16 = vld [vmem:[%s961_s29 + $0x100] sm:$0xff] }
  0x1c   : > { %260 = vst [vmem:[%s966_s30 + $0x70] sm:$0xff] %v259_v14  ;;  %v265_v17 = vld [vmem:[%s961_s29 + $0x108] sm:$0xff]  ;;  %262 = vst [vmem:[%s966_s30 + $0x78] sm:$0xff] %v261_v15  ;;  %v267_v18 = vld [vmem:[%s961_s29 + $0x110] sm:$0xff] }
  0x1d   : > { %264 = vst [vmem:[%s966_s30 + $0x80] sm:$0xff] %v263_v16  ;;  %266 = vst [vmem:[%s966_s30 + $0x88] sm:$0xff] %v265_v17  ;;  %v269_v19 = vld [vmem:[%s961_s29 + $0x118] sm:$0xff]  ;;  %v271_v20 = vld [vmem:[%s961_s29 + $0x120] sm:$0xff] }
  0x1e   : > { %268 = vst [vmem:[%s966_s30 + $0x90] sm:$0xff] %v267_v18  ;;  %270 = vst [vmem:[%s966_s30 + $0x98] sm:$0xff] %v269_v19  ;;  %v273_v21 = vld [vmem:[%s961_s29 + $0x128] sm:$0xff]  ;;  %v275_v22 = vld [vmem:[%s961_s29 + $0x130] sm:$0xff] }
  0x1f   : > { %272 = vst [vmem:[%s966_s30 + $0xa0] sm:$0xff] %v271_v20  ;;  %v277_v23 = vld [vmem:[%s961_s29 + $0x138] sm:$0xff]  ;;  %274 = vst [vmem:[%s966_s30 + $0xa8] sm:$0xff] %v273_v21  ;;  %v279_v24 = vld [vmem:[%s961_s29 + $0x140] sm:$0xff] }
  0x20   : > { %276 = vst [vmem:[%s966_s30 + $0xb0] sm:$0xff] %v275_v22  ;;  %278 = vst [vmem:[%s966_s30 + $0xb8] sm:$0xff] %v277_v23  ;;  %v281_v25 = vld [vmem:[%s961_s29 + $0x148] sm:$0xff]  ;;  %v283_v26 = vld [vmem:[%s961_s29 + $0x150] sm:$0xff] }
  0x21   : > { %280 = vst [vmem:[%s966_s30 + $0xc0] sm:$0xff] %v279_v24  ;;  %282 = vst [vmem:[%s966_s30 + $0xc8] sm:$0xff] %v281_v25  ;;  %v285_v27 = vld [vmem:[%s961_s29 + $0x158] sm:$0xff]  ;;  %v287_v28 = vld [vmem:[%s961_s29 + $0x160] sm:$0xff] }
  0x22   : > { %284 = vst [vmem:[%s966_s30 + $0xd0] sm:$0xff] %v283_v26  ;;  %v289_v29 = vld [vmem:[%s961_s29 + $0x168] sm:$0xff]  ;;  %286 = vst [vmem:[%s966_s30 + $0xd8] sm:$0xff] %v285_v27  ;;  %v291_v30 = vld [vmem:[%s961_s29 + $0x170] sm:$0xff] }
  0x23   : > { %288 = vst [vmem:[%s966_s30 + $0xe0] sm:$0xff] %v287_v28  ;;  %290 = vst [vmem:[%s966_s30 + $0xe8] sm:$0xff] %v289_v29  ;;  %v293_v31 = vld [vmem:[%s961_s29 + $0x178] sm:$0xff] }
  0x24   : > { %292 = vst [vmem:[%s966_s30 + $0xf0] sm:$0xff] %v291_v30  ;;  %294 = vst [vmem:[%s966_s30 + $0xf8] sm:$0xff] %v293_v31 }
  0x25 PF: > { %p746_p10 = scmp.ge.s32.totalorder %s877_s15, 1  ;;  %p299_p11 = scmp.lt.s32.totalorder %s877_s15, 3 }
  0x27   : > { %p300_p12 = pnand %p746_p10, %p299_p11 }
  0x28   : > { %s306_s4 = sand.u32 (!%p300_p12), 1, %s869_s13  }
  0x29   : > { %303 = sbr.rel (%p300_p12) target bundleno = 112 (0x70), region = 66  ;;  %s1034_s5 = sshll.u32 (!%p300_p12), %s306_s4, 8 }
  0x2a   : > { %s1047_s10 = scalar_lea.vmem (!%p300_p12), [#allocation2], %s1034_s5  ;;  %s1096_s11 = scalar_lea.vmem (!%p300_p12), [#allocation3], %s1034_s5 }
  0x2b   : > { %s636_s17 = scalar_lea.sflag (!%p300_p12), [#allocation4], %s306_s4 }
  0x2e   : > { %v1039_v32 = vld [vmem:[%s1403_s1] ss:$0 sm:$0xff]  ;;  %v334_v36 = vld [vmem:[%s1047_s10 + $0x8] sm:$0xff]  ;;  %v335_v41 = vld [vmem:[%s1047_s10 + $0x10] sm:$0xff]  ;;  %v879_v5 = vmov 0.0  }
  0x2f   : > { %v1044_v33 = vld [vmem:[%s1404_s2] ss:$0 sm:$0xff]  ;;  %v356_v39 = vmul.f32 %v1039_v32, %v334_v36  ;;  %v752_v40 = vld [vmem:[%s1047_s10 + $0x88] sm:$0xff]  ;;  %v753_v42 = vld [vmem:[%s1047_s10 + $0x90] sm:$0xff]  ;;  %v357_v44 = vmul.f32 %v1039_v32, %v335_v41 }
  0x30   : > { %v333_v34 = vld [vmem:[%s1047_s10] sm:$0xff]  ;;  %v507_v43 = vmul.f32 %v752_v40, %v1039_v32  ;;  %v508_v45 = vmul.f32 %v753_v42, %v1039_v32  ;;  %v336_v46 = vld [vmem:[%s1047_s10 + $0x18] sm:$0xff]  ;;  %v338_v54 = vld [vmem:[%s1047_s10 + $0x28] sm:$0xff] }
  0x31   : > { %v751_v35 = vld [vmem:[%s1047_s10 + $0x80] sm:$0xff]  ;;  %v355_v37 = vmul.f32 %v1039_v32, %v333_v34  ;;  %v754_v47 = vld [vmem:[%s1047_s10 + $0x98] sm:$0xff]  ;;  %v378_v51 = vadd.f32 %v1044_v33, %v356_v39  ;;  %v358_v52 = vmul.f32 %v1039_v32, %v336_v46  ;;  %v379_v56 = vadd.f32 %v1044_v33, %v357_v44  ;;  %v756_v10 = vld [vmem:[%s1047_s10 + $0xa8] sm:$0xff] }
  0x32   : > { %v506_v38 = vmul.f32 %v751_v35, %v1039_v32  ;;  %v337_v48 = vld [vmem:[%s1047_s10 + $0x20] sm:$0xff]  ;;  %v1073_v55 = vadd.f32 %v1044_v33, %v507_v43  ;;  %v1077_v57 = vadd.f32 %v1044_v33, %v508_v45  ;;  %v509_v58 = vmul.f32 %v754_v47, %v1039_v32  ;;  %v339_v13 = vld [vmem:[%s1047_s10 + $0x30] sm:$0xff]  ;;  %v340_v15 = vld [vmem:[%s1047_s10 + $0x38] sm:$0xff] }
  0x33   : > { %v377_v49 = vadd.f32 %v1044_v33, %v355_v37  ;;  %v755_v53 = vld [vmem:[%s1047_s10 + $0xa0] sm:$0xff]  ;;  %v394_v60 = vmul.f32 0.5, %v378_v51  ;;  %v380_v61 = vadd.f32 %v1044_v33, %v358_v52  ;;  %v359_v62 = vmul.f32 %v1039_v32, %v337_v48  ;;  %v757_v14 = vld [vmem:[%s1047_s10 + $0xb0] sm:$0xff]  ;;  %v758_v20 = vld [vmem:[%s1047_s10 + $0xb8] sm:$0xff] }
  0x34   : > { %v1066_v50 = vadd.f32 %v1044_v33, %v506_v38  ;;  %v395_v63 = vmul.f32 0.5, %v379_v56  ;;  %v1083_v0 = vadd.f32 %v1044_v33, %v509_v58  ;;  %v510_v1 = vmul.f32 %v755_v53, %v1039_v32  ;;  %v341_v21 = vld [vmem:[%s1047_s10 + $0x40] sm:$0xff]  ;;  %v342_v44 = vld [vmem:[%s1047_s10 + $0x48] sm:$0xff] }
  0x35   : > { %v393_v59 = vmul.f32 0.5, %v377_v49  ;;  %v360_v2 = vmul.f32 %v1039_v32, %v338_v54  ;;  %vm426_vm1 = vcmp.ge.f32.partialorder %v394_v60, 0.5  ;;  %v396_v3 = vmul.f32 0.5, %v380_v61  ;;  %v759_v35 = vld [vmem:[%s1047_s10 + $0xc0] sm:$0xff]  ;;  %v760_v48 = vld [vmem:[%s1047_s10 + $0xc8] sm:$0xff]  ;;  %v343_v49 = vld [vmem:[%s1047_s10 + $0x50] sm:$0xff] }
  0x36   : > { %v381_v4 = vadd.f32 %v1044_v33, %v359_v62  ;;  %v442_v8 = vsel %vm426_vm1, 1.0, %v879_v5  ;;  %v1092_v9 = vsel %vm426_vm1, 0.0, %v394_v60  ;;  %vm427_vm2 = vcmp.ge.f32.partialorder %v395_v63, 0.5 }
  0x37   : > { %vm425_vm0 = vcmp.ge.f32.partialorder %v393_v59, 0.5  ;;  %458 = vst [vmem:[%s1096_s11 + $0x8] sm:$0xff] %v442_v8  ;;  %v539_v12 = vsub.f32 %v1073_v55, %v1092_v9  ;;  %vm428_vm3 = vcmp.ge.f32.partialorder %v396_v3, 0.5  ;;  %v443_v16 = vsel %vm427_vm2, 1.0, %v879_v5 }
  0x38   : > { %v441_v6 = vsel %vm425_vm0, 1.0, %v879_v5  ;;  %v1089_v7 = vsel %vm425_vm0, 0.0, %v393_v59  ;;  %v1108_v17 = vsel %vm427_vm2, 0.0, %v395_v63  ;;  %v444_v18 = vsel %vm428_vm3, 1.0, %v879_v5  ;;  %459 = vst [vmem:[%s1096_s11 + $0x10] sm:$0xff] %v443_v16  ;;  %v763_v16 = vld [vmem:[%s1047_s10 + $0xe0] sm:$0xff] }
  0x39   : > { %457 = vst [vmem:[%s1096_s11] sm:$0xff] %v441_v6  ;;  %v538_v11 = vsub.f32 %v1066_v50, %v1089_v7  ;;  %v1111_v19 = vsel %vm428_vm3, 0.0, %v396_v3  ;;  %v540_v22 = vsub.f32 %v1077_v57, %v1108_v17  ;;  %460 = vst [vmem:[%s1096_s11 + $0x18] sm:$0xff] %v444_v18  ;;  %v397_v24 = vmul.f32 0.5, %v381_v4  ;;  %v761_v4 = vld [vmem:[%s1047_s10 + $0xd0] sm:$0xff]  ;;  %v344_v6 = vld [vmem:[%s1047_s10 + $0x58] sm:$0xff] }
  0x3a   : > { %v541_v23 = vsub.f32 %v1083_v0, %v1111_v19  ;;  %v1122_v25 = vadd.f32 %v1044_v33, %v510_v1  ;;  %v382_v26 = vadd.f32 %v1044_v33, %v360_v2  ;;  %v511_v27 = vmul.f32 %v756_v10, %v1039_v32 }
  0x3b   : > { %v361_v28 = vmul.f32 %v1039_v32, %v339_v13  ;;  %v512_v29 = vmul.f32 %v757_v14, %v1039_v32  ;;  %vm429_vm4 = vcmp.ge.f32.partialorder %v397_v24, 0.5  ;;  %v362_v30 = vmul.f32 %v1039_v32, %v340_v15  ;;  %v762_v14 = vld [vmem:[%s1047_s10 + $0xd8] sm:$0xff]  ;;  %v345_v15 = vld [vmem:[%s1047_s10 + $0x60] sm:$0xff] }
  0x3c   : > { %v513_v31 = vmul.f32 %v758_v20, %v1039_v32  ;;  %v363_v34 = vmul.f32 %v1039_v32, %v341_v21  ;;  %v445_v36 = vsel %vm429_vm4, 1.0, %v879_v5  ;;  %v1133_v37 = vsel %vm429_vm4, 0.0, %v397_v24 }
  0x3d   : > { %v398_v38 = vmul.f32 0.5, %v382_v26  ;;  %v1136_v39 = vadd.f32 %v1044_v33, %v511_v27  ;;  %461 = vst [vmem:[%s1096_s11 + $0x20] sm:$0xff] %v445_v36  ;;  %v542_v40 = vsub.f32 %v1122_v25, %v1133_v37  ;;  %v383_v41 = vadd.f32 %v1044_v33, %v361_v28  ;;  %v346_v26 = vld [vmem:[%s1047_s10 + $0x68] sm:$0xff] }
  0x3e   : > { %v1143_v42 = vadd.f32 %v1044_v33, %v512_v29  ;;  %v384_v43 = vadd.f32 %v1044_v33, %v362_v30  ;;  %v1148_v45 = vadd.f32 %v1044_v33, %v513_v31  ;;  %v385_v46 = vadd.f32 %v1044_v33, %v363_v34 }
  0x3f   : > { %vm430_vm5 = vcmp.ge.f32.partialorder %v398_v38, 0.5  ;;  %v514_v47 = vmul.f32 %v759_v35, %v1039_v32  ;;  %v399_v53 = vmul.f32 0.5, %v383_v41  ;;  %v364_v60 = vmul.f32 %v1039_v32, %v342_v44 }
  0x40   : > { %v446_v51 = vsel %vm430_vm5, 1.0, %v879_v5  ;;  %v1155_v52 = vsel %vm430_vm5, 0.0, %v398_v38  ;;  %v400_v54 = vmul.f32 0.5, %v384_v43  ;;  %v401_v58 = vmul.f32 0.5, %v385_v46 }
  0x41   : > { %462 = vst [vmem:[%s1096_s11 + $0x28] sm:$0xff] %v446_v51  ;;  %v543_v56 = vsub.f32 %v1136_v39, %v1155_v52  ;;  %v1161_v59 = vadd.f32 %v1044_v33, %v514_v47  ;;  %vm431_vm6 = vcmp.ge.f32.partialorder %v399_v53, 0.5  ;;  %v515_v61 = vmul.f32 %v760_v48, %v1039_v32  ;;  %v764_v48 = vld [vmem:[%s1047_s10 + $0xe8] sm:$0xff]  ;;  %v765_v51 = vld [vmem:[%s1047_s10 + $0xf0] sm:$0xff] }
  0x42   : > { %vm432_vm7 = vcmp.ge.f32.partialorder %v400_v54, 0.5  ;;  %v365_v62 = vmul.f32 %v1039_v32, %v343_v49  ;;  %v447_v63 = vsel %vm431_vm6, 1.0, %v879_v5  ;;  %v1167_v1 = vsel %vm431_vm6, 0.0, %v399_v53  ;;  %v347_v49 = vld [vmem:[%s1047_s10 + $0x70] sm:$0xff] }
  0x43   : > { %v448_v2 = vsel %vm432_vm7, 1.0, %v879_v5  ;;  %v1170_v3 = vsel %vm432_vm7, 0.0, %v400_v54  ;;  %463 = vst [vmem:[%s1096_s11 + $0x30] sm:$0xff] %v447_v63  ;;  %v544_v8 = vsub.f32 %v1143_v42, %v1167_v1  ;;  %vm433_vm8 = vcmp.ge.f32.partialorder %v401_v58, 0.5 }
  0x44   : > { %464 = vst [vmem:[%s1096_s11 + $0x38] sm:$0xff] %v448_v2  ;;  %v545_v10 = vsub.f32 %v1148_v45, %v1170_v3  ;;  %v386_v13 = vadd.f32 %v1044_v33, %v364_v60  ;;  %v449_v18 = vsel %vm433_vm8, 1.0, %v879_v5  ;;  %v1185_v20 = vsel %vm433_vm8, 0.0, %v401_v58 }
  0x45   : > { %v1188_v21 = vadd.f32 %v1044_v33, %v515_v61  ;;  %v387_v24 = vadd.f32 %v1044_v33, %v365_v62  ;;  %465 = vst [vmem:[%s1096_s11 + $0x40] sm:$0xff] %v449_v18  ;;  %v546_v27 = vsub.f32 %v1161_v59, %v1185_v20  ;;  %v516_v29 = vmul.f32 %v761_v4, %v1039_v32 }
  0x46   : > { %v402_v28 = vmul.f32 0.5, %v386_v13  ;;  %v366_v30 = vmul.f32 %v1039_v32, %v344_v6  ;;  %v517_v34 = vmul.f32 %v762_v14, %v1039_v32  ;;  %v367_v35 = vmul.f32 %v1039_v32, %v345_v15  ;;  %v348_v14 = vld [vmem:[%s1047_s10 + $0x78] sm:$0xff] }
  0x47   : > { %v403_v31 = vmul.f32 0.5, %v387_v24  ;;  %v518_v36 = vmul.f32 %v763_v16, %v1039_v32  ;;  %v1201_v38 = vadd.f32 %v1044_v33, %v516_v29  ;;  %v368_v43 = vmul.f32 %v1039_v32, %v346_v26  ;;  %v766_v15 = vld [vmem:[%s1047_s10 + $0xf8] sm:$0xff] }
  0x48   : > { %vm434_vm9 = vcmp.ge.f32.partialorder %v402_v28, 0.5  ;;  %v388_v41 = vadd.f32 %v1044_v33, %v366_v30  ;;  %v1209_v47 = vadd.f32 %v1044_v33, %v517_v34  ;;  %v389_v62 = vadd.f32 %v1044_v33, %v367_v35 }
  0x49   : > { %v450_v44 = vsel %vm434_vm9, 1.0, %v879_v5  ;;  %v1206_v46 = vsel %vm434_vm9, 0.0, %v402_v28  ;;  %vm435_vm10 = vcmp.ge.f32.partialorder %v403_v31, 0.5  ;;  %v1225_v63 = vadd.f32 %v1044_v33, %v518_v36 }
  0x4a   : > { %466 = vst [vmem:[%s1096_s11 + $0x48] sm:$0xff] %v450_v44  ;;  %v547_v53 = vsub.f32 %v1188_v21, %v1206_v46  ;;  %v451_v54 = vsel %vm435_vm10, 1.0, %v879_v5  ;;  %v1218_v58 = vsel %vm435_vm10, 0.0, %v403_v31  ;;  %v404_v60 = vmul.f32 0.5, %v388_v41 }
  0x4b   : > { %467 = vst [vmem:[%s1096_s11 + $0x50] sm:$0xff] %v451_v54  ;;  %v548_v61 = vsub.f32 %v1201_v38, %v1218_v58  ;;  %v390_v2 = vadd.f32 %v1044_v33, %v368_v43  ;;  %v519_v4 = vmul.f32 %v764_v48, %v1039_v32  ;;  %v369_v6 = vmul.f32 %v1039_v32, %v347_v49 }
  0x4c   : > { %vm436_vm11 = vcmp.ge.f32.partialorder %v404_v60, 0.5  ;;  %v520_v13 = vmul.f32 %v765_v51, %v1039_v32  ;;  %v405_v24 = vmul.f32 0.5, %v389_v62  ;;  %v370_v34 = vmul.f32 %v1039_v32, %v348_v14 }
  0x4d   : > { %v452_v16 = vsel %vm436_vm11, 1.0, %v879_v5  ;;  %v1234_v18 = vsel %vm436_vm11, 0.0, %v404_v60  ;;  %v406_v26 = vmul.f32 0.5, %v390_v2  ;;  %v1240_v29 = vadd.f32 %v1044_v33, %v519_v4 }
  0x4e   : > { %468 = vst [vmem:[%s1096_s11 + $0x58] sm:$0xff] %v452_v16  ;;  %v549_v28 = vsub.f32 %v1209_v47, %v1234_v18  ;;  %v391_v30 = vadd.f32 %v1044_v33, %v369_v6  ;;  %v1244_v31 = vadd.f32 %v1044_v33, %v520_v13  ;;  %vm437_vm12 = vcmp.ge.f32.partialorder %v405_v24, 0.5 }
  0x4f   : > { %vm438_vm13 = vcmp.ge.f32.partialorder %v406_v26, 0.5  ;;  %v521_v35 = vmul.f32 %v766_v15, %v1039_v32  ;;  %v453_v36 = vsel %vm437_vm12, 1.0, %v879_v5  ;;  %v1249_v41 = vsel %vm437_vm12, 0.0, %v405_v24 }
  0x50   : > { %v454_v43 = vsel %vm438_vm13, 1.0, %v879_v5  ;;  %v1252_v44 = vsel %vm438_vm13, 0.0, %v406_v26  ;;  %469 = vst [vmem:[%s1096_s11 + $0x60] sm:$0xff] %v453_v36  ;;  %v550_v48 = vsub.f32 %v1225_v63, %v1249_v41  ;;  %v407_v51 = vmul.f32 0.5, %v391_v30 }
  0x51   : > { %470 = vst [vmem:[%s1096_s11 + $0x68] sm:$0xff] %v454_v43  ;;  %v551_v49 = vsub.f32 %v1240_v29, %v1252_v44  ;;  %v392_v32 = vadd.f32 %v1044_v33, %v370_v34  ;;  %v1262_v54 = vadd.f32 %v1044_v33, %v521_v35  ;;  %v554_v60 = vmul.f32 0.5, %v538_v11 }
  0x52   : > { %v555_v62 = vmul.f32 0.5, %v539_v12  ;;  %v556_v2 = vmul.f32 0.5, %v540_v22  ;;  %vm439_vm14 = vcmp.ge.f32.partialorder %v407_v51, 0.5  ;;  %v557_v33 = vmul.f32 0.5, %v541_v23 }
  0x53   : > { %v408_v4 = vmul.f32 0.5, %v392_v32  ;;  %v558_v50 = vmul.f32 0.5, %v542_v40  ;;  %v455_v11 = vsel %vm439_vm14, 1.0, %v879_v5  ;;  %v1280_v6 = vsel %vm439_vm14, 0.0, %v407_v51 }
  0x54   : > { %v570_v55 = vadd.f32 %v554_v60, %v1089_v7  ;;  %v571_v57 = vadd.f32 %v555_v62, %v1092_v9  ;;  %471 = vst [vmem:[%s1096_s11 + $0x70] sm:$0xff] %v455_v11  ;;  %v552_v0 = vsub.f32 %v1244_v31, %v1280_v6  ;;  %v572_v12 = vadd.f32 %v556_v2, %v1108_v17 }
  0x55   : > { %vm440_vm15 = vcmp.ge.f32.partialorder %v408_v4, 0.5  ;;  %v573_v22 = vadd.f32 %v557_v33, %v1111_v19  ;;  %v574_v19 = vadd.f32 %v558_v50, %v1133_v37  ;;  %v559_v13 = vmul.f32 0.5, %v543_v56 }
  0x56   : > { %v456_v23 = vsel %vm440_vm15, 1.0, %v879_v5  ;;  %v488_v25 = vsel %vm440_vm15, 0.0, %v408_v4  ;;  %vm586_vm0 = vcmp.ge.f32.partialorder %v570_v55, 0.5  ;;  %vm587_vm1 = vcmp.ge.f32.partialorder %v571_v57, 0.5 }
  0x57   : > { %472 = vst [vmem:[%s1096_s11 + $0x78] sm:$0xff] %v456_v23  ;;  %v553_v7 = vsub.f32 %v1262_v54, %v488_v25  ;;  %v602_v9 = vsel %vm586_vm0, 1.0, %v879_v5  ;;  %v603_v40 = vsel %vm587_vm1, 1.0, %v879_v5  ;;  %vm588_vm2 = vcmp.ge.f32.partialorder %v572_v12, 0.5 }
  0x58   : > { %767 = vst [vmem:[%s1096_s11 + $0x80] sm:$0xff] %v602_v9  ;;  %768 = vst [vmem:[%s1096_s11 + $0x88] sm:$0xff] %v603_v40  ;;  %v604_v17 = vsel %vm588_vm2, 1.0, %v879_v5  ;;  %vm589_vm3 = vcmp.ge.f32.partialorder %v573_v22, 0.5  ;;  %v560_v15 = vmul.f32 0.5, %v544_v8  ;;  %v561_v16 = vmul.f32 0.5, %v545_v10 }
  0x59   : > { %769 = vst [vmem:[%s1096_s11 + $0x90] sm:$0xff] %v604_v17  ;;  %v605_v14 = vsel %vm589_vm3, 1.0, %v879_v5  ;;  %v562_v37 = vmul.f32 0.5, %v546_v27  ;;  %vm590_vm4 = vcmp.ge.f32.partialorder %v574_v19, 0.5  ;;  %v575_v39 = vadd.f32 %v559_v13, %v1155_v52 }
  0x5a   : > { %770 = vst [vmem:[%s1096_s11 + $0x98] sm:$0xff] %v605_v14  ;;  %v563_v56 = vmul.f32 0.5, %v547_v53  ;;  %v564_v42 = vmul.f32 0.5, %v548_v61  ;;  %v606_v45 = vsel %vm590_vm4, 1.0, %v879_v5  ;;  %v576_v8 = vadd.f32 %v560_v15, %v1167_v1 }
  0x5b   : > { %v577_v59 = vadd.f32 %v561_v16, %v1170_v3  ;;  %v578_v10 = vadd.f32 %v562_v37, %v1185_v20  ;;  %771 = vst [vmem:[%s1096_s11 + $0xa0] sm:$0xff] %v606_v45  ;;  %vm591_vm5 = vcmp.ge.f32.partialorder %v575_v39, 0.5  ;;  %v565_v27 = vmul.f32 0.5, %v549_v28 }
  0x5c   : > { %v579_v52 = vadd.f32 %v563_v56, %v1206_v46  ;;  %v580_v21 = vadd.f32 %v564_v42, %v1218_v58  ;;  %v607_v38 = vsel %vm591_vm5, 1.0, %v879_v5  ;;  %vm592_vm6 = vcmp.ge.f32.partialorder %v576_v8, 0.5 }
  0x5d   : > { %vm593_vm7 = vcmp.ge.f32.partialorder %v577_v59, 0.5  ;;  %vm594_vm8 = vcmp.ge.f32.partialorder %v578_v10, 0.5  ;;  %772 = vst [vmem:[%s1096_s11 + $0xa8] sm:$0xff] %v607_v38  ;;  %v608_v1 = vsel %vm592_vm6, 1.0, %v879_v5  ;;  %v581_v47 = vadd.f32 %v565_v27, %v1234_v18 }
  0x5e   : > { %v609_v3 = vsel %vm593_vm7, 1.0, %v879_v5  ;;  %v610_v20 = vsel %vm594_vm8, 1.0, %v879_v5  ;;  %vm595_vm9 = vcmp.ge.f32.partialorder %v579_v52, 0.5  ;;  %773 = vst [vmem:[%s1096_s11 + $0xb0] sm:$0xff] %v608_v1  ;;  %vm596_vm10 = vcmp.ge.f32.partialorder %v580_v21, 0.5 }
  0x5f   : > { %774 = vst [vmem:[%s1096_s11 + $0xb8] sm:$0xff] %v609_v3  ;;  %775 = vst [vmem:[%s1096_s11 + $0xc0] sm:$0xff] %v610_v20  ;;  %v611_v46 = vsel %vm595_vm9, 1.0, %v879_v5  ;;  %v566_v53 = vmul.f32 0.5, %v550_v48  ;;  %v612_v58 = vsel %vm596_vm10, 1.0, %v879_v5  ;;  %v567_v61 = vmul.f32 0.5, %v551_v49 }
  0x60   : > { %776 = vst [vmem:[%s1096_s11 + $0xc8] sm:$0xff] %v611_v46  ;;  %v568_v24 = vmul.f32 0.5, %v552_v0  ;;  %v569_v26 = vmul.f32 0.5, %v553_v7  ;;  %777 = vst [vmem:[%s1096_s11 + $0xd0] sm:$0xff] %v612_v58  ;;  %vm597_vm11 = vcmp.ge.f32.partialorder %v581_v47, 0.5 }
  0x61   : > { %v582_v28 = vadd.f32 %v566_v53, %v1249_v41  ;;  %v613_v18 = vsel %vm597_vm11, 1.0, %v879_v5  ;;  %v583_v63 = vadd.f32 %v567_v61, %v1252_v44 }
  0x62   : > { %v584_v30 = vadd.f32 %v568_v24, %v1280_v6  ;;  %v585_v31 = vadd.f32 %v569_v26, %v488_v25  ;;  %778 = vst [vmem:[%s1096_s11 + $0xd8] sm:$0xff] %v613_v18 }
  0x63   : > { %vm598_vm12 = vcmp.ge.f32.partialorder %v582_v28, 0.5  ;;  %vm599_vm13 = vcmp.ge.f32.partialorder %v583_v63, 0.5 }
  0x64   : > { %v614_v29 = vsel %vm598_vm12, 1.0, %v879_v5  ;;  %vm600_vm14 = vcmp.ge.f32.partialorder %v584_v30, 0.5  ;;  %vm601_vm15 = vcmp.ge.f32.partialorder %v585_v31, 0.5  ;;  %v615_v34 = vsel %vm599_vm13, 1.0, %v879_v5 }
  0x65   : > { %779 = vst [vmem:[%s1096_s11 + $0xe0] sm:$0xff] %v614_v29  ;;  %v616_v35 = vsel %vm600_vm14, 1.0, %v879_v5  ;;  %v617_v36 = vsel %vm601_vm15, 1.0, %v879_v5  ;;  %780 = vst [vmem:[%s1096_s11 + $0xe8] sm:$0xff] %v615_v34 }
  0x66   : > { %781 = vst [vmem:[%s1096_s11 + $0xf0] sm:$0xff] %v616_v35  ;;  %782 = vst [vmem:[%s1096_s11 + $0xf8] sm:$0xff] %v617_v36 }
  0x67   : > { %s789_s19 = sshll.u32 %s739_s16, 11  ;;  %s659_s20 = sshll.u32 %s1096_s11, 4  ;;  %s660_s20 = int_to_ptr.vmem [resolvable:$true] %s659_s20 }
  0x68   : > { %s648_s26 = scalar_lea.hbm %s1405_s3, %s789_s19  ;;  %s880_s27 = smov 2048  }
  0x69   : > { %790 = sst [smem:[#allocation6]] (%p945_p6), %s880_s27  ;;  %s881_s28 = smov 4096  }
  0x6a   : > { %791 = sst [smem:[#allocation6 + $0x1]] (%p945_p6), %s881_s28  ;;  %s882_s29 = smov 16  }
  0x6b   : > { %792 = sst [smem:[#allocation6 + $0x2]] (%p945_p6), %s882_s29  ;;  %s883_s30 = smov 128  }
  0x6c   : > { %793 = sst [smem:[#allocation6 + $0x3]] (%p945_p6), %s883_s30  ;;  %s884_s16 = smov 8  }
  0x6d   : > { %794 = sst [smem:[#allocation6 + $0x4]] (%p945_p6), %s883_s30  ;;  %s885_s4 = smov 131072  }
  0x6e   : > { %795 = sst [smem:[#allocation6 + $0x5]] (%p945_p6), %s884_s16  ;;  %s886_s5 = smov 0  }
  0x6f   : > { %796 = dma.general (%p945_p6), %s660_s20, 4096, %s648_s26, %s636_s17, %s885_s4, [#allocation6], %s886_s5, 0  }
  0x70 PF: > { %s687_s6 = sand.u32 1, %s865_s12   ;;  %p799_p13 = pnand %p742_p9, %p949_p8 }
  0x71   : > { %s688_s7 = scalar_lea.sflag [#allocation4], %s687_s6 }
  0x72   : > { %p800_p0 = pneg %p799_p13 }
  0x74   : > { %860 = dma.done.wait (%p800_p0), %s688_s7, 4096  }
  0x75   : > { %862 = vsyncadd (%p800_p0), %s688_s7, 4294963200  ;;  %p13_p1 = scmp.ge.s32.totalorder %s930_s18, 4   ;;  %s1408_s12 = smov %s869_s13 }
  0x76   : > { %s1409_s13 = smov %s873_s14  ;;  %s1410_s14 = smov %s943_s21 }
  0x77   : > { %s1411_s15 = smov %s930_s18  ;;  %15 = sbr.rel (!%p13_p1) target bundleno = 3 (0x3), region = 117 }
  0x7c   :  { %693 = vsyncpa [#allocation4], 1 }
  0x7d   :  { %695 = vsyncpa [#allocation4 + $0x1], 1 }

// kernel: ssa_rel_scl_forward.12
= control target key start
LH: loop header
LB: loop body
LE: loop exit
PB: predicated region body
PF: predicated region fallthrough
CT: control target
= control target key end

     0   :  { %s1535_s15 = smov 0   ;;  %s1537_s16 = smov 0   ;;  %s1971_s0 = inlined_call_operand.vmem [shape: f32[2,256,128], index: 0, kind: input, shape index: {}]   ;;  %s1972_s1 = inlined_call_operand.vmem [shape: bf16[128,128], index: 1, kind: input, shape index: {}]   ;;  %s1973_s2 = inlined_call_operand.vmem [shape: f32[2,256,128], index: 2, kind: output, shape index: {0}]   ;;  %s1974_s3 = inlined_call_operand.vmem [shape: f32[2,1,128], index: 3, kind: output, shape index: {1}]   ;;  %s1975_s4 = inlined_call_operand.vmem [shape: f32[2,1,128], index: 4, kind: output, shape index: {2}]  }
   0x1   :  { %s1539_s17 = smov 0  }
   0x2 LB: > { %s1551_s18 = sadd.s32 4294967295, %s1507_s17   ;;  %s1554_s19 = sadd.s32 1, %s1507_s17   ;;  %s1507_s17 = sphi %s1539_s17, %s1989_s17   ;;  %s1503_s16 = sphi %s1537_s16, %s1988_s16   ;;  %s1499_s15 = sphi %s1535_s15, %s1987_s15  }
   0x3   : > { %s19_s20 = ssub.s32 %s1507_s17, %s1554_s19  ;;  %s22_s21 = sadd.s32 1, %s1503_s16 }
   0x4   : > { %p20_p0 = scmp.eq.s32.totalorder %s19_s20, 0  ;;  %p29_p1 = scmp.ne.s32.totalorder %s1503_s16, %s1499_s15 }
   0x5   : > { %p30_p2 = scmp.eq.s32.totalorder %s1507_s17, 0  ;;  %p80_p3 = scmp.eq.s32.totalorder %s1551_s18, 1 }
   0x6   : > { %s1564_s22 = scalar_select %p20_p0, %s1503_s16, %s22_s21  }
   0x7   : > { %p31_p4 = por %p30_p2, %p29_p1  ;;  %p1566_p5 = por %p80_p3, %p29_p1 }
   0x8   : > { %p1270_p6 = scmp.ge.s32.totalorder %s1507_s17, 2 }
   0xa   : > { %157 = sbr.rel (%p1270_p6) target bundleno = 35 (0x23), region = 20 }
   0xf   : > { %160 = sbr.rel (!%p31_p4) target bundleno = 35 (0x23), region = 24  ;;  %s162_s24 = sand.u32 (%p31_p4), 1, %s1503_s16  }
  0x10   : > { %s1354_s25 = sshll.u32 (%p31_p4), %s1507_s17, 7  ;;  %s1271_s26 = sshll.u32 (%p31_p4), %s162_s24, 8 }
  0x11   : > { %s1576_s29 = scalar_lea.vmem (%p31_p4), %s1971_s0, %s1354_s25  ;;  %s1581_s30 = scalar_lea.vmem (%p31_p4), [#allocation2], %s1271_s26 }
  0x12   : > { %v258_v0 = vld [vmem:[%s1576_s29] sm:$0xff] (%p31_p4)  ;;  %v260_v1 = vld [vmem:[%s1576_s29 + $0x8] sm:$0xff] (%p31_p4)  ;;  %v262_v2 = vld [vmem:[%s1576_s29 + $0x10] sm:$0xff] (%p31_p4) }
  0x13   : > { %259 = vst [vmem:[%s1581_s30] sm:$0xff] (%p31_p4), %v258_v0  ;;  %261 = vst [vmem:[%s1581_s30 + $0x8] sm:$0xff] (%p31_p4), %v260_v1  ;;  %v264_v3 = vld [vmem:[%s1576_s29 + $0x18] sm:$0xff] (%p31_p4)  ;;  %v266_v4 = vld [vmem:[%s1576_s29 + $0x20] sm:$0xff] (%p31_p4) }
  0x14   : > { %263 = vst [vmem:[%s1581_s30 + $0x10] sm:$0xff] %v262_v2  ;;  %v268_v5 = vld [vmem:[%s1576_s29 + $0x28] sm:$0xff]  ;;  %265 = vst [vmem:[%s1581_s30 + $0x18] sm:$0xff] %v264_v3  ;;  %v270_v6 = vld [vmem:[%s1576_s29 + $0x30] sm:$0xff] }
  0x15   : > { %267 = vst [vmem:[%s1581_s30 + $0x20] sm:$0xff] %v266_v4  ;;  %269 = vst [vmem:[%s1581_s30 + $0x28] sm:$0xff] %v268_v5  ;;  %v272_v7 = vld [vmem:[%s1576_s29 + $0x38] sm:$0xff]  ;;  %v274_v8 = vld [vmem:[%s1576_s29 + $0x40] sm:$0xff] }
  0x16   : > { %271 = vst [vmem:[%s1581_s30 + $0x30] sm:$0xff] %v270_v6  ;;  %273 = vst [vmem:[%s1581_s30 + $0x38] sm:$0xff] %v272_v7  ;;  %v276_v9 = vld [vmem:[%s1576_s29 + $0x48] sm:$0xff]  ;;  %v278_v10 = vld [vmem:[%s1576_s29 + $0x50] sm:$0xff] }
  0x17   : > { %275 = vst [vmem:[%s1581_s30 + $0x40] sm:$0xff] %v274_v8  ;;  %v280_v11 = vld [vmem:[%s1576_s29 + $0x58] sm:$0xff]  ;;  %277 = vst [vmem:[%s1581_s30 + $0x48] sm:$0xff] %v276_v9  ;;  %v282_v12 = vld [vmem:[%s1576_s29 + $0x60] sm:$0xff] }
  0x18   : > { %279 = vst [vmem:[%s1581_s30 + $0x50] sm:$0xff] %v278_v10  ;;  %281 = vst [vmem:[%s1581_s30 + $0x58] sm:$0xff] %v280_v11  ;;  %v284_v13 = vld [vmem:[%s1576_s29 + $0x68] sm:$0xff]  ;;  %v286_v14 = vld [vmem:[%s1576_s29 + $0x70] sm:$0xff] }
  0x19   : > { %283 = vst [vmem:[%s1581_s30 + $0x60] sm:$0xff] %v282_v12  ;;  %285 = vst [vmem:[%s1581_s30 + $0x68] sm:$0xff] %v284_v13  ;;  %v288_v15 = vld [vmem:[%s1576_s29 + $0x78] sm:$0xff]  ;;  %v290_v16 = vld [vmem:[%s1576_s29 + $0x100] sm:$0xff] }
  0x1a   : > { %287 = vst [vmem:[%s1581_s30 + $0x70] sm:$0xff] %v286_v14  ;;  %v292_v17 = vld [vmem:[%s1576_s29 + $0x108] sm:$0xff]  ;;  %289 = vst [vmem:[%s1581_s30 + $0x78] sm:$0xff] %v288_v15  ;;  %v294_v18 = vld [vmem:[%s1576_s29 + $0x110] sm:$0xff] }
  0x1b   : > { %291 = vst [vmem:[%s1581_s30 + $0x80] sm:$0xff] %v290_v16  ;;  %293 = vst [vmem:[%s1581_s30 + $0x88] sm:$0xff] %v292_v17  ;;  %v296_v19 = vld [vmem:[%s1576_s29 + $0x118] sm:$0xff]  ;;  %v298_v20 = vld [vmem:[%s1576_s29 + $0x120] sm:$0xff] }
  0x1c   : > { %295 = vst [vmem:[%s1581_s30 + $0x90] sm:$0xff] %v294_v18  ;;  %297 = vst [vmem:[%s1581_s30 + $0x98] sm:$0xff] %v296_v19  ;;  %v300_v21 = vld [vmem:[%s1576_s29 + $0x128] sm:$0xff]  ;;  %v302_v22 = vld [vmem:[%s1576_s29 + $0x130] sm:$0xff] }
  0x1d   : > { %299 = vst [vmem:[%s1581_s30 + $0xa0] sm:$0xff] %v298_v20  ;;  %v304_v23 = vld [vmem:[%s1576_s29 + $0x138] sm:$0xff]  ;;  %301 = vst [vmem:[%s1581_s30 + $0xa8] sm:$0xff] %v300_v21  ;;  %v306_v24 = vld [vmem:[%s1576_s29 + $0x140] sm:$0xff] }
  0x1e   : > { %303 = vst [vmem:[%s1581_s30 + $0xb0] sm:$0xff] %v302_v22  ;;  %305 = vst [vmem:[%s1581_s30 + $0xb8] sm:$0xff] %v304_v23  ;;  %v308_v25 = vld [vmem:[%s1576_s29 + $0x148] sm:$0xff]  ;;  %v310_v26 = vld [vmem:[%s1576_s29 + $0x150] sm:$0xff] }
  0x1f   : > { %307 = vst [vmem:[%s1581_s30 + $0xc0] sm:$0xff] %v306_v24  ;;  %309 = vst [vmem:[%s1581_s30 + $0xc8] sm:$0xff] %v308_v25  ;;  %v312_v27 = vld [vmem:[%s1576_s29 + $0x158] sm:$0xff]  ;;  %v314_v28 = vld [vmem:[%s1576_s29 + $0x160] sm:$0xff] }
  0x20   : > { %311 = vst [vmem:[%s1581_s30 + $0xd0] sm:$0xff] %v310_v26  ;;  %v316_v29 = vld [vmem:[%s1576_s29 + $0x168] sm:$0xff]  ;;  %313 = vst [vmem:[%s1581_s30 + $0xd8] sm:$0xff] %v312_v27  ;;  %v318_v30 = vld [vmem:[%s1576_s29 + $0x170] sm:$0xff] }
  0x21   : > { %315 = vst [vmem:[%s1581_s30 + $0xe0] sm:$0xff] %v314_v28  ;;  %317 = vst [vmem:[%s1581_s30 + $0xe8] sm:$0xff] %v316_v29  ;;  %v320_v31 = vld [vmem:[%s1576_s29 + $0x178] sm:$0xff] }
  0x22   : > { %319 = vst [vmem:[%s1581_s30 + $0xf0] sm:$0xff] %v318_v30  ;;  %321 = vst [vmem:[%s1581_s30 + $0xf8] sm:$0xff] %v320_v31 }
  0x23 PF: > { %p1274_p7 = scmp.ge.s32.totalorder %s1507_s17, 1  ;;  %p326_p8 = scmp.lt.s32.totalorder %s1507_s17, 3 }
  0x25   : > { %p327_p9 = pnand %p1274_p7, %p326_p8 }
  0x26   : > { %s333_s7 = sand.u32 (!%p327_p9), 1, %s1499_s15   ;;  %p365_p10 = scmp.lt.s32.totalorder (!%p327_p9), %s1551_s18, 1 }
  0x27   : > { %330 = sbr.rel (%p327_p9) target bundleno = 324 (0x144), region = 62  ;;  %s1653_s10 = sshll.u32 (!%p327_p9), %s333_s7, 8 }
  0x28   : > { %s1662_s15 = scalar_lea.vmem (!%p327_p9), [#allocation2], %s1653_s10  ;;  %s1847_s29 = scalar_lea.vmem (!%p327_p9), [#allocation3], %s1653_s10 }
  0x2c   : > { %v1477_v32 = vld [vmem:[%s1972_s1 + $0x38] sm:$0xff]   ;;  %v1478_v33 = vld [vmem:[%s1972_s1 + $0x30] sm:$0xff]   ;;  %v1479_v34 = vld [vmem:[%s1972_s1 + $0x28] sm:$0xff]   ;;  %v1509_v55 = vmov 1.0|1.0   ;;  %s366_s30 = scalar_select %p365_p10, %s1551_s18, 1 }
  0x2d   : > { %1388 = vmatprep.subr.bf16.mxu0 %v1477_v32  ;;  %1420 = vmatprep.subr.bf16.mxu1 %v1477_v32  ;;  %v1480_v35 = vld [vmem:[%s1972_s1 + $0x20] sm:$0xff]   ;;  %v389_v37 = vld [vmem:[%s1662_s15 + $0x8] sm:$0xff]  ;;  %v390_v40 = vld [vmem:[%s1662_s15 + $0x10] sm:$0xff]  ;;  %s1355_s11 = sshll.u32 (%p1566_p5), %s1551_s18, 7 }
  0x2e   : > { %1389 = vmatpush3.bf16.msra.mxu0 %v1477_v32  ;;  %1421 = vmatpush3.bf16.msra.mxu1 %v1477_v32  ;;  %v388_v36 = vld [vmem:[%s1662_s15] sm:$0xff]  ;;  %v405_v39 = vmul.f32 0.5, %v389_v37  ;;  %v391_v41 = vld [vmem:[%s1662_s15 + $0x18] sm:$0xff]  ;;  %v1302_v43 = vld [vmem:[%s1662_s15 + $0x88] sm:$0xff]  ;;  %v1670_v44 = vmul.f32 0.5, %v390_v40  ;;  %s367_s7 = scalar_lea.vmem %s1974_s3, %s366_s30  ;;  %s370_s10 = scalar_lea.vmem %s1975_s4, %s366_s30 }
  0x2f   : > { %1390 = vmatprep.subr.bf16.mxu0 %v1478_v33  ;;  %1422 = vmatprep.subr.bf16.mxu1 %v1478_v33  ;;  %v404_v38 = vmul.f32 0.5, %v388_v36  ;;  %v1301_v42 = vld [vmem:[%s1662_s15 + $0x80] sm:$0xff]  ;;  %v1672_v45 = vmul.f32 0.5, %v391_v41  ;;  %v1303_v47 = vld [vmem:[%s1662_s15 + $0x90] sm:$0xff]  ;;  %v1304_v48 = vld [vmem:[%s1662_s15 + $0x98] sm:$0xff]  ;;  %s1898_s14 = scalar_lea.vmem (%p1566_p5), %s1973_s2, %s1355_s11 }
  0x30   : > { %v392_v46 = vld [vmem:[%s1662_s15 + $0x20] sm:$0xff]  ;;  %vm437_vm1 = vcmp.ge.f32.partialorder %v405_v39, 0.5  ;;  %v393_v49 = vld [vmem:[%s1662_s15 + $0x28] sm:$0xff]  ;;  %v1481_v51 = vld [vmem:[%s1972_s1 + $0x18] sm:$0xff]   ;;  %vm438_vm3 = vcmp.ge.f32.partialorder %v1670_v44, 0.5 }
  0x31   : > { %vm436_vm0 = vcmp.ge.f32.partialorder %v404_v38, 0.5  ;;  %v1678_v50 = vmul.f32 0.5, %v392_v46  ;;  %v477_v53 = vsel %vm437_vm1, 0.0, %v405_v39  ;;  %vm439_vm4 = vcmp.ge.f32.partialorder %v1672_v45, 0.5  ;;  %v394_v54 = vld [vmem:[%s1662_s15 + $0x30] sm:$0xff]  ;;  %v1305_v60 = vld [vmem:[%s1662_s15 + $0xa0] sm:$0xff] }
  0x32   : > { %1391 = vmatpush3.bf16.msra.mxu0 %v1478_v33  ;;  %1423 = vmatpush3.bf16.msra.mxu1 %v1478_v33  ;;  %v476_v52 = vsel %vm436_vm0, 0.0, %v404_v38  ;;  %vm1285_vm2 = vmpackc.low %vm437_vm1, %vm436_vm0  ;;  %v731_v57 = vsub.f32 %v1302_v43, %v477_v53  ;;  %v478_v58 = vsel %vm438_vm3, 0.0, %v1670_v44  ;;  %v479_v59 = vsel %vm439_vm4, 0.0, %v1672_v45  ;;  %v395_v0 = vld [vmem:[%s1662_s15 + $0x38] sm:$0xff]  ;;  %v1306_v4 = vld [vmem:[%s1662_s15 + $0xa8] sm:$0xff] }
  0x33   : > { %1392 = vmatprep.subr.bf16.mxu0 %v1479_v34  ;;  %1424 = vmatprep.subr.bf16.mxu1 %v1479_v34  ;;  %v730_v56 = vsub.f32 %v1301_v42, %v476_v52  ;;  %v732_v61 = vsub.f32 %v1303_v47, %v478_v58  ;;  %v733_v62 = vsub.f32 %v1304_v48, %v479_v59  ;;  %v1694_v63 = vmul.f32 0.5, %v393_v49  ;;  %v1482_v6 = vld [vmem:[%s1972_s1 + $0x10] sm:$0xff]   ;;  %v1483_v12 = vld [vmem:[%s1972_s1 + $0x8] sm:$0xff]   ;;  %v396_v16 = vld [vmem:[%s1662_s15 + $0x40] sm:$0xff] }
  0x34   : > { %1404 = vmatprep.mubr.msk.bf16.mxu0 %vm1285_vm2, %v1509_v55  ;;  %vm440_vm5 = vcmp.ge.f32.partialorder %v1678_v50, 0.5  ;;  %v747_v2 = vmul.f32 0.5, %v731_v57  ;;  %v1702_v5 = vmul.f32 0.5, %v394_v54  ;;  %v1711_v11 = vmul.f32 0.5, %v395_v0  ;;  %v397_v17 = vld [vmem:[%s1662_s15 + $0x48] sm:$0xff]  ;;  %v1307_v18 = vld [vmem:[%s1662_s15 + $0xb0] sm:$0xff]  ;;  %vm1771_vm2 = vmpackc.low %vm439_vm4, %vm438_vm3 }
  0x35   : > { %v746_v1 = vmul.f32 0.5, %v730_v56  ;;  %v480_v3 = vsel %vm440_vm5, 0.0, %v1678_v50  ;;  %vm441_vm6 = vcmp.ge.f32.partialorder %v1694_v63, 0.5  ;;  %v748_v13 = vmul.f32 0.5, %v732_v61  ;;  %v1308_v19 = vld [vmem:[%s1662_s15 + $0xb8] sm:$0xff]  ;;  %v398_v22 = vld [vmem:[%s1662_s15 + $0x50] sm:$0xff] }
  0x36   : > { %1393 = vmatpush3.bf16.msra.mxu0 %v1479_v34  ;;  %1425 = vmatpush3.bf16.msra.mxu1 %v1479_v34  ;;  %v734_v7 = vsub.f32 %v1305_v60, %v480_v3  ;;  %v763_v9 = vadd.f32 %v747_v2, %v477_v53  ;;  %v481_v10 = vsel %vm441_vm6, 0.0, %v1694_v63  ;;  %v749_v14 = vmul.f32 0.5, %v733_v62  ;;  %v399_v23 = vld [vmem:[%s1662_s15 + $0x58] sm:$0xff]  ;;  %v1309_v32 = vld [vmem:[%s1662_s15 + $0xc0] sm:$0xff]  ;;  %v1310_v33 = vld [vmem:[%s1662_s15 + $0xc8] sm:$0xff] }
  0x37   : > { %1394 = vmatprep.subr.bf16.mxu0 %v1480_v35  ;;  %1426 = vmatprep.subr.bf16.mxu1 %v1480_v35  ;;  %v762_v8 = vadd.f32 %v746_v1, %v476_v52  ;;  %v735_v15 = vsub.f32 %v1306_v4, %v481_v10  ;;  %vm442_vm9 = vcmp.ge.f32.partialorder %v1702_v5, 0.5  ;;  %vm443_vm10 = vcmp.ge.f32.partialorder %v1711_v11, 0.5  ;;  %v1484_v36 = vld [vmem:[%s1972_s1] sm:$0xff]   ;;  %v401_v47 = vld [vmem:[%s1662_s15 + $0x68] sm:$0xff]  ;;  %v1311_v57 = vld [vmem:[%s1662_s15 + $0xd0] sm:$0xff] }
  0x38   : > { %vm779_vm8 = vcmp.ge.f32.partialorder %v763_v9, 0.5  ;;  %v750_v20 = vmul.f32 0.5, %v734_v7  ;;  %v482_v24 = vsel %vm442_vm9, 0.0, %v1702_v5  ;;  %v483_v25 = vsel %vm443_vm10, 0.0, %v1711_v11  ;;  %v400_v40 = vld [vmem:[%s1662_s15 + $0x60] sm:$0xff]  ;;  %v403_v61 = vld [vmem:[%s1662_s15 + $0x78] sm:$0xff] }
  0x39   : > { %vm778_vm7 = vcmp.ge.f32.partialorder %v762_v8, 0.5  ;;  %v751_v21 = vmul.f32 0.5, %v735_v15  ;;  %v1731_v26 = vmul.f32 0.5, %v396_v16  ;;  %v1733_v27 = vmul.f32 0.5, %v397_v17  ;;  %v1313_v0 = vld [vmem:[%s1662_s15 + $0xe0] sm:$0xff]  ;;  %v1314_v1 = vld [vmem:[%s1662_s15 + $0xe8] sm:$0xff] }
  0x3a   : > { %1395 = vmatpush3.bf16.msra.mxu0 %v1480_v35  ;;  %1427 = vmatpush3.bf16.msra.mxu1 %v1480_v35  ;;  %vm1317_vm11 = vmpackc.low %vm779_vm8, %vm778_vm7  ;;  %v764_v28 = vadd.f32 %v748_v13, %v478_v58  ;;  %v765_v29 = vadd.f32 %v749_v14, %v479_v59  ;;  %v736_v30 = vsub.f32 %v1307_v18, %v482_v24  ;;  %v1739_v34 = vmul.f32 0.5, %v398_v22  ;;  %v1312_v58 = vld [vmem:[%s1662_s15 + $0xd8] sm:$0xff] }
  0x3b   : > { %1396 = vmatprep.subr.bf16.mxu0 %v1481_v51  ;;  %1428 = vmatprep.subr.bf16.mxu1 %v1481_v51  ;;  %v737_v31 = vsub.f32 %v1308_v19, %v483_v25  ;;  %vm444_vm12 = vcmp.ge.f32.partialorder %v1731_v26, 0.5  ;;  %vm445_vm13 = vcmp.ge.f32.partialorder %v1733_v27, 0.5  ;;  %v1741_v35 = vmul.f32 0.5, %v399_v23  ;;  %v1315_v19 = vld [vmem:[%s1662_s15 + $0xf0] sm:$0xff] }
  0x3c   : > { %1436 = vmatprep.mubr.msk.bf16.mxu1 %vm1317_vm11, %v1509_v55  ;;  %v766_v37 = vadd.f32 %v750_v20, %v480_v3  ;;  %v767_v38 = vadd.f32 %v751_v21, %v481_v10  ;;  %v484_v39 = vsel %vm444_vm12, 0.0, %v1731_v26  ;;  %v485_v41 = vsel %vm445_vm13, 0.0, %v1733_v27  ;;  %v1316_v20 = vld [vmem:[%s1662_s15 + $0xf8] sm:$0xff] }
  0x3d   : > { %v738_v42 = vsub.f32 %v1309_v32, %v484_v39  ;;  %vm446_vm14 = vcmp.ge.f32.partialorder %v1739_v34, 0.5  ;;  %vm1976_vm15 = vcmp.ge.f32.partialorder %v1741_v35, 0.5  ;;  %v752_v43 = vmul.f32 0.5, %v736_v30 }
  0x3e   : > { %1397 = vmatpush3.bf16.msra.mxu0 %v1481_v51  ;;  %1429 = vmatpush3.bf16.msra.mxu1 %v1481_v51  ;;  %v739_v46 = vsub.f32 %v1310_v33, %v485_v41  ;;  %vm780_vm0 = vcmp.ge.f32.partialorder %v764_v28, 0.5  ;;  %vm781_vm1 = vcmp.ge.f32.partialorder %v765_v29, 0.5  ;;  %v753_v48 = vmul.f32 0.5, %v737_v31  ;;  %v402_v51 = vld [vmem:[%s1662_s15 + $0x70] sm:$0xff] }
  0x3f   : > { %1398 = vmatprep.subr.bf16.mxu0 %v1482_v6  ;;  %1430 = vmatprep.subr.bf16.mxu1 %v1482_v6  ;;  %v1756_v49 = vmul.f32 0.5, %v400_v40  ;;  %v754_v52 = vmul.f32 0.5, %v738_v42  ;;  %v486_v54 = vsel %vm446_vm14, 0.0, %v1739_v34  ;;  %v487_v56 = vsel %vm1976_vm15, 0.0, %v1741_v35  ;;  %vm1781_vm15 = vmpackc.low %vm441_vm6, %vm440_vm5 }
  0x40   : > { %v755_v53 = vmul.f32 0.5, %v739_v46  ;;  %vm782_vm7 = vcmp.ge.f32.partialorder %v766_v37, 0.5  ;;  %vm783_vm8 = vcmp.ge.f32.partialorder %v767_v38, 0.5  ;;  %v417_v60 = vmul.f32 0.5, %v401_v47  ;;  %vm1319_vm3 = vmpackc.low %vm781_vm1, %vm780_vm0 }
  0x41   : > { %vm448_vm11 = vcmp.ge.f32.partialorder %v1756_v49, 0.5  ;;  %v768_v44 = vadd.f32 %v752_v43, %v482_v24  ;;  %v1790_v2 = vmul.f32 0.5, %v402_v51  ;;  %v769_v50 = vadd.f32 %v753_v48, %v483_v25  ;;  %vm1321_vm5 = vmpackc.low %vm783_vm8, %vm782_vm7 }
  0x42   : > { %1399 = vmatpush3.bf16.msra.mxu0 %v1482_v6  ;;  %1431 = vmatpush3.bf16.msra.mxu1 %v1482_v6  ;;  %v488_v45 = vsel %vm448_vm11, 0.0, %v1756_v49  ;;  %v740_v63 = vsub.f32 %v1311_v57, %v486_v54  ;;  %v741_v3 = vsub.f32 %v1312_v58, %v487_v56  ;;  %vm1977_vm4 = vcmp.ge.f32.partialorder %v417_v60, 0.5 }
  0x43   : > { %1400 = vmatprep.subr.bf16.mxu0 %v1483_v12  ;;  %1432 = vmatprep.subr.bf16.mxu1 %v1483_v12  ;;  %v770_v4 = vadd.f32 %v754_v52, %v484_v39  ;;  %v771_v6 = vadd.f32 %v755_v53, %v485_v41  ;;  %v489_v7 = vsel %vm1977_vm4, 0.0, %v417_v60  ;;  %v419_v8 = vmul.f32 0.5, %v403_v61 }
  0x44   : > { %v742_v9 = vsub.f32 %v1313_v0, %v488_v45  ;;  %v743_v10 = vsub.f32 %v1314_v1, %v489_v7  ;;  %vm450_vm6 = vcmp.ge.f32.partialorder %v1790_v2, 0.5  ;;  %vm784_vm1 = vcmp.ge.f32.partialorder %v768_v44, 0.5 }
  0x45   : > { %vm451_vm0 = vcmp.ge.f32.partialorder %v419_v8, 0.5  ;;  %vm785_vm7 = vcmp.ge.f32.partialorder %v769_v50, 0.5  ;;  %vm786_vm8 = vcmp.ge.f32.partialorder %v770_v4, 0.5  ;;  %vm787_vm4 = vcmp.ge.f32.partialorder %v771_v6, 0.5 }
  0x46   : > { %1401 = vmatpush3.bf16.msra.mxu0 %v1483_v12  ;;  %1433 = vmatpush3.bf16.msra.mxu1 %v1483_v12  ;;  %v756_v12 = vmul.f32 0.5, %v740_v63  ;;  %v757_v13 = vmul.f32 0.5, %v741_v3  ;;  %v758_v15 = vmul.f32 0.5, %v742_v9  ;;  %v759_v16 = vmul.f32 0.5, %v743_v10 }
  0x47   : > { %1402 = vmatprep.subr.bf16.mxu0 %v1484_v36  ;;  %1434 = vmatprep.subr.bf16.mxu1 %v1484_v36  ;;  %v490_v17 = vsel %vm450_vm6, 0.0, %v1790_v2  ;;  %v491_v18 = vsel %vm451_vm0, 0.0, %v419_v8 }
  0x48   : > { %v772_v5 = vadd.f32 %v756_v12, %v486_v54  ;;  %v773_v11 = vadd.f32 %v757_v13, %v487_v56  ;;  %v744_v21 = vsub.f32 %v1315_v19, %v490_v17  ;;  %v745_v22 = vsub.f32 %v1316_v20, %v491_v18 }
  0x49   : > { %v774_v23 = vadd.f32 %v758_v15, %v488_v45  ;;  %v775_v24 = vadd.f32 %v759_v16, %v489_v7 }
  0x4a   : > { %1403 = vmatpush3.bf16.msra.mxu0 %v1484_v36  ;;  %1435 = vmatpush3.bf16.msra.mxu1 %v1484_v36  ;;  %v760_v25 = vmul.f32 0.5, %v744_v21  ;;  %v761_v26 = vmul.f32 0.5, %v745_v22 }
  0x4c   : > { %v776_v27 = vadd.f32 %v760_v25, %v490_v17  ;;  %v777_v28 = vadd.f32 %v761_v26, %v491_v18 }
  0x4d   : > { %1405 = vmatmul.mubr.msk.bf16.vlgmr.msra.gmra.mxu0 %vm1771_vm2, %v1509_v55  ;;  %1437 = vmatmul.mubr.msk.bf16.vlgmr.msra.gmra.mxu1 %vm1319_vm3, %v1509_v55  ;;  %vm1810_vm2 = vmpackc.low %vm443_vm10, %vm442_vm9  ;;  %vm788_vm10 = vcmp.ge.f32.partialorder %v772_v5, 0.5 }
  0x4e   : > { %1408 = vmatprep.mubr.msk.bf16.mxu0 %vm1781_vm15, %v1509_v55  ;;  %1440 = vmatprep.mubr.msk.bf16.mxu1 %vm1321_vm5, %v1509_v55  ;;  %vm1293_vm15 = vmpackc.low %vm445_vm13, %vm444_vm12  ;;  %vm789_vm12 = vcmp.ge.f32.partialorder %v773_v11, 0.5  ;;  %vm1985_vm13 = vcmp.ge.f32.partialorder %v1741_v35, 0.5  ;;  %vm790_vm5 = vcmp.ge.f32.partialorder %v774_v23, 0.5 }
  0x4f   : > { %vm1323_vm3 = vmpackc.low %vm785_vm7, %vm784_vm1  ;;  %vm791_vm1 = vcmp.ge.f32.partialorder %v775_v24, 0.5  ;;  %vm1986_vm7 = vcmp.ge.f32.partialorder %v417_v60, 0.5 }
  0x50   : > { %vm1325_vm9 = vmpackc.low %vm787_vm4, %vm786_vm8 }
  0x51   : > { %vm1295_vm4 = vmpackc.low %vm1985_vm13, %vm446_vm14  ;;  %vm792_vm14 = vcmp.ge.f32.partialorder %v776_v27, 0.5 }
  0x52   : > { %vm1297_vm8 = vmpackc.low %vm1986_vm7, %vm448_vm11 }
  0x55   : > { %1409 = vmatmul.mubr.msk.bf16.gmra.mxu0 %vm1810_vm2, %v1509_v55  ;;  %1441 = vmatmul.mubr.msk.bf16.gmra.mxu1 %vm1323_vm3, %v1509_v55  ;;  %vm1327_vm2 = vmpackc.low %vm789_vm12, %vm788_vm10  ;;  %vm793_vm3 = vcmp.ge.f32.partialorder %v777_v28, 0.5 }
  0x56   : > { %1412 = vmatprep.mubr.msk.bf16.mxu0 %vm1293_vm15, %v1509_v55  ;;  %1444 = vmatprep.mubr.msk.bf16.mxu1 %vm1325_vm9, %v1509_v55  ;;  %vm1329_vm15 = vmpackc.low %vm791_vm1, %vm790_vm5 }
  0x57   : > { %vm1299_vm9 = vmpackc.low %vm451_vm0, %vm450_vm6 }
  0x58   : > { %vm1331_vm11 = vmpackc.low %vm793_vm3, %vm792_vm14 }
  0x5d   : > { %1413 = vmatmul.mubr.msk.bf16.gmra.mxu0 %vm1295_vm4, %v1509_v55  ;;  %1445 = vmatmul.mubr.msk.bf16.gmra.mxu1 %vm1327_vm2, %v1509_v55 }
  0x5e   : > { %1416 = vmatprep.mubr.msk.bf16.mxu0 %vm1297_vm8, %v1509_v55  ;;  %1448 = vmatprep.mubr.msk.bf16.mxu1 %vm1329_vm15, %v1509_v55 }
  0x65   : > { %1417 = vmatmul.mubr.msk.bf16.gmra.mxu0 %vm1299_vm9, %v1509_v55  ;;  %1449 = vmatmul.mubr.msk.bf16.gmra.mxu1 %vm1331_vm11, %v1509_v55 }
 0x10d   : > { %v1406_v29 = vpop.f32.mrf.mxu0  ;;  %v1438_v30 = vpop.f32.mrf.mxu1 }
 0x10e   : > { %639 = vst [vmem:[%s1847_s29 + $0x10] sm:$0xff] %v1406_v29  ;;  %1335 = vst [vmem:[%s1847_s29 + $0x90] sm:$0xff] %v1438_v30  ;;  %v677_v42 = vmul.f32 %v1406_v29, %v1406_v29  ;;  %v956_v43 = vmul.f32 %v1438_v30, %v1438_v30 }
 0x10f   : > { %v574_v31 = vpop.f32.mrf.mxu0  ;;  %v852_v32 = vpop.f32.mrf.mxu1 }
 0x110   : > { %637 = vst [vmem:[%s1847_s29] sm:$0xff] %v574_v31  ;;  %1333 = vst [vmem:[%s1847_s29 + $0x80] sm:$0xff] %v852_v32  ;;  %v675_v34 = vmul.f32 %v574_v31, %v574_v31  ;;  %v954_v35 = vmul.f32 %v852_v32, %v852_v32 }
 0x111   : > { %v1407_v33 = vpop.f32.mrf.mxu0  ;;  %v1439_v55 = vpop.f32.mrf.mxu1 }
 0x112   : > { %640 = vst [vmem:[%s1847_s29 + $0x18] sm:$0xff] %v1407_v33  ;;  %1336 = vst [vmem:[%s1847_s29 + $0x98] sm:$0xff] %v1439_v55  ;;  %v678_v53 = vmul.f32 %v1407_v33, %v1407_v33  ;;  %v957_v57 = vmul.f32 %v1439_v55, %v1439_v55 }
 0x113   : > { %v577_v36 = vpop.f32.mrf.mxu0  ;;  %v855_v37 = vpop.f32.mrf.mxu1 }
 0x114   : > { %638 = vst [vmem:[%s1847_s29 + $0x8] sm:$0xff] %v577_v36  ;;  %v653_v38 = vadd.f32 %v577_v36, %v574_v31  ;;  %v676_v39 = vmul.f32 %v577_v36, %v577_v36  ;;  %1334 = vst [vmem:[%s1847_s29 + $0x88] sm:$0xff] %v855_v37  ;;  %v932_v40 = vadd.f32 %v855_v37, %v852_v32 }
 0x115   : > { %v955_v41 = vmul.f32 %v855_v37, %v855_v37  ;;  %v1410_v46 = vpop.f32.mrf.mxu0  ;;  %v1442_v47 = vpop.f32.mrf.mxu1 }
 0x116   : > { %v654_v48 = vadd.f32 %v1406_v29, %v653_v38  ;;  %v691_v49 = vadd.f32 %v676_v39, %v675_v34  ;;  %v933_v51 = vadd.f32 %v1438_v30, %v932_v40  ;;  %643 = vst [vmem:[%s1847_s29 + $0x30] sm:$0xff] %v1410_v46  ;;  %1339 = vst [vmem:[%s1847_s29 + $0xb0] sm:$0xff] %v1442_v47 }
 0x117   : > { %v970_v52 = vadd.f32 %v955_v41, %v954_v35  ;;  %v590_v54 = vpop.f32.mrf.mxu0  ;;  %v868_v56 = vpop.f32.mrf.mxu1  ;;  %v681_v15 = vmul.f32 %v1410_v46, %v1410_v46  ;;  %v960_v18 = vmul.f32 %v1442_v47, %v1442_v47 }
 0x118   : > { %v692_v58 = vadd.f32 %v691_v49, %v677_v42  ;;  %641 = vst [vmem:[%s1847_s29 + $0x20] sm:$0xff] %v590_v54  ;;  %v655_v60 = vadd.f32 %v1407_v33, %v654_v48  ;;  %1337 = vst [vmem:[%s1847_s29 + $0xa0] sm:$0xff] %v868_v56  ;;  %v679_v61 = vmul.f32 %v590_v54, %v590_v54 }
 0x119   : > { %v971_v59 = vadd.f32 %v970_v52, %v956_v43  ;;  %v934_v62 = vadd.f32 %v1439_v55, %v933_v51  ;;  %v1411_v44 = vpop.f32.mrf.mxu0  ;;  %v1443_v45 = vpop.f32.mrf.mxu1  ;;  %v958_v2 = vmul.f32 %v868_v56, %v868_v56 }
 0x11a   : > { %v656_v0 = vadd.f32 %v655_v60, %v590_v54  ;;  %v693_v1 = vadd.f32 %v692_v58, %v678_v53  ;;  %644 = vst [vmem:[%s1847_s29 + $0x38] sm:$0xff] %v1411_v44  ;;  %1340 = vst [vmem:[%s1847_s29 + $0xb8] sm:$0xff] %v1443_v45  ;;  %v682_v21 = vmul.f32 %v1411_v44, %v1411_v44 }
 0x11b   : > { %v972_v50 = vadd.f32 %v971_v59, %v957_v57  ;;  %v935_v63 = vadd.f32 %v934_v62, %v868_v56  ;;  %v593_v3 = vpop.f32.mrf.mxu0  ;;  %v871_v4 = vpop.f32.mrf.mxu1  ;;  %v961_v24 = vmul.f32 %v1443_v45, %v1443_v45 }
 0x11c   : > { %v694_v6 = vadd.f32 %v693_v1, %v679_v61  ;;  %642 = vst [vmem:[%s1847_s29 + $0x28] sm:$0xff] %v593_v3  ;;  %v657_v8 = vadd.f32 %v656_v0, %v593_v3  ;;  %v680_v9 = vmul.f32 %v593_v3, %v593_v3  ;;  %1338 = vst [vmem:[%s1847_s29 + $0xa8] sm:$0xff] %v871_v4 }
 0x11d   : > { %v973_v7 = vadd.f32 %v972_v50, %v958_v2  ;;  %v936_v10 = vadd.f32 %v935_v63, %v871_v4  ;;  %v959_v12 = vmul.f32 %v871_v4, %v871_v4  ;;  %v1414_v13 = vpop.f32.mrf.mxu0  ;;  %v1446_v14 = vpop.f32.mrf.mxu1 }
 0x11e   : > { %v658_v16 = vadd.f32 %v1410_v46, %v657_v8  ;;  %v695_v17 = vadd.f32 %v694_v6, %v680_v9  ;;  %647 = vst [vmem:[%s1847_s29 + $0x50] sm:$0xff] %v1414_v13  ;;  %1343 = vst [vmem:[%s1847_s29 + $0xd0] sm:$0xff] %v1446_v14  ;;  %v685_v46 = vmul.f32 %v1414_v13, %v1414_v13 }
 0x11f   : > { %v937_v19 = vadd.f32 %v1442_v47, %v936_v10  ;;  %v974_v20 = vadd.f32 %v973_v7, %v959_v12  ;;  %v606_v5 = vpop.f32.mrf.mxu0  ;;  %v884_v11 = vpop.f32.mrf.mxu1  ;;  %v964_v49 = vmul.f32 %v1446_v14, %v1446_v14 }
 0x120   : > { %v696_v22 = vadd.f32 %v695_v17, %v681_v15  ;;  %645 = vst [vmem:[%s1847_s29 + $0x40] sm:$0xff] %v606_v5  ;;  %v659_v23 = vadd.f32 %v1411_v44, %v658_v16  ;;  %1341 = vst [vmem:[%s1847_s29 + $0xc0] sm:$0xff] %v884_v11  ;;  %v683_v30 = vmul.f32 %v606_v5, %v606_v5 }
 0x121   : > { %v975_v25 = vadd.f32 %v974_v20, %v960_v18  ;;  %v938_v26 = vadd.f32 %v1443_v45, %v937_v19  ;;  %v1415_v27 = vpop.f32.mrf.mxu0  ;;  %v1447_v28 = vpop.f32.mrf.mxu1  ;;  %v962_v33 = vmul.f32 %v884_v11, %v884_v11 }
 0x122   : > { %v660_v29 = vadd.f32 %v659_v23, %v606_v5  ;;  %v697_v31 = vadd.f32 %v696_v22, %v682_v21  ;;  %648 = vst [vmem:[%s1847_s29 + $0x58] sm:$0xff] %v1415_v27  ;;  %1344 = vst [vmem:[%s1847_s29 + $0xd8] sm:$0xff] %v1447_v28  ;;  %v686_v56 = vmul.f32 %v1415_v27, %v1415_v27 }
 0x123   : > { %v939_v32 = vadd.f32 %v938_v26, %v884_v11  ;;  %v976_v55 = vadd.f32 %v975_v25, %v961_v24  ;;  %v609_v34 = vpop.f32.mrf.mxu0  ;;  %v887_v35 = vpop.f32.mrf.mxu1  ;;  %v965_v59 = vmul.f32 %v1447_v28, %v1447_v28 }
 0x124   : > { %v698_v36 = vadd.f32 %v697_v31, %v683_v30  ;;  %646 = vst [vmem:[%s1847_s29 + $0x48] sm:$0xff] %v609_v34  ;;  %v661_v37 = vadd.f32 %v660_v29, %v609_v34  ;;  %v684_v38 = vmul.f32 %v609_v34, %v609_v34  ;;  %1342 = vst [vmem:[%s1847_s29 + $0xc8] sm:$0xff] %v887_v35 }
 0x125   : > { %v963_v39 = vmul.f32 %v887_v35, %v887_v35  ;;  %v977_v40 = vadd.f32 %v976_v55, %v962_v33  ;;  %v940_v41 = vadd.f32 %v939_v32, %v887_v35  ;;  %v1418_v42 = vpop.f32.mrf.mxu0  ;;  %v1450_v43 = vpop.f32.mrf.mxu1 }
 0x126   : > { %v662_v47 = vadd.f32 %v1414_v13, %v661_v37  ;;  %v699_v48 = vadd.f32 %v698_v36, %v684_v38  ;;  %651 = vst [vmem:[%s1847_s29 + $0x70] sm:$0xff] %v1418_v42  ;;  %1347 = vst [vmem:[%s1847_s29 + $0xf0] sm:$0xff] %v1450_v43  ;;  %v689_v13 = vmul.f32 %v1418_v42, %v1418_v42 }
 0x127   : > { %v941_v51 = vadd.f32 %v1446_v14, %v940_v41  ;;  %v978_v52 = vadd.f32 %v977_v40, %v963_v39  ;;  %v622_v53 = vpop.f32.mrf.mxu0  ;;  %v900_v54 = vpop.f32.mrf.mxu1  ;;  %v968_v16 = vmul.f32 %v1450_v43, %v1450_v43 }
 0x128   : > { %v700_v57 = vadd.f32 %v699_v48, %v685_v46  ;;  %649 = vst [vmem:[%s1847_s29 + $0x60] sm:$0xff] %v622_v53  ;;  %v663_v58 = vadd.f32 %v1415_v27, %v662_v47  ;;  %1345 = vst [vmem:[%s1847_s29 + $0xe0] sm:$0xff] %v900_v54  ;;  %v687_v0 = vmul.f32 %v622_v53, %v622_v53 }
 0x129   : > { %v979_v60 = vadd.f32 %v978_v52, %v964_v49  ;;  %v942_v61 = vadd.f32 %v1447_v28, %v941_v51  ;;  %v1419_v62 = vpop.f32.mrf.mxu0  ;;  %v1451_v44 = vpop.f32.mrf.mxu1  ;;  %v966_v50 = vmul.f32 %v900_v54, %v900_v54 }
 0x12a   : > { %v664_v45 = vadd.f32 %v663_v58, %v622_v53  ;;  %v701_v1 = vadd.f32 %v700_v57, %v686_v56  ;;  %652 = vst [vmem:[%s1847_s29 + $0x78] sm:$0xff] %v1419_v62  ;;  %1348 = vst [vmem:[%s1847_s29 + $0xf8] sm:$0xff] %v1451_v44  ;;  %v690_v19 = vmul.f32 %v1419_v62, %v1419_v62  ;;  %v1100_v53 = vld [vmem:[%s1847_s29] sm:$0xff] (%p1566_p5)  ;;  %v1104_v56 = vld [vmem:[%s1847_s29 + $0x10] sm:$0xff] (%p1566_p5) }
 0x12b   : > { %v943_v2 = vadd.f32 %v942_v61, %v900_v54  ;;  %v980_v63 = vadd.f32 %v979_v60, %v965_v59  ;;  %v625_v3 = vpop.f32.mrf.mxu0  ;;  %v903_v4 = vpop.f32.mrf.mxu1  ;;  %v969_v11 = vmul.f32 %v1451_v44, %v1451_v44  ;;  %v1102_v54 = vld [vmem:[%s1847_s29 + $0x8] sm:$0xff] (%p1566_p5)  ;;  %v1106_v57 = vld [vmem:[%s1847_s29 + $0x18] sm:$0xff] (%p1566_p5)  ;;  %v1108_v58 = vld [vmem:[%s1847_s29 + $0x20] sm:$0xff] (%p1566_p5)  ;;  %1101 = vst [vmem:[%s1898_s14] sm:$0xff] (%p1566_p5), %v1100_v53 }
 0x12c   : > { %v702_v6 = vadd.f32 %v701_v1, %v687_v0  ;;  %650 = vst [vmem:[%s1847_s29 + $0x68] sm:$0xff] %v625_v3  ;;  %v665_v7 = vadd.f32 %v664_v45, %v625_v3  ;;  %v688_v8 = vmul.f32 %v625_v3, %v625_v3  ;;  %1346 = vst [vmem:[%s1847_s29 + $0xe8] sm:$0xff] %v903_v4  ;;  %v1110_v59 = vld [vmem:[%s1847_s29 + $0x28] sm:$0xff] (%p1566_p5)  ;;  %v1112_v60 = vld [vmem:[%s1847_s29 + $0x30] sm:$0xff] (%p1566_p5) }
 0x12d   : > { %v967_v9 = vmul.f32 %v903_v4, %v903_v4  ;;  %v981_v10 = vadd.f32 %v980_v63, %v966_v50  ;;  %v944_v12 = vadd.f32 %v943_v2, %v903_v4  ;;  %1103 = vst [vmem:[%s1898_s14 + $0x8] sm:$0xff] (%p1566_p5), %v1102_v54  ;;  %1105 = vst [vmem:[%s1898_s14 + $0x10] sm:$0xff] (%p1566_p5), %v1104_v56  ;;  %v1114_v61 = vld [vmem:[%s1847_s29 + $0x38] sm:$0xff] (%p1566_p5)  ;;  %v1120_v45 = vld [vmem:[%s1847_s29 + $0x50] sm:$0xff] (%p1566_p5) }
 0x12e   : > { %v666_v14 = vadd.f32 %v1418_v42, %v665_v7  ;;  %v703_v15 = vadd.f32 %v702_v6, %v688_v8  ;;  %1107 = vst [vmem:[%s1898_s14 + $0x18] sm:$0xff] (%p1566_p5), %v1106_v57  ;;  %1109 = vst [vmem:[%s1898_s14 + $0x20] sm:$0xff] (%p1566_p5), %v1108_v58  ;;  %v1122_v0 = vld [vmem:[%s1847_s29 + $0x58] sm:$0xff] (%p1566_p5)  ;;  %v1128_v50 = vld [vmem:[%s1847_s29 + $0x70] sm:$0xff] (%p1566_p5) }
 0x12f   : > { %v945_v17 = vadd.f32 %v1450_v43, %v944_v12  ;;  %v982_v18 = vadd.f32 %v981_v10, %v967_v9  ;;  %1111 = vst [vmem:[%s1898_s14 + $0x28] sm:$0xff] (%p1566_p5), %v1110_v59  ;;  %1113 = vst [vmem:[%s1898_s14 + $0x30] sm:$0xff] (%p1566_p5), %v1112_v60  ;;  %v1124_v1 = vld [vmem:[%s1847_s29 + $0x60] sm:$0xff] (%p1566_p5)  ;;  %v1134_v4 = vld [vmem:[%s1847_s29 + $0x88] sm:$0xff] (%p1566_p5) }
 0x130   : > { %v667_v20 = vadd.f32 %v1419_v62, %v666_v14  ;;  %v704_v5 = vadd.f32 %v703_v15, %v689_v13  ;;  %v1116_v62 = vld [vmem:[%s1847_s29 + $0x40] sm:$0xff] (%p1566_p5)  ;;  %1115 = vst [vmem:[%s1898_s14 + $0x38] sm:$0xff] (%p1566_p5), %v1114_v61  ;;  %1121 = vst [vmem:[%s1898_s14 + $0x50] sm:$0xff] (%p1566_p5), %v1120_v45  ;;  %v1136_v6 = vld [vmem:[%s1847_s29 + $0x90] sm:$0xff] (%p1566_p5) }
 0x131   : > { %v946_v21 = vadd.f32 %v1451_v44, %v945_v17  ;;  %v983_v22 = vadd.f32 %v982_v18, %v968_v16  ;;  %1117 = vst [vmem:[%s1898_s14 + $0x40] sm:$0xff] (%p1566_p5), %v1116_v62  ;;  %v1118_v44 = vld [vmem:[%s1847_s29 + $0x48] sm:$0xff] (%p1566_p5)  ;;  %1123 = vst [vmem:[%s1898_s14 + $0x58] sm:$0xff] (%p1566_p5), %v1122_v0  ;;  %v1130_v63 = vld [vmem:[%s1847_s29 + $0x78] sm:$0xff] (%p1566_p5) }
 0x132   : > { %v668_v23 = vrot.slane %v667_v20, 4  ;;  %v705_v24 = vadd.f32 %v704_v5, %v690_v19  ;;  %1119 = vst [vmem:[%s1898_s14 + $0x48] sm:$0xff] (%p1566_p5), %v1118_v44  ;;  %1125 = vst [vmem:[%s1898_s14 + $0x60] sm:$0xff] (%p1566_p5), %v1124_v1  ;;  %v1132_v3 = vld [vmem:[%s1847_s29 + $0x80] sm:$0xff] (%p1566_p5)  ;;  %v1138_v7 = vld [vmem:[%s1847_s29 + $0x98] sm:$0xff] (%p1566_p5) }
 0x133   : > { %v947_v25 = vrot.slane %v946_v21, 4  ;;  %v984_v26 = vadd.f32 %v983_v22, %v969_v11  ;;  %v1126_v2 = vld [vmem:[%s1847_s29 + $0x68] sm:$0xff] (%p1566_p5)  ;;  %1129 = vst [vmem:[%s1898_s14 + $0x70] sm:$0xff] (%p1566_p5), %v1128_v50  ;;  %1131 = vst [vmem:[%s1898_s14 + $0x78] sm:$0xff] (%p1566_p5), %v1130_v63  ;;  %v1140_v8 = vld [vmem:[%s1847_s29 + $0xa0] sm:$0xff] (%p1566_p5) }
 0x134   : > { %v669_v27 = vadd.f32 %v668_v23, %v667_v20  ;;  %v706_v28 = vrot.slane %v705_v24, 4  ;;  %1127 = vst [vmem:[%s1898_s14 + $0x68] sm:$0xff] (%p1566_p5), %v1126_v2  ;;  %1133 = vst [vmem:[%s1898_s14 + $0x100] sm:$0xff] (%p1566_p5), %v1132_v3  ;;  %v1142_v9 = vld [vmem:[%s1847_s29 + $0xa8] sm:$0xff] (%p1566_p5)  ;;  %v1144_v10 = vld [vmem:[%s1847_s29 + $0xb0] sm:$0xff] (%p1566_p5) }
 0x135   : > { %v948_v29 = vadd.f32 %v947_v25, %v946_v21  ;;  %v985_v30 = vrot.slane %v984_v26, 4  ;;  %1135 = vst [vmem:[%s1898_s14 + $0x108] sm:$0xff] (%p1566_p5), %v1134_v4  ;;  %1137 = vst [vmem:[%s1898_s14 + $0x110] sm:$0xff] (%p1566_p5), %v1136_v6  ;;  %v1146_v12 = vld [vmem:[%s1847_s29 + $0xb8] sm:$0xff] (%p1566_p5)  ;;  %v1148_v13 = vld [vmem:[%s1847_s29 + $0xc0] sm:$0xff] (%p1566_p5) }
 0x136   : > { %v670_v31 = vrot.slane %v669_v27, 2  ;;  %v707_v32 = vadd.f32 %v706_v28, %v705_v24  ;;  %1139 = vst [vmem:[%s1898_s14 + $0x118] sm:$0xff] (%p1566_p5), %v1138_v7  ;;  %1141 = vst [vmem:[%s1898_s14 + $0x120] sm:$0xff] (%p1566_p5), %v1140_v8  ;;  %v1150_v14 = vld [vmem:[%s1847_s29 + $0xc8] sm:$0xff] (%p1566_p5)  ;;  %v1152_v15 = vld [vmem:[%s1847_s29 + $0xd0] sm:$0xff] (%p1566_p5) }
 0x137   : > { %v949_v33 = vrot.slane %v948_v29, 2  ;;  %v986_v55 = vadd.f32 %v985_v30, %v984_v26  ;;  %1143 = vst [vmem:[%s1898_s14 + $0x128] sm:$0xff] (%p1566_p5), %v1142_v9  ;;  %1145 = vst [vmem:[%s1898_s14 + $0x130] sm:$0xff] (%p1566_p5), %v1144_v10  ;;  %v1154_v16 = vld [vmem:[%s1847_s29 + $0xd8] sm:$0xff] (%p1566_p5)  ;;  %v1156_v17 = vld [vmem:[%s1847_s29 + $0xe0] sm:$0xff] (%p1566_p5) }
 0x138   : > { %v671_v34 = vadd.f32 %v670_v31, %v669_v27  ;;  %v708_v35 = vrot.slane %v707_v32, 2  ;;  %1147 = vst [vmem:[%s1898_s14 + $0x138] sm:$0xff] (%p1566_p5), %v1146_v12  ;;  %1149 = vst [vmem:[%s1898_s14 + $0x140] sm:$0xff] (%p1566_p5), %v1148_v13  ;;  %v1158_v18 = vld [vmem:[%s1847_s29 + $0xe8] sm:$0xff] (%p1566_p5)  ;;  %v1160_v19 = vld [vmem:[%s1847_s29 + $0xf0] sm:$0xff] (%p1566_p5) }
 0x139   : > { %v950_v36 = vadd.f32 %v949_v33, %v948_v29  ;;  %v987_v37 = vrot.slane %v986_v55, 2  ;;  %1151 = vst [vmem:[%s1898_s14 + $0x148] sm:$0xff] (%p1566_p5), %v1150_v14  ;;  %1153 = vst [vmem:[%s1898_s14 + $0x150] sm:$0xff] (%p1566_p5), %v1152_v15  ;;  %v1162_v20 = vld [vmem:[%s1847_s29 + $0xf8] sm:$0xff] (%p1566_p5) }
 0x13a   : > { %v672_v38 = vrot.slane %v671_v34, 1  ;;  %v709_v39 = vadd.f32 %v708_v35, %v707_v32  ;;  %1155 = vst [vmem:[%s1898_s14 + $0x158] sm:$0xff] (%p1566_p5), %v1154_v16  ;;  %1157 = vst [vmem:[%s1898_s14 + $0x160] sm:$0xff] (%p1566_p5), %v1156_v17 }
 0x13b   : > { %v951_v40 = vrot.slane %v950_v36, 1  ;;  %v988_v41 = vadd.f32 %v987_v37, %v986_v55  ;;  %1159 = vst [vmem:[%s1898_s14 + $0x168] sm:$0xff] (%p1566_p5), %v1158_v18  ;;  %1161 = vst [vmem:[%s1898_s14 + $0x170] sm:$0xff] (%p1566_p5), %v1160_v19 }
 0x13c   : > { %v673_v42 = vadd.f32 %v672_v38, %v671_v34  ;;  %v710_v43 = vrot.slane %v709_v39, 1  ;;  %1163 = vst [vmem:[%s1898_s14 + $0x178] sm:$0xff] (%p1566_p5), %v1162_v20 }
 0x13d   : > { %v952_v46 = vadd.f32 %v951_v40, %v950_v36  ;;  %v989_v47 = vrot.slane %v988_v41, 1 }
 0x13e   : > { %v711_v48 = vadd.f32 %v710_v43, %v709_v39 }
 0x13f   : > { %v953_v49 = vadd.f32 %v952_v46, %v673_v42  ;;  %v990_v51 = vadd.f32 %v989_v47, %v988_v41  ;;  %1006 = sbr.rel (!%p1566_p5) target bundleno = 324 (0x144), region = 70 }
 0x141   : > { %v991_v52 = vadd.f32 %v990_v51, %v711_v48  ;;  %992 = vst [vmem:[%s367_s7] sm:$0x1] %v953_v49 }
 0x143   : > { %993 = vst [vmem:[%s370_s10] sm:$0x1] %v991_v52 }
 0x144 PF: > { %p12_p11 = scmp.ge.s32.totalorder %s1554_s19, 4   ;;  %s1987_s15 = smov %s1503_s16 }
 0x145   : > { %s1988_s16 = smov %s1564_s22  ;;  %s1989_s17 = smov %s1554_s19 }
 0x146   :  { %14 = sbr.rel (!%p12_p11) target bundleno = 2 (0x2), region = 165 }

// kernel: ssa_rel_scl_forward.11
= control target key start
LH: loop header
LB: loop body
LE: loop exit
PB: predicated region body
PF: predicated region fallthrough
CT: control target
= control target key end

     0   :  { %s5269_s27 = smov 0   ;;  %s5271_s28 = smov 0   ;;  %s7391_s0 = inlined_call_operand.vmem [shape: f32[4,128,384], index: 0, kind: input, shape index: {}, may-alias: {0,1}]   ;;  %s7392_s1 = inlined_call_operand.vmem [shape: f32[4,128,384], index: 1, kind: input, shape index: {}, may-alias: {0,1}]   ;;  %s7393_s2 = inlined_call_operand.vmem [shape: bf16[4,128,128], index: 2, kind: input, shape index: {}]   ;;  %s7394_s3 = inlined_call_operand.vmem [shape: f32[8,128,128], index: 3, kind: input, shape index: {}]   ;;  %s7395_s4 = inlined_call_operand.vmem [shape: f32[1,128], index: 4, kind: input, shape index: {}]   ;;  %s7396_s5 = inlined_call_operand.vmem [shape: f32[1,128], index: 5, kind: input, shape index: {}]   ;;  %s7397_s6 = inlined_call_operand.vmem [shape: f32[1,128], index: 6, kind: input, shape index: {}]   ;;  %s7398_s7 = inlined_call_operand.vmem [shape: f32[1,128], index: 7, kind: input, shape index: {}]   ;;  %s7399_s8 = inlined_call_operand.vmem [shape: f32[4,128,128], index: 8, kind: output, shape index: {}]  }
   0x1   :  { %s5273_s29 = smov 0  }
   0x2 LB: > { %s4092_s30 = sadd.s32 4294967295, %s5215_s29   ;;  %s5286_s9 = sadd.s32 1, %s5215_s29   ;;  %s5215_s29 = sphi %s5273_s29, %s7543_s29   ;;  %s5211_s28 = sphi %s5271_s28, %s7542_s28   ;;  %s5207_s27 = sphi %s5269_s27, %s7541_s27  }
   0x3   : > { %s22_s10 = ssub.s32 %s5215_s29, %s5286_s9  ;;  %s25_s11 = sadd.s32 1, %s5211_s28 }
   0x4   : > { %p23_p0 = scmp.eq.s32.totalorder %s22_s10, 0  ;;  %p32_p1 = scmp.ne.s32.totalorder %s5211_s28, %s5207_s27 }
   0x5   : > { %p33_p2 = scmp.eq.s32.totalorder %s5215_s29, 0  ;;  %p4095_p4 = scmp.ge.s32.totalorder %s5215_s29, 4 }
   0x6   : > { %s5295_s12 = scalar_select %p23_p0, %s5211_s28, %s25_s11  }
   0x7   : > { %p5297_p3 = por %p33_p2, %p32_p1  ;;  %256 = sbr.rel (%p4095_p4) target bundleno = 38 (0x26), region = 36 }
   0xc   : > { %259 = sbr.rel (!%p5297_p3) target bundleno = 25 (0x19), region = 40  ;;  %s261_s14 = sand.u32 (%p5297_p3), 1, %s5211_s28  }
   0xd   : > { %s5147_s15 = smul.u32 (%p5297_p3), 384, %s5215_s29  ;;  %s4096_s16 = sshll.u32 (%p5297_p3), %s261_s14, 7 }
   0xe   : > { %s263_s20 = scalar_lea.vmem (%p5297_p3), [#allocation2], %s4096_s16 }
   0xf   : > { %s5309_s19 = scalar_lea.vmem (%p5297_p3), %s7391_s0, %s5147_s15 }
  0x10   : > { %v325_v0 = vld [vmem:[%s5309_s19] sm:$0xff] (%p5297_p3)  ;;  %v327_v1 = vld [vmem:[%s5309_s19 + $0x18] sm:$0xff] (%p5297_p3)  ;;  %v329_v2 = vld [vmem:[%s5309_s19 + $0x30] sm:$0xff] (%p5297_p3) }
  0x11   : > { %326 = vst [vmem:[%s263_s20] sm:$0xff] %v325_v0  ;;  %328 = vst [vmem:[%s263_s20 + $0x8] sm:$0xff] %v327_v1  ;;  %v331_v3 = vld [vmem:[%s5309_s19 + $0x48] sm:$0xff]  ;;  %v333_v4 = vld [vmem:[%s5309_s19 + $0x60] sm:$0xff] }
  0x12   : > { %330 = vst [vmem:[%s263_s20 + $0x10] sm:$0xff] %v329_v2  ;;  %v335_v5 = vld [vmem:[%s5309_s19 + $0x78] sm:$0xff]  ;;  %332 = vst [vmem:[%s263_s20 + $0x18] sm:$0xff] %v331_v3  ;;  %v337_v6 = vld [vmem:[%s5309_s19 + $0x90] sm:$0xff] }
  0x13   : > { %334 = vst [vmem:[%s263_s20 + $0x20] sm:$0xff] %v333_v4  ;;  %336 = vst [vmem:[%s263_s20 + $0x28] sm:$0xff] %v335_v5  ;;  %v339_v7 = vld [vmem:[%s5309_s19 + $0xa8] sm:$0xff]  ;;  %v341_v8 = vld [vmem:[%s5309_s19 + $0xc0] sm:$0xff] }
  0x14   : > { %338 = vst [vmem:[%s263_s20 + $0x30] sm:$0xff] %v337_v6  ;;  %340 = vst [vmem:[%s263_s20 + $0x38] sm:$0xff] %v339_v7  ;;  %v343_v9 = vld [vmem:[%s5309_s19 + $0xd8] sm:$0xff]  ;;  %v345_v10 = vld [vmem:[%s5309_s19 + $0xf0] sm:$0xff] }
  0x15   : > { %342 = vst [vmem:[%s263_s20 + $0x40] sm:$0xff] %v341_v8  ;;  %v347_v11 = vld [vmem:[%s5309_s19 + $0x108] sm:$0xff]  ;;  %344 = vst [vmem:[%s263_s20 + $0x48] sm:$0xff] %v343_v9  ;;  %v349_v12 = vld [vmem:[%s5309_s19 + $0x120] sm:$0xff] }
  0x16   : > { %346 = vst [vmem:[%s263_s20 + $0x50] sm:$0xff] %v345_v10  ;;  %348 = vst [vmem:[%s263_s20 + $0x58] sm:$0xff] %v347_v11  ;;  %v351_v13 = vld [vmem:[%s5309_s19 + $0x138] sm:$0xff]  ;;  %v353_v14 = vld [vmem:[%s5309_s19 + $0x150] sm:$0xff] }
  0x17   : > { %350 = vst [vmem:[%s263_s20 + $0x60] sm:$0xff] %v349_v12  ;;  %352 = vst [vmem:[%s263_s20 + $0x68] sm:$0xff] %v351_v13  ;;  %v355_v15 = vld [vmem:[%s5309_s19 + $0x168] sm:$0xff] }
  0x18   : > { %354 = vst [vmem:[%s263_s20 + $0x70] sm:$0xff] %v353_v14  ;;  %356 = vst [vmem:[%s263_s20 + $0x78] sm:$0xff] %v355_v15 }
  0x19 PF: > { %362 = sbr.rel (!%p5297_p3) target bundleno = 38 (0x26), region = 78  ;;  %s364_s21 = sand.u32 (%p5297_p3), 1, %s5211_s28  }
  0x1a   : > { %s4099_s22 = smul.u32 (%p5297_p3), 384, %s5215_s29  ;;  %s4098_s23 = sshll.u32 (%p5297_p3), %s364_s21, 7 }
  0x1b   : > { %s366_s10 = scalar_lea.vmem (%p5297_p3), [#allocation3], %s4098_s23 }
  0x1c   : > { %s5334_s26 = scalar_lea.vmem (%p5297_p3), %s7392_s1, %s4099_s22 }
  0x1d   : > { %v4100_v16 = vld [vmem:[%s5334_s26 + $0x8] sm:$0xff] (%p5297_p3)  ;;  %v4101_v17 = vld [vmem:[%s5334_s26 + $0x20] sm:$0xff] (%p5297_p3)  ;;  %v4102_v18 = vld [vmem:[%s5334_s26 + $0x38] sm:$0xff] (%p5297_p3) }
  0x1e   : > { %430 = vst [vmem:[%s366_s10] sm:$0xff] %v4100_v16  ;;  %432 = vst [vmem:[%s366_s10 + $0x8] sm:$0xff] %v4101_v17  ;;  %v4103_v19 = vld [vmem:[%s5334_s26 + $0x50] sm:$0xff]  ;;  %v4104_v20 = vld [vmem:[%s5334_s26 + $0x68] sm:$0xff] }
  0x1f   : > { %434 = vst [vmem:[%s366_s10 + $0x10] sm:$0xff] %v4102_v18  ;;  %v4105_v21 = vld [vmem:[%s5334_s26 + $0x80] sm:$0xff]  ;;  %436 = vst [vmem:[%s366_s10 + $0x18] sm:$0xff] %v4103_v19  ;;  %v4106_v22 = vld [vmem:[%s5334_s26 + $0x98] sm:$0xff] }
  0x20   : > { %438 = vst [vmem:[%s366_s10 + $0x20] sm:$0xff] %v4104_v20  ;;  %440 = vst [vmem:[%s366_s10 + $0x28] sm:$0xff] %v4105_v21  ;;  %v4107_v23 = vld [vmem:[%s5334_s26 + $0xb0] sm:$0xff]  ;;  %v4108_v24 = vld [vmem:[%s5334_s26 + $0xc8] sm:$0xff] }
  0x21   : > { %442 = vst [vmem:[%s366_s10 + $0x30] sm:$0xff] %v4106_v22  ;;  %444 = vst [vmem:[%s366_s10 + $0x38] sm:$0xff] %v4107_v23  ;;  %v4109_v25 = vld [vmem:[%s5334_s26 + $0xe0] sm:$0xff]  ;;  %v4110_v26 = vld [vmem:[%s5334_s26 + $0xf8] sm:$0xff] }
  0x22   : > { %446 = vst [vmem:[%s366_s10 + $0x40] sm:$0xff] %v4108_v24  ;;  %v4111_v27 = vld [vmem:[%s5334_s26 + $0x110] sm:$0xff]  ;;  %448 = vst [vmem:[%s366_s10 + $0x48] sm:$0xff] %v4109_v25  ;;  %v4112_v28 = vld [vmem:[%s5334_s26 + $0x128] sm:$0xff] }
  0x23   : > { %450 = vst [vmem:[%s366_s10 + $0x50] sm:$0xff] %v4110_v26  ;;  %452 = vst [vmem:[%s366_s10 + $0x58] sm:$0xff] %v4111_v27  ;;  %v4113_v29 = vld [vmem:[%s5334_s26 + $0x140] sm:$0xff]  ;;  %v4114_v30 = vld [vmem:[%s5334_s26 + $0x158] sm:$0xff] }
  0x24   : > { %454 = vst [vmem:[%s366_s10 + $0x60] sm:$0xff] %v4112_v28  ;;  %456 = vst [vmem:[%s366_s10 + $0x68] sm:$0xff] %v4113_v29  ;;  %v4115_v31 = vld [vmem:[%s5334_s26 + $0x170] sm:$0xff] }
  0x25   : > { %458 = vst [vmem:[%s366_s10 + $0x70] sm:$0xff] %v4114_v30  ;;  %460 = vst [vmem:[%s366_s10 + $0x78] sm:$0xff] %v4115_v31 }
  0x26 PF: > { %p4116_p5 = scmp.ge.s32.totalorder %s5215_s29, 1  ;;  %p473_p6 = scmp.lt.s32.totalorder %s5215_s29, 5 }
  0x28   : > { %p474_p7 = pnand %p4116_p5, %p473_p6 }
  0x2a   : > { %477 = sbr.rel (%p474_p7) target bundleno = 2546 (0x9f2), region = 120 }
  0x2f   : > { %s480_s11 = sand.u32 1, %s5207_s27   ;;  %v5360_v32 = vld [vmem:[%s7397_s6] ss:$0 sm:$0xff]  ;;  %p5375_p8 = scmp.lt.s32.totalorder %s4092_s30, 3  ;;  %vm712_vm0 = vcmask 130048   ;;  %vm1462_vm1 = vcmask 261248  }
  0x30   : > { %s5355_s13 = sshll.u32 %s480_s11, 7  ;;  %v5365_v33 = vld [vmem:[%s7398_s7] ss:$0 sm:$0xff]  ;;  %s5217_s22 = smov 112   ;;  %vm1882_vm2 = vcmask 392448   ;;  %vm2302_vm3 = vcmask 523648  }
  0x31   : > { %s5368_s18 = scalar_lea.vmem [#allocation3], %s5355_s13  ;;  %s7545_s30 = smov (!%p5375_p8, %s4092_s30), 3  ;;  %v5425_v6 = vld [vmem:[%s7395_s4] ss:$0 sm:$0xff]  ;;  %vm2722_vm4 = vcmask 654848   ;;  %vm3142_vm5 = vcmask 786048  }
  0x32   : > { %v624_v34 = vld [vmem:[%s5368_s18 + $0x70] sm:$0xff]  ;;  %v625_v35 = vld [vmem:[%s5368_s18 + $0x78] sm:$0xff]  ;;  %v622_v36 = vld [vmem:[%s5368_s18 + $0x60] sm:$0xff]  ;;  %s4313_s29 = sshll.u32 %s7545_s30, 6  ;;  %s5435_s21 = scalar_lea.vmem [#allocation2], %s5355_s13  ;;  %vm3562_vm6 = vcmask 917248  }
  0x33   : > { %v647_v37 = vmul.f32 %v5360_v32, %v624_v34  ;;  %v648_v38 = vmul.f32 %v5360_v32, %v625_v35  ;;  %v623_v39 = vld [vmem:[%s5368_s18 + $0x68] sm:$0xff]  ;;  %v645_v40 = vmul.f32 %v5360_v32, %v622_v36  ;;  %v620_v41 = vld [vmem:[%s5368_s18 + $0x50] sm:$0xff]  ;;  %v621_v42 = vld [vmem:[%s5368_s18 + $0x58] sm:$0xff]  ;;  %s5447_s25 = scalar_lea.vmem %s7393_s2, %s4313_s29  ;;  %s5218_s11 = smov 96   ;;  %vm3982_vm7 = vcmask 1048448  }
  0x34   : > { %v646_v43 = vmul.f32 %v5360_v32, %v623_v39  ;;  %v643_v44 = vmul.f32 %v5360_v32, %v620_v41  ;;  %v644_v45 = vmul.f32 %v5360_v32, %v621_v42  ;;  %v618_v46 = vld [vmem:[%s5368_s18 + $0x40] sm:$0xff]  ;;  %v619_v47 = vld [vmem:[%s5368_s18 + $0x48] sm:$0xff]  ;;  %v616_v48 = vld [vmem:[%s5368_s18 + $0x30] sm:$0xff]  ;;  %s5219_s15 = smov 80   ;;  %s5220_s16 = smov 64  }
  0x35   : > { %v670_v49 = vadd.f32 %v5365_v33, %v647_v37  ;;  %v671_v50 = vadd.f32 %v5365_v33, %v648_v38  ;;  %v668_v51 = vadd.f32 %v5365_v33, %v645_v40  ;;  %v641_v52 = vmul.f32 %v5360_v32, %v618_v46  ;;  %v617_v53 = vld [vmem:[%s5368_s18 + $0x38] sm:$0xff]  ;;  %v614_v54 = vld [vmem:[%s5368_s18 + $0x20] sm:$0xff]  ;;  %v615_v59 = vld [vmem:[%s5368_s18 + $0x28] sm:$0xff]  ;;  %s4314_s17 = sshll.u32 %s7545_s30, 7  ;;  %s5222_s30 = smov 32  }
  0x36   : > { %v669_v55 = vadd.f32 %v5365_v33, %v646_v43  ;;  %v666_v56 = vadd.f32 %v5365_v33, %v643_v44  ;;  %v667_v57 = vadd.f32 %v5365_v33, %v644_v45  ;;  %v642_v58 = vmul.f32 %v5360_v32, %v619_v47  ;;  %v612_v4 = vld [vmem:[%s5368_s18 + $0x10] sm:$0xff]  ;;  %v613_v5 = vld [vmem:[%s5368_s18 + $0x18] sm:$0xff]  ;;  %v610_v9 = vld [vmem:[%s5368_s18] sm:$0xff]  ;;  %s5921_s19 = scalar_lea.vmem %s7399_s8, %s4314_s17  ;;  %s5223_s29 = smov 16  }
  0x37   : > { %v5408_v60 = vpack.c.bf16 %v671_v50, %v670_v49  ;;  %v664_v61 = vadd.f32 %v5365_v33, %v641_v52  ;;  %v639_v62 = vmul.f32 %v5360_v32, %v616_v48  ;;  %v640_v63 = vmul.f32 %v5360_v32, %v617_v53  ;;  %v611_v10 = vld [vmem:[%s5368_s18 + $0x8] sm:$0xff]  ;;  %v540_v11 = vld [vmem:[%s5435_s21] sm:$0xff]  ;;  %v542_v24 = vld [vmem:[%s5435_s21 + $0x10] sm:$0xff]  ;;  %s5221_s18 = smov 48  }
  0x38   : > { %v5414_v0 = vpack.c.bf16 %v669_v55, %v668_v51  ;;  %v5416_v1 = vpack.c.bf16 %v667_v57, %v666_v56  ;;  %v665_v2 = vadd.f32 %v5365_v33, %v642_v58  ;;  %v637_v3 = vmul.f32 %v5360_v32, %v614_v54  ;;  %v541_v18 = vld [vmem:[%s5435_s21 + $0x8] sm:$0xff]  ;;  %v5460_v19 = vld [vmem:[%s7396_s5] ss:$0 sm:$0xff]  ;;  %v543_v25 = vld [vmem:[%s5435_s21 + $0x18] sm:$0xff] }
  0x39   : > { %5083 = vmatprep.subr.msk.bf16.mxu0 %vm712_vm0, %v5408_v60  ;;  %v759_v7 = vsel %vm712_vm0, %v5408_v60, 0  ;;  %v638_v8 = vmul.f32 %v5360_v32, %v615_v59  ;;  %1106 = vrot.lane.b32.xlu0 %v5408_v60, %s5217_s22  ;;  %v662_v12 = vadd.f32 %v5365_v33, %v639_v62  ;;  %v663_v13 = vadd.f32 %v5365_v33, %v640_v63  ;;  %v544_v26 = vld [vmem:[%s5435_s21 + $0x20] sm:$0xff]  ;;  %v5472_v27 = vld [vmem:[%s5447_s25 + $0x38] sm:$0xff]   ;;  %v545_v38 = vld [vmem:[%s5435_s21 + $0x28] sm:$0xff] }
  0x3a   : > { %4572 = vmatpush3.bf16.xpose.msra.mxu0 %v759_v7  ;;  %1102 = vrot.lane.b32.xlu1 %v5416_v1, %s5217_s22  ;;  %v5451_v14 = vpack.c.bf16 %v665_v2, %v664_v61  ;;  %v660_v15 = vadd.f32 %v5365_v33, %v637_v3  ;;  %v635_v16 = vmul.f32 %v5360_v32, %v612_v4  ;;  %v756_v28 = vsel %vm712_vm0, %v5414_v0, 0  ;;  %v546_v43 = vld [vmem:[%s5435_s21 + $0x30] sm:$0xff]  ;;  %v547_v44 = vld [vmem:[%s5435_s21 + $0x38] sm:$0xff]  ;;  %v548_v47 = vld [vmem:[%s5435_s21 + $0x40] sm:$0xff] }
  0x3b   : > { %5084 = vmatprep.subr.msk.bf16.mxu0 %vm712_vm0, %v5414_v0  ;;  %v636_v17 = vmul.f32 %v5360_v32, %v613_v5  ;;  %v661_v20 = vadd.f32 %v5365_v33, %v638_v8  ;;  %v633_v21 = vmul.f32 %v5360_v32, %v610_v9  ;;  %v634_v22 = vmul.f32 %v5360_v32, %v611_v10  ;;  %v5483_v32 = vld [vmem:[%s5447_s25 + $0x30] sm:$0xff]   ;;  %v549_v54 = vld [vmem:[%s5435_s21 + $0x48] sm:$0xff]  ;;  %v551_v57 = vld [vmem:[%s5435_s21 + $0x58] sm:$0xff] }
  0x3c   : > { %v563_v23 = vmul.f32 %v5425_v6, %v540_v11  ;;  %v5476_v29 = vpack.c.bf16 %v663_v13, %v662_v12  ;;  %v564_v30 = vmul.f32 %v5425_v6, %v541_v18  ;;  %v658_v34 = vadd.f32 %v5365_v33, %v635_v16  ;;  %4603 = vmatprep.subr.bf16.mxu1 %v5472_v27  ;;  %v550_v55 = vld [vmem:[%s5435_s21 + $0x50] sm:$0xff]  ;;  %v5524_v56 = vld [vmem:[%s5447_s25 + $0x28] sm:$0xff]   ;;  %v552_v3 = vld [vmem:[%s5435_s21 + $0x60] sm:$0xff] }
  0x3d   : > { %1104 = vrot.lane.b32.xlu0 %v5414_v0, %s5217_s22  ;;  %v659_v35 = vadd.f32 %v5365_v33, %v636_v17  ;;  %v656_v36 = vadd.f32 %v5365_v33, %v633_v21  ;;  %v657_v37 = vadd.f32 %v5365_v33, %v634_v22  ;;  %v5491_v39 = vpack.c.bf16 %v661_v20, %v660_v15  ;;  %v553_v9 = vld [vmem:[%s5435_s21 + $0x68] sm:$0xff]  ;;  %v5548_v10 = vld [vmem:[%s5447_s25 + $0x20] sm:$0xff]   ;;  %v554_v11 = vld [vmem:[%s5435_s21 + $0x70] sm:$0xff] }
  0x3e   : > { %v586_v31 = vadd.f32 %v5460_v19, %v563_v23  ;;  %1100 = vrot.lane.b32.xlu1 %v5451_v14, %s5217_s22  ;;  %v587_v40 = vadd.f32 %v5460_v19, %v564_v30  ;;  %v565_v41 = vmul.f32 %v5425_v6, %v542_v24  ;;  %v566_v42 = vmul.f32 %v5425_v6, %v543_v25  ;;  %v555_v12 = vld [vmem:[%s5435_s21 + $0x78] sm:$0xff] }
  0x3f   : > { %4604 = vmatpush3.bf16.msra.mxu1 %v5472_v27  ;;  %v567_v45 = vmul.f32 %v5425_v6, %v544_v26  ;;  %v568_v46 = vmul.f32 %v5425_v6, %v545_v38  ;;  %v5511_v48 = vpack.c.bf16 %v659_v35, %v658_v34  ;;  %v5513_v49 = vpack.c.bf16 %v657_v37, %v656_v36  ;;  %v5573_v25 = vld [vmem:[%s5447_s25 + $0x18] sm:$0xff]   ;;  %v5592_v36 = vld [vmem:[%s5447_s25 + $0x10] sm:$0xff]  }
  0x40   : > { %4605 = vmatprep.subr.bf16.mxu1 %v5483_v32  ;;  %v5502_v33 = vpack.c.bf16 %v587_v40, %v586_v31  ;;  %v588_v50 = vadd.f32 %v5460_v19, %v565_v41  ;;  %v589_v51 = vadd.f32 %v5460_v19, %v566_v42  ;;  %v569_v52 = vmul.f32 %v5425_v6, %v546_v43  ;;  %v5652_v43 = vld [vmem:[%s5447_s25 + $0x8] sm:$0xff]  }
  0x41   : > { %1098 = vrot.lane.b32.xlu0 %v5476_v29, %s5217_s22  ;;  %v570_v53 = vmul.f32 %v5425_v6, %v547_v44  ;;  %v590_v58 = vadd.f32 %v5460_v19, %v567_v45  ;;  %v591_v59 = vadd.f32 %v5460_v19, %v568_v46  ;;  %v571_v61 = vmul.f32 %v5425_v6, %v548_v47  ;;  %v5659_v44 = vld [vmem:[%s5447_s25] sm:$0xff]  }
  0x42   : > { %4574 = vmatpush3.bf16.xpose.msra.mxu0 %v756_v28  ;;  %1096 = vrot.lane.b32.xlu1 %v5491_v39, %s5217_s22  ;;  %v753_v62 = vsel %vm712_vm0, %v5416_v1, 0  ;;  %v572_v63 = vmul.f32 %v5425_v6, %v549_v54  ;;  %v573_v2 = vmul.f32 %v5425_v6, %v550_v55  ;;  %v5540_v4 = vpack.c.bf16 %v589_v51, %v588_v50  ;;  %v699_v50 = vld [vmem:[%s7394_s3 + $0x18] sm:$0xff]  ;;  %v696_v51 = vld [vmem:[%s7394_s3] sm:$0xff]  ;;  %v698_v54 = vld [vmem:[%s7394_s3 + $0x10] sm:$0xff] }
  0x43   : > { %5085 = vmatprep.subr.msk.bf16.mxu0 %vm712_vm0, %v5416_v1  ;;  %4587 = vmatprep.mubr.msk.bf16.mxu0 %vm712_vm0, %v5502_v33  ;;  %v592_v5 = vadd.f32 %v5460_v19, %v569_v52  ;;  %v593_v7 = vadd.f32 %v5460_v19, %v570_v53  ;;  %v574_v8 = vmul.f32 %v5425_v6, %v551_v57  ;;  %v750_v26 = vsel %vm712_vm0, %v5451_v14, 0  ;;  %v697_v53 = vld [vmem:[%s7394_s3 + $0x8] sm:$0xff] }
  0x44   : > { %4606 = vmatpush3.bf16.msra.mxu1 %v5483_v32  ;;  %v5554_v13 = vpack.c.bf16 %v591_v59, %v590_v58  ;;  %v594_v15 = vadd.f32 %v5460_v19, %v571_v61  ;;  %v575_v16 = vmul.f32 %v5425_v6, %v552_v3  ;;  %v595_v17 = vadd.f32 %v5460_v19, %v572_v63 }
  0x45   : > { %1094 = vrot.lane.b32.xlu0 %v5511_v48, %s5217_s22  ;;  %4607 = vmatprep.subr.bf16.mxu1 %v5524_v56  ;;  %v596_v18 = vadd.f32 %v5460_v19, %v573_v2  ;;  %v576_v20 = vmul.f32 %v5425_v6, %v553_v9  ;;  %v5566_v21 = vpack.c.bf16 %v593_v7, %v592_v5  ;;  %v744_v40 = vsel %vm712_vm0, %v5491_v39, 0  ;;  %v702_v2 = vld [vmem:[%s7394_s3 + $0x30] sm:$0xff]  ;;  %v703_v9 = vld [vmem:[%s7394_s3 + $0x38] sm:$0xff] }
  0x46   : > { %1092 = vrot.lane.b32.xlu1 %v5513_v49, %s5217_s22  ;;  %v597_v22 = vadd.f32 %v5460_v19, %v574_v8  ;;  %v577_v23 = vmul.f32 %v5425_v6, %v554_v11  ;;  %v578_v24 = vmul.f32 %v5425_v6, %v555_v12  ;;  %v5581_v28 = vpack.c.bf16 %v595_v17, %v594_v15  ;;  %v700_v8 = vld [vmem:[%s7394_s3 + $0x20] sm:$0xff] }
  0x47   : > { %v598_v30 = vadd.f32 %v5460_v19, %v575_v16  ;;  %v599_v31 = vadd.f32 %v5460_v19, %v576_v20  ;;  %v741_v41 = vsel %vm712_vm0, %v5511_v48, 0  ;;  %v738_v42 = vsel %vm712_vm0, %v5513_v49, 0  ;;  %v701_v16 = vld [vmem:[%s7394_s3 + $0x28] sm:$0xff] }
  0x48   : > { %4608 = vmatpush3.bf16.msra.mxu1 %v5524_v56  ;;  %v5586_v6 = vpack.c.bf16 %v597_v22, %v596_v18  ;;  %v600_v34 = vadd.f32 %v5460_v19, %v577_v23  ;;  %v601_v35 = vadd.f32 %v5460_v19, %v578_v24  ;;  %v747_v19 = vsel %vm712_vm0, %v5476_v29, 0 }
  0x49   : > { %1068 = vrot.lane.b32.xlu0 %v5502_v33, %s5217_s22  ;;  %4609 = vmatprep.subr.bf16.mxu1 %v5548_v10  ;;  %v5600_v37 = vpack.c.bf16 %v599_v31, %v598_v30  ;;  %v706_v30 = vld [vmem:[%s7394_s3 + $0x50] sm:$0xff] }
  0x4a   : > { %4576 = vmatpush3.bf16.xpose.msra.mxu0 %v753_v62  ;;  %1070 = vrot.lane.b32.xlu1 %v5540_v4, %s5217_s22  ;;  %v5603_v38 = vpack.c.bf16 %v601_v35, %v600_v34  ;;  %v704_v35 = vld [vmem:[%s7394_s3 + $0x40] sm:$0xff] }
  0x4b   : > { %5086 = vmatprep.subr.msk.bf16.mxu0 %vm712_vm0, %v5451_v14 }
  0x4c   : > { %4610 = vmatpush3.bf16.msra.mxu1 %v5548_v10 }
  0x4d   : > { %1072 = vrot.lane.b32.xlu0 %v5554_v13, %s5217_s22  ;;  %4611 = vmatprep.subr.bf16.mxu1 %v5573_v25 }
  0x4e   : > { %1074 = vrot.lane.b32.xlu1 %v5566_v21, %s5217_s22 }
  0x50   : > { %4612 = vmatpush3.bf16.msra.mxu1 %v5573_v25 }
  0x51   : > { %1076 = vrot.lane.b32.xlu0 %v5581_v28, %s5217_s22  ;;  %4613 = vmatprep.subr.bf16.mxu1 %v5592_v36 }
  0x52   : > { %4578 = vmatpush3.bf16.xpose.msra.mxu0 %v750_v26  ;;  %1078 = vrot.lane.b32.xlu1 %v5586_v6, %s5217_s22 }
  0x53   : > { %5087 = vmatprep.subr.msk.bf16.mxu0 %vm712_vm0, %v5476_v29 }
  0x54   : > { %4614 = vmatpush3.bf16.msra.mxu1 %v5592_v36 }
  0x55   : > { %1080 = vrot.lane.b32.xlu0 %v5600_v37, %s5217_s22  ;;  %4615 = vmatprep.subr.bf16.mxu1 %v5652_v43 }
  0x56   : > { %1082 = vrot.lane.b32.xlu1 %v5603_v38, %s5217_s22 }
  0x58   : > { %4616 = vmatpush3.bf16.msra.mxu1 %v5652_v43 }
  0x59   : > { %1275 = vrot.lane.b32.xlu0 %v5472_v27, %s5217_s22  ;;  %4617 = vmatprep.subr.bf16.mxu1 %v5659_v44 }
  0x5a   : > { %4580 = vmatpush3.bf16.xpose.msra.mxu0 %v747_v19  ;;  %1273 = vrot.lane.b32.xlu1 %v5483_v32, %s5217_s22  ;;  %v707_v19 = vld [vmem:[%s7394_s3 + $0x58] sm:$0xff] }
  0x5b   : > { %5088 = vmatprep.subr.msk.bf16.mxu0 %vm712_vm0, %v5491_v39 }
  0x5c   : > { %4618 = vmatpush3.bf16.msra.mxu1 %v5659_v44 }
  0x5d   : > { %1271 = vrot.lane.b32.xlu0 %v5524_v56, %s5217_s22 }
  0x5e   : > { %1269 = vrot.lane.b32.xlu1 %v5548_v10, %s5217_s22 }
  0x61   : > { %1267 = vrot.lane.b32.xlu0 %v5573_v25, %s5217_s22 }
  0x62   : > { %4582 = vmatpush3.bf16.xpose.msra.mxu0 %v744_v40  ;;  %1265 = vrot.lane.b32.xlu1 %v5592_v36, %s5217_s22 }
  0x63   : > { %5089 = vmatprep.subr.msk.bf16.mxu0 %vm712_vm0, %v5511_v48 }
  0x65   : > { %1263 = vrot.lane.b32.xlu0 %v5652_v43, %s5217_s22 }
  0x66   : > { %1261 = vrot.lane.b32.xlu1 %v5659_v44, %s5217_s22 }
  0x69   : > { %1526 = vrot.lane.b32.xlu0 %v5408_v60, %s5218_s11 }
  0x6a   : > { %4584 = vmatpush3.bf16.xpose.msra.mxu0 %v741_v41  ;;  %1524 = vrot.lane.b32.xlu1 %v5414_v0, %s5218_s11 }
  0x6b   : > { %5090 = vmatprep.subr.msk.bf16.mxu0 %vm712_vm0, %v5513_v49 }
  0x6d   : > { %1522 = vrot.lane.b32.xlu0 %v5416_v1, %s5218_s11 }
  0x6e   : > { %1520 = vrot.lane.b32.xlu1 %v5451_v14, %s5218_s11 }
  0x71   : > { %1518 = vrot.lane.b32.xlu0 %v5476_v29, %s5218_s11 }
  0x72   : > { %4586 = vmatpush3.bf16.xpose.msra.mxu0 %v738_v42  ;;  %1516 = vrot.lane.b32.xlu1 %v5491_v39, %s5218_s11 }
  0x75   : > { %1514 = vrot.lane.b32.xlu0 %v5511_v48, %s5218_s11 }
  0x76   : > { %1512 = vrot.lane.b32.xlu1 %v5513_v49, %s5218_s11 }
  0x79   : > { %4588 = vmatmul.mubr.msk.bf16.vlgmr.msra.gmra.mxu0 %vm712_vm0, %v5540_v4  ;;  %1496 = vrot.lane.b32.xlu0 %v5502_v33, %s5218_s11 }
  0x7a   : > { %4591 = vmatprep.mubr.msk.bf16.mxu0 %vm712_vm0, %v5554_v13  ;;  %1498 = vrot.lane.b32.xlu1 %v5540_v4, %s5218_s11 }
  0x7d   : > { %1500 = vrot.lane.b32.xlu0 %v5554_v13, %s5218_s11 }
  0x7e   : > { %1502 = vrot.lane.b32.xlu1 %v5566_v21, %s5218_s11 }
  0x81   : > { %4592 = vmatmul.mubr.msk.bf16.gmra.mxu0 %vm712_vm0, %v5566_v21  ;;  %1504 = vrot.lane.b32.xlu0 %v5581_v28, %s5218_s11 }
  0x82   : > { %4595 = vmatprep.mubr.msk.bf16.mxu0 %vm712_vm0, %v5581_v28  ;;  %1506 = vrot.lane.b32.xlu1 %v5586_v6, %s5218_s11 }
  0x85   : > { %1508 = vrot.lane.b32.xlu0 %v5600_v37, %s5218_s11 }
  0x86   : > { %1510 = vrot.lane.b32.xlu1 %v5603_v38, %s5218_s11 }
  0x89   : > { %4596 = vmatmul.mubr.msk.bf16.gmra.mxu0 %vm712_vm0, %v5586_v6  ;;  %1695 = vrot.lane.b32.xlu0 %v5472_v27, %s5218_s11 }
  0x8a   : > { %4599 = vmatprep.mubr.msk.bf16.mxu0 %vm712_vm0, %v5600_v37  ;;  %1693 = vrot.lane.b32.xlu1 %v5483_v32, %s5218_s11 }
  0x8d   : > { %1691 = vrot.lane.b32.xlu0 %v5524_v56, %s5218_s11 }
  0x8e   : > { %1689 = vrot.lane.b32.xlu1 %v5548_v10, %s5218_s11 }
  0x91   : > { %4600 = vmatmul.mubr.msk.bf16.gmra.mxu0 %vm712_vm0, %v5603_v38  ;;  %1687 = vrot.lane.b32.xlu0 %v5573_v25, %s5218_s11 }
  0x92   : > { %1685 = vrot.lane.b32.xlu1 %v5592_v36, %s5218_s11 }
  0x95   : > { %1683 = vrot.lane.b32.xlu0 %v5652_v43, %s5218_s11 }
  0x96   : > { %1681 = vrot.lane.b32.xlu1 %v5659_v44, %s5218_s11 }
  0x99   : > { %1946 = vrot.lane.b32.xlu0 %v5408_v60, %s5219_s15 }
  0x9a   : > { %1944 = vrot.lane.b32.xlu1 %v5414_v0, %s5219_s15 }
  0x9d   : > { %1942 = vrot.lane.b32.xlu0 %v5416_v1, %s5219_s15 }
  0x9e   : > { %1940 = vrot.lane.b32.xlu1 %v5451_v14, %s5219_s15 }
  0xa1   : > { %1938 = vrot.lane.b32.xlu0 %v5476_v29, %s5219_s15 }
  0xa2   : > { %1936 = vrot.lane.b32.xlu1 %v5491_v39, %s5219_s15 }
  0xa5   : > { %1934 = vrot.lane.b32.xlu0 %v5511_v48, %s5219_s15 }
  0xa6   : > { %1932 = vrot.lane.b32.xlu1 %v5513_v49, %s5219_s15 }
  0xa9   : > { %1916 = vrot.lane.b32.xlu0 %v5502_v33, %s5219_s15 }
  0xaa   : > { %1918 = vrot.lane.b32.xlu1 %v5540_v4, %s5219_s15 }
  0xab   : > { %v1107_v45 = vpop.permute.xlu0 %1106 }
  0xac   : > { %5091 = vmatprep.subr.msk.bf16.mxu1 %vm712_vm0, %v1107_v45  ;;  %v1154_v5 = vsel %vm712_vm0, %v1107_v45, 0  ;;  %v1103_v40 = vpop.permute.xlu1 %1102  ;;  %v705_v45 = vld [vmem:[%s7394_s3 + $0x48] sm:$0xff] }
  0xad   : > { %1920 = vrot.lane.b32.xlu0 %v5554_v13, %s5219_s15 }
  0xae   : > { %1922 = vrot.lane.b32.xlu1 %v5566_v21, %s5219_s15 }
  0xaf   : > { %v1105_v11 = vpop.permute.xlu0 %1104 }
  0xb0   : > { %v1151_v31 = vsel %vm712_vm0, %v1105_v11, 0 }
  0xb1   : > { %1924 = vrot.lane.b32.xlu0 %v5581_v28, %s5219_s15 }
  0xb2   : > { %1926 = vrot.lane.b32.xlu1 %v5586_v6, %s5219_s15 }
  0xb5   : > { %1928 = vrot.lane.b32.xlu0 %v5600_v37, %s5219_s15 }
  0xb6   : > { %1930 = vrot.lane.b32.xlu1 %v5603_v38, %s5219_s15 }
  0xb9   : > { %2115 = vrot.lane.b32.xlu0 %v5472_v27, %s5219_s15 }
  0xba   : > { %2113 = vrot.lane.b32.xlu1 %v5483_v32, %s5219_s15 }
  0xbd   : > { %2111 = vrot.lane.b32.xlu0 %v5524_v56, %s5219_s15 }
  0xbe   : > { %2109 = vrot.lane.b32.xlu1 %v5548_v10, %s5219_s15 }
  0xc1   : > { %2107 = vrot.lane.b32.xlu0 %v5573_v25, %s5219_s15 }
  0xc2   : > { %2105 = vrot.lane.b32.xlu1 %v5592_v36, %s5219_s15 }
  0xc5   : > { %2103 = vrot.lane.b32.xlu0 %v5652_v43, %s5219_s15 }
  0xc6   : > { %2101 = vrot.lane.b32.xlu1 %v5659_v44, %s5219_s15 }
  0xc9   : > { %2366 = vrot.lane.b32.xlu0 %v5408_v60, %s5220_s16 }
  0xca   : > { %2364 = vrot.lane.b32.xlu1 %v5414_v0, %s5220_s16 }
  0xcd   : > { %2362 = vrot.lane.b32.xlu0 %v5416_v1, %s5220_s16 }
  0xce   : > { %2360 = vrot.lane.b32.xlu1 %v5451_v14, %s5220_s16 }
  0xd1   : > { %2358 = vrot.lane.b32.xlu0 %v5476_v29, %s5220_s16 }
  0xd2   : > { %2356 = vrot.lane.b32.xlu1 %v5491_v39, %s5220_s16 }
  0xd5   : > { %2354 = vrot.lane.b32.xlu0 %v5511_v48, %s5220_s16 }
  0xd6   : > { %2352 = vrot.lane.b32.xlu1 %v5513_v49, %s5220_s16 }
  0xd9   : > { %2336 = vrot.lane.b32.xlu0 %v5502_v33, %s5220_s16 }
  0xda   : > { %2338 = vrot.lane.b32.xlu1 %v5540_v4, %s5220_s16 }
  0xdd   : > { %2340 = vrot.lane.b32.xlu0 %v5554_v13, %s5220_s16 }
  0xde   : > { %2342 = vrot.lane.b32.xlu1 %v5566_v21, %s5220_s16 }
  0xe1   : > { %2344 = vrot.lane.b32.xlu0 %v5581_v28, %s5220_s16 }
  0xe2   : > { %2346 = vrot.lane.b32.xlu1 %v5586_v6, %s5220_s16 }
  0xe5   : > { %2348 = vrot.lane.b32.xlu0 %v5600_v37, %s5220_s16 }
  0xe6   : > { %2350 = vrot.lane.b32.xlu1 %v5603_v38, %s5220_s16 }
  0xe9   : > { %2535 = vrot.lane.b32.xlu0 %v5472_v27, %s5220_s16 }
  0xea   : > { %2533 = vrot.lane.b32.xlu1 %v5483_v32, %s5220_s16 }
  0xed   : > { %2531 = vrot.lane.b32.xlu0 %v5524_v56, %s5220_s16 }
  0xee   : > { %2529 = vrot.lane.b32.xlu1 %v5548_v10, %s5220_s16 }
  0xf1   : > { %2527 = vrot.lane.b32.xlu0 %v5573_v25, %s5220_s16 }
  0xf2   : > { %2525 = vrot.lane.b32.xlu1 %v5592_v36, %s5220_s16 }
  0xf5   : > { %2523 = vrot.lane.b32.xlu0 %v5652_v43, %s5220_s16 }
  0xf6   : > { %2521 = vrot.lane.b32.xlu1 %v5659_v44, %s5220_s16 }
  0xf9   : > { %2786 = vrot.lane.b32.xlu0 %v5408_v60, %s5221_s18 }
  0xfa   : > { %2784 = vrot.lane.b32.xlu1 %v5414_v0, %s5221_s18 }
  0xfd   : > { %2782 = vrot.lane.b32.xlu0 %v5416_v1, %s5221_s18 }
  0xfe   : > { %2780 = vrot.lane.b32.xlu1 %v5451_v14, %s5221_s18 }
 0x101   : > { %2778 = vrot.lane.b32.xlu0 %v5476_v29, %s5221_s18 }
 0x139   : > { %v4589_v46 = vpop.f32.mrf.mxu0 }
 0x13a   : > { %v804_v61 = vadd.f32 %v4589_v46, %v698_v54 }
 0x13b   : > { %v795_v47 = vpop.f32.mrf.mxu0 }
 0x13c   : > { %v796_v58 = vadd.f32 %v795_v47, %v696_v51 }
 0x13d   : > { %v4590_v52 = vpop.f32.mrf.mxu0 }
 0x13e   : > { %v807_v55 = vadd.f32 %v4590_v52, %v699_v50 }
 0x13f   : > { %v798_v57 = vpop.f32.mrf.mxu0 }
 0x140   : > { %v799_v59 = vadd.f32 %v798_v57, %v697_v53  ;;  %v859_v3 = vpack.c.bf16 %v807_v55, %v804_v61  ;;  %v710_v55 = vld [vmem:[%s7394_s3 + $0x70] sm:$0xff]  ;;  %v1148_v57 = vsel %vm712_vm0, %v1103_v40, 0  ;;  %v708_v61 = vld [vmem:[%s7394_s3 + $0x60] sm:$0xff] }
 0x141   : > { %v4593_v62 = vpop.f32.mrf.mxu0 }
 0x142   : > { %v858_v63 = vpack.c.bf16 %v799_v59, %v796_v58  ;;  %v820_v12 = vadd.f32 %v4593_v62, %v702_v2  ;;  %v1099_v58 = vpop.permute.xlu0 %1098  ;;  %v711_v62 = vld [vmem:[%s7394_s3 + $0x78] sm:$0xff]  ;;  %2774 = vrot.lane.b32.xlu0 %v5511_v48, %s5221_s18 }
 0x143   : > { %v811_v7 = vpop.f32.mrf.mxu0 }
 0x144   : > { %4619 = vmatprep.mubr.bf16.mxu1 %v858_v63  ;;  %v812_v17 = vadd.f32 %v811_v7, %v700_v8  ;;  %v1101_v63 = vpop.permute.xlu1 %1100  ;;  %2776 = vrot.lane.b32.xlu1 %v5491_v39, %s5221_s18 }
 0x145   : > { %4620 = vmatmul.mubr.bf16.vlgmr.msra.gmra.mxu1 %v859_v3  ;;  %v4594_v15 = vpop.f32.mrf.mxu0 }
 0x146   : > { %4636 = vmatpush3.bf16.xpose.msra.mxu1 %v1154_v5  ;;  %v823_v18 = vadd.f32 %v4594_v15, %v703_v9  ;;  %v709_v5 = vld [vmem:[%s7394_s3 + $0x68] sm:$0xff] }
 0x147   : > { %5092 = vmatprep.subr.msk.bf16.mxu1 %vm712_vm0, %v1105_v11  ;;  %v814_v20 = vpop.f32.mrf.mxu0  ;;  %v1095_v11 = vpop.permute.xlu0 %1094  ;;  %2756 = vrot.lane.b32.xlu0 %v5502_v33, %s5221_s18 }
 0x148   : > { %v815_v22 = vadd.f32 %v814_v20, %v701_v16  ;;  %v861_v23 = vpack.c.bf16 %v823_v18, %v820_v12  ;;  %v1142_v20 = vsel %vm712_vm0, %v1099_v58, 0 }
 0x149   : > { %v4597_v24 = vpop.f32.mrf.mxu0 }
 0x14a   : > { %v860_v26 = vpack.c.bf16 %v815_v22, %v812_v17  ;;  %v836_v41 = vadd.f32 %v4597_v24, %v706_v30  ;;  %v1145_v17 = vsel %vm712_vm0, %v1101_v63, 0  ;;  %v1097_v22 = vpop.permute.xlu1 %1096  ;;  %v1136_v24 = vsel %vm712_vm0, %v1095_v11, 0  ;;  %2772 = vrot.lane.b32.xlu1 %v5513_v49, %s5221_s18 }
 0x14b   : > { %v827_v34 = vpop.f32.mrf.mxu0  ;;  %v1069_v18 = vpop.permute.xlu0 %1068  ;;  %2760 = vrot.lane.b32.xlu0 %v5554_v13, %s5221_s18 }
 0x14c   : > { %4623 = vmatprep.mubr.bf16.mxu1 %v860_v26  ;;  %v828_v46 = vadd.f32 %v827_v34, %v704_v35 }
 0x14d   : > { %v4598_v42 = vpop.f32.mrf.mxu0  ;;  %4624 = vmatmul.mubr.bf16.gmra.mxu1 %v861_v23  ;;  %v1139_v23 = vsel %vm712_vm0, %v1097_v22, 0 }
 0x14e   : > { %4638 = vmatpush3.bf16.xpose.msra.mxu1 %v1151_v31  ;;  %v839_v47 = vadd.f32 %v4598_v42, %v707_v19  ;;  %v1093_v26 = vpop.permute.xlu1 %1092  ;;  %2758 = vrot.lane.b32.xlu1 %v5540_v4, %s5221_s18 }
 0x14f   : > { %5093 = vmatprep.subr.msk.bf16.mxu1 %vm712_vm0, %v1103_v40  ;;  %v830_v50 = vpop.f32.mrf.mxu0  ;;  %v1133_v30 = vsel %vm712_vm0, %v1093_v26, 0  ;;  %v1073_v34 = vpop.permute.xlu0 %1072  ;;  %2764 = vrot.lane.b32.xlu0 %v5581_v28, %s5221_s18 }
 0x150   : > { %v831_v51 = vadd.f32 %v830_v50, %v705_v45  ;;  %v863_v52 = vpack.c.bf16 %v839_v47, %v836_v41 }
 0x151   : > { %v4601_v53 = vpop.f32.mrf.mxu0 }
 0x152   : > { %v862_v54 = vpack.c.bf16 %v831_v51, %v828_v46  ;;  %v852_v2 = vadd.f32 %v4601_v53, %v710_v55  ;;  %v1071_v31 = vpop.permute.xlu1 %1070  ;;  %2762 = vrot.lane.b32.xlu1 %v5566_v21, %s5221_s18 }
 0x153   : > { %v843_v59 = vpop.f32.mrf.mxu0  ;;  %v1077_v19 = vpop.permute.xlu0 %1076  ;;  %2768 = vrot.lane.b32.xlu0 %v5600_v37, %s5221_s18 }
 0x154   : > { %4627 = vmatprep.mubr.bf16.mxu1 %v862_v54  ;;  %v844_v7 = vadd.f32 %v843_v59, %v708_v61 }
 0x155   : > { %v4602_v3 = vpop.f32.mrf.mxu0  ;;  %4628 = vmatmul.mubr.bf16.gmra.mxu1 %v863_v52 }
 0x156   : > { %4640 = vmatpush3.bf16.xpose.msra.mxu1 %v1148_v57  ;;  %v855_v8 = vadd.f32 %v4602_v3, %v711_v62  ;;  %v1075_v35 = vpop.permute.xlu1 %1074  ;;  %2766 = vrot.lane.b32.xlu1 %v5586_v6, %s5221_s18 }
 0x157   : > { %5094 = vmatprep.subr.msk.bf16.mxu1 %vm712_vm0, %v1101_v63  ;;  %v846_v9 = vpop.f32.mrf.mxu0  ;;  %v1081_v41 = vpop.permute.xlu0 %1080  ;;  %2955 = vrot.lane.b32.xlu0 %v5472_v27, %s5221_s18 }
 0x158   : > { %v847_v12 = vadd.f32 %v846_v9, %v709_v5  ;;  %v865_v15 = vpack.c.bf16 %v855_v8, %v852_v2 }
 0x15a   : > { %v864_v16 = vpack.c.bf16 %v847_v12, %v844_v7  ;;  %v1079_v40 = vpop.permute.xlu1 %1078  ;;  %2770 = vrot.lane.b32.xlu1 %v5603_v38, %s5221_s18 }
 0x15b   : > { %v1276_v45 = vpop.permute.xlu0 %1275  ;;  %2951 = vrot.lane.b32.xlu0 %v5524_v56, %s5221_s18 }
 0x15c   : > { %4631 = vmatprep.mubr.bf16.mxu1 %v864_v16  ;;  %4667 = vmatprep.subr.bf16.mxu0 %v1276_v45 }
 0x15d   : > { %4632 = vmatmul.mubr.bf16.gmra.mxu1 %v865_v15  ;;  %4668 = vmatpush3.bf16.msra.mxu0 %v1276_v45 }
 0x15e   : > { %4642 = vmatpush3.bf16.xpose.msra.mxu1 %v1145_v17  ;;  %4651 = vmatprep.mubr.msk.bf16.mxu1 %vm712_vm0, %v1069_v18  ;;  %v1083_v42 = vpop.permute.xlu1 %1082 }
 0x15f   : > { %5095 = vmatprep.subr.msk.bf16.mxu1 %vm712_vm0, %v1099_v58  ;;  %v1272_v47 = vpop.permute.xlu0 %1271  ;;  %2953 = vrot.lane.b32.xlu1 %v5483_v32, %s5221_s18 }
 0x160   : > { %2947 = vrot.lane.b32.xlu0 %v5573_v25, %s5221_s18 }
 0x162   : > { %v1274_v46 = vpop.permute.xlu1 %1273 }
 0x163   : > { %4669 = vmatprep.subr.bf16.mxu0 %v1274_v46  ;;  %v1268_v51 = vpop.permute.xlu0 %1267  ;;  %2949 = vrot.lane.b32.xlu1 %v5548_v10, %s5221_s18 }
 0x164   : > { %4670 = vmatpush3.bf16.msra.mxu0 %v1274_v46  ;;  %2943 = vrot.lane.b32.xlu0 %v5652_v43, %s5221_s18 }
 0x165   : > { %4671 = vmatprep.subr.bf16.mxu0 %v1272_v47 }
 0x166   : > { %4644 = vmatpush3.bf16.xpose.msra.mxu1 %v1142_v20  ;;  %v1270_v50 = vpop.permute.xlu1 %1269 }
 0x167   : > { %5096 = vmatprep.subr.msk.bf16.mxu1 %vm712_vm0, %v1097_v22  ;;  %v1264_v53 = vpop.permute.xlu0 %1263  ;;  %2945 = vrot.lane.b32.xlu1 %v5592_v36, %s5221_s18 }
 0x168   : > { %4672 = vmatpush3.bf16.msra.mxu0 %v1272_v47  ;;  %3206 = vrot.lane.b32.xlu0 %v5408_v60, %s5222_s30 }
 0x169   : > { %4673 = vmatprep.subr.bf16.mxu0 %v1270_v50 }
 0x16a   : > { %v1266_v52 = vpop.permute.xlu1 %1265 }
 0x16b   : > { %v5833_v55 = vpop.permute.xlu0 %1526  ;;  %2941 = vrot.lane.b32.xlu1 %v5659_v44, %s5221_s18 }
 0x16c   : > { %4674 = vmatpush3.bf16.msra.mxu0 %v1270_v50  ;;  %3202 = vrot.lane.b32.xlu0 %v5416_v1, %s5222_s30 }
 0x16d   : > { %4675 = vmatprep.subr.bf16.mxu0 %v1268_v51 }
 0x16e   : > { %4646 = vmatpush3.bf16.xpose.msra.mxu1 %v1139_v23  ;;  %v1262_v54 = vpop.permute.xlu1 %1261 }
 0x16f   : > { %5097 = vmatprep.subr.msk.bf16.mxu1 %vm712_vm0, %v1095_v11  ;;  %v5861_v57 = vpop.permute.xlu0 %1522  ;;  %3204 = vrot.lane.b32.xlu1 %v5414_v0, %s5222_s30 }
 0x170   : > { %4676 = vmatpush3.bf16.msra.mxu0 %v1268_v51  ;;  %3198 = vrot.lane.b32.xlu0 %v5476_v29, %s5222_s30 }
 0x171   : > { %4677 = vmatprep.subr.bf16.mxu0 %v1266_v52 }
 0x172   : > { %v5863_v58 = vpop.permute.xlu1 %1524 }
 0x173   : > { %v5869_v59 = vpop.permute.xlu0 %1518  ;;  %3200 = vrot.lane.b32.xlu1 %v5451_v14, %s5222_s30 }
 0x174   : > { %4678 = vmatpush3.bf16.msra.mxu0 %v1266_v52  ;;  %3194 = vrot.lane.b32.xlu0 %v5511_v48, %s5222_s30 }
 0x175   : > { %4679 = vmatprep.subr.bf16.mxu0 %v1264_v53 }
 0x176   : > { %4648 = vmatpush3.bf16.xpose.msra.mxu1 %v1136_v24  ;;  %v5871_v61 = vpop.permute.xlu1 %1520 }
 0x177   : > { %5098 = vmatprep.subr.msk.bf16.mxu1 %vm712_vm0, %v1093_v26  ;;  %v5879_v63 = vpop.permute.xlu0 %1514  ;;  %3196 = vrot.lane.b32.xlu1 %v5491_v39, %s5222_s30 }
 0x178   : > { %4680 = vmatpush3.bf16.msra.mxu0 %v1264_v53  ;;  %3176 = vrot.lane.b32.xlu0 %v5502_v33, %s5222_s30 }
 0x179   : > { %4681 = vmatprep.subr.bf16.mxu0 %v1262_v54 }
 0x17a   : > { %v5877_v62 = vpop.permute.xlu1 %1516 }
 0x17b   : > { %v5887_v3 = vpop.permute.xlu0 %1496  ;;  %3192 = vrot.lane.b32.xlu1 %v5513_v49, %s5222_s30 }
 0x17c   : > { %4682 = vmatpush3.bf16.msra.mxu0 %v1262_v54  ;;  %3180 = vrot.lane.b32.xlu0 %v5554_v13, %s5222_s30 }
 0x17d   : > { %5099 = vmatprep.subr.msk.bf16.mxu0 %vm712_vm0, %v5833_v55 }
 0x17e   : > { %4650 = vmatpush3.bf16.xpose.msra.mxu1 %v1133_v30  ;;  %v5885_v2 = vpop.permute.xlu1 %1512 }
 0x17f   : > { %v5895_v7 = vpop.permute.xlu0 %1500  ;;  %3178 = vrot.lane.b32.xlu1 %v5540_v4, %s5222_s30 }
 0x180   : > { %3184 = vrot.lane.b32.xlu0 %v5581_v28, %s5222_s30 }
 0x182   : > { %v5893_v5 = vpop.permute.xlu1 %1498 }
 0x183   : > { %v5903_v9 = vpop.permute.xlu0 %1504  ;;  %3182 = vrot.lane.b32.xlu1 %v5566_v21, %s5222_s30 }
 0x184   : > { %3188 = vrot.lane.b32.xlu0 %v5600_v37, %s5222_s30 }
 0x185   : > { %4652 = vmatmul.mubr.msk.bf16.vlgmr.msra.gmra.mxu1 %vm712_vm0, %v1071_v31 }
 0x186   : > { %4655 = vmatprep.mubr.msk.bf16.mxu1 %vm712_vm0, %v1073_v34  ;;  %v5901_v8 = vpop.permute.xlu1 %1502 }
 0x187   : > { %v5912_v12 = vpop.permute.xlu0 %1508  ;;  %3186 = vrot.lane.b32.xlu1 %v5586_v6, %s5222_s30 }
 0x18a   : > { %v5910_v11 = vpop.permute.xlu1 %1506 }
 0x18b   : > { %v1696_v18 = vpop.permute.xlu0 %1695  ;;  %3190 = vrot.lane.b32.xlu1 %v5603_v38, %s5222_s30 }
 0x18c   : > { %4731 = vmatprep.subr.bf16.mxu1 %v1696_v18 }
 0x18d   : > { %4656 = vmatmul.mubr.msk.bf16.gmra.mxu1 %vm712_vm0, %v1075_v35 }
 0x18e   : > { %4659 = vmatprep.mubr.msk.bf16.mxu1 %vm712_vm0, %v1077_v19  ;;  %v5923_v17 = vpop.permute.xlu1 %1510  ;;  %4732 = vmatpush3.bf16.msra.mxu1 %v1696_v18 }
 0x18f   : > { %v1692_v34 = vpop.permute.xlu0 %1691 }
 0x192   : > { %v1694_v26 = vpop.permute.xlu1 %1693 }
 0x193   : > { %4733 = vmatprep.subr.bf16.mxu1 %v1694_v26  ;;  %v1688_v47 = vpop.permute.xlu0 %1687 }
 0x194   : > { %4734 = vmatpush3.bf16.msra.mxu1 %v1694_v26 }
 0x195   : > { %4660 = vmatmul.mubr.msk.bf16.gmra.mxu1 %vm712_vm0, %v1079_v40  ;;  %4735 = vmatprep.subr.bf16.mxu1 %v1692_v34 }
 0x196   : > { %4663 = vmatprep.mubr.msk.bf16.mxu1 %vm712_vm0, %v1081_v41 }
 0x197   : > { %v1684_v18 = vpop.permute.xlu0 %1683 }
 0x198   : > { %4736 = vmatpush3.bf16.msra.mxu1 %v1692_v34 }
 0x19b   : > { %v5973_v34 = vpop.permute.xlu0 %1946 }
 0x19d   : > { %4664 = vmatmul.mubr.msk.bf16.gmra.mxu1 %vm712_vm0, %v1083_v42  ;;  %v1690_v42 = vpop.permute.xlu1 %1689 }
 0x19e   : > { %4737 = vmatprep.subr.bf16.mxu1 %v1690_v42 }
 0x19f   : > { %4738 = vmatpush3.bf16.msra.mxu1 %v1690_v42 }
 0x1a0   : > { %4739 = vmatprep.subr.bf16.mxu1 %v1688_v47 }
 0x1a1   : > { %v1686_v54 = vpop.permute.xlu1 %1685 }
 0x1a3   : > { %4740 = vmatpush3.bf16.msra.mxu1 %v1688_v47  ;;  %v5991_v47 = vpop.permute.xlu0 %1942 }
 0x1a4   : > { %4741 = vmatprep.subr.bf16.mxu1 %v1686_v54 }
 0x1a5   : > { %v1682_v26 = vpop.permute.xlu1 %1681 }
 0x1a7   : > { %4742 = vmatpush3.bf16.msra.mxu1 %v1686_v54  ;;  %v6003_v32 = vpop.permute.xlu0 %1938 }
 0x1a8   : > { %4743 = vmatprep.subr.bf16.mxu1 %v1684_v18 }
 0x1a9   : > { %v5983_v42 = vpop.permute.xlu1 %1944 }
 0x1ab   : > { %4744 = vmatpush3.bf16.msra.mxu1 %v1684_v18 }
 0x1ac   : > { %4745 = vmatprep.subr.bf16.mxu1 %v1682_v26 }
 0x1ad   : > { %v6001_v27 = vpop.permute.xlu1 %1940 }
 0x1af   : > { %4746 = vmatpush3.bf16.msra.mxu1 %v1682_v26 }
 0x1b0   : > { %5107 = vmatprep.subr.msk.bf16.mxu1 %vm712_vm0, %v5973_v34 }
 0x205   : > { %v4621_v15 = vpop.f32.mrf.mxu1 }
 0x206   : > { %v1013_v16 = vmul.f32 0.088388346, %v4621_v15 }
 0x207   : > { %v948_v20 = vpop.f32.mrf.mxu1 }
 0x208   : > { %1029 = vst.msk [vmem:[%s5921_s19 + $0x10] sm:$0xff] %vm712_vm0, %v1013_v16  ;;  %v1011_v22 = vmul.f32 0.088388346, %v948_v20 }
 0x209   : > { %v4622_v23 = vpop.f32.mrf.mxu1 }
 0x20a   : > { %1027 = vst.msk [vmem:[%s5921_s19] sm:$0xff] %vm712_vm0, %v1011_v22  ;;  %v1014_v24 = vmul.f32 0.088388346, %v4622_v23 }
 0x20b   : > { %v951_v30 = vpop.f32.mrf.mxu1 }
 0x20c   : > { %1030 = vst.msk [vmem:[%s5921_s19 + $0x18] sm:$0xff] %vm712_vm0, %v1014_v24  ;;  %v1012_v31 = vmul.f32 0.088388346, %v951_v30 }
 0x20d   : > { %v4625_v35 = vpop.f32.mrf.mxu1 }
 0x20e   : > { %1028 = vst.msk [vmem:[%s5921_s19 + $0x8] sm:$0xff] %vm712_vm0, %v1012_v31  ;;  %v1017_v19 = vmul.f32 0.088388346, %v4625_v35 }
 0x20f   : > { %v964_v40 = vpop.f32.mrf.mxu1 }
 0x210   : > { %1033 = vst.msk [vmem:[%s5921_s19 + $0x30] sm:$0xff] %vm712_vm0, %v1017_v19  ;;  %v1015_v41 = vmul.f32 0.088388346, %v964_v40 }
 0x211   : > { %v4626_v45 = vpop.f32.mrf.mxu1 }
 0x212   : > { %1031 = vst.msk [vmem:[%s5921_s19 + $0x20] sm:$0xff] %vm712_vm0, %v1015_v41  ;;  %v1018_v46 = vmul.f32 0.088388346, %v4626_v45 }
 0x213   : > { %v967_v50 = vpop.f32.mrf.mxu1 }
 0x214   : > { %1034 = vst.msk [vmem:[%s5921_s19 + $0x38] sm:$0xff] %vm712_vm0, %v1018_v46  ;;  %v1016_v51 = vmul.f32 0.088388346, %v967_v50  ;;  %v6009_v50 = vpop.permute.xlu1 %1936 }
 0x215   : > { %v4629_v52 = vpop.f32.mrf.mxu1 }
 0x216   : > { %1032 = vst.msk [vmem:[%s5921_s19 + $0x28] sm:$0xff] %vm712_vm0, %v1016_v51  ;;  %v1021_v53 = vmul.f32 0.088388346, %v4629_v52  ;;  %v6015_v51 = vpop.permute.xlu0 %1934 }
 0x217   : > { %v980_v15 = vpop.f32.mrf.mxu1 }
 0x218   : > { %1037 = vst.msk [vmem:[%s5921_s19 + $0x50] sm:$0xff] %vm712_vm0, %v1021_v53  ;;  %v1019_v16 = vmul.f32 0.088388346, %v980_v15  ;;  %v6021_v52 = vpop.permute.xlu1 %1932 }
 0x219   : > { %v4630_v20 = vpop.f32.mrf.mxu1  ;;  %7431 = vst [vmem:[#allocation4_spill] sm:$0xff] %v6021_v52 }
 0x21a   : > { %1035 = vst.msk [vmem:[%s5921_s19 + $0x40] sm:$0xff] %vm712_vm0, %v1019_v16  ;;  %v1022_v22 = vmul.f32 0.088388346, %v4630_v20  ;;  %v6023_v53 = vpop.permute.xlu0 %1916 }
 0x21b   : > { %v983_v23 = vpop.f32.mrf.mxu1 }
 0x21c   : > { %1038 = vst.msk [vmem:[%s5921_s19 + $0x58] sm:$0xff] %vm712_vm0, %v1022_v22  ;;  %v1020_v24 = vmul.f32 0.088388346, %v983_v23  ;;  %v6029_v54 = vpop.permute.xlu1 %1918 }
 0x21d   : > { %v4633_v30 = vpop.f32.mrf.mxu1  ;;  %7432 = vst [vmem:[#allocation5_spill] sm:$0xff] %v6029_v54 }
 0x21e   : > { %1036 = vst.msk [vmem:[%s5921_s19 + $0x48] sm:$0xff] %vm712_vm0, %v1020_v24  ;;  %v1025_v31 = vmul.f32 0.088388346, %v4633_v30  ;;  %v6035_v15 = vpop.permute.xlu0 %1920  ;;  %v4146_v24 = vld [vmem:[%s7394_s3 + $0x98] sm:$0xff]  ;;  %v4143_v30 = vld [vmem:[%s7394_s3 + $0x80] sm:$0xff] }
 0x21f   : > { %v996_v35 = vpop.f32.mrf.mxu1  ;;  %7433 = vst [vmem:[#allocation6_spill] sm:$0xff] %v6035_v15  ;;  %v4149_v15 = vld [vmem:[%s7394_s3 + $0xb0] sm:$0xff] }
 0x220   : > { %1041 = vst.msk [vmem:[%s5921_s19 + $0x70] sm:$0xff] %vm712_vm0, %v1025_v31  ;;  %v1023_v19 = vmul.f32 0.088388346, %v996_v35  ;;  %v6041_v16 = vpop.permute.xlu1 %1922  ;;  %v4144_v35 = vld [vmem:[%s7394_s3 + $0x88] sm:$0xff] }
 0x221   : > { %v4634_v40 = vpop.f32.mrf.mxu1  ;;  %7434 = vst [vmem:[#allocation7_spill] sm:$0xff] %v6041_v16 }
 0x222   : > { %1039 = vst.msk [vmem:[%s5921_s19 + $0x60] sm:$0xff] %vm712_vm0, %v1023_v19  ;;  %v1026_v41 = vmul.f32 0.088388346, %v4634_v40  ;;  %v6043_v18 = vpop.permute.xlu0 %1924  ;;  %v4145_v19 = vld [vmem:[%s7394_s3 + $0x90] sm:$0xff] }
 0x223   : > { %v999_v45 = vpop.f32.mrf.mxu1  ;;  %7435 = vst [vmem:[#allocation8_spill] sm:$0xff] %v6043_v18 }
 0x224   : > { %1042 = vst.msk [vmem:[%s5921_s19 + $0x78] sm:$0xff] %vm712_vm0, %v1026_v41  ;;  %v1024_v46 = vmul.f32 0.088388346, %v999_v45  ;;  %v6049_v22 = vpop.permute.xlu1 %1926 }
 0x225   : > { %7436 = vst [vmem:[#allocation9_spill] sm:$0xff] %v6049_v22 }
 0x226   : > { %1040 = vst.msk [vmem:[%s5921_s19 + $0x68] sm:$0xff] %vm712_vm0, %v1024_v46  ;;  %v6058_v26 = vpop.permute.xlu0 %1928 }
 0x227   : > { %7437 = vst [vmem:[#allocation10_spill] sm:$0xff] %v6058_v26 }
 0x228   : > { %v6073_v26 = vpop.permute.xlu1 %1930 }
 0x229   : > { %7438 = vst [vmem:[#allocation11_spill] sm:$0xff] %v6073_v26 }
 0x22a   : > { %v6078_v54 = vpop.permute.xlu0 %2115 }
 0x245   : > { %v4653_v20 = vpop.f32.mrf.mxu1 }
 0x246   : > { %v1199_v22 = vadd.f32 %v4653_v20, %v4145_v19  ;;  %v4150_v20 = vld [vmem:[%s7394_s3 + $0xb8] sm:$0xff] }
 0x247   : > { %v1190_v23 = vpop.f32.mrf.mxu1 }
 0x248   : > { %v1191_v45 = vadd.f32 %v4143_v30, %v1190_v23  ;;  %v4147_v23 = vld [vmem:[%s7394_s3 + $0xa0] sm:$0xff]  ;;  %v4148_v30 = vld [vmem:[%s7394_s3 + $0xa8] sm:$0xff] }
 0x249   : > { %v4654_v31 = vpop.f32.mrf.mxu1 }
 0x24a   : > { %v1202_v40 = vadd.f32 %v4654_v31, %v4146_v24  ;;  %v1574_v31 = vsel %vm712_vm0, %v5833_v55, 0 }
 0x24b   : > { %v1193_v41 = vpop.f32.mrf.mxu1 }
 0x24c   : > { %v1194_v46 = vadd.f32 %v4144_v35, %v1193_v41  ;;  %v1254_v24 = vpack.c.bf16 %v1202_v40, %v1199_v22  ;;  %v6095_v40 = vpop.permute.xlu1 %2113 }
 0x24d   : > { %v4657_v18 = vpop.f32.mrf.mxu1 }
 0x24e   : > { %v1253_v16 = vpack.c.bf16 %v1194_v46, %v1191_v45  ;;  %v1215_v55 = vadd.f32 %v4657_v18, %v4149_v15  ;;  %v6100_v45 = vld [vmem:[%s5447_s25 + $0x38] sm:$0xff]   ;;  %v6107_v18 = vld [vmem:[%s5447_s25 + $0x30] sm:$0xff]  }
 0x24f   : > { %v1206_v52 = vpop.f32.mrf.mxu1  ;;  %3375 = vrot.lane.b32.xlu0 %v6100_v45, %s5222_s30  ;;  %3373 = vrot.lane.b32.xlu1 %v6107_v18, %s5222_s30 }
 0x250   : > { %4683 = vmatprep.mubr.bf16.mxu0 %v1253_v16  ;;  %v1207_v35 = vadd.f32 %v4147_v23, %v1206_v52  ;;  %v6104_v16 = vpop.permute.xlu0 %2111  ;;  %v1571_v23 = vsel %vm712_vm0, %v5863_v58, 0 }
 0x251   : > { %4684 = vmatmul.mubr.bf16.vlgmr.msra.gmra.mxu0 %v1254_v24  ;;  %v4658_v22 = vpop.f32.mrf.mxu1 }
 0x252   : > { %4700 = vmatpush3.bf16.xpose.msra.mxu0 %v1574_v31  ;;  %v1218_v19 = vadd.f32 %v4658_v22, %v4150_v20  ;;  %v4153_v31 = vld [vmem:[%s7394_s3 + $0xd0] sm:$0xff]  ;;  %v4151_v22 = vld [vmem:[%s7394_s3 + $0xc0] sm:$0xff] }
 0x253   : > { %5100 = vmatprep.subr.msk.bf16.mxu0 %vm712_vm0, %v5863_v58  ;;  %v1209_v41 = vpop.f32.mrf.mxu1  ;;  %3371 = vrot.lane.b32.xlu0 %v5524_v56, %s5222_s30 }
 0x254   : > { %v1210_v15 = vadd.f32 %v4148_v30, %v1209_v41  ;;  %v1256_v52 = vpack.c.bf16 %v1218_v19, %v1215_v55  ;;  %v4154_v30 = vld [vmem:[%s7394_s3 + $0xd8] sm:$0xff]  ;;  %v6124_v55 = vpop.permute.xlu1 %2109  ;;  %3369 = vrot.lane.b32.xlu1 %v5548_v10, %s5222_s30  ;;  %v4152_v19 = vld [vmem:[%s7394_s3 + $0xc8] sm:$0xff]  ;;  %v6131_v26 = vpop.permute.xlu0 %2107 }
 0x255   : > { %v4661_v46 = vpop.f32.mrf.mxu1 }
 0x256   : > { %v1255_v24 = vpack.c.bf16 %v1210_v15, %v1207_v35  ;;  %v1231_v35 = vadd.f32 %v4661_v46, %v4153_v31  ;;  %v4157_v31 = vld [vmem:[%s7394_s3 + $0xf0] sm:$0xff] }
 0x257   : > { %v1222_v20 = vpop.f32.mrf.mxu1  ;;  %3367 = vrot.lane.b32.xlu0 %v5573_v25, %s5222_s30  ;;  %v4155_v25 = vld [vmem:[%s7394_s3 + $0xe0] sm:$0xff] }
 0x258   : > { %4687 = vmatprep.mubr.bf16.mxu0 %v1255_v24  ;;  %v1223_v41 = vadd.f32 %v4151_v22, %v1222_v20  ;;  %3365 = vrot.lane.b32.xlu1 %v5592_v36, %s5222_s30  ;;  %v1568_v20 = vsel %vm712_vm0, %v5861_v57, 0  ;;  %v4158_v36 = vld [vmem:[%s7394_s3 + $0xf8] sm:$0xff] }
 0x259   : > { %v4662_v58 = vpop.f32.mrf.mxu1  ;;  %4688 = vmatmul.mubr.bf16.gmra.mxu0 %v1256_v52 }
 0x25a   : > { %4702 = vmatpush3.bf16.xpose.msra.mxu0 %v1571_v23  ;;  %v1234_v15 = vadd.f32 %v4662_v58, %v4154_v30  ;;  %v6142_v23 = vpop.permute.xlu1 %2105  ;;  %v6154_v30 = vpop.permute.xlu0 %2103  ;;  %v4156_v58 = vld [vmem:[%s7394_s3 + $0xe8] sm:$0xff] }
 0x25b   : > { %5101 = vmatprep.subr.msk.bf16.mxu0 %vm712_vm0, %v5861_v57  ;;  %v1225_v56 = vpop.f32.mrf.mxu1  ;;  %3363 = vrot.lane.b32.xlu0 %v5652_v43, %s5222_s30 }
 0x25c   : > { %v1226_v10 = vadd.f32 %v4152_v19, %v1225_v56  ;;  %v1258_v52 = vpack.c.bf16 %v1234_v15, %v1231_v35  ;;  %3361 = vrot.lane.b32.xlu1 %v5659_v44, %s5222_s30 }
 0x25d   : > { %v4665_v46 = vpop.f32.mrf.mxu1 }
 0x25e   : > { %v1257_v24 = vpack.c.bf16 %v1226_v10, %v1223_v41  ;;  %v1247_v35 = vadd.f32 %v4665_v46, %v4157_v31  ;;  %v6165_v10 = vpop.permute.xlu1 %2101  ;;  %v1565_v31 = vsel %vm712_vm0, %v5871_v61, 0 }
 0x25f   : > { %v1238_v22 = vpop.f32.mrf.mxu1  ;;  %3626 = vrot.lane.b32.xlu0 %v5408_v60, %s5223_s29 }
 0x260   : > { %4691 = vmatprep.mubr.bf16.mxu0 %v1257_v24  ;;  %v1239_v19 = vadd.f32 %v4155_v25, %v1238_v22  ;;  %3624 = vrot.lane.b32.xlu1 %v5414_v0, %s5223_s29  ;;  %v6169_v24 = vpop.permute.xlu0 %2366 }
 0x261   : > { %v4666_v57 = vpop.f32.mrf.mxu1  ;;  %4692 = vmatmul.mubr.bf16.gmra.mxu0 %v1258_v52 }
 0x262   : > { %4704 = vmatpush3.bf16.xpose.msra.mxu0 %v1568_v20  ;;  %v1250_v41 = vadd.f32 %v4666_v57, %v4158_v36  ;;  %v6179_v60 = vpop.permute.xlu1 %2364 }
 0x263   : > { %5102 = vmatprep.subr.msk.bf16.mxu0 %vm712_vm0, %v5871_v61  ;;  %v1241_v15 = vpop.f32.mrf.mxu1  ;;  %3622 = vrot.lane.b32.xlu0 %v5416_v1, %s5223_s29  ;;  %v1562_v1 = vsel %vm712_vm0, %v5869_v59, 0 }
 0x264   : > { %v1242_v56 = vadd.f32 %v4156_v58, %v1241_v15  ;;  %v1260_v52 = vpack.c.bf16 %v1250_v41, %v1247_v35  ;;  %3620 = vrot.lane.b32.xlu1 %v5451_v14, %s5223_s29  ;;  %v6185_v0 = vpop.permute.xlu0 %2362 }
 0x266   : > { %v1259_v46 = vpack.c.bf16 %v1242_v56, %v1239_v19  ;;  %v6193_v14 = vpop.permute.xlu1 %2360 }
 0x267   : > { %3618 = vrot.lane.b32.xlu0 %v5476_v29, %s5223_s29 }
 0x268   : > { %4695 = vmatprep.mubr.bf16.mxu0 %v1259_v46  ;;  %3616 = vrot.lane.b32.xlu1 %v5491_v39, %s5223_s29  ;;  %v6197_v61 = vpop.permute.xlu0 %2358  ;;  %v1559_v39 = vsel %vm712_vm0, %v5877_v62, 0 }
 0x269   : > { %4696 = vmatmul.mubr.bf16.gmra.mxu0 %v1260_v52 }
 0x26a   : > { %4706 = vmatpush3.bf16.xpose.msra.mxu0 %v1565_v31  ;;  %4715 = vmatprep.mubr.msk.bf16.mxu0 %vm712_vm0, %v5887_v3  ;;  %v6205_v29 = vpop.permute.xlu1 %2356 }
 0x26b   : > { %5103 = vmatprep.subr.msk.bf16.mxu0 %vm712_vm0, %v5869_v59  ;;  %3614 = vrot.lane.b32.xlu0 %v5511_v48, %s5223_s29 }
 0x26c   : > { %3612 = vrot.lane.b32.xlu1 %v5513_v49, %s5223_s29  ;;  %v6211_v48 = vpop.permute.xlu0 %2354 }
 0x26f   : > { %3596 = vrot.lane.b32.xlu0 %v5502_v33, %s5223_s29  ;;  %v6219_v33 = vpop.permute.xlu1 %2352 }
 0x270   : > { %3598 = vrot.lane.b32.xlu1 %v5540_v4, %s5223_s29  ;;  %v6223_v49 = vpop.permute.xlu0 %2336  ;;  %v1556_v4 = vsel %vm712_vm0, %v5879_v63, 0 }
 0x272   : > { %4708 = vmatpush3.bf16.xpose.msra.mxu0 %v1562_v1 }
 0x273   : > { %5104 = vmatprep.subr.msk.bf16.mxu0 %vm712_vm0, %v5877_v62  ;;  %3600 = vrot.lane.b32.xlu0 %v5554_v13, %s5223_s29  ;;  %v6231_v13 = vpop.permute.xlu1 %2338  ;;  %v5191_v62 = vld [vmem:[%s5447_s25 + $0x18] sm:$0xff]  }
 0x274   : > { %3602 = vrot.lane.b32.xlu1 %v5566_v21, %s5223_s29  ;;  %v6237_v21 = vpop.permute.xlu0 %2340 }
 0x277   : > { %3604 = vrot.lane.b32.xlu0 %v5581_v28, %s5223_s29  ;;  %v1553_v28 = vsel %vm712_vm0, %v5885_v2, 0 }
 0x278   : > { %3606 = vrot.lane.b32.xlu1 %v5586_v6, %s5223_s29  ;;  %v5189_v6 = vld [vmem:[%s5447_s25 + $0x28] sm:$0xff]   ;;  %v6249_v59 = vpop.permute.xlu0 %2344 }
 0x27a   : > { %4710 = vmatpush3.bf16.xpose.msra.mxu0 %v1559_v39 }
 0x27b   : > { %5105 = vmatprep.subr.msk.bf16.mxu0 %vm712_vm0, %v5879_v63  ;;  %3608 = vrot.lane.b32.xlu0 %v5600_v37, %s5223_s29  ;;  %v6245_v37 = vpop.permute.xlu1 %2342  ;;  %v5192_v63 = vld [vmem:[%s5447_s25 + $0x10] sm:$0xff]  }
 0x27c   : > { %3610 = vrot.lane.b32.xlu1 %v5603_v38, %s5223_s29  ;;  %v5190_v38 = vld [vmem:[%s5447_s25 + $0x20] sm:$0xff]   ;;  %v6260_v3 = vpop.permute.xlu0 %2348 }
 0x27f   : > { %3795 = vrot.lane.b32.xlu0 %v6100_v45, %s5223_s29 }
 0x280   : > { %3793 = vrot.lane.b32.xlu1 %v6107_v18, %s5223_s29  ;;  %v6272_v18 = vpop.permute.xlu0 %2535 }
 0x282   : > { %4712 = vmatpush3.bf16.xpose.msra.mxu0 %v1556_v4 }
 0x283   : > { %5106 = vmatprep.subr.msk.bf16.mxu0 %vm712_vm0, %v5885_v2  ;;  %3791 = vrot.lane.b32.xlu0 %v5189_v6, %s5223_s29  ;;  %v6256_v2 = vpop.permute.xlu1 %2346 }
 0x284   : > { %3789 = vrot.lane.b32.xlu1 %v5190_v38, %s5223_s29 }
 0x287   : > { %3787 = vrot.lane.b32.xlu0 %v5191_v62, %s5223_s29  ;;  %v6270_v45 = vpop.permute.xlu1 %2350 }
 0x288   : > { %3785 = vrot.lane.b32.xlu1 %v5192_v63, %s5223_s29 }
 0x28a   : > { %4714 = vmatpush3.bf16.xpose.msra.mxu0 %v1553_v28 }
 0x28b   : > { %4795 = vmatprep.subr.bf16.mxu0 %v6078_v54  ;;  %3783 = vrot.lane.b32.xlu0 %v5652_v43, %s5223_s29  ;;  %v6280_v43 = vpop.permute.xlu1 %2533 }
 0x28c   : > { %3781 = vrot.lane.b32.xlu1 %v5659_v44, %s5223_s29  ;;  %v6284_v44 = vpop.permute.xlu0 %2531 }
 0x291   : > { %4716 = vmatmul.mubr.msk.bf16.vlgmr.msra.gmra.mxu0 %vm712_vm0, %v5893_v5  ;;  %v6288_v5 = vpop.permute.xlu1 %2529 }
 0x292   : > { %4719 = vmatprep.mubr.msk.bf16.mxu0 %vm712_vm0, %v5895_v7  ;;  %4796 = vmatpush3.bf16.msra.mxu0 %v6078_v54  ;;  %v6294_v7 = vpop.permute.xlu0 %2527 }
 0x293   : > { %4797 = vmatprep.subr.bf16.mxu0 %v6095_v40 }
 0x296   : > { %4798 = vmatpush3.bf16.msra.mxu0 %v6095_v40 }
 0x297   : > { %4799 = vmatprep.subr.bf16.mxu0 %v6104_v16 }
 0x299   : > { %4720 = vmatmul.mubr.msk.bf16.gmra.mxu0 %vm712_vm0, %v5901_v8  ;;  %v6298_v8 = vpop.permute.xlu1 %2525 }
 0x29a   : > { %4723 = vmatprep.mubr.msk.bf16.mxu0 %vm712_vm0, %v5903_v9  ;;  %4800 = vmatpush3.bf16.msra.mxu0 %v6104_v16  ;;  %v6302_v9 = vpop.permute.xlu0 %2523 }
 0x29b   : > { %4801 = vmatprep.subr.bf16.mxu0 %v6124_v55 }
 0x29e   : > { %4802 = vmatpush3.bf16.msra.mxu0 %v6124_v55 }
 0x29f   : > { %4803 = vmatprep.subr.bf16.mxu0 %v6131_v26 }
 0x2a1   : > { %4724 = vmatmul.mubr.msk.bf16.gmra.mxu0 %vm712_vm0, %v5910_v11  ;;  %v6308_v11 = vpop.permute.xlu1 %2521 }
 0x2a2   : > { %4727 = vmatprep.mubr.msk.bf16.mxu0 %vm712_vm0, %v5912_v12  ;;  %4804 = vmatpush3.bf16.msra.mxu0 %v6131_v26  ;;  %v6310_v12 = vpop.permute.xlu0 %2786 }
 0x2a3   : > { %4805 = vmatprep.subr.bf16.mxu0 %v6142_v23 }
 0x2a5   : > { %v6315_v54 = vpop.permute.xlu1 %2784 }
 0x2a6   : > { %4806 = vmatpush3.bf16.msra.mxu0 %v6142_v23  ;;  %v6317_v26 = vpop.permute.xlu0 %2782 }
 0x2a7   : > { %4807 = vmatprep.subr.bf16.mxu0 %v6154_v30 }
 0x2a9   : > { %4728 = vmatmul.mubr.msk.bf16.gmra.mxu0 %vm712_vm0, %v5923_v17  ;;  %v6319_v40 = vpop.permute.xlu1 %2780 }
 0x2aa   : > { %4808 = vmatpush3.bf16.msra.mxu0 %v6154_v30  ;;  %7439 = vst [vmem:[#allocation12_spill] sm:$0xff] %v6319_v40  ;;  %v6321_v17 = vpop.permute.xlu0 %2778 }
 0x2ab   : > { %4809 = vmatprep.subr.bf16.mxu0 %v6165_v10  ;;  %7440 = vst [vmem:[#allocation13_spill] sm:$0xff] %v6321_v17 }
 0x2ad   : > { %v6323_v16 = vpop.permute.xlu1 %2776 }
 0x2ae   : > { %4810 = vmatpush3.bf16.msra.mxu0 %v6165_v10  ;;  %7441 = vst [vmem:[#allocation14_spill] sm:$0xff] %v6323_v16  ;;  %v6325_v55 = vpop.permute.xlu0 %2774 }
 0x2af   : > { %5115 = vmatprep.subr.msk.bf16.mxu0 %vm712_vm0, %v6169_v24  ;;  %7442 = vst [vmem:[#allocation15_spill] sm:$0xff] %v6325_v55  ;;  %v4173_v55 = vld [vmem:[%s7394_s3 + $0x130] sm:$0xff] }
 0x2b1   : > { %v6327_v23 = vpop.permute.xlu1 %2772 }
 0x2b2   : > { %7443 = vst [vmem:[#allocation16_spill] sm:$0xff] %v6327_v23  ;;  %v6329_v20 = vpop.permute.xlu0 %2756 }
 0x2b3   : > { %7444 = vst [vmem:[#allocation17_spill] sm:$0xff] %v6329_v20  ;;  %v1994_v20 = vsel %vm712_vm0, %v5973_v34, 0 }
 0x2b5   : > { %v6331_v22 = vpop.permute.xlu1 %2758 }
 0x2b6   : > { %7445 = vst [vmem:[#allocation18_spill] sm:$0xff] %v6331_v22  ;;  %v6333_v25 = vpop.permute.xlu0 %2760 }
 0x2b7   : > { %7446 = vst [vmem:[#allocation19_spill] sm:$0xff] %v6333_v25 }
 0x2b9   : > { %v6335_v36 = vpop.permute.xlu1 %2762 }
 0x2ba   : > { %7447 = vst [vmem:[#allocation20_spill] sm:$0xff] %v6335_v36  ;;  %v6337_v30 = vpop.permute.xlu0 %2764 }
 0x2bb   : > { %7448 = vst [vmem:[#allocation21_spill] sm:$0xff] %v6337_v30 }
 0x2bd   : > { %v6339_v35 = vpop.permute.xlu1 %2766 }
 0x2be   : > { %7449 = vst [vmem:[#allocation22_spill] sm:$0xff] %v6339_v35  ;;  %v6341_v57 = vpop.permute.xlu0 %2768 }
 0x2bf   : > { %7450 = vst [vmem:[#allocation23_spill] sm:$0xff] %v6341_v57 }
 0x2c1   : > { %v6343_v58 = vpop.permute.xlu1 %2770 }
 0x2c2   : > { %7451 = vst [vmem:[#allocation24_spill] sm:$0xff] %v6343_v58  ;;  %v6345_v19 = vpop.permute.xlu0 %2955 }
 0x2c5   : > { %v6347_v41 = vpop.permute.xlu1 %2953 }
 0x2c6   : > { %v6349_v15 = vpop.permute.xlu0 %2951 }
 0x2c9   : > { %v6351_v56 = vpop.permute.xlu1 %2949 }
 0x2ca   : > { %v6353_v10 = vpop.permute.xlu0 %2947 }
 0x2cd   : > { %v6355_v52 = vpop.permute.xlu1 %2945 }
 0x2ce   : > { %v6357_v46 = vpop.permute.xlu0 %2943 }
 0x2d1   : > { %v6359_v31 = vpop.permute.xlu1 %2941 }
 0x2d2   : > { %v6361_v1 = vpop.permute.xlu0 %3206 }
 0x2d5   : > { %v6363_v39 = vpop.permute.xlu1 %3204 }
 0x2d6   : > { %7452 = vst [vmem:[#allocation25_spill] sm:$0xff] %v6363_v39  ;;  %v6365_v4 = vpop.permute.xlu0 %3202 }
 0x2d7   : > { %7453 = vst [vmem:[#allocation26_spill] sm:$0xff] %v6365_v4 }
 0x2d9   : > { %v6367_v28 = vpop.permute.xlu1 %3200 }
 0x2da   : > { %7454 = vst [vmem:[#allocation27_spill] sm:$0xff] %v6367_v28  ;;  %v6369_v6 = vpop.permute.xlu0 %3198 }
 0x2db   : > { %7455 = vst [vmem:[#allocation28_spill] sm:$0xff] %v6369_v6 }
 0x2dd   : > { %v6371_v38 = vpop.permute.xlu1 %3196 }
 0x2de   : > { %7456 = vst [vmem:[#allocation29_spill] sm:$0xff] %v6371_v38  ;;  %v6373_v62 = vpop.permute.xlu0 %3194 }
 0x2df   : > { %7457 = vst [vmem:[#allocation30_spill] sm:$0xff] %v6373_v62 }
 0x2e1   : > { %v6375_v63 = vpop.permute.xlu1 %3192 }
 0x2e2   : > { %7458 = vst [vmem:[#allocation31_spill] sm:$0xff] %v6375_v63  ;;  %v6377_v58 = vpop.permute.xlu0 %3176 }
 0x2e3   : > { %7459 = vst [vmem:[#allocation32_spill] sm:$0xff] %v6377_v58 }
 0x2e5   : > { %v6379_v30 = vpop.permute.xlu1 %3178 }
 0x2e6   : > { %7460 = vst [vmem:[#allocation33_spill] sm:$0xff] %v6379_v30  ;;  %v6382_v4 = vpop.permute.xlu0 %3180 }
 0x2e7   : > { %7461 = vst [vmem:[#allocation34_spill] sm:$0xff] %v6382_v4 }
 0x2e9   : > { %v6386_v63 = vpop.permute.xlu1 %3182 }
 0x2ea   : > { %7462 = vst [vmem:[#allocation35_spill] sm:$0xff] %v6386_v63  ;;  %v6388_v58 = vpop.permute.xlu0 %3184 }
 0x2eb   : > { %7463 = vst [vmem:[#allocation36_spill] sm:$0xff] %v6388_v58 }
 0x2ed   : > { %v6392_v4 = vpop.permute.xlu1 %3186 }
 0x2ee   : > { %7464 = vst [vmem:[#allocation37_spill] sm:$0xff] %v6392_v4 }
 0x311   : > { %v4685_v57 = vpop.f32.mrf.mxu0 }
 0x312   : > { %v1384_v35 = vmul.f32 0.088388346, %v4685_v57 }
 0x313   : > { %v1319_v36 = vpop.f32.mrf.mxu0 }
 0x314   : > { %1418 = vrot.lane.b32.xlu0 %v1384_v35, %s5223_s29  ;;  %v1382_v39 = vmul.f32 0.088388346, %v1319_v36 }
 0x315   : > { %v4686_v28 = vpop.f32.mrf.mxu0 }
 0x316   : > { %v1385_v6 = vmul.f32 0.088388346, %v4686_v28 }
 0x317   : > { %v1322_v25 = vpop.f32.mrf.mxu0 }
 0x318   : > { %1414 = vrot.lane.b32.xlu0 %v1382_v39, %s5223_s29  ;;  %1420 = vrot.lane.b32.xlu1 %v1385_v6, %s5223_s29  ;;  %v1383_v38 = vmul.f32 0.088388346, %v1322_v25  ;;  %v6396_v25 = vpop.permute.xlu0 %3188 }
 0x319   : > { %v4689_v62 = vpop.f32.mrf.mxu0  ;;  %7465 = vst [vmem:[#allocation38_spill] sm:$0xff] %v6396_v25 }
 0x31a   : > { %v1388_v57 = vmul.f32 0.088388346, %v4689_v62 }
 0x31b   : > { %v1335_v30 = vpop.f32.mrf.mxu0 }
 0x31c   : > { %1416 = vrot.lane.b32.xlu1 %v1383_v38, %s5223_s29  ;;  %v1386_v35 = vmul.f32 0.088388346, %v1335_v30  ;;  %1426 = vrot.lane.b32.xlu0 %v1388_v57, %s5223_s29  ;;  %v6400_v30 = vpop.permute.xlu1 %3190 }
 0x31d   : > { %v4690_v36 = vpop.f32.mrf.mxu0  ;;  %7466 = vst [vmem:[#allocation39_spill] sm:$0xff] %v6400_v30 }
 0x31e   : > { %v1389_v28 = vmul.f32 0.088388346, %v4690_v36  ;;  %v6402_v36 = vpop.permute.xlu0 %3375 }
 0x31f   : > { %v1338_v39 = vpop.f32.mrf.mxu0  ;;  %7467 = vst [vmem:[#allocation40_spill] sm:$0xff] %v6402_v36 }
 0x320   : > { %v1387_v22 = vmul.f32 0.088388346, %v1338_v39  ;;  %1428 = vrot.lane.b32.xlu1 %v1389_v28, %s5223_s29  ;;  %1422 = vrot.lane.b32.xlu0 %v1386_v35, %s5223_s29  ;;  %v6406_v25 = vpop.permute.xlu1 %3373 }
 0x321   : > { %v4693_v6 = vpop.f32.mrf.mxu0  ;;  %7468 = vst [vmem:[#allocation41_spill] sm:$0xff] %v6406_v25 }
 0x322   : > { %v1392_v62 = vmul.f32 0.088388346, %v4693_v6 }
 0x323   : > { %v1351_v58 = vpop.f32.mrf.mxu0 }
 0x324   : > { %v1390_v63 = vmul.f32 0.088388346, %v1351_v58  ;;  %1424 = vrot.lane.b32.xlu1 %v1387_v22, %s5223_s29  ;;  %1434 = vrot.lane.b32.xlu0 %v1392_v62, %s5223_s29  ;;  %v6410_v62 = vpop.permute.xlu0 %3371 }
 0x325   : > { %v4694_v38 = vpop.f32.mrf.mxu0  ;;  %7469 = vst [vmem:[#allocation42_spill] sm:$0xff] %v6410_v62 }
 0x326   : > { %v1393_v57 = vmul.f32 0.088388346, %v4694_v38 }
 0x327   : > { %v1354_v39 = vpop.f32.mrf.mxu0 }
 0x328   : > { %v1391_v28 = vmul.f32 0.088388346, %v1354_v39  ;;  %1436 = vrot.lane.b32.xlu1 %v1393_v57, %s5223_s29  ;;  %1430 = vrot.lane.b32.xlu0 %v1390_v63, %s5223_s29  ;;  %v6414_v63 = vpop.permute.xlu1 %3369  ;;  %v6416_v39 = vpop.permute.xlu0 %3367 }
 0x329   : > { %v4697_v35 = vpop.f32.mrf.mxu0  ;;  %7470 = vst [vmem:[#allocation43_spill] sm:$0xff] %v6414_v63  ;;  %7471 = vst [vmem:[#allocation44_spill] sm:$0xff] %v6416_v39 }
 0x32a   : > { %v1396_v6 = vmul.f32 0.088388346, %v4697_v35 }
 0x32b   : > { %v1367_v58 = vpop.f32.mrf.mxu0 }
 0x32c   : > { %v1394_v22 = vmul.f32 0.088388346, %v1367_v58  ;;  %1432 = vrot.lane.b32.xlu1 %v1391_v28, %s5223_s29  ;;  %1442 = vrot.lane.b32.xlu0 %v1396_v6, %s5223_s29  ;;  %v6419_v35 = vpop.permute.xlu1 %3365  ;;  %v6421_v28 = vpop.permute.xlu0 %3363 }
 0x32d   : > { %v4698_v38 = vpop.f32.mrf.mxu0  ;;  %7472 = vst [vmem:[#allocation45_spill] sm:$0xff] %v6419_v35  ;;  %7473 = vst [vmem:[#allocation46_spill] sm:$0xff] %v6421_v28 }
 0x32e   : > { %v1397_v30 = vmul.f32 0.088388346, %v4698_v38 }
 0x32f   : > { %v1370_v4 = vpop.f32.mrf.mxu0 }
 0x330   : > { %1444 = vrot.lane.b32.xlu1 %v1397_v30, %s5223_s29  ;;  %v1395_v57 = vmul.f32 0.088388346, %v1370_v4  ;;  %1438 = vrot.lane.b32.xlu0 %v1394_v22, %s5223_s29  ;;  %v6423_v6 = vpop.permute.xlu1 %3361  ;;  %v6425_v58 = vpop.permute.xlu0 %3626 }
 0x331   : > { %7474 = vst [vmem:[#allocation47_spill] sm:$0xff] %v6423_v6  ;;  %7475 = vst [vmem:[#allocation48_spill] sm:$0xff] %v6425_v58  ;;  %v4170_v6 = vld [vmem:[%s7394_s3 + $0x118] sm:$0xff] }
 0x334   : > { %1440 = vrot.lane.b32.xlu1 %v1395_v57, %s5223_s29  ;;  %v6427_v38 = vpop.permute.xlu1 %3624  ;;  %v6429_v30 = vpop.permute.xlu0 %3622 }
 0x335   : > { %7476 = vst [vmem:[#allocation49_spill] sm:$0xff] %v6427_v38  ;;  %7477 = vst [vmem:[#allocation50_spill] sm:$0xff] %v6429_v30  ;;  %v4167_v30 = vld [vmem:[%s7394_s3 + $0x100] sm:$0xff] }
 0x338   : > { %v6431_v4 = vpop.permute.xlu1 %3620  ;;  %v6433_v22 = vpop.permute.xlu0 %3618 }
 0x339   : > { %7478 = vst [vmem:[#allocation51_spill] sm:$0xff] %v6431_v4  ;;  %7479 = vst [vmem:[#allocation52_spill] sm:$0xff] %v6433_v22  ;;  %v4168_v22 = vld [vmem:[%s7394_s3 + $0x108] sm:$0xff] }
 0x33c   : > { %v6435_v63 = vpop.permute.xlu1 %3616  ;;  %v6437_v39 = vpop.permute.xlu0 %3614 }
 0x33d   : > { %7480 = vst [vmem:[#allocation53_spill] sm:$0xff] %v6435_v63  ;;  %7481 = vst [vmem:[#allocation54_spill] sm:$0xff] %v6437_v39  ;;  %v4169_v39 = vld [vmem:[%s7394_s3 + $0x110] sm:$0xff] }
 0x340   : > { %v6442_v28 = vpop.permute.xlu1 %3612  ;;  %v6453_v63 = vpop.permute.xlu0 %3596 }
 0x341   : > { %7482 = vst [vmem:[#allocation55_spill] sm:$0xff] %v6442_v28 }
 0x344   : > { %v6458_v16 = vpop.permute.xlu1 %3598 }
 0x351   : > { %v4717_v57 = vpop.f32.mrf.mxu0 }
 0x352   : > { %v1619_v28 = vadd.f32 %v4717_v57, %v4169_v39  ;;  %v4174_v39 = vld [vmem:[%s7394_s3 + $0x138] sm:$0xff] }
 0x353   : > { %v1610_v35 = vpop.f32.mrf.mxu0 }
 0x354   : > { %v1611_v62 = vadd.f32 %v4167_v30, %v1610_v35  ;;  %v6475_v30 = vpop.permute.xlu1 %3602 }
 0x355   : > { %v4718_v38 = vpop.f32.mrf.mxu0 }
 0x356   : > { %v1622_v4 = vadd.f32 %v4718_v38, %v4170_v6  ;;  %v4171_v6 = vld [vmem:[%s7394_s3 + $0x120] sm:$0xff] }
 0x357   : > { %v1613_v58 = vpop.f32.mrf.mxu0 }
 0x358   : > { %v1614_v25 = vadd.f32 %v4168_v22, %v1613_v58  ;;  %v1674_v17 = vpack.c.bf16 %v1622_v4, %v1619_v28  ;;  %v4172_v28 = vld [vmem:[%s7394_s3 + $0x128] sm:$0xff] }
 0x359   : > { %v4721_v36 = vpop.f32.mrf.mxu0 }
 0x35a   : > { %v1673_v23 = vpack.c.bf16 %v1614_v25, %v1611_v62  ;;  %v6468_v25 = vpop.permute.xlu0 %3600  ;;  %v1635_v62 = vadd.f32 %v4721_v36, %v4173_v55  ;;  %v4177_v55 = vld [vmem:[%s7394_s3 + $0x150] sm:$0xff]  ;;  %v4175_v36 = vld [vmem:[%s7394_s3 + $0x140] sm:$0xff] }
 0x35b   : > { %v1626_v40 = vpop.f32.mrf.mxu0 }
 0x35c   : > { %4747 = vmatprep.mubr.bf16.mxu1 %v1673_v23  ;;  %v1627_v34 = vadd.f32 %v4171_v6, %v1626_v40  ;;  %v1991_v40 = vsel %vm712_vm0, %v5983_v42, 0  ;;  %v4178_v6 = vld [vmem:[%s7394_s3 + $0x158] sm:$0xff] }
 0x35d   : > { %4748 = vmatmul.mubr.bf16.vlgmr.msra.gmra.mxu1 %v1674_v17  ;;  %v4722_v35 = vpop.f32.mrf.mxu0 }
 0x35e   : > { %4764 = vmatpush3.bf16.xpose.msra.mxu1 %v1994_v20  ;;  %v1638_v58 = vadd.f32 %v4722_v35, %v4174_v39  ;;  %v6477_v57 = vpop.permute.xlu0 %3604  ;;  %v4176_v35 = vld [vmem:[%s7394_s3 + $0x148] sm:$0xff] }
 0x35f   : > { %5108 = vmatprep.subr.msk.bf16.mxu1 %vm712_vm0, %v5983_v42  ;;  %v1629_v38 = vpop.f32.mrf.mxu0 }
 0x360   : > { %v1630_v4 = vadd.f32 %v4172_v28, %v1629_v38  ;;  %v1676_v23 = vpack.c.bf16 %v1638_v58, %v1635_v62  ;;  %v6493_v28 = vpop.permute.xlu1 %3606 }
 0x361   : > { %v4725_v22 = vpop.f32.mrf.mxu0  ;;  %7483 = vst [vmem:[#allocation56_spill] sm:$0xff] %v6493_v28 }
 0x362   : > { %v1675_v17 = vpack.c.bf16 %v1630_v4, %v1627_v34  ;;  %v1651_v39 = vadd.f32 %v4725_v22, %v4177_v55  ;;  %v6497_v38 = vpop.permute.xlu0 %3608 }
 0x363   : > { %v1642_v20 = vpop.f32.mrf.mxu0  ;;  %7484 = vst [vmem:[#allocation57_spill] sm:$0xff] %v6497_v38 }
 0x364   : > { %4751 = vmatprep.mubr.bf16.mxu1 %v1675_v17  ;;  %v1643_v42 = vadd.f32 %v4175_v36, %v1642_v20  ;;  %v4179_v20 = vld [vmem:[%s7394_s3 + $0x160] sm:$0xff]  ;;  %v4182_v36 = vld [vmem:[%s7394_s3 + $0x178] sm:$0xff] }
 0x365   : > { %v4726_v62 = vpop.f32.mrf.mxu0  ;;  %4752 = vmatmul.mubr.bf16.gmra.mxu1 %v1676_v23  ;;  %v4181_v23 = vld [vmem:[%s7394_s3 + $0x170] sm:$0xff] }
 0x366   : > { %4766 = vmatpush3.bf16.xpose.msra.mxu1 %v1991_v40  ;;  %v1654_v34 = vadd.f32 %v4726_v62, %v4178_v6  ;;  %v1988_v40 = vsel %vm712_vm0, %v5991_v47, 0  ;;  %v6510_v6 = vpop.permute.xlu1 %3610 }
 0x367   : > { %5109 = vmatprep.subr.msk.bf16.mxu1 %vm712_vm0, %v5991_v47  ;;  %v1645_v58 = vpop.f32.mrf.mxu0  ;;  %7485 = vst [vmem:[#allocation58_spill] sm:$0xff] %v6510_v6  ;;  %v6515_v47 = vpop.permute.xlu0 %3795 }
 0x368   : > { %v1646_v4 = vadd.f32 %v4176_v35, %v1645_v58  ;;  %v1678_v17 = vpack.c.bf16 %v1654_v34, %v1651_v39  ;;  %v4180_v35 = vld [vmem:[%s7394_s3 + $0x168] sm:$0xff] }
 0x369   : > { %v4729_v22 = vpop.f32.mrf.mxu0 }
 0x36a   : > { %v1677_v55 = vpack.c.bf16 %v1646_v4, %v1643_v42  ;;  %v1667_v39 = vadd.f32 %v4729_v22, %v4181_v23  ;;  %v6519_v6 = vpop.permute.xlu1 %3793 }
 0x36b   : > { %v1658_v28 = vpop.f32.mrf.mxu0 }
 0x36c   : > { %4755 = vmatprep.mubr.bf16.mxu1 %v1677_v55  ;;  %v1659_v42 = vadd.f32 %v4179_v20, %v1658_v28  ;;  %v6523_v55 = vpop.permute.xlu0 %3791 }
 0x36d   : > { %v4730_v62 = vpop.f32.mrf.mxu0  ;;  %4756 = vmatmul.mubr.bf16.gmra.mxu1 %v1678_v17  ;;  %v1985_v17 = vsel %vm712_vm0, %v6001_v27, 0 }
 0x36e   : > { %4768 = vmatpush3.bf16.xpose.msra.mxu1 %v1988_v40  ;;  %v1670_v34 = vadd.f32 %v4730_v62, %v4182_v36  ;;  %v6529_v28 = vpop.permute.xlu1 %3789 }
 0x36f   : > { %5110 = vmatprep.subr.msk.bf16.mxu1 %vm712_vm0, %v6001_v27  ;;  %v1661_v58 = vpop.f32.mrf.mxu0  ;;  %v1982_v27 = vsel %vm712_vm0, %v6003_v32, 0 }
 0x370   : > { %v1662_v4 = vadd.f32 %v4180_v35, %v1661_v58  ;;  %v1680_v38 = vpack.c.bf16 %v1670_v34, %v1667_v39  ;;  %v6531_v23 = vpop.permute.xlu0 %3787 }
 0x372   : > { %v1679_v22 = vpack.c.bf16 %v1662_v4, %v1659_v42  ;;  %v6535_v40 = vpop.permute.xlu1 %3785  ;;  %v7486_v42 = vld [vmem:[#allocation4_spill] sm:$0xff] }
 0x373   : > { %v1973_v4 = vsel %vm712_vm0, %v7486_v42, 0 }
 0x374   : > { %4759 = vmatprep.mubr.bf16.mxu1 %v1679_v22 }
 0x375   : > { %4760 = vmatmul.mubr.bf16.gmra.mxu1 %v1680_v38  ;;  %v6539_v38 = vpop.permute.xlu0 %3783 }
 0x376   : > { %4770 = vmatpush3.bf16.xpose.msra.mxu1 %v1985_v17  ;;  %4779 = vmatprep.mubr.msk.bf16.mxu1 %vm712_vm0, %v6023_v53  ;;  %v1979_v53 = vsel %vm712_vm0, %v6009_v50, 0  ;;  %v6543_v20 = vpop.permute.xlu1 %3781 }
 0x377   : > { %5111 = vmatprep.subr.msk.bf16.mxu1 %vm712_vm0, %v6003_v32 }
 0x37e   : > { %4772 = vmatpush3.bf16.xpose.msra.mxu1 %v1982_v27 }
 0x37f   : > { %5112 = vmatprep.subr.msk.bf16.mxu1 %vm712_vm0, %v6009_v50  ;;  %v1976_v50 = vsel %vm712_vm0, %v6015_v51, 0 }
 0x386   : > { %4774 = vmatpush3.bf16.xpose.msra.mxu1 %v1979_v53  ;;  %v1419_v36 = vpop.permute.xlu0 %1418  ;;  %v7487_v53 = vld [vmem:[#allocation5_spill] sm:$0xff] }
 0x387   : > { %1465 = vst.msk [vmem:[%s5921_s19 + $0x10] sm:$0xff] %vm1462_vm1, %v1419_v36  ;;  %5113 = vmatprep.subr.msk.bf16.mxu1 %vm712_vm0, %v6015_v51 }
 0x38a   : > { %v1415_v32 = vpop.permute.xlu0 %1414  ;;  %v1421_v39 = vpop.permute.xlu1 %1420 }
 0x38b   : > { %1463 = vst.msk [vmem:[%s5921_s19] sm:$0xff] %vm1462_vm1, %v1415_v32  ;;  %1466 = vst.msk [vmem:[%s5921_s19 + $0x18] sm:$0xff] %vm1462_vm1, %v1421_v39  ;;  %v7488_v39 = vld [vmem:[#allocation6_spill] sm:$0xff] }
 0x38e   : > { %4776 = vmatpush3.bf16.xpose.msra.mxu1 %v1976_v50  ;;  %v1417_v62 = vpop.permute.xlu1 %1416  ;;  %v1427_v35 = vpop.permute.xlu0 %1426 }
 0x38f   : > { %1464 = vst.msk [vmem:[%s5921_s19 + $0x8] sm:$0xff] %vm1462_vm1, %v1417_v62  ;;  %5114 = vmatprep.subr.msk.bf16.mxu1 %vm712_vm0, %v7486_v42  ;;  %1469 = vst.msk [vmem:[%s5921_s19 + $0x30] sm:$0xff] %vm1462_vm1, %v1427_v35  ;;  %v7489_v35 = vld [vmem:[#allocation7_spill] sm:$0xff]  ;;  %v7490_v42 = vld [vmem:[#allocation8_spill] sm:$0xff] }
 0x392   : > { %v1429_v34 = vpop.permute.xlu1 %1428  ;;  %v1423_v58 = vpop.permute.xlu0 %1422 }
 0x393   : > { %1470 = vst.msk [vmem:[%s5921_s19 + $0x38] sm:$0xff] %vm1462_vm1, %v1429_v34  ;;  %1467 = vst.msk [vmem:[%s5921_s19 + $0x20] sm:$0xff] %vm1462_vm1, %v1423_v58  ;;  %v7492_v34 = vld [vmem:[#allocation10_spill] sm:$0xff] }
 0x396   : > { %4778 = vmatpush3.bf16.xpose.msra.mxu1 %v1973_v4  ;;  %v1425_v51 = vpop.permute.xlu1 %1424  ;;  %v1435_v22 = vpop.permute.xlu0 %1434 }
 0x397   : > { %1468 = vst.msk [vmem:[%s5921_s19 + $0x28] sm:$0xff] %vm1462_vm1, %v1425_v51  ;;  %1473 = vst.msk [vmem:[%s5921_s19 + $0x50] sm:$0xff] %vm1462_vm1, %v1435_v22  ;;  %4859 = vmatprep.subr.bf16.mxu1 %v6272_v18 }
 0x39a   : > { %v1437_v17 = vpop.permute.xlu1 %1436  ;;  %v1431_v27 = vpop.permute.xlu0 %1430 }
 0x39b   : > { %1474 = vst.msk [vmem:[%s5921_s19 + $0x58] sm:$0xff] %vm1462_vm1, %v1437_v17  ;;  %1471 = vst.msk [vmem:[%s5921_s19 + $0x40] sm:$0xff] %vm1462_vm1, %v1431_v27 }
 0x39d   : > { %4780 = vmatmul.mubr.msk.bf16.vlgmr.msra.gmra.mxu1 %vm712_vm0, %v7487_v53 }
 0x39e   : > { %v1433_v36 = vpop.permute.xlu1 %1432  ;;  %v1443_v32 = vpop.permute.xlu0 %1442  ;;  %4783 = vmatprep.mubr.msk.bf16.mxu1 %vm712_vm0, %v7488_v39  ;;  %4860 = vmatpush3.bf16.msra.mxu1 %v6272_v18 }
 0x39f   : > { %1472 = vst.msk [vmem:[%s5921_s19 + $0x48] sm:$0xff] %vm1462_vm1, %v1433_v36  ;;  %1477 = vst.msk [vmem:[%s5921_s19 + $0x70] sm:$0xff] %vm1462_vm1, %v1443_v32  ;;  %4861 = vmatprep.subr.bf16.mxu1 %v6280_v43 }
 0x3a2   : > { %v1445_v50 = vpop.permute.xlu1 %1444  ;;  %v1439_v62 = vpop.permute.xlu0 %1438  ;;  %4862 = vmatpush3.bf16.msra.mxu1 %v6280_v43  ;;  %v7491_v43 = vld [vmem:[#allocation9_spill] sm:$0xff] }
 0x3a3   : > { %1478 = vst.msk [vmem:[%s5921_s19 + $0x78] sm:$0xff] %vm1462_vm1, %v1445_v50  ;;  %1475 = vst.msk [vmem:[%s5921_s19 + $0x60] sm:$0xff] %vm1462_vm1, %v1439_v62  ;;  %4863 = vmatprep.subr.bf16.mxu1 %v6284_v44 }
 0x3a5   : > { %4784 = vmatmul.mubr.msk.bf16.gmra.mxu1 %vm712_vm0, %v7489_v35 }
 0x3a6   : > { %v1441_v18 = vpop.permute.xlu1 %1440  ;;  %4787 = vmatprep.mubr.msk.bf16.mxu1 %vm712_vm0, %v7490_v42  ;;  %4864 = vmatpush3.bf16.msra.mxu1 %v6284_v44  ;;  %v7493_v44 = vld [vmem:[#allocation11_spill] sm:$0xff] }
 0x3a7   : > { %1476 = vst.msk [vmem:[%s5921_s19 + $0x68] sm:$0xff] %vm1462_vm1, %v1441_v18  ;;  %4865 = vmatprep.subr.bf16.mxu1 %v6288_v5 }
 0x3aa   : > { %4866 = vmatpush3.bf16.msra.mxu1 %v6288_v5 }
 0x3ab   : > { %4867 = vmatprep.subr.bf16.mxu1 %v6294_v7 }
 0x3ad   : > { %4788 = vmatmul.mubr.msk.bf16.gmra.mxu1 %vm712_vm0, %v7491_v43 }
 0x3ae   : > { %4791 = vmatprep.mubr.msk.bf16.mxu1 %vm712_vm0, %v7492_v34  ;;  %4868 = vmatpush3.bf16.msra.mxu1 %v6294_v7 }
 0x3af   : > { %4869 = vmatprep.subr.bf16.mxu1 %v6298_v8 }
 0x3b2   : > { %4870 = vmatpush3.bf16.msra.mxu1 %v6298_v8 }
 0x3b3   : > { %4871 = vmatprep.subr.bf16.mxu1 %v6302_v9 }
 0x3b5   : > { %4792 = vmatmul.mubr.msk.bf16.gmra.mxu1 %vm712_vm0, %v7493_v44 }
 0x3b6   : > { %4872 = vmatpush3.bf16.msra.mxu1 %v6302_v9 }
 0x3b7   : > { %4873 = vmatprep.subr.bf16.mxu1 %v6308_v11 }
 0x3ba   : > { %4874 = vmatpush3.bf16.msra.mxu1 %v6308_v11 }
 0x3bb   : > { %5123 = vmatprep.subr.msk.bf16.mxu1 %vm712_vm0, %v6310_v12 }
 0x41d   : > { %v4749_v5 = vpop.f32.mrf.mxu1 }
 0x41e   : > { %v1804_v7 = vmul.f32 0.088388346, %v4749_v5 }
 0x41f   : > { %v1739_v58 = vpop.f32.mrf.mxu1 }
 0x420   : > { %1838 = vrot.lane.b32.xlu0 %v1804_v7, %s5222_s30  ;;  %v1802_v4 = vmul.f32 0.088388346, %v1739_v58 }
 0x421   : > { %v4750_v8 = vpop.f32.mrf.mxu1 }
 0x422   : > { %v1805_v51 = vmul.f32 0.088388346, %v4750_v8 }
 0x423   : > { %v1742_v22 = vpop.f32.mrf.mxu1 }
 0x424   : > { %1834 = vrot.lane.b32.xlu0 %v1802_v4, %s5222_s30  ;;  %1840 = vrot.lane.b32.xlu1 %v1805_v51, %s5222_s30  ;;  %v1803_v17 = vmul.f32 0.088388346, %v1742_v22 }
 0x425   : > { %v4753_v9 = vpop.f32.mrf.mxu1 }
 0x426   : > { %v1808_v27 = vmul.f32 0.088388346, %v4753_v9 }
 0x427   : > { %v1755_v11 = vpop.f32.mrf.mxu1 }
 0x428   : > { %1836 = vrot.lane.b32.xlu1 %v1803_v17, %s5222_s30  ;;  %v1806_v53 = vmul.f32 0.088388346, %v1755_v11  ;;  %1846 = vrot.lane.b32.xlu0 %v1808_v27, %s5222_s30 }
 0x429   : > { %v4754_v36 = vpop.f32.mrf.mxu1 }
 0x42a   : > { %v1809_v32 = vmul.f32 0.088388346, %v4754_v36  ;;  %v4191_v36 = vld [vmem:[%s7394_s3 + $0x180] sm:$0xff] }
 0x42b   : > { %v1758_v39 = vpop.f32.mrf.mxu1 }
 0x42c   : > { %v1807_v50 = vmul.f32 0.088388346, %v1758_v39  ;;  %1848 = vrot.lane.b32.xlu1 %v1809_v32, %s5222_s30  ;;  %1842 = vrot.lane.b32.xlu0 %v1806_v53, %s5222_s30  ;;  %v4194_v53 = vld [vmem:[%s7394_s3 + $0x198] sm:$0xff]  ;;  %v4192_v39 = vld [vmem:[%s7394_s3 + $0x188] sm:$0xff] }
 0x42d   : > { %v4757_v62 = vpop.f32.mrf.mxu1 }
 0x42e   : > { %v1812_v35 = vmul.f32 0.088388346, %v4757_v62 }
 0x42f   : > { %v1771_v18 = vpop.f32.mrf.mxu1 }
 0x430   : > { %v1810_v42 = vmul.f32 0.088388346, %v1771_v18  ;;  %1844 = vrot.lane.b32.xlu1 %v1807_v50, %s5222_s30  ;;  %1854 = vrot.lane.b32.xlu0 %v1812_v35, %s5222_s30  ;;  %v4193_v50 = vld [vmem:[%s7394_s3 + $0x190] sm:$0xff] }
 0x431   : > { %v4758_v43 = vpop.f32.mrf.mxu1 }
 0x432   : > { %v1813_v34 = vmul.f32 0.088388346, %v4758_v43 }
 0x433   : > { %v1774_v44 = vpop.f32.mrf.mxu1 }
 0x434   : > { %v1811_v5 = vmul.f32 0.088388346, %v1774_v44  ;;  %1856 = vrot.lane.b32.xlu1 %v1813_v34, %s5222_s30  ;;  %1850 = vrot.lane.b32.xlu0 %v1810_v42, %s5222_s30 }
 0x435   : > { %v4761_v7 = vpop.f32.mrf.mxu1 }
 0x436   : > { %v1816_v58 = vmul.f32 0.088388346, %v4761_v7 }
 0x437   : > { %v1787_v8 = vpop.f32.mrf.mxu1 }
 0x438   : > { %v1814_v4 = vmul.f32 0.088388346, %v1787_v8  ;;  %1852 = vrot.lane.b32.xlu1 %v1811_v5, %s5222_s30  ;;  %1862 = vrot.lane.b32.xlu0 %v1816_v58, %s5222_s30  ;;  %v4197_v5 = vld [vmem:[%s7394_s3 + $0x1b0] sm:$0xff]  ;;  %v2414_v58 = vsel %vm712_vm0, %v6169_v24, 0 }
 0x439   : > { %v4762_v51 = vpop.f32.mrf.mxu1 }
 0x43a   : > { %v1817_v22 = vmul.f32 0.088388346, %v4762_v51  ;;  %v4198_v51 = vld [vmem:[%s7394_s3 + $0x1b8] sm:$0xff] }
 0x43b   : > { %v1790_v9 = vpop.f32.mrf.mxu1 }
 0x43c   : > { %1864 = vrot.lane.b32.xlu1 %v1817_v22, %s5222_s30  ;;  %v1815_v17 = vmul.f32 0.088388346, %v1790_v9  ;;  %1858 = vrot.lane.b32.xlu0 %v1814_v4, %s5222_s30  ;;  %v4195_v4 = vld [vmem:[%s7394_s3 + $0x1a0] sm:$0xff] }
 0x440   : > { %1860 = vrot.lane.b32.xlu1 %v1815_v17, %s5222_s30  ;;  %v4196_v17 = vld [vmem:[%s7394_s3 + $0x1a8] sm:$0xff] }
 0x45d   : > { %v4781_v27 = vpop.f32.mrf.mxu1 }
 0x45e   : > { %v2039_v43 = vadd.f32 %v4781_v27, %v4193_v50  ;;  %v4201_v50 = vld [vmem:[%s7394_s3 + $0x1d0] sm:$0xff] }
 0x45f   : > { %v2030_v11 = vpop.f32.mrf.mxu1 }
 0x460   : > { %v2031_v18 = vadd.f32 %v4191_v36, %v2030_v11 }
 0x461   : > { %v4782_v32 = vpop.f32.mrf.mxu1 }
 0x462   : > { %v2042_v62 = vadd.f32 %v4782_v32, %v4194_v53 }
 0x463   : > { %v2033_v35 = vpop.f32.mrf.mxu1 }
 0x464   : > { %v2034_v42 = vadd.f32 %v4192_v39, %v2033_v35  ;;  %v2094_v7 = vpack.c.bf16 %v2042_v62, %v2039_v43  ;;  %v2411_v62 = vsel %vm712_vm0, %v6179_v60, 0 }
 0x465   : > { %v4785_v34 = vpop.f32.mrf.mxu1 }
 0x466   : > { %v2093_v44 = vpack.c.bf16 %v2034_v42, %v2031_v18  ;;  %v2055_v22 = vadd.f32 %v4785_v34, %v4197_v5  ;;  %v4199_v18 = vld [vmem:[%s7394_s3 + $0x1c0] sm:$0xff]  ;;  %v4202_v42 = vld [vmem:[%s7394_s3 + $0x1d8] sm:$0xff] }
 0x467   : > { %v2046_v8 = vpop.f32.mrf.mxu1 }
 0x468   : > { %4811 = vmatprep.mubr.bf16.mxu0 %v2093_v44  ;;  %v2047_v27 = vadd.f32 %v4195_v4, %v2046_v8  ;;  %v4200_v44 = vld [vmem:[%s7394_s3 + $0x1c8] sm:$0xff] }
 0x469   : > { %4812 = vmatmul.mubr.bf16.vlgmr.msra.gmra.mxu0 %v2094_v7  ;;  %v4786_v9 = vpop.f32.mrf.mxu1 }
 0x46a   : > { %4828 = vmatpush3.bf16.xpose.msra.mxu0 %v2414_v58  ;;  %v2058_v24 = vadd.f32 %v4786_v9, %v4198_v51  ;;  %v2408_v9 = vsel %vm712_vm0, %v6185_v0, 0 }
 0x46b   : > { %5116 = vmatprep.subr.msk.bf16.mxu0 %vm712_vm0, %v6179_v60  ;;  %v2049_v11 = vpop.f32.mrf.mxu1 }
 0x46c   : > { %v2050_v53 = vadd.f32 %v4196_v17, %v2049_v11  ;;  %v2096_v36 = vpack.c.bf16 %v2058_v24, %v2055_v22  ;;  %v4205_v22 = vld [vmem:[%s7394_s3 + $0x1f0] sm:$0xff]  ;;  %v4206_v24 = vld [vmem:[%s7394_s3 + $0x1f8] sm:$0xff] }
 0x46d   : > { %v4789_v32 = vpop.f32.mrf.mxu1 }
 0x46e   : > { %v2095_v39 = vpack.c.bf16 %v2050_v53, %v2047_v27  ;;  %v2071_v43 = vadd.f32 %v4789_v32, %v4201_v50  ;;  %v4203_v27 = vld [vmem:[%s7394_s3 + $0x1e0] sm:$0xff] }
 0x46f   : > { %v2062_v35 = vpop.f32.mrf.mxu1 }
 0x470   : > { %4815 = vmatprep.mubr.bf16.mxu0 %v2095_v39  ;;  %v2063_v5 = vadd.f32 %v4199_v18, %v2062_v35  ;;  %v2405_v18 = vsel %vm712_vm0, %v6193_v14, 0 }
 0x471   : > { %v4790_v34 = vpop.f32.mrf.mxu1  ;;  %4816 = vmatmul.mubr.bf16.gmra.mxu0 %v2096_v36  ;;  %v4204_v36 = vld [vmem:[%s7394_s3 + $0x1e8] sm:$0xff] }
 0x472   : > { %4830 = vmatpush3.bf16.xpose.msra.mxu0 %v2411_v62  ;;  %v2074_v60 = vadd.f32 %v4790_v34, %v4202_v42  ;;  %v2402_v42 = vsel %vm712_vm0, %v6197_v61, 0 }
 0x473   : > { %5117 = vmatprep.subr.msk.bf16.mxu0 %vm712_vm0, %v6185_v0  ;;  %v2065_v7 = vpop.f32.mrf.mxu1 }
 0x474   : > { %v2066_v58 = vadd.f32 %v4200_v44, %v2065_v7  ;;  %v2098_v8 = vpack.c.bf16 %v2074_v60, %v2071_v43  ;;  %v2393_v7 = vsel %vm712_vm0, %v6219_v33, 0 }
 0x475   : > { %v4793_v4 = vpop.f32.mrf.mxu1 }
 0x476   : > { %v2097_v51 = vpack.c.bf16 %v2066_v58, %v2063_v5  ;;  %v2087_v11 = vadd.f32 %v4793_v4, %v4205_v22 }
 0x477   : > { %v2078_v17 = vpop.f32.mrf.mxu1 }
 0x478   : > { %4819 = vmatprep.mubr.bf16.mxu0 %v2097_v51  ;;  %v2079_v32 = vadd.f32 %v4203_v27, %v2078_v17 }
 0x479   : > { %v4794_v53 = vpop.f32.mrf.mxu1  ;;  %4820 = vmatmul.mubr.bf16.gmra.mxu0 %v2098_v8 }
 0x47a   : > { %4832 = vmatpush3.bf16.xpose.msra.mxu0 %v2408_v9  ;;  %v2090_v0 = vadd.f32 %v4794_v53, %v4206_v24 }
 0x47b   : > { %5118 = vmatprep.subr.msk.bf16.mxu0 %vm712_vm0, %v6193_v14  ;;  %v2081_v39 = vpop.f32.mrf.mxu1  ;;  %v2399_v14 = vsel %vm712_vm0, %v6205_v29, 0 }
 0x47c   : > { %v2082_v50 = vadd.f32 %v4204_v36, %v2081_v39  ;;  %v2100_v62 = vpack.c.bf16 %v2090_v0, %v2087_v11 }
 0x47e   : > { %v2099_v35 = vpack.c.bf16 %v2082_v50, %v2079_v32 }
 0x480   : > { %4823 = vmatprep.mubr.bf16.mxu0 %v2099_v35 }
 0x481   : > { %4824 = vmatmul.mubr.bf16.gmra.mxu0 %v2100_v62 }
 0x482   : > { %4834 = vmatpush3.bf16.xpose.msra.mxu0 %v2405_v18  ;;  %4843 = vmatprep.mubr.msk.bf16.mxu0 %vm712_vm0, %v6223_v49 }
 0x483   : > { %5119 = vmatprep.subr.msk.bf16.mxu0 %vm712_vm0, %v6197_v61 }
 0x48a   : > { %4836 = vmatpush3.bf16.xpose.msra.mxu0 %v2402_v42 }
 0x48b   : > { %5120 = vmatprep.subr.msk.bf16.mxu0 %vm712_vm0, %v6205_v29  ;;  %v2396_v29 = vsel %vm712_vm0, %v6211_v48, 0 }
 0x492   : > { %4838 = vmatpush3.bf16.xpose.msra.mxu0 %v2399_v14  ;;  %v1839_v43 = vpop.permute.xlu0 %1838 }
 0x493   : > { %1885 = vst.msk [vmem:[%s5921_s19 + $0x10] sm:$0xff] %vm1882_vm2, %v1839_v43  ;;  %5121 = vmatprep.subr.msk.bf16.mxu0 %vm712_vm0, %v6211_v48 }
 0x496   : > { %v1835_v61 = vpop.permute.xlu0 %1834  ;;  %v1841_v49 = vpop.permute.xlu1 %1840 }
 0x497   : > { %1883 = vst.msk [vmem:[%s5921_s19] sm:$0xff] %vm1882_vm2, %v1835_v61  ;;  %1886 = vst.msk [vmem:[%s5921_s19 + $0x18] sm:$0xff] %vm1882_vm2, %v1841_v49 }
 0x49a   : > { %4840 = vmatpush3.bf16.xpose.msra.mxu0 %v2396_v29  ;;  %v1837_v34 = vpop.permute.xlu1 %1836  ;;  %v1847_v44 = vpop.permute.xlu0 %1846 }
 0x49b   : > { %1884 = vst.msk [vmem:[%s5921_s19 + $0x8] sm:$0xff] %vm1882_vm2, %v1837_v34  ;;  %5122 = vmatprep.subr.msk.bf16.mxu0 %vm712_vm0, %v6219_v33  ;;  %1889 = vst.msk [vmem:[%s5921_s19 + $0x30] sm:$0xff] %vm1882_vm2, %v1847_v44  ;;  %v4218_v44 = vld [vmem:[%s7394_s3 + $0x218] sm:$0xff] }
 0x49e   : > { %v1849_v5 = vpop.permute.xlu1 %1848  ;;  %v1843_v60 = vpop.permute.xlu0 %1842 }
 0x49f   : > { %1890 = vst.msk [vmem:[%s5921_s19 + $0x38] sm:$0xff] %vm1882_vm2, %v1849_v5  ;;  %1887 = vst.msk [vmem:[%s5921_s19 + $0x20] sm:$0xff] %vm1882_vm2, %v1843_v60  ;;  %v4215_v5 = vld [vmem:[%s7394_s3 + $0x200] sm:$0xff] }
 0x4a2   : > { %4842 = vmatpush3.bf16.xpose.msra.mxu0 %v2393_v7  ;;  %v1845_v48 = vpop.permute.xlu1 %1844  ;;  %v1855_v58 = vpop.permute.xlu0 %1854  ;;  %v4216_v7 = vld [vmem:[%s7394_s3 + $0x208] sm:$0xff] }
 0x4a3   : > { %1888 = vst.msk [vmem:[%s5921_s19 + $0x28] sm:$0xff] %vm1882_vm2, %v1845_v48  ;;  %1893 = vst.msk [vmem:[%s5921_s19 + $0x50] sm:$0xff] %vm1882_vm2, %v1855_v58  ;;  %4923 = vmatprep.subr.bf16.mxu0 %v6345_v19  ;;  %v4217_v48 = vld [vmem:[%s7394_s3 + $0x210] sm:$0xff] }
 0x4a6   : > { %v1857_v8 = vpop.permute.xlu1 %1856  ;;  %v1851_v4 = vpop.permute.xlu0 %1850 }
 0x4a7   : > { %1894 = vst.msk [vmem:[%s5921_s19 + $0x58] sm:$0xff] %vm1882_vm2, %v1857_v8  ;;  %1891 = vst.msk [vmem:[%s5921_s19 + $0x40] sm:$0xff] %vm1882_vm2, %v1851_v4 }
 0x4a9   : > { %4844 = vmatmul.mubr.msk.bf16.vlgmr.msra.gmra.mxu0 %vm712_vm0, %v6231_v13 }
 0x4aa   : > { %v1853_v33 = vpop.permute.xlu1 %1852  ;;  %v1863_v51 = vpop.permute.xlu0 %1862  ;;  %4847 = vmatprep.mubr.msk.bf16.mxu0 %vm712_vm0, %v6237_v21  ;;  %4924 = vmatpush3.bf16.msra.mxu0 %v6345_v19 }
 0x4ab   : > { %1892 = vst.msk [vmem:[%s5921_s19 + $0x48] sm:$0xff] %vm1882_vm2, %v1853_v33  ;;  %1897 = vst.msk [vmem:[%s5921_s19 + $0x70] sm:$0xff] %vm1882_vm2, %v1863_v51  ;;  %4925 = vmatprep.subr.bf16.mxu0 %v6347_v41 }
 0x4ae   : > { %v1865_v22 = vpop.permute.xlu1 %1864  ;;  %v1859_v9 = vpop.permute.xlu0 %1858  ;;  %4926 = vmatpush3.bf16.msra.mxu0 %v6347_v41 }
 0x4af   : > { %1898 = vst.msk [vmem:[%s5921_s19 + $0x78] sm:$0xff] %vm1882_vm2, %v1865_v22  ;;  %1895 = vst.msk [vmem:[%s5921_s19 + $0x60] sm:$0xff] %vm1882_vm2, %v1859_v9  ;;  %4927 = vmatprep.subr.bf16.mxu0 %v6349_v15 }
 0x4b1   : > { %4848 = vmatmul.mubr.msk.bf16.gmra.mxu0 %vm712_vm0, %v6245_v37 }
 0x4b2   : > { %v1861_v13 = vpop.permute.xlu1 %1860  ;;  %4851 = vmatprep.mubr.msk.bf16.mxu0 %vm712_vm0, %v6249_v59  ;;  %4928 = vmatpush3.bf16.msra.mxu0 %v6349_v15 }
 0x4b3   : > { %1896 = vst.msk [vmem:[%s5921_s19 + $0x68] sm:$0xff] %vm1882_vm2, %v1861_v13  ;;  %4929 = vmatprep.subr.bf16.mxu0 %v6351_v56  ;;  %v4221_v13 = vld [vmem:[%s7394_s3 + $0x230] sm:$0xff] }
 0x4b6   : > { %4930 = vmatpush3.bf16.msra.mxu0 %v6351_v56 }
 0x4b7   : > { %4931 = vmatprep.subr.bf16.mxu0 %v6353_v10 }
 0x4b9   : > { %4852 = vmatmul.mubr.msk.bf16.gmra.mxu0 %vm712_vm0, %v6256_v2 }
 0x4ba   : > { %4855 = vmatprep.mubr.msk.bf16.mxu0 %vm712_vm0, %v6260_v3  ;;  %4932 = vmatpush3.bf16.msra.mxu0 %v6353_v10 }
 0x4bb   : > { %4933 = vmatprep.subr.bf16.mxu0 %v6355_v52 }
 0x4be   : > { %4934 = vmatpush3.bf16.msra.mxu0 %v6355_v52 }
 0x4bf   : > { %4935 = vmatprep.subr.bf16.mxu0 %v6357_v46 }
 0x4c1   : > { %4856 = vmatmul.mubr.msk.bf16.gmra.mxu0 %vm712_vm0, %v6270_v45 }
 0x4c2   : > { %4936 = vmatpush3.bf16.msra.mxu0 %v6357_v46 }
 0x4c3   : > { %4937 = vmatprep.subr.bf16.mxu0 %v6359_v31 }
 0x4c6   : > { %4938 = vmatpush3.bf16.msra.mxu0 %v6359_v31 }
 0x4c7   : > { %5131 = vmatprep.subr.msk.bf16.mxu0 %vm712_vm0, %v6361_v1 }
 0x529   : > { %v4813_v21 = vpop.f32.mrf.mxu0 }
 0x52a   : > { %v2224_v37 = vmul.f32 0.088388346, %v4813_v21 }
 0x52b   : > { %v2159_v59 = vpop.f32.mrf.mxu0 }
 0x52c   : > { %2258 = vrot.lane.b32.xlu0 %v2224_v37, %s5221_s18  ;;  %v2222_v3 = vmul.f32 0.088388346, %v2159_v59  ;;  %v2834_v37 = vsel %vm712_vm0, %v6310_v12, 0 }
 0x52d   : > { %v4814_v2 = vpop.f32.mrf.mxu0 }
 0x52e   : > { %v2225_v19 = vmul.f32 0.088388346, %v4814_v2  ;;  %v4219_v2 = vld [vmem:[%s7394_s3 + $0x220] sm:$0xff] }
 0x52f   : > { %v2162_v41 = vpop.f32.mrf.mxu0 }
 0x530   : > { %2254 = vrot.lane.b32.xlu0 %v2222_v3, %s5221_s18  ;;  %2260 = vrot.lane.b32.xlu1 %v2225_v19, %s5221_s18  ;;  %v2223_v15 = vmul.f32 0.088388346, %v2162_v41  ;;  %v4222_v3 = vld [vmem:[%s7394_s3 + $0x238] sm:$0xff] }
 0x531   : > { %v4817_v45 = vpop.f32.mrf.mxu0 }
 0x532   : > { %v2228_v56 = vmul.f32 0.088388346, %v4817_v45  ;;  %v4220_v45 = vld [vmem:[%s7394_s3 + $0x228] sm:$0xff] }
 0x533   : > { %v2175_v10 = vpop.f32.mrf.mxu0 }
 0x534   : > { %2256 = vrot.lane.b32.xlu1 %v2223_v15, %s5221_s18  ;;  %v2226_v52 = vmul.f32 0.088388346, %v2175_v10  ;;  %2266 = vrot.lane.b32.xlu0 %v2228_v56, %s5221_s18 }
 0x535   : > { %v4818_v46 = vpop.f32.mrf.mxu0 }
 0x536   : > { %v2229_v31 = vmul.f32 0.088388346, %v4818_v46 }
 0x537   : > { %v2178_v17 = vpop.f32.mrf.mxu0 }
 0x538   : > { %v2227_v27 = vmul.f32 0.088388346, %v2178_v17  ;;  %2268 = vrot.lane.b32.xlu1 %v2229_v31, %s5221_s18  ;;  %2262 = vrot.lane.b32.xlu0 %v2226_v52, %s5221_s18  ;;  %v4225_v17 = vld [vmem:[%s7394_s3 + $0x250] sm:$0xff] }
 0x539   : > { %v4821_v24 = vpop.f32.mrf.mxu0 }
 0x53a   : > { %v2232_v11 = vmul.f32 0.088388346, %v4821_v24 }
 0x53b   : > { %v2191_v53 = vpop.f32.mrf.mxu0 }
 0x53c   : > { %v2230_v36 = vmul.f32 0.088388346, %v2191_v53  ;;  %2264 = vrot.lane.b32.xlu1 %v2227_v27, %s5221_s18  ;;  %2274 = vrot.lane.b32.xlu0 %v2232_v11, %s5221_s18  ;;  %v2831_v27 = vsel %vm712_vm0, %v6315_v54, 0  ;;  %v4223_v11 = vld [vmem:[%s7394_s3 + $0x240] sm:$0xff]  ;;  %v4226_v53 = vld [vmem:[%s7394_s3 + $0x258] sm:$0xff] }
 0x53d   : > { %v4822_v32 = vpop.f32.mrf.mxu0 }
 0x53e   : > { %v2233_v0 = vmul.f32 0.088388346, %v4822_v32 }
 0x53f   : > { %v2194_v39 = vpop.f32.mrf.mxu0 }
 0x540   : > { %v2231_v50 = vmul.f32 0.088388346, %v2194_v39  ;;  %2276 = vrot.lane.b32.xlu1 %v2233_v0, %s5221_s18  ;;  %2270 = vrot.lane.b32.xlu0 %v2230_v36, %s5221_s18  ;;  %v4224_v0 = vld [vmem:[%s7394_s3 + $0x248] sm:$0xff] }
 0x541   : > { %v4825_v62 = vpop.f32.mrf.mxu0 }
 0x542   : > { %v2236_v35 = vmul.f32 0.088388346, %v4825_v62 }
 0x543   : > { %v2207_v18 = vpop.f32.mrf.mxu0 }
 0x544   : > { %v2234_v42 = vmul.f32 0.088388346, %v2207_v18  ;;  %2272 = vrot.lane.b32.xlu1 %v2231_v50, %s5221_s18  ;;  %2282 = vrot.lane.b32.xlu0 %v2236_v35, %s5221_s18 }
 0x545   : > { %v4826_v14 = vpop.f32.mrf.mxu0 }
 0x546   : > { %v2237_v43 = vmul.f32 0.088388346, %v4826_v14  ;;  %v4229_v14 = vld [vmem:[%s7394_s3 + $0x270] sm:$0xff] }
 0x547   : > { %v2210_v61 = vpop.f32.mrf.mxu0 }
 0x548   : > { %2284 = vrot.lane.b32.xlu1 %v2237_v43, %s5221_s18  ;;  %v2235_v49 = vmul.f32 0.088388346, %v2210_v61  ;;  %2278 = vrot.lane.b32.xlu0 %v2234_v42, %s5221_s18  ;;  %v2828_v43 = vsel %vm712_vm0, %v6317_v26, 0 }
 0x54c   : > { %2280 = vrot.lane.b32.xlu1 %v2235_v49, %s5221_s18  ;;  %v4227_v49 = vld [vmem:[%s7394_s3 + $0x260] sm:$0xff] }
 0x569   : > { %v4845_v29 = vpop.f32.mrf.mxu0 }
 0x56a   : > { %v2459_v51 = vadd.f32 %v4845_v29, %v4217_v48  ;;  %v4230_v29 = vld [vmem:[%s7394_s3 + $0x278] sm:$0xff] }
 0x56b   : > { %v2450_v34 = vpop.f32.mrf.mxu0 }
 0x56c   : > { %v2451_v4 = vadd.f32 %v4215_v5, %v2450_v34  ;;  %v4228_v5 = vld [vmem:[%s7394_s3 + $0x268] sm:$0xff] }
 0x56d   : > { %v4846_v60 = vpop.f32.mrf.mxu0 }
 0x56e   : > { %v2462_v58 = vadd.f32 %v4846_v60, %v4218_v44 }
 0x56f   : > { %v2453_v8 = vpop.f32.mrf.mxu0 }
 0x570   : > { %v2454_v33 = vadd.f32 %v4216_v7, %v2453_v8  ;;  %v2514_v21 = vpack.c.bf16 %v2462_v58, %v2459_v51  ;;  %v7494_v7 = vld [vmem:[#allocation12_spill] sm:$0xff]  ;;  %v7495_v51 = vld [vmem:[#allocation17_spill] sm:$0xff] }
 0x571   : > { %v4849_v22 = vpop.f32.mrf.mxu0 }
 0x572   : > { %v2513_v9 = vpack.c.bf16 %v2454_v33, %v2451_v4  ;;  %v2475_v19 = vadd.f32 %v4849_v22, %v4221_v13  ;;  %v2825_v33 = vsel %vm712_vm0, %v7494_v7, 0  ;;  %v7496_v22 = vld [vmem:[#allocation13_spill] sm:$0xff]  ;;  %v7497_v13 = vld [vmem:[#allocation14_spill] sm:$0xff] }
 0x573   : > { %v2466_v59 = vpop.f32.mrf.mxu0 }
 0x574   : > { %4875 = vmatprep.mubr.bf16.mxu1 %v2513_v9  ;;  %v2467_v15 = vadd.f32 %v4219_v2, %v2466_v59  ;;  %v2822_v9 = vsel %vm712_vm0, %v7496_v22, 0  ;;  %v7498_v59 = vld [vmem:[#allocation15_spill] sm:$0xff] }
 0x575   : > { %4876 = vmatmul.mubr.bf16.vlgmr.msra.gmra.mxu1 %v2514_v21  ;;  %v4850_v41 = vpop.f32.mrf.mxu0  ;;  %v2819_v21 = vsel %vm712_vm0, %v7497_v13, 0 }
 0x576   : > { %4892 = vmatpush3.bf16.xpose.msra.mxu1 %v2834_v37  ;;  %v2478_v12 = vadd.f32 %v4850_v41, %v4222_v3 }
 0x577   : > { %5124 = vmatprep.subr.msk.bf16.mxu1 %vm712_vm0, %v6315_v54  ;;  %v2469_v56 = vpop.f32.mrf.mxu0 }
 0x578   : > { %v2470_v10 = vadd.f32 %v4220_v45, %v2469_v56  ;;  %v2516_v52 = vpack.c.bf16 %v2478_v12, %v2475_v19  ;;  %v2816_v19 = vsel %vm712_vm0, %v7498_v59, 0 }
 0x579   : > { %v4853_v46 = vpop.f32.mrf.mxu0 }
 0x57a   : > { %v2515_v31 = vpack.c.bf16 %v2470_v10, %v2467_v15  ;;  %v2491_v36 = vadd.f32 %v4853_v46, %v4225_v17  ;;  %v7499_v15 = vld [vmem:[#allocation16_spill] sm:$0xff] }
 0x57b   : > { %v2482_v24 = vpop.f32.mrf.mxu0  ;;  %v2813_v10 = vsel %vm712_vm0, %v7499_v15, 0 }
 0x57c   : > { %4879 = vmatprep.mubr.bf16.mxu1 %v2515_v31  ;;  %v2483_v39 = vadd.f32 %v4223_v11, %v2482_v24  ;;  %v7500_v31 = vld [vmem:[#allocation40_spill] sm:$0xff]  ;;  %v7501_v24 = vld [vmem:[#allocation18_spill] sm:$0xff] }
 0x57d   : > { %v4854_v32 = vpop.f32.mrf.mxu0  ;;  %4880 = vmatmul.mubr.bf16.gmra.mxu1 %v2516_v52 }
 0x57e   : > { %4894 = vmatpush3.bf16.xpose.msra.mxu1 %v2831_v27  ;;  %v2494_v54 = vadd.f32 %v4854_v32, %v4226_v53  ;;  %v7503_v32 = vld [vmem:[#allocation41_spill] sm:$0xff] }
 0x57f   : > { %5125 = vmatprep.subr.msk.bf16.mxu1 %vm712_vm0, %v6317_v26  ;;  %v2485_v50 = vpop.f32.mrf.mxu0 }
 0x580   : > { %v2486_v62 = vadd.f32 %v4224_v0, %v2485_v50  ;;  %v2518_v35 = vpack.c.bf16 %v2494_v54, %v2491_v36  ;;  %v7502_v36 = vld [vmem:[#allocation19_spill] sm:$0xff]  ;;  %v7504_v54 = vld [vmem:[#allocation42_spill] sm:$0xff]  ;;  %v7505_v50 = vld [vmem:[#allocation20_spill] sm:$0xff] }
 0x581   : > { %v4857_v18 = vpop.f32.mrf.mxu0 }
 0x582   : > { %v2517_v42 = vpack.c.bf16 %v2486_v62, %v2483_v39  ;;  %v2507_v34 = vadd.f32 %v4857_v18, %v4229_v14  ;;  %v7507_v18 = vld [vmem:[#allocation43_spill] sm:$0xff]  ;;  %v7509_v14 = vld [vmem:[#allocation22_spill] sm:$0xff] }
 0x583   : > { %v2498_v61 = vpop.f32.mrf.mxu0 }
 0x584   : > { %4883 = vmatprep.mubr.bf16.mxu1 %v2517_v42  ;;  %v2499_v60 = vadd.f32 %v4227_v49, %v2498_v61  ;;  %v7508_v42 = vld [vmem:[#allocation44_spill] sm:$0xff]  ;;  %v7511_v61 = vld [vmem:[#allocation45_spill] sm:$0xff]  ;;  %v7512_v49 = vld [vmem:[#allocation46_spill] sm:$0xff] }
 0x585   : > { %v4858_v44 = vpop.f32.mrf.mxu0  ;;  %4884 = vmatmul.mubr.bf16.gmra.mxu1 %v2518_v35  ;;  %v7506_v35 = vld [vmem:[#allocation21_spill] sm:$0xff] }
 0x586   : > { %4896 = vmatpush3.bf16.xpose.msra.mxu1 %v2828_v43  ;;  %v2510_v26 = vadd.f32 %v4858_v44, %v4230_v29  ;;  %v7510_v43 = vld [vmem:[#allocation23_spill] sm:$0xff]  ;;  %v7513_v29 = vld [vmem:[#allocation24_spill] sm:$0xff] }
 0x587   : > { %5126 = vmatprep.subr.msk.bf16.mxu1 %vm712_vm0, %v7494_v7  ;;  %v2501_v48 = vpop.f32.mrf.mxu0  ;;  %v7515_v44 = vld [vmem:[#allocation48_spill] sm:$0xff] }
 0x588   : > { %v2502_v58 = vadd.f32 %v4228_v5, %v2501_v48  ;;  %v2520_v8 = vpack.c.bf16 %v2510_v26, %v2507_v34  ;;  %v7514_v34 = vld [vmem:[#allocation47_spill] sm:$0xff] }
 0x58a   : > { %v2519_v4 = vpack.c.bf16 %v2502_v58, %v2499_v60 }
 0x58c   : > { %4887 = vmatprep.mubr.bf16.mxu1 %v2519_v4 }
 0x58d   : > { %4888 = vmatmul.mubr.bf16.gmra.mxu1 %v2520_v8 }
 0x58e   : > { %4898 = vmatpush3.bf16.xpose.msra.mxu1 %v2825_v33  ;;  %4907 = vmatprep.mubr.msk.bf16.mxu1 %vm712_vm0, %v7495_v51 }
 0x58f   : > { %5127 = vmatprep.subr.msk.bf16.mxu1 %vm712_vm0, %v7496_v22 }
 0x596   : > { %4900 = vmatpush3.bf16.xpose.msra.mxu1 %v2822_v9 }
 0x597   : > { %5128 = vmatprep.subr.msk.bf16.mxu1 %vm712_vm0, %v7497_v13 }
 0x59e   : > { %4902 = vmatpush3.bf16.xpose.msra.mxu1 %v2819_v21  ;;  %v2259_v37 = vpop.permute.xlu0 %2258 }
 0x59f   : > { %2305 = vst.msk [vmem:[%s5921_s19 + $0x10] sm:$0xff] %vm2302_vm3, %v2259_v37  ;;  %5129 = vmatprep.subr.msk.bf16.mxu1 %vm712_vm0, %v7498_v59 }
 0x5a2   : > { %v2255_v2 = vpop.permute.xlu0 %2254  ;;  %v2261_v3 = vpop.permute.xlu1 %2260 }
 0x5a3   : > { %2303 = vst.msk [vmem:[%s5921_s19] sm:$0xff] %vm2302_vm3, %v2255_v2  ;;  %2306 = vst.msk [vmem:[%s5921_s19 + $0x18] sm:$0xff] %vm2302_vm3, %v2261_v3 }
 0x5a6   : > { %4904 = vmatpush3.bf16.xpose.msra.mxu1 %v2816_v19  ;;  %v2257_v41 = vpop.permute.xlu1 %2256  ;;  %v2267_v45 = vpop.permute.xlu0 %2266 }
 0x5a7   : > { %2304 = vst.msk [vmem:[%s5921_s19 + $0x8] sm:$0xff] %vm2302_vm3, %v2257_v41  ;;  %5130 = vmatprep.subr.msk.bf16.mxu1 %vm712_vm0, %v7499_v15  ;;  %2309 = vst.msk [vmem:[%s5921_s19 + $0x30] sm:$0xff] %vm2302_vm3, %v2267_v45 }
 0x5aa   : > { %v2269_v12 = vpop.permute.xlu1 %2268  ;;  %v2263_v56 = vpop.permute.xlu0 %2262 }
 0x5ab   : > { %2310 = vst.msk [vmem:[%s5921_s19 + $0x38] sm:$0xff] %vm2302_vm3, %v2269_v12  ;;  %2307 = vst.msk [vmem:[%s5921_s19 + $0x20] sm:$0xff] %vm2302_vm3, %v2263_v56 }
 0x5ae   : > { %4906 = vmatpush3.bf16.xpose.msra.mxu1 %v2813_v10  ;;  %v2265_v52 = vpop.permute.xlu1 %2264  ;;  %v2275_v46 = vpop.permute.xlu0 %2274 }
 0x5af   : > { %2308 = vst.msk [vmem:[%s5921_s19 + $0x28] sm:$0xff] %vm2302_vm3, %v2265_v52  ;;  %2313 = vst.msk [vmem:[%s5921_s19 + $0x50] sm:$0xff] %vm2302_vm3, %v2275_v46  ;;  %4987 = vmatprep.subr.bf16.mxu1 %v7500_v31 }
 0x5b2   : > { %v2277_v17 = vpop.permute.xlu1 %2276  ;;  %v2271_v27 = vpop.permute.xlu0 %2270 }
 0x5b3   : > { %2314 = vst.msk [vmem:[%s5921_s19 + $0x58] sm:$0xff] %vm2302_vm3, %v2277_v17  ;;  %2311 = vst.msk [vmem:[%s5921_s19 + $0x40] sm:$0xff] %vm2302_vm3, %v2271_v27 }
 0x5b5   : > { %4908 = vmatmul.mubr.msk.bf16.vlgmr.msra.gmra.mxu1 %vm712_vm0, %v7501_v24 }
 0x5b6   : > { %v2273_v11 = vpop.permute.xlu1 %2272  ;;  %v2283_v53 = vpop.permute.xlu0 %2282  ;;  %4911 = vmatprep.mubr.msk.bf16.mxu1 %vm712_vm0, %v7502_v36  ;;  %4988 = vmatpush3.bf16.msra.mxu1 %v7500_v31 }
 0x5b7   : > { %2312 = vst.msk [vmem:[%s5921_s19 + $0x48] sm:$0xff] %vm2302_vm3, %v2273_v11  ;;  %2317 = vst.msk [vmem:[%s5921_s19 + $0x70] sm:$0xff] %vm2302_vm3, %v2283_v53  ;;  %4989 = vmatprep.subr.bf16.mxu1 %v7503_v32 }
 0x5ba   : > { %v2285_v0 = vpop.permute.xlu1 %2284  ;;  %v2279_v39 = vpop.permute.xlu0 %2278  ;;  %4990 = vmatpush3.bf16.msra.mxu1 %v7503_v32  ;;  %v4242_v32 = vld [vmem:[%s7394_s3 + $0x298] sm:$0xff] }
 0x5bb   : > { %2318 = vst.msk [vmem:[%s5921_s19 + $0x78] sm:$0xff] %vm2302_vm3, %v2285_v0  ;;  %2315 = vst.msk [vmem:[%s5921_s19 + $0x60] sm:$0xff] %vm2302_vm3, %v2279_v39  ;;  %4991 = vmatprep.subr.bf16.mxu1 %v7504_v54  ;;  %v4239_v0 = vld [vmem:[%s7394_s3 + $0x280] sm:$0xff] }
 0x5bd   : > { %4912 = vmatmul.mubr.msk.bf16.gmra.mxu1 %vm712_vm0, %v7505_v50  ;;  %v4241_v50 = vld [vmem:[%s7394_s3 + $0x290] sm:$0xff] }
 0x5be   : > { %v2281_v62 = vpop.permute.xlu1 %2280  ;;  %4915 = vmatprep.mubr.msk.bf16.mxu1 %vm712_vm0, %v7506_v35  ;;  %4992 = vmatpush3.bf16.msra.mxu1 %v7504_v54  ;;  %v4240_v54 = vld [vmem:[%s7394_s3 + $0x288] sm:$0xff] }
 0x5bf   : > { %2316 = vst.msk [vmem:[%s5921_s19 + $0x68] sm:$0xff] %vm2302_vm3, %v2281_v62  ;;  %4993 = vmatprep.subr.bf16.mxu1 %v7507_v18 }
 0x5c2   : > { %4994 = vmatpush3.bf16.msra.mxu1 %v7507_v18 }
 0x5c3   : > { %4995 = vmatprep.subr.bf16.mxu1 %v7508_v42 }
 0x5c5   : > { %4916 = vmatmul.mubr.msk.bf16.gmra.mxu1 %vm712_vm0, %v7509_v14 }
 0x5c6   : > { %4919 = vmatprep.mubr.msk.bf16.mxu1 %vm712_vm0, %v7510_v43  ;;  %4996 = vmatpush3.bf16.msra.mxu1 %v7508_v42 }
 0x5c7   : > { %4997 = vmatprep.subr.bf16.mxu1 %v7511_v61 }
 0x5ca   : > { %4998 = vmatpush3.bf16.msra.mxu1 %v7511_v61 }
 0x5cb   : > { %4999 = vmatprep.subr.bf16.mxu1 %v7512_v49 }
 0x5cd   : > { %4920 = vmatmul.mubr.msk.bf16.gmra.mxu1 %vm712_vm0, %v7513_v29 }
 0x5ce   : > { %5000 = vmatpush3.bf16.msra.mxu1 %v7512_v49  ;;  %v4245_v49 = vld [vmem:[%s7394_s3 + $0x2b0] sm:$0xff] }
 0x5cf   : > { %5001 = vmatprep.subr.bf16.mxu1 %v7514_v34 }
 0x5d2   : > { %5002 = vmatpush3.bf16.msra.mxu1 %v7514_v34  ;;  %v3254_v34 = vsel %vm712_vm0, %v6361_v1, 0 }
 0x5d3   : > { %5139 = vmatprep.subr.msk.bf16.mxu1 %vm712_vm0, %v7515_v44 }
 0x635   : > { %v4877_v5 = vpop.f32.mrf.mxu1 }
 0x636   : > { %v2644_v60 = vmul.f32 0.088388346, %v4877_v5 }
 0x637   : > { %v2579_v26 = vpop.f32.mrf.mxu1 }
 0x638   : > { %2678 = vrot.lane.b32.xlu0 %v2644_v60, %s5220_s16  ;;  %v2642_v48 = vmul.f32 0.088388346, %v2579_v26  ;;  %v4243_v60 = vld [vmem:[%s7394_s3 + $0x2a0] sm:$0xff]  ;;  %v4246_v26 = vld [vmem:[%s7394_s3 + $0x2b8] sm:$0xff] }
 0x639   : > { %v4878_v7 = vpop.f32.mrf.mxu1 }
 0x63a   : > { %v2645_v58 = vmul.f32 0.088388346, %v4878_v7 }
 0x63b   : > { %v2582_v8 = vpop.f32.mrf.mxu1 }
 0x63c   : > { %2674 = vrot.lane.b32.xlu0 %v2642_v48, %s5220_s16  ;;  %2680 = vrot.lane.b32.xlu1 %v2645_v58, %s5220_s16  ;;  %v2643_v33 = vmul.f32 0.088388346, %v2582_v8  ;;  %v4244_v58 = vld [vmem:[%s7394_s3 + $0x2a8] sm:$0xff] }
 0x63d   : > { %v4881_v4 = vpop.f32.mrf.mxu1 }
 0x63e   : > { %v2648_v51 = vmul.f32 0.088388346, %v4881_v4  ;;  %v7516_v4 = vld [vmem:[#allocation25_spill] sm:$0xff] }
 0x63f   : > { %v2595_v22 = vpop.f32.mrf.mxu1 }
 0x640   : > { %2676 = vrot.lane.b32.xlu1 %v2643_v33, %s5220_s16  ;;  %v2646_v9 = vmul.f32 0.088388346, %v2595_v22  ;;  %2686 = vrot.lane.b32.xlu0 %v2648_v51, %s5220_s16 }
 0x641   : > { %v4882_v13 = vpop.f32.mrf.mxu1 }
 0x642   : > { %v2649_v21 = vmul.f32 0.088388346, %v4882_v13 }
 0x643   : > { %v2598_v37 = vpop.f32.mrf.mxu1 }
 0x644   : > { %v2647_v59 = vmul.f32 0.088388346, %v2598_v37  ;;  %2688 = vrot.lane.b32.xlu1 %v2649_v21, %s5220_s16  ;;  %2682 = vrot.lane.b32.xlu0 %v2646_v9, %s5220_s16  ;;  %v4249_v21 = vld [vmem:[%s7394_s3 + $0x2d0] sm:$0xff]  ;;  %v3251_v37 = vsel %vm712_vm0, %v7516_v4, 0 }
 0x645   : > { %v4885_v2 = vpop.f32.mrf.mxu1 }
 0x646   : > { %v2652_v3 = vmul.f32 0.088388346, %v4885_v2  ;;  %v4247_v2 = vld [vmem:[%s7394_s3 + $0x2c0] sm:$0xff] }
 0x647   : > { %v2611_v19 = vpop.f32.mrf.mxu1 }
 0x648   : > { %v2650_v41 = vmul.f32 0.088388346, %v2611_v19  ;;  %2684 = vrot.lane.b32.xlu1 %v2647_v59, %s5220_s16  ;;  %2694 = vrot.lane.b32.xlu0 %v2652_v3, %s5220_s16  ;;  %v4250_v3 = vld [vmem:[%s7394_s3 + $0x2d8] sm:$0xff] }
 0x649   : > { %v4886_v45 = vpop.f32.mrf.mxu1 }
 0x64a   : > { %v2653_v15 = vmul.f32 0.088388346, %v4886_v45  ;;  %v4248_v45 = vld [vmem:[%s7394_s3 + $0x2c8] sm:$0xff] }
 0x64b   : > { %v2614_v12 = vpop.f32.mrf.mxu1 }
 0x64c   : > { %v2651_v56 = vmul.f32 0.088388346, %v2614_v12  ;;  %2696 = vrot.lane.b32.xlu1 %v2653_v15, %s5220_s16  ;;  %2690 = vrot.lane.b32.xlu0 %v2650_v41, %s5220_s16 }
 0x64d   : > { %v4889_v10 = vpop.f32.mrf.mxu1 }
 0x64e   : > { %v2656_v52 = vmul.f32 0.088388346, %v4889_v10 }
 0x64f   : > { %v2627_v46 = vpop.f32.mrf.mxu1 }
 0x650   : > { %v2654_v31 = vmul.f32 0.088388346, %v2627_v46  ;;  %2692 = vrot.lane.b32.xlu1 %v2651_v56, %s5220_s16  ;;  %2702 = vrot.lane.b32.xlu0 %v2656_v52, %s5220_s16  ;;  %v7517_v56 = vld [vmem:[#allocation26_spill] sm:$0xff] }
 0x651   : > { %v4890_v17 = vpop.f32.mrf.mxu1 }
 0x652   : > { %v2657_v27 = vmul.f32 0.088388346, %v4890_v17 }
 0x653   : > { %v2630_v24 = vpop.f32.mrf.mxu1 }
 0x654   : > { %2704 = vrot.lane.b32.xlu1 %v2657_v27, %s5220_s16  ;;  %v2655_v11 = vmul.f32 0.088388346, %v2630_v24  ;;  %2698 = vrot.lane.b32.xlu0 %v2654_v31, %s5220_s16  ;;  %v4253_v27 = vld [vmem:[%s7394_s3 + $0x2f0] sm:$0xff]  ;;  %v3248_v24 = vsel %vm712_vm0, %v7517_v56, 0 }
 0x658   : > { %2700 = vrot.lane.b32.xlu1 %v2655_v11, %s5220_s16 }
 0x675   : > { %v4909_v53 = vpop.f32.mrf.mxu1 }
 0x676   : > { %v2879_v14 = vadd.f32 %v4909_v53, %v4241_v50  ;;  %v4251_v53 = vld [vmem:[%s7394_s3 + $0x2e0] sm:$0xff] }
 0x677   : > { %v2870_v36 = vpop.f32.mrf.mxu1 }
 0x678   : > { %v2871_v18 = vadd.f32 %v4239_v0, %v2870_v36  ;;  %v4254_v36 = vld [vmem:[%s7394_s3 + $0x2f8] sm:$0xff] }
 0x679   : > { %v4910_v39 = vpop.f32.mrf.mxu1 }
 0x67a   : > { %v2882_v62 = vadd.f32 %v4910_v39, %v4242_v32  ;;  %v4252_v39 = vld [vmem:[%s7394_s3 + $0x2e8] sm:$0xff] }
 0x67b   : > { %v2873_v35 = vpop.f32.mrf.mxu1 }
 0x67c   : > { %v2874_v42 = vadd.f32 %v4240_v54, %v2873_v35  ;;  %v2934_v29 = vpack.c.bf16 %v2882_v62, %v2879_v14  ;;  %v7518_v62 = vld [vmem:[#allocation27_spill] sm:$0xff] }
 0x67d   : > { %v4913_v43 = vpop.f32.mrf.mxu1 }
 0x67e   : > { %v2933_v61 = vpack.c.bf16 %v2874_v42, %v2871_v18  ;;  %v2895_v7 = vadd.f32 %v4913_v43, %v4245_v49  ;;  %v3245_v43 = vsel %vm712_vm0, %v7518_v62, 0  ;;  %v7520_v49 = vld [vmem:[#allocation28_spill] sm:$0xff] }
 0x67f   : > { %v2886_v5 = vpop.f32.mrf.mxu1 }
 0x680   : > { %4939 = vmatprep.mubr.bf16.mxu0 %v2933_v61  ;;  %v2887_v8 = vadd.f32 %v4243_v60, %v2886_v5  ;;  %v7519_v61 = vld [vmem:[#allocation32_spill] sm:$0xff] }
 0x681   : > { %4940 = vmatmul.mubr.bf16.vlgmr.msra.gmra.mxu0 %v2934_v29  ;;  %v4914_v48 = vpop.f32.mrf.mxu1  ;;  %v3242_v29 = vsel %vm712_vm0, %v7520_v49, 0 }
 0x682   : > { %4956 = vmatpush3.bf16.xpose.msra.mxu0 %v3254_v34  ;;  %v2898_v1 = vadd.f32 %v4914_v48, %v4246_v26  ;;  %v7521_v34 = vld [vmem:[#allocation29_spill] sm:$0xff]  ;;  %v7522_v26 = vld [vmem:[#allocation30_spill] sm:$0xff] }
 0x683   : > { %5132 = vmatprep.subr.msk.bf16.mxu0 %vm712_vm0, %v7516_v4  ;;  %v2889_v33 = vpop.f32.mrf.mxu1  ;;  %v3239_v5 = vsel %vm712_vm0, %v7521_v34, 0  ;;  %v7523_v4 = vld [vmem:[#allocation31_spill] sm:$0xff] }
 0x684   : > { %v2890_v51 = vadd.f32 %v4244_v58, %v2889_v33  ;;  %v2936_v22 = vpack.c.bf16 %v2898_v1, %v2895_v7  ;;  %v3236_v58 = vsel %vm712_vm0, %v7522_v26, 0 }
 0x685   : > { %v4917_v9 = vpop.f32.mrf.mxu1 }
 0x686   : > { %v2935_v13 = vpack.c.bf16 %v2890_v51, %v2887_v8  ;;  %v2911_v19 = vadd.f32 %v4917_v9, %v4249_v21 }
 0x687   : > { %v2902_v59 = vpop.f32.mrf.mxu1 }
 0x688   : > { %4943 = vmatprep.mubr.bf16.mxu0 %v2935_v13  ;;  %v2903_v15 = vadd.f32 %v4247_v2, %v2902_v59  ;;  %v7524_v59 = vld [vmem:[#allocation33_spill] sm:$0xff] }
 0x689   : > { %v4918_v41 = vpop.f32.mrf.mxu1  ;;  %4944 = vmatmul.mubr.bf16.gmra.mxu0 %v2936_v22  ;;  %v3233_v22 = vsel %vm712_vm0, %v7523_v4, 0 }
 0x68a   : > { %4958 = vmatpush3.bf16.xpose.msra.mxu0 %v3251_v37  ;;  %v2914_v12 = vadd.f32 %v4918_v41, %v4250_v3 }
 0x68b   : > { %5133 = vmatprep.subr.msk.bf16.mxu0 %vm712_vm0, %v7517_v56  ;;  %v2905_v10 = vpop.f32.mrf.mxu1  ;;  %v7529_v56 = vld [vmem:[#allocation38_spill] sm:$0xff] }
 0x68c   : > { %v2906_v52 = vadd.f32 %v4248_v45, %v2905_v10  ;;  %v2938_v46 = vpack.c.bf16 %v2914_v12, %v2911_v19  ;;  %v7525_v19 = vld [vmem:[#allocation34_spill] sm:$0xff]  ;;  %v7527_v12 = vld [vmem:[#allocation36_spill] sm:$0xff] }
 0x68d   : > { %v4921_v31 = vpop.f32.mrf.mxu1 }
 0x68e   : > { %v2937_v17 = vpack.c.bf16 %v2906_v52, %v2903_v15  ;;  %v2927_v32 = vadd.f32 %v4921_v31, %v4253_v27  ;;  %v7526_v15 = vld [vmem:[#allocation35_spill] sm:$0xff] }
 0x68f   : > { %v2918_v11 = vpop.f32.mrf.mxu1 }
 0x690   : > { %4947 = vmatprep.mubr.bf16.mxu0 %v2937_v17  ;;  %v2919_v54 = vadd.f32 %v4251_v53, %v2918_v11 }
 0x691   : > { %v4922_v0 = vpop.f32.mrf.mxu1  ;;  %4948 = vmatmul.mubr.bf16.gmra.mxu0 %v2938_v46 }
 0x692   : > { %4960 = vmatpush3.bf16.xpose.msra.mxu0 %v3248_v24  ;;  %v2930_v50 = vadd.f32 %v4922_v0, %v4254_v36 }
 0x693   : > { %5134 = vmatprep.subr.msk.bf16.mxu0 %vm712_vm0, %v7518_v62  ;;  %v2921_v35 = vpop.f32.mrf.mxu1 }
 0x694   : > { %v2922_v18 = vadd.f32 %v4252_v39, %v2921_v35  ;;  %v2940_v42 = vpack.c.bf16 %v2930_v50, %v2927_v32 }
 0x696   : > { %v2939_v14 = vpack.c.bf16 %v2922_v18, %v2919_v54 }
 0x698   : > { %4951 = vmatprep.mubr.bf16.mxu0 %v2939_v14 }
 0x699   : > { %4952 = vmatmul.mubr.bf16.gmra.mxu0 %v2940_v42 }
 0x69a   : > { %4962 = vmatpush3.bf16.xpose.msra.mxu0 %v3245_v43  ;;  %4971 = vmatprep.mubr.msk.bf16.mxu0 %vm712_vm0, %v7519_v61 }
 0x69b   : > { %5135 = vmatprep.subr.msk.bf16.mxu0 %vm712_vm0, %v7520_v49 }
 0x6a2   : > { %4964 = vmatpush3.bf16.xpose.msra.mxu0 %v3242_v29 }
 0x6a3   : > { %5136 = vmatprep.subr.msk.bf16.mxu0 %vm712_vm0, %v7521_v34 }
 0x6aa   : > { %4966 = vmatpush3.bf16.xpose.msra.mxu0 %v3239_v5  ;;  %v2679_v60 = vpop.permute.xlu0 %2678 }
 0x6ab   : > { %2725 = vst.msk [vmem:[%s5921_s19 + $0x10] sm:$0xff] %vm2722_vm4, %v2679_v60  ;;  %5137 = vmatprep.subr.msk.bf16.mxu0 %vm712_vm0, %v7522_v26 }
 0x6ae   : > { %v2675_v7 = vpop.permute.xlu0 %2674  ;;  %v2681_v48 = vpop.permute.xlu1 %2680 }
 0x6af   : > { %2723 = vst.msk [vmem:[%s5921_s19] sm:$0xff] %vm2722_vm4, %v2675_v7  ;;  %2726 = vst.msk [vmem:[%s5921_s19 + $0x18] sm:$0xff] %vm2722_vm4, %v2681_v48  ;;  %v4266_v48 = vld [vmem:[%s7394_s3 + $0x318] sm:$0xff] }
 0x6b2   : > { %4968 = vmatpush3.bf16.xpose.msra.mxu0 %v3236_v58  ;;  %v2677_v8 = vpop.permute.xlu1 %2676  ;;  %v2687_v1 = vpop.permute.xlu0 %2686  ;;  %v4263_v58 = vld [vmem:[%s7394_s3 + $0x300] sm:$0xff] }
 0x6b3   : > { %2724 = vst.msk [vmem:[%s5921_s19 + $0x8] sm:$0xff] %vm2722_vm4, %v2677_v8  ;;  %5138 = vmatprep.subr.msk.bf16.mxu0 %vm712_vm0, %v7523_v4  ;;  %2729 = vst.msk [vmem:[%s5921_s19 + $0x30] sm:$0xff] %vm2722_vm4, %v2687_v1  ;;  %v4264_v1 = vld [vmem:[%s7394_s3 + $0x308] sm:$0xff]  ;;  %v4265_v4 = vld [vmem:[%s7394_s3 + $0x310] sm:$0xff] }
 0x6b6   : > { %v2689_v33 = vpop.permute.xlu1 %2688  ;;  %v2683_v51 = vpop.permute.xlu0 %2682 }
 0x6b7   : > { %2730 = vst.msk [vmem:[%s5921_s19 + $0x38] sm:$0xff] %vm2722_vm4, %v2689_v33  ;;  %2727 = vst.msk [vmem:[%s5921_s19 + $0x20] sm:$0xff] %vm2722_vm4, %v2683_v51 }
 0x6ba   : > { %4970 = vmatpush3.bf16.xpose.msra.mxu0 %v3233_v22  ;;  %v2685_v9 = vpop.permute.xlu1 %2684  ;;  %v2695_v13 = vpop.permute.xlu0 %2694 }
 0x6bb   : > { %2728 = vst.msk [vmem:[%s5921_s19 + $0x28] sm:$0xff] %vm2722_vm4, %v2685_v9  ;;  %2733 = vst.msk [vmem:[%s5921_s19 + $0x50] sm:$0xff] %vm2722_vm4, %v2695_v13  ;;  %5051 = vmatprep.subr.bf16.mxu0 %v6515_v47 }
 0x6be   : > { %v2697_v21 = vpop.permute.xlu1 %2696  ;;  %v2691_v37 = vpop.permute.xlu0 %2690 }
 0x6bf   : > { %2734 = vst.msk [vmem:[%s5921_s19 + $0x58] sm:$0xff] %vm2722_vm4, %v2697_v21  ;;  %2731 = vst.msk [vmem:[%s5921_s19 + $0x40] sm:$0xff] %vm2722_vm4, %v2691_v37 }
 0x6c1   : > { %4972 = vmatmul.mubr.msk.bf16.vlgmr.msra.gmra.mxu0 %vm712_vm0, %v7524_v59  ;;  %v4269_v59 = vld [vmem:[%s7394_s3 + $0x330] sm:$0xff] }
 0x6c2   : > { %v2693_v2 = vpop.permute.xlu1 %2692  ;;  %v2703_v3 = vpop.permute.xlu0 %2702  ;;  %4975 = vmatprep.mubr.msk.bf16.mxu0 %vm712_vm0, %v7525_v19  ;;  %5052 = vmatpush3.bf16.msra.mxu0 %v6515_v47 }
 0x6c3   : > { %2732 = vst.msk [vmem:[%s5921_s19 + $0x48] sm:$0xff] %vm2722_vm4, %v2693_v2  ;;  %2737 = vst.msk [vmem:[%s5921_s19 + $0x70] sm:$0xff] %vm2722_vm4, %v2703_v3  ;;  %5053 = vmatprep.subr.bf16.mxu0 %v6519_v6  ;;  %v3674_v3 = vsel %vm712_vm0, %v7515_v44, 0 }
 0x6c6   : > { %v2705_v41 = vpop.permute.xlu1 %2704  ;;  %v2699_v45 = vpop.permute.xlu0 %2698  ;;  %5054 = vmatpush3.bf16.msra.mxu0 %v6519_v6  ;;  %v7528_v6 = vld [vmem:[#allocation37_spill] sm:$0xff] }
 0x6c7   : > { %2738 = vst.msk [vmem:[%s5921_s19 + $0x78] sm:$0xff] %vm2722_vm4, %v2705_v41  ;;  %2735 = vst.msk [vmem:[%s5921_s19 + $0x60] sm:$0xff] %vm2722_vm4, %v2699_v45  ;;  %5055 = vmatprep.subr.bf16.mxu0 %v6523_v55  ;;  %v4267_v41 = vld [vmem:[%s7394_s3 + $0x320] sm:$0xff]  ;;  %v4270_v45 = vld [vmem:[%s7394_s3 + $0x338] sm:$0xff] }
 0x6c9   : > { %4976 = vmatmul.mubr.msk.bf16.gmra.mxu0 %vm712_vm0, %v7526_v15 }
 0x6ca   : > { %v2701_v47 = vpop.permute.xlu1 %2700  ;;  %4979 = vmatprep.mubr.msk.bf16.mxu0 %vm712_vm0, %v7527_v12  ;;  %5056 = vmatpush3.bf16.msra.mxu0 %v6523_v55  ;;  %v7530_v55 = vld [vmem:[#allocation39_spill] sm:$0xff]  ;;  %v4268_v12 = vld [vmem:[%s7394_s3 + $0x328] sm:$0xff] }
 0x6cb   : > { %2736 = vst.msk [vmem:[%s5921_s19 + $0x68] sm:$0xff] %vm2722_vm4, %v2701_v47  ;;  %5057 = vmatprep.subr.bf16.mxu0 %v6529_v28 }
 0x6ce   : > { %5058 = vmatpush3.bf16.msra.mxu0 %v6529_v28 }
 0x6cf   : > { %5059 = vmatprep.subr.bf16.mxu0 %v6531_v23 }
 0x6d1   : > { %4980 = vmatmul.mubr.msk.bf16.gmra.mxu0 %vm712_vm0, %v7528_v6 }
 0x6d2   : > { %4983 = vmatprep.mubr.msk.bf16.mxu0 %vm712_vm0, %v7529_v56  ;;  %5060 = vmatpush3.bf16.msra.mxu0 %v6531_v23  ;;  %v7531_v56 = vld [vmem:[#allocation49_spill] sm:$0xff] }
 0x6d3   : > { %5061 = vmatprep.subr.bf16.mxu0 %v6535_v40 }
 0x6d6   : > { %5062 = vmatpush3.bf16.msra.mxu0 %v6535_v40 }
 0x6d7   : > { %5063 = vmatprep.subr.bf16.mxu0 %v6539_v38 }
 0x6d9   : > { %4984 = vmatmul.mubr.msk.bf16.gmra.mxu0 %vm712_vm0, %v7530_v55 }
 0x6da   : > { %5064 = vmatpush3.bf16.msra.mxu0 %v6539_v38 }
 0x6db   : > { %5065 = vmatprep.subr.bf16.mxu0 %v6543_v20 }
 0x6de   : > { %5066 = vmatpush3.bf16.msra.mxu0 %v6543_v20 }
 0x741   : > { %v4941_v28 = vpop.f32.mrf.mxu0 }
 0x742   : > { %v3064_v10 = vmul.f32 0.088388346, %v4941_v28 }
 0x743   : > { %v2999_v52 = vpop.f32.mrf.mxu0 }
 0x744   : > { %3098 = vrot.lane.b32.xlu0 %v3064_v10, %s5219_s15  ;;  %v3062_v46 = vmul.f32 0.088388346, %v2999_v52 }
 0x745   : > { %v4942_v23 = vpop.f32.mrf.mxu0 }
 0x746   : > { %v3065_v31 = vmul.f32 0.088388346, %v4942_v23 }
 0x747   : > { %v3002_v40 = vpop.f32.mrf.mxu0 }
 0x748   : > { %3094 = vrot.lane.b32.xlu0 %v3062_v46, %s5219_s15  ;;  %3100 = vrot.lane.b32.xlu1 %v3065_v31, %s5219_s15  ;;  %v3063_v27 = vmul.f32 0.088388346, %v3002_v40  ;;  %v4273_v46 = vld [vmem:[%s7394_s3 + $0x350] sm:$0xff]  ;;  %v3671_v31 = vsel %vm712_vm0, %v7531_v56, 0 }
 0x749   : > { %v4945_v17 = vpop.f32.mrf.mxu0 }
 0x74a   : > { %v3068_v38 = vmul.f32 0.088388346, %v4945_v17  ;;  %v4271_v17 = vld [vmem:[%s7394_s3 + $0x340] sm:$0xff] }
 0x74b   : > { %v3015_v24 = vpop.f32.mrf.mxu0 }
 0x74c   : > { %3096 = vrot.lane.b32.xlu1 %v3063_v27, %s5219_s15  ;;  %v3066_v20 = vmul.f32 0.088388346, %v3015_v24  ;;  %3106 = vrot.lane.b32.xlu0 %v3068_v38, %s5219_s15  ;;  %v4274_v27 = vld [vmem:[%s7394_s3 + $0x358] sm:$0xff] }
 0x74d   : > { %v4946_v11 = vpop.f32.mrf.mxu0 }
 0x74e   : > { %v3069_v53 = vmul.f32 0.088388346, %v4946_v11 }
 0x74f   : > { %v3018_v36 = vpop.f32.mrf.mxu0 }
 0x750   : > { %v3067_v32 = vmul.f32 0.088388346, %v3018_v36  ;;  %3108 = vrot.lane.b32.xlu1 %v3069_v53, %s5219_s15  ;;  %3102 = vrot.lane.b32.xlu0 %v3066_v20, %s5219_s15  ;;  %v4272_v20 = vld [vmem:[%s7394_s3 + $0x348] sm:$0xff]  ;;  %v7532_v36 = vld [vmem:[#allocation50_spill] sm:$0xff] }
 0x751   : > { %v4949_v0 = vpop.f32.mrf.mxu0 }
 0x752   : > { %v3072_v39 = vmul.f32 0.088388346, %v4949_v0 }
 0x753   : > { %v3031_v54 = vpop.f32.mrf.mxu0 }
 0x754   : > { %v3070_v50 = vmul.f32 0.088388346, %v3031_v54  ;;  %3104 = vrot.lane.b32.xlu1 %v3067_v32, %s5219_s15  ;;  %3114 = vrot.lane.b32.xlu0 %v3072_v39, %s5219_s15 }
 0x755   : > { %v4950_v62 = vpop.f32.mrf.mxu0 }
 0x756   : > { %v3073_v35 = vmul.f32 0.088388346, %v4950_v62  ;;  %v4277_v62 = vld [vmem:[%s7394_s3 + $0x370] sm:$0xff] }
 0x757   : > { %v3034_v18 = vpop.f32.mrf.mxu0 }
 0x758   : > { %v3071_v42 = vmul.f32 0.088388346, %v3034_v18  ;;  %3116 = vrot.lane.b32.xlu1 %v3073_v35, %s5219_s15  ;;  %3110 = vrot.lane.b32.xlu0 %v3070_v50, %s5219_s15  ;;  %v3668_v35 = vsel %vm712_vm0, %v7532_v36, 0 }
 0x759   : > { %v4953_v14 = vpop.f32.mrf.mxu0 }
 0x75a   : > { %v3076_v43 = vmul.f32 0.088388346, %v4953_v14  ;;  %v4278_v14 = vld [vmem:[%s7394_s3 + $0x378] sm:$0xff] }
 0x75b   : > { %v3047_v61 = vpop.f32.mrf.mxu0 }
 0x75c   : > { %v3074_v49 = vmul.f32 0.088388346, %v3047_v61  ;;  %3112 = vrot.lane.b32.xlu1 %v3071_v42, %s5219_s15  ;;  %3122 = vrot.lane.b32.xlu0 %v3076_v43, %s5219_s15  ;;  %v4275_v42 = vld [vmem:[%s7394_s3 + $0x360] sm:$0xff] }
 0x75d   : > { %v4954_v29 = vpop.f32.mrf.mxu0 }
 0x75e   : > { %v3077_v34 = vmul.f32 0.088388346, %v4954_v29 }
 0x75f   : > { %v3050_v5 = vpop.f32.mrf.mxu0 }
 0x760   : > { %3124 = vrot.lane.b32.xlu1 %v3077_v34, %s5219_s15  ;;  %v3075_v60 = vmul.f32 0.088388346, %v3050_v5  ;;  %3118 = vrot.lane.b32.xlu0 %v3074_v49, %s5219_s15  ;;  %v4276_v49 = vld [vmem:[%s7394_s3 + $0x368] sm:$0xff]  ;;  %v7533_v5 = vld [vmem:[#allocation51_spill] sm:$0xff] }
 0x764   : > { %3120 = vrot.lane.b32.xlu1 %v3075_v60, %s5219_s15 }
 0x781   : > { %v4973_v26 = vpop.f32.mrf.mxu0 }
 0x782   : > { %v3299_v13 = vadd.f32 %v4973_v26, %v4265_v4  ;;  %v7535_v4 = vld [vmem:[#allocation53_spill] sm:$0xff] }
 0x783   : > { %v3290_v7 = vpop.f32.mrf.mxu0 }
 0x784   : > { %v3291_v22 = vadd.f32 %v4263_v58, %v3290_v7  ;;  %v3665_v58 = vsel %vm712_vm0, %v7533_v5, 0 }
 0x785   : > { %v4974_v8 = vpop.f32.mrf.mxu0 }
 0x786   : > { %v3302_v33 = vadd.f32 %v4974_v8, %v4266_v48  ;;  %v7534_v8 = vld [vmem:[#allocation52_spill] sm:$0xff] }
 0x787   : > { %v3293_v51 = vpop.f32.mrf.mxu0 }
 0x788   : > { %v3294_v9 = vadd.f32 %v4264_v1, %v3293_v51  ;;  %v3354_v2 = vpack.c.bf16 %v3302_v33, %v3299_v13  ;;  %v3662_v1 = vsel %vm712_vm0, %v7534_v8, 0  ;;  %v3659_v33 = vsel %vm712_vm0, %v7535_v4, 0 }
 0x789   : > { %v4977_v21 = vpop.f32.mrf.mxu0 }
 0x78a   : > { %v3353_v37 = vpack.c.bf16 %v3294_v9, %v3291_v22  ;;  %v3315_v15 = vadd.f32 %v4977_v21, %v4269_v59  ;;  %v7537_v59 = vld [vmem:[#allocation55_spill] sm:$0xff] }
 0x78b   : > { %v3306_v19 = vpop.f32.mrf.mxu0 }
 0x78c   : > { %5003 = vmatprep.mubr.bf16.mxu1 %v3353_v37  ;;  %v3307_v6 = vadd.f32 %v4267_v41, %v3306_v19  ;;  %v3653_v19 = vsel %vm712_vm0, %v7537_v59, 0 }
 0x78d   : > { %5004 = vmatmul.mubr.bf16.vlgmr.msra.gmra.mxu1 %v3354_v2  ;;  %v4978_v47 = vpop.f32.mrf.mxu0 }
 0x78e   : > { %5020 = vmatpush3.bf16.xpose.msra.mxu1 %v3674_v3  ;;  %v3318_v44 = vadd.f32 %v4978_v47, %v4270_v45 }
 0x78f   : > { %5140 = vmatprep.subr.msk.bf16.mxu1 %vm712_vm0, %v7531_v56  ;;  %v3309_v55 = vpop.f32.mrf.mxu0 }
 0x790   : > { %v3310_v28 = vadd.f32 %v4268_v12, %v3309_v55  ;;  %v3356_v10 = vpack.c.bf16 %v3318_v44, %v3315_v15  ;;  %v7539_v55 = vld [vmem:[#allocation57_spill] sm:$0xff] }
 0x791   : > { %v4981_v52 = vpop.f32.mrf.mxu0 }
 0x792   : > { %v3355_v23 = vpack.c.bf16 %v3310_v28, %v3307_v6  ;;  %v3331_v38 = vadd.f32 %v4981_v52, %v4273_v46  ;;  %v7540_v28 = vld [vmem:[#allocation58_spill] sm:$0xff] }
 0x793   : > { %v3322_v40 = vpop.f32.mrf.mxu0 }
 0x794   : > { %5007 = vmatprep.mubr.bf16.mxu1 %v3355_v23  ;;  %v3323_v11 = vadd.f32 %v4271_v17, %v3322_v40 }
 0x795   : > { %v4982_v24 = vpop.f32.mrf.mxu0  ;;  %5008 = vmatmul.mubr.bf16.gmra.mxu1 %v3356_v10 }
 0x796   : > { %5022 = vmatpush3.bf16.xpose.msra.mxu1 %v3671_v31  ;;  %v3334_v53 = vadd.f32 %v4982_v24, %v4274_v27 }
 0x797   : > { %5141 = vmatprep.subr.msk.bf16.mxu1 %vm712_vm0, %v7532_v36  ;;  %v3325_v32 = vpop.f32.mrf.mxu0 }
 0x798   : > { %v3326_v0 = vadd.f32 %v4272_v20, %v3325_v32  ;;  %v3358_v39 = vpack.c.bf16 %v3334_v53, %v3331_v38 }
 0x799   : > { %v4985_v54 = vpop.f32.mrf.mxu0 }
 0x79a   : > { %v3357_v50 = vpack.c.bf16 %v3326_v0, %v3323_v11  ;;  %v3347_v43 = vadd.f32 %v4985_v54, %v4277_v62 }
 0x79b   : > { %v3338_v18 = vpop.f32.mrf.mxu0 }
 0x79c   : > { %5011 = vmatprep.mubr.bf16.mxu1 %v3357_v50  ;;  %v3339_v29 = vadd.f32 %v4275_v42, %v3338_v18 }
 0x79d   : > { %v4986_v61 = vpop.f32.mrf.mxu0  ;;  %5012 = vmatmul.mubr.bf16.gmra.mxu1 %v3358_v39 }
 0x79e   : > { %5024 = vmatpush3.bf16.xpose.msra.mxu1 %v3668_v35  ;;  %v3350_v34 = vadd.f32 %v4986_v61, %v4278_v14 }
 0x79f   : > { %5142 = vmatprep.subr.msk.bf16.mxu1 %vm712_vm0, %v7533_v5  ;;  %v3341_v60 = vpop.f32.mrf.mxu0 }
 0x7a0   : > { %v3342_v26 = vadd.f32 %v4276_v49, %v3341_v60  ;;  %v3360_v7 = vpack.c.bf16 %v3350_v34, %v3347_v43 }
 0x7a2   : > { %v3359_v48 = vpack.c.bf16 %v3342_v26, %v3339_v29 }
 0x7a4   : > { %5015 = vmatprep.mubr.bf16.mxu1 %v3359_v48  ;;  %v4287_v48 = vld [vmem:[%s7394_s3 + $0x380] sm:$0xff] }
 0x7a5   : > { %5016 = vmatmul.mubr.bf16.gmra.mxu1 %v3360_v7  ;;  %v4290_v7 = vld [vmem:[%s7394_s3 + $0x398] sm:$0xff] }
 0x7a6   : > { %5026 = vmatpush3.bf16.xpose.msra.mxu1 %v3665_v58  ;;  %5035 = vmatprep.mubr.msk.bf16.mxu1 %vm712_vm0, %v6453_v63  ;;  %v7536_v63 = vld [vmem:[#allocation54_spill] sm:$0xff] }
 0x7a7   : > { %5143 = vmatprep.subr.msk.bf16.mxu1 %vm712_vm0, %v7534_v8  ;;  %v3656_v13 = vsel %vm712_vm0, %v7536_v63, 0  ;;  %v4288_v8 = vld [vmem:[%s7394_s3 + $0x388] sm:$0xff] }
 0x7ae   : > { %5028 = vmatpush3.bf16.xpose.msra.mxu1 %v3662_v1  ;;  %v4289_v1 = vld [vmem:[%s7394_s3 + $0x390] sm:$0xff] }
 0x7af   : > { %5144 = vmatprep.subr.msk.bf16.mxu1 %vm712_vm0, %v7535_v4 }
 0x7b6   : > { %5030 = vmatpush3.bf16.xpose.msra.mxu1 %v3659_v33  ;;  %v3099_v51 = vpop.permute.xlu0 %3098 }
 0x7b7   : > { %3145 = vst.msk [vmem:[%s5921_s19 + $0x10] sm:$0xff] %vm3142_vm5, %v3099_v51  ;;  %5145 = vmatprep.subr.msk.bf16.mxu1 %vm712_vm0, %v7536_v63 }
 0x7ba   : > { %v3095_v22 = vpop.permute.xlu0 %3094  ;;  %v3101_v9 = vpop.permute.xlu1 %3100 }
 0x7bb   : > { %3143 = vst.msk [vmem:[%s5921_s19] sm:$0xff] %vm3142_vm5, %v3095_v22  ;;  %3146 = vst.msk [vmem:[%s5921_s19 + $0x18] sm:$0xff] %vm3142_vm5, %v3101_v9 }
 0x7be   : > { %5032 = vmatpush3.bf16.xpose.msra.mxu1 %v3656_v13  ;;  %v3097_v21 = vpop.permute.xlu1 %3096  ;;  %v3107_v37 = vpop.permute.xlu0 %3106 }
 0x7bf   : > { %3144 = vst.msk [vmem:[%s5921_s19 + $0x8] sm:$0xff] %vm3142_vm5, %v3097_v21  ;;  %5146 = vmatprep.subr.msk.bf16.mxu1 %vm712_vm0, %v7537_v59  ;;  %3149 = vst.msk [vmem:[%s5921_s19 + $0x30] sm:$0xff] %vm3142_vm5, %v3107_v37  ;;  %v4294_v59 = vld [vmem:[%s7394_s3 + $0x3b8] sm:$0xff] }
 0x7c2   : > { %v3109_v2 = vpop.permute.xlu1 %3108  ;;  %v3103_v3 = vpop.permute.xlu0 %3102 }
 0x7c3   : > { %3150 = vst.msk [vmem:[%s5921_s19 + $0x38] sm:$0xff] %vm3142_vm5, %v3109_v2  ;;  %3147 = vst.msk [vmem:[%s5921_s19 + $0x20] sm:$0xff] %vm3142_vm5, %v3103_v3  ;;  %v4291_v2 = vld [vmem:[%s7394_s3 + $0x3a0] sm:$0xff] }
 0x7c6   : > { %5034 = vmatpush3.bf16.xpose.msra.mxu1 %v3653_v19  ;;  %v3105_v41 = vpop.permute.xlu1 %3104  ;;  %v3115_v45 = vpop.permute.xlu0 %3114  ;;  %v4292_v19 = vld [vmem:[%s7394_s3 + $0x3a8] sm:$0xff] }
 0x7c7   : > { %3148 = vst.msk [vmem:[%s5921_s19 + $0x28] sm:$0xff] %vm3142_vm5, %v3105_v41  ;;  %3153 = vst.msk [vmem:[%s5921_s19 + $0x50] sm:$0xff] %vm3142_vm5, %v3115_v45  ;;  %v4293_v41 = vld [vmem:[%s7394_s3 + $0x3b0] sm:$0xff] }
 0x7ca   : > { %v3117_v15 = vpop.permute.xlu1 %3116  ;;  %v3111_v47 = vpop.permute.xlu0 %3110 }
 0x7cb   : > { %3154 = vst.msk [vmem:[%s5921_s19 + $0x58] sm:$0xff] %vm3142_vm5, %v3117_v15  ;;  %3151 = vst.msk [vmem:[%s5921_s19 + $0x40] sm:$0xff] %vm3142_vm5, %v3111_v47 }
 0x7cd   : > { %5036 = vmatmul.mubr.msk.bf16.vlgmr.msra.gmra.mxu1 %vm712_vm0, %v6458_v16 }
 0x7ce   : > { %5039 = vmatprep.mubr.msk.bf16.mxu1 %vm712_vm0, %v6468_v25  ;;  %v3113_v12 = vpop.permute.xlu1 %3112  ;;  %v3123_v6 = vpop.permute.xlu0 %3122  ;;  %v7538_v25 = vld [vmem:[#allocation56_spill] sm:$0xff] }
 0x7cf   : > { %3152 = vst.msk [vmem:[%s5921_s19 + $0x48] sm:$0xff] %vm3142_vm5, %v3113_v12  ;;  %3157 = vst.msk [vmem:[%s5921_s19 + $0x70] sm:$0xff] %vm3142_vm5, %v3123_v6 }
 0x7d2   : > { %v3125_v44 = vpop.permute.xlu1 %3124  ;;  %v3119_v56 = vpop.permute.xlu0 %3118 }
 0x7d3   : > { %3158 = vst.msk [vmem:[%s5921_s19 + $0x78] sm:$0xff] %vm3142_vm5, %v3125_v44  ;;  %3155 = vst.msk [vmem:[%s5921_s19 + $0x60] sm:$0xff] %vm3142_vm5, %v3119_v56 }
 0x7d5   : > { %5040 = vmatmul.mubr.msk.bf16.gmra.mxu1 %vm712_vm0, %v6475_v30 }
 0x7d6   : > { %5043 = vmatprep.mubr.msk.bf16.mxu1 %vm712_vm0, %v6477_v57  ;;  %v3121_v16 = vpop.permute.xlu1 %3120 }
 0x7d7   : > { %3156 = vst.msk [vmem:[%s5921_s19 + $0x68] sm:$0xff] %vm3142_vm5, %v3121_v16 }
 0x7dd   : > { %5044 = vmatmul.mubr.msk.bf16.gmra.mxu1 %vm712_vm0, %v7538_v25 }
 0x7de   : > { %5047 = vmatprep.mubr.msk.bf16.mxu1 %vm712_vm0, %v7539_v55  ;;  %v4298_v55 = vld [vmem:[%s7394_s3 + $0x3d8] sm:$0xff] }
 0x7e5   : > { %5048 = vmatmul.mubr.msk.bf16.gmra.mxu1 %vm712_vm0, %v7540_v28  ;;  %v4295_v28 = vld [vmem:[%s7394_s3 + $0x3c0] sm:$0xff] }
 0x84d   : > { %v5005_v10 = vpop.f32.mrf.mxu1 }
 0x84e   : > { %v3484_v52 = vmul.f32 0.088388346, %v5005_v10 }
 0x84f   : > { %v3419_v23 = vpop.f32.mrf.mxu1 }
 0x850   : > { %3518 = vrot.lane.b32.xlu0 %v3484_v52, %s5218_s11  ;;  %v3482_v46 = vmul.f32 0.088388346, %v3419_v23  ;;  %v4296_v52 = vld [vmem:[%s7394_s3 + $0x3c8] sm:$0xff]  ;;  %v4297_v23 = vld [vmem:[%s7394_s3 + $0x3d0] sm:$0xff] }
 0x851   : > { %v5006_v30 = vpop.f32.mrf.mxu1 }
 0x852   : > { %v3485_v57 = vmul.f32 0.088388346, %v5006_v30 }
 0x853   : > { %v3422_v31 = vpop.f32.mrf.mxu1 }
 0x854   : > { %3514 = vrot.lane.b32.xlu0 %v3482_v46, %s5218_s11  ;;  %3520 = vrot.lane.b32.xlu1 %v3485_v57, %s5218_s11  ;;  %v3483_v17 = vmul.f32 0.088388346, %v3422_v31 }
 0x855   : > { %v5009_v40 = vpop.f32.mrf.mxu1 }
 0x856   : > { %v3488_v27 = vmul.f32 0.088388346, %v5009_v40 }
 0x857   : > { %v3435_v38 = vpop.f32.mrf.mxu1 }
 0x858   : > { %3516 = vrot.lane.b32.xlu1 %v3483_v17, %s5218_s11  ;;  %v3486_v24 = vmul.f32 0.088388346, %v3435_v38  ;;  %3526 = vrot.lane.b32.xlu0 %v3488_v27, %s5218_s11 }
 0x859   : > { %v5010_v20 = vpop.f32.mrf.mxu1 }
 0x85a   : > { %v3489_v11 = vmul.f32 0.088388346, %v5010_v20  ;;  %v4302_v20 = vld [vmem:[%s7394_s3 + $0x3f8] sm:$0xff] }
 0x85b   : > { %v3438_v53 = vpop.f32.mrf.mxu1 }
 0x85c   : > { %v3487_v36 = vmul.f32 0.088388346, %v3438_v53  ;;  %3528 = vrot.lane.b32.xlu1 %v3489_v11, %s5218_s11  ;;  %3522 = vrot.lane.b32.xlu0 %v3486_v24, %s5218_s11  ;;  %v4299_v11 = vld [vmem:[%s7394_s3 + $0x3e0] sm:$0xff] }
 0x85d   : > { %v5013_v32 = vpop.f32.mrf.mxu1 }
 0x85e   : > { %v3492_v0 = vmul.f32 0.088388346, %v5013_v32  ;;  %v4301_v32 = vld [vmem:[%s7394_s3 + $0x3f0] sm:$0xff] }
 0x85f   : > { %v3451_v39 = vpop.f32.mrf.mxu1 }
 0x860   : > { %v3490_v54 = vmul.f32 0.088388346, %v3451_v39  ;;  %3524 = vrot.lane.b32.xlu1 %v3487_v36, %s5218_s11  ;;  %3534 = vrot.lane.b32.xlu0 %v3492_v0, %s5218_s11  ;;  %v4300_v36 = vld [vmem:[%s7394_s3 + $0x3e8] sm:$0xff] }
 0x861   : > { %v5014_v50 = vpop.f32.mrf.mxu1 }
 0x862   : > { %v3493_v62 = vmul.f32 0.088388346, %v5014_v50 }
 0x863   : > { %v3454_v35 = vpop.f32.mrf.mxu1 }
 0x864   : > { %v3491_v18 = vmul.f32 0.088388346, %v3454_v35  ;;  %3536 = vrot.lane.b32.xlu1 %v3493_v62, %s5218_s11  ;;  %3530 = vrot.lane.b32.xlu0 %v3490_v54, %s5218_s11 }
 0x865   : > { %v5017_v42 = vpop.f32.mrf.mxu1 }
 0x866   : > { %v3496_v14 = vmul.f32 0.088388346, %v5017_v42 }
 0x867   : > { %v3467_v43 = vpop.f32.mrf.mxu1 }
 0x868   : > { %v3494_v61 = vmul.f32 0.088388346, %v3467_v43  ;;  %3532 = vrot.lane.b32.xlu1 %v3491_v18, %s5218_s11  ;;  %3542 = vrot.lane.b32.xlu0 %v3496_v14, %s5218_s11 }
 0x869   : > { %v5018_v49 = vpop.f32.mrf.mxu1 }
 0x86a   : > { %v3497_v29 = vmul.f32 0.088388346, %v5018_v49 }
 0x86b   : > { %v3470_v34 = vpop.f32.mrf.mxu1 }
 0x86c   : > { %3544 = vrot.lane.b32.xlu1 %v3497_v29, %s5218_s11  ;;  %v3495_v5 = vmul.f32 0.088388346, %v3470_v34  ;;  %3538 = vrot.lane.b32.xlu0 %v3494_v61, %s5218_s11 }
 0x870   : > { %3540 = vrot.lane.b32.xlu1 %v3495_v5, %s5218_s11 }
 0x88d   : > { %v5037_v60 = vpop.f32.mrf.mxu1 }
 0x88e   : > { %v3719_v22 = vadd.f32 %v5037_v60, %v4289_v1 }
 0x88f   : > { %v3710_v26 = vpop.f32.mrf.mxu1 }
 0x890   : > { %v3711_v51 = vadd.f32 %v4287_v48, %v3710_v26 }
 0x891   : > { %v5038_v58 = vpop.f32.mrf.mxu1 }
 0x892   : > { %v3722_v4 = vadd.f32 %v5038_v58, %v4290_v7 }
 0x893   : > { %v3713_v33 = vpop.f32.mrf.mxu1 }
 0x894   : > { %v3714_v63 = vadd.f32 %v4288_v8, %v3713_v33  ;;  %v3774_v21 = vpack.c.bf16 %v3722_v4, %v3719_v22 }
 0x895   : > { %v5041_v9 = vpop.f32.mrf.mxu1 }
 0x896   : > { %v3773_v13 = vpack.c.bf16 %v3714_v63, %v3711_v51  ;;  %v3735_v6 = vadd.f32 %v5041_v9, %v4293_v41 }
 0x897   : > { %v3726_v37 = vpop.f32.mrf.mxu1 }
 0x898   : > { %5067 = vmatprep.mubr.bf16.mxu0 %v3773_v13  ;;  %v3727_v47 = vadd.f32 %v4291_v2, %v3726_v37 }
 0x899   : > { %v5042_v3 = vpop.f32.mrf.mxu1  ;;  %5068 = vmatmul.mubr.bf16.vlgmr.msra.gmra.mxu0 %v3774_v21 }
 0x89a   : > { %v3738_v45 = vadd.f32 %v5042_v3, %v4294_v59 }
 0x89b   : > { %v3729_v15 = vpop.f32.mrf.mxu1 }
 0x89c   : > { %v3730_v12 = vadd.f32 %v4292_v19, %v3729_v15  ;;  %v3776_v16 = vpack.c.bf16 %v3738_v45, %v3735_v6 }
 0x89d   : > { %v5045_v44 = vpop.f32.mrf.mxu1 }
 0x89e   : > { %v3775_v56 = vpack.c.bf16 %v3730_v12, %v3727_v47  ;;  %v3751_v40 = vadd.f32 %v5045_v44, %v4297_v23 }
 0x89f   : > { %v3742_v25 = vpop.f32.mrf.mxu1 }
 0x8a0   : > { %5071 = vmatprep.mubr.bf16.mxu0 %v3775_v56  ;;  %v3743_v57 = vadd.f32 %v4295_v28, %v3742_v25 }
 0x8a1   : > { %v5046_v10 = vpop.f32.mrf.mxu1  ;;  %5072 = vmatmul.mubr.bf16.gmra.mxu0 %v3776_v16 }
 0x8a2   : > { %v3754_v30 = vadd.f32 %v5046_v10, %v4298_v55 }
 0x8a3   : > { %v3745_v46 = vpop.f32.mrf.mxu1 }
 0x8a4   : > { %v3746_v31 = vadd.f32 %v4296_v52, %v3745_v46  ;;  %v3778_v38 = vpack.c.bf16 %v3754_v30, %v3751_v40 }
 0x8a5   : > { %v5049_v17 = vpop.f32.mrf.mxu1 }
 0x8a6   : > { %v3777_v27 = vpack.c.bf16 %v3746_v31, %v3743_v57  ;;  %v3767_v62 = vadd.f32 %v5049_v17, %v4301_v32 }
 0x8a7   : > { %v3758_v24 = vpop.f32.mrf.mxu1 }
 0x8a8   : > { %5075 = vmatprep.mubr.bf16.mxu0 %v3777_v27  ;;  %v3759_v54 = vadd.f32 %v4299_v11, %v3758_v24 }
 0x8a9   : > { %v5050_v53 = vpop.f32.mrf.mxu1  ;;  %5076 = vmatmul.mubr.bf16.gmra.mxu0 %v3778_v38 }
 0x8aa   : > { %v3770_v0 = vadd.f32 %v5050_v53, %v4302_v20 }
 0x8ab   : > { %v3761_v39 = vpop.f32.mrf.mxu1 }
 0x8ac   : > { %v3762_v50 = vadd.f32 %v4300_v36, %v3761_v39  ;;  %v3780_v18 = vpack.c.bf16 %v3770_v0, %v3767_v62 }
 0x8ae   : > { %v3779_v35 = vpack.c.bf16 %v3762_v50, %v3759_v54 }
 0x8b0   : > { %5079 = vmatprep.mubr.bf16.mxu0 %v3779_v35 }
 0x8b1   : > { %5080 = vmatmul.mubr.bf16.gmra.mxu0 %v3780_v18 }
 0x8c2   : > { %v3519_v42 = vpop.permute.xlu0 %3518 }
 0x8c3   : > { %3565 = vst.msk [vmem:[%s5921_s19 + $0x10] sm:$0xff] %vm3562_vm6, %v3519_v42 }
 0x8c6   : > { %v3515_v14 = vpop.permute.xlu0 %3514  ;;  %v3521_v43 = vpop.permute.xlu1 %3520 }
 0x8c7   : > { %3563 = vst.msk [vmem:[%s5921_s19] sm:$0xff] %vm3562_vm6, %v3515_v14  ;;  %3566 = vst.msk [vmem:[%s5921_s19 + $0x18] sm:$0xff] %vm3562_vm6, %v3521_v43 }
 0x8ca   : > { %v3517_v61 = vpop.permute.xlu1 %3516  ;;  %v3527_v49 = vpop.permute.xlu0 %3526 }
 0x8cb   : > { %3564 = vst.msk [vmem:[%s5921_s19 + $0x8] sm:$0xff] %vm3562_vm6, %v3517_v61  ;;  %3569 = vst.msk [vmem:[%s5921_s19 + $0x30] sm:$0xff] %vm3562_vm6, %v3527_v49 }
 0x8ce   : > { %v3529_v29 = vpop.permute.xlu1 %3528  ;;  %v3523_v34 = vpop.permute.xlu0 %3522 }
 0x8cf   : > { %3570 = vst.msk [vmem:[%s5921_s19 + $0x38] sm:$0xff] %vm3562_vm6, %v3529_v29  ;;  %3567 = vst.msk [vmem:[%s5921_s19 + $0x20] sm:$0xff] %vm3562_vm6, %v3523_v34 }
 0x8d2   : > { %v3525_v5 = vpop.permute.xlu1 %3524  ;;  %v3535_v60 = vpop.permute.xlu0 %3534 }
 0x8d3   : > { %3568 = vst.msk [vmem:[%s5921_s19 + $0x28] sm:$0xff] %vm3562_vm6, %v3525_v5  ;;  %3573 = vst.msk [vmem:[%s5921_s19 + $0x50] sm:$0xff] %vm3562_vm6, %v3535_v60 }
 0x8d6   : > { %v3537_v26 = vpop.permute.xlu1 %3536  ;;  %v3531_v7 = vpop.permute.xlu0 %3530 }
 0x8d7   : > { %3574 = vst.msk [vmem:[%s5921_s19 + $0x58] sm:$0xff] %vm3562_vm6, %v3537_v26  ;;  %3571 = vst.msk [vmem:[%s5921_s19 + $0x40] sm:$0xff] %vm3562_vm6, %v3531_v7 }
 0x8da   : > { %v3533_v48 = vpop.permute.xlu1 %3532  ;;  %v3543_v58 = vpop.permute.xlu0 %3542 }
 0x8db   : > { %3572 = vst.msk [vmem:[%s5921_s19 + $0x48] sm:$0xff] %vm3562_vm6, %v3533_v48  ;;  %3577 = vst.msk [vmem:[%s5921_s19 + $0x70] sm:$0xff] %vm3562_vm6, %v3543_v58 }
 0x8de   : > { %v3545_v8 = vpop.permute.xlu1 %3544  ;;  %v3539_v1 = vpop.permute.xlu0 %3538 }
 0x8df   : > { %3578 = vst.msk [vmem:[%s5921_s19 + $0x78] sm:$0xff] %vm3562_vm6, %v3545_v8  ;;  %3575 = vst.msk [vmem:[%s5921_s19 + $0x60] sm:$0xff] %vm3562_vm6, %v3539_v1 }
 0x8e2   : > { %v3541_v4 = vpop.permute.xlu1 %3540 }
 0x8e3   : > { %3576 = vst.msk [vmem:[%s5921_s19 + $0x68] sm:$0xff] %vm3562_vm6, %v3541_v4 }
 0x959   : > { %v5069_v33 = vpop.f32.mrf.mxu0 }
 0x95a   : > { %v3904_v51 = vmul.f32 0.088388346, %v5069_v33 }
 0x95b   : > { %v3839_v63 = vpop.f32.mrf.mxu0 }
 0x95c   : > { %3938 = vrot.lane.b32.xlu0 %v3904_v51, %s5217_s22  ;;  %v3902_v9 = vmul.f32 0.088388346, %v3839_v63 }
 0x95d   : > { %v5070_v22 = vpop.f32.mrf.mxu0 }
 0x95e   : > { %v3905_v13 = vmul.f32 0.088388346, %v5070_v22 }
 0x95f   : > { %v3842_v21 = vpop.f32.mrf.mxu0 }
 0x960   : > { %3934 = vrot.lane.b32.xlu0 %v3902_v9, %s5217_s22  ;;  %3940 = vrot.lane.b32.xlu1 %v3905_v13, %s5217_s22  ;;  %v3903_v59 = vmul.f32 0.088388346, %v3842_v21 }
 0x961   : > { %v5073_v37 = vpop.f32.mrf.mxu0 }
 0x962   : > { %v3908_v2 = vmul.f32 0.088388346, %v5073_v37 }
 0x963   : > { %v3855_v3 = vpop.f32.mrf.mxu0 }
 0x964   : > { %3946 = vrot.lane.b32.xlu0 %v3908_v2, %s5217_s22  ;;  %3936 = vrot.lane.b32.xlu1 %v3903_v59, %s5217_s22  ;;  %v3906_v41 = vmul.f32 0.088388346, %v3855_v3 }
 0x965   : > { %v5074_v19 = vpop.f32.mrf.mxu0 }
 0x966   : > { %v3909_v45 = vmul.f32 0.088388346, %v5074_v19 }
 0x967   : > { %v3858_v15 = vpop.f32.mrf.mxu0 }
 0x968   : > { %3942 = vrot.lane.b32.xlu0 %v3906_v41, %s5217_s22  ;;  %3948 = vrot.lane.b32.xlu1 %v3909_v45, %s5217_s22  ;;  %v3907_v12 = vmul.f32 0.088388346, %v3858_v15 }
 0x969   : > { %v5077_v47 = vpop.f32.mrf.mxu0 }
 0x96a   : > { %v3912_v6 = vmul.f32 0.088388346, %v5077_v47 }
 0x96b   : > { %v3871_v44 = vpop.f32.mrf.mxu0 }
 0x96c   : > { %3954 = vrot.lane.b32.xlu0 %v3912_v6, %s5217_s22  ;;  %3944 = vrot.lane.b32.xlu1 %v3907_v12, %s5217_s22  ;;  %v3910_v16 = vmul.f32 0.088388346, %v3871_v44 }
 0x96d   : > { %v5078_v56 = vpop.f32.mrf.mxu0 }
 0x96e   : > { %v3913_v25 = vmul.f32 0.088388346, %v5078_v56 }
 0x96f   : > { %v3874_v55 = vpop.f32.mrf.mxu0 }
 0x970   : > { %3950 = vrot.lane.b32.xlu0 %v3910_v16, %s5217_s22  ;;  %3956 = vrot.lane.b32.xlu1 %v3913_v25, %s5217_s22  ;;  %v3911_v10 = vmul.f32 0.088388346, %v3874_v55 }
 0x971   : > { %v5081_v28 = vpop.f32.mrf.mxu0 }
 0x972   : > { %v3916_v57 = vmul.f32 0.088388346, %v5081_v28 }
 0x973   : > { %v3887_v52 = vpop.f32.mrf.mxu0 }
 0x974   : > { %v3914_v23 = vmul.f32 0.088388346, %v3887_v52  ;;  %3952 = vrot.lane.b32.xlu1 %v3911_v10, %s5217_s22 }
 0x975   : > { %v5082_v30 = vpop.f32.mrf.mxu0 }
 0x976   : > { %3958 = vrot.lane.b32.xlu0 %v3914_v23, %s5217_s22  ;;  %v3917_v40 = vmul.f32 0.088388346, %v5082_v30 }
 0x977   : > { %v3890_v46 = vpop.f32.mrf.mxu0 }
 0x978   : > { %v3915_v31 = vmul.f32 0.088388346, %v3890_v46 }
 0x97a   : > { %3962 = vrot.lane.b32.xlu0 %v3916_v57, %s5217_s22  ;;  %3960 = vrot.lane.b32.xlu1 %v3915_v31, %s5217_s22 }
 0x97e   : > { %3964 = vrot.lane.b32.xlu1 %v3917_v40, %s5217_s22 }
 0x9ce   : > { %v3939_v17 = vpop.permute.xlu0 %3938 }
 0x9cf   : > { %3985 = vst.msk [vmem:[%s5921_s19 + $0x10] sm:$0xff] %vm3982_vm7, %v3939_v17 }
 0x9d2   : > { %v3935_v27 = vpop.permute.xlu0 %3934  ;;  %v3941_v38 = vpop.permute.xlu1 %3940 }
 0x9d3   : > { %3983 = vst.msk [vmem:[%s5921_s19] sm:$0xff] %vm3982_vm7, %v3935_v27  ;;  %3986 = vst.msk [vmem:[%s5921_s19 + $0x18] sm:$0xff] %vm3982_vm7, %v3941_v38 }
 0x9d6   : > { %v3947_v24 = vpop.permute.xlu0 %3946  ;;  %v3937_v20 = vpop.permute.xlu1 %3936 }
 0x9d7   : > { %3989 = vst.msk [vmem:[%s5921_s19 + $0x30] sm:$0xff] %vm3982_vm7, %v3947_v24  ;;  %3984 = vst.msk [vmem:[%s5921_s19 + $0x8] sm:$0xff] %vm3982_vm7, %v3937_v20 }
 0x9da   : > { %v3943_v11 = vpop.permute.xlu0 %3942  ;;  %v3949_v53 = vpop.permute.xlu1 %3948 }
 0x9db   : > { %3987 = vst.msk [vmem:[%s5921_s19 + $0x20] sm:$0xff] %vm3982_vm7, %v3943_v11  ;;  %3990 = vst.msk [vmem:[%s5921_s19 + $0x38] sm:$0xff] %vm3982_vm7, %v3949_v53 }
 0x9de   : > { %v3955_v36 = vpop.permute.xlu0 %3954  ;;  %v3945_v32 = vpop.permute.xlu1 %3944 }
 0x9df   : > { %3993 = vst.msk [vmem:[%s5921_s19 + $0x50] sm:$0xff] %vm3982_vm7, %v3955_v36  ;;  %3988 = vst.msk [vmem:[%s5921_s19 + $0x28] sm:$0xff] %vm3982_vm7, %v3945_v32 }
 0x9e2   : > { %v3951_v0 = vpop.permute.xlu0 %3950  ;;  %v3957_v39 = vpop.permute.xlu1 %3956 }
 0x9e3   : > { %3991 = vst.msk [vmem:[%s5921_s19 + $0x40] sm:$0xff] %vm3982_vm7, %v3951_v0  ;;  %3994 = vst.msk [vmem:[%s5921_s19 + $0x58] sm:$0xff] %vm3982_vm7, %v3957_v39 }
 0x9e6   : > { %v3953_v54 = vpop.permute.xlu1 %3952 }
 0x9e7   : > { %3992 = vst.msk [vmem:[%s5921_s19 + $0x48] sm:$0xff] %vm3982_vm7, %v3953_v54 }
 0x9e8   : > { %v3959_v50 = vpop.permute.xlu0 %3958 }
 0x9e9   : > { %3995 = vst.msk [vmem:[%s5921_s19 + $0x60] sm:$0xff] %vm3982_vm7, %v3959_v50 }
 0x9ec   : > { %v3963_v62 = vpop.permute.xlu0 %3962  ;;  %v3961_v35 = vpop.permute.xlu1 %3960 }
 0x9ed   : > { %3997 = vst.msk [vmem:[%s5921_s19 + $0x70] sm:$0xff] %vm3982_vm7, %v3963_v62  ;;  %3996 = vst.msk [vmem:[%s5921_s19 + $0x68] sm:$0xff] %vm3982_vm7, %v3961_v35 }
 0x9f0   : > { %v3965_v18 = vpop.permute.xlu1 %3964 }
 0x9f1   : > { %3998 = vst.msk [vmem:[%s5921_s19 + $0x78] sm:$0xff] %vm3982_vm7, %v3965_v18 }
 0x9f2 PF: > { %p15_p9 = scmp.ge.s32.totalorder %s5286_s9, 6   ;;  %s7541_s27 = smov %s5211_s28 }
 0x9f3   : > { %s7542_s28 = smov %s5295_s12  ;;  %s7543_s29 = smov %s5286_s9 }
 0x9f4   :  { %17 = sbr.rel (!%p15_p9) target bundleno = 2 (0x2), region = 181 }

</bundles_post_ra>
